<compile_context>
chip_gen: v7x
topology: tpu7x:2x2x1
jax: 0.10.0
libtpu: 0.0.40
codegen_flags: <defaults>
</compile_context>

<pallas_src>
import jax
import jax.numpy as jnp
from jax.experimental import pallas as pl
from jax.experimental.pallas import tpu as pltpu

SELU_ALPHA = 1.6732632423543772848170429916717
SELU_SCALE = 1.0507009873554804934193349852946

N_CHANNELS = 3
N_CLASSES = 6
H_IN = 128            # required so that flattened features == 256 * 9 * 1
KSIZE = 9
OUT_LANES = 128       # lane-dense output width (log-probs live in first 6 lanes)
BT_MAX = 64           # max samples per grid step (well under VMEM even on v7x)


def _selu(x):
    # elementwise math kept in f32 (v5e has no bf16 VALU/EUP)
    return SELU_SCALE * jnp.where(x > 0, x, SELU_ALPHA * (jnp.exp(x) - 1.0))


def _conv_selu_pool(x, w_ref, b_ref):
    """One Conv2d(k=(9,1)) -> SELU -> MaxPool2d((2,1)) stage.

    x:     (BT, h_in, c_in) bf16, channels-last per sample (W=1 squeezed)
    w_ref: (9*c_in, c_out)  bf16 im2col weight; row k*c_in + ci maps to
                            PyTorch conv weight [c_out, ci, k, 0]
    b_ref: (1, c_out)       f32
    returns (BT, (h_in-8)//2, c_out) bf16
    """
    bt, h_in, c_in = x.shape
    c_out = w_ref.shape[1]
    h_out = h_in - (KSIZE - 1)

    # im2col-in-K: build the slab once, then a single MXU matmul per layer
    # (vs. 9 matmuls with K=c_in plus 9 accumulate adds / per-tap relayouts).
    slab = jnp.concatenate([x[:, k:k + h_out, :] for k in range(KSIZE)],
                           axis=-1)                               # (BT, h_out, 9*c_in)
    acc = jnp.dot(slab.reshape(bt * h_out, KSIZE * c_in), w_ref[...],
                  preferred_element_type=jnp.float32)             # (BT*h_out, c_out) f32
    acc = _selu(acc + b_ref[...])

    hp = h_out // 2                                               # MaxPool2d((2,1))
    pooled = jnp.max(acc.reshape(bt * hp, 2, c_out), axis=1)
    return pooled.reshape(bt, hp, c_out).astype(jnp.bfloat16)     # bf16 for next matmul


def classifier_kernel(x_ref,
                      w1, b1, w2, b2, w3, b3, w4, b4, w5, b5,
                      out_ref):
    x = x_ref[...]                               # (BT, 128, 3) bf16
    bt = x.shape[0]

    h = _conv_selu_pool(x, w1, b1)               # (BT, 60, 64)
    h = _conv_selu_pool(h, w2, b2)               # (BT, 26, 128)
    h = _conv_selu_pool(h, w3, b3)               # (BT, 9, 256)

    # Flatten row-major over (H, C).  NOTE: PyTorch flattens NCHW as c*9 + h;
    # when importing real PyTorch fc1 weights, permute their rows at load time.
    feat = h.reshape(bt, 9 * 256)                # (BT, 2304) bf16

    z = jnp.dot(feat, w4[...], preferred_element_type=jnp.float32) + b4[...]
    z = _selu(z)                                 # (BT, 64) f32
    z = jnp.dot(z.astype(jnp.bfloat16), w5[...],
                preferred_element_type=jnp.float32) + b5[...]     # (BT, 128) f32

    # log_softmax over the class dim.  Padding lanes (6..127) carry a -1e9
    # bias so exp underflows to 0 and they do not perturb the normalization.
    m = jnp.max(z, axis=1, keepdims=True)
    s = z - m
    lse = jnp.log(jnp.sum(jnp.exp(s), axis=1, keepdims=True))
    out_ref[...] = s - lse


def _const_spec(shape):
    nd = len(shape)
    return pl.BlockSpec(shape, lambda i, _nd=nd: (0,) * _nd)


def init_params(key):
    """Deterministic LeCun-normal-ish init (synthetic; matches module shapes).

    Conv weights are stored im2col-style as (9*C_in, C_out); Linear weights as
    (in, out) (transpose of PyTorch's (out, in)); biases as (C,).
    """
    # TODO(synk): the original `weight_init` fn is not defined in the snippet;
    # we use a deterministic LeCun-normal init instead.
    ks = jax.random.split(key, 10)

    def nrm(k, shape, fan_in):
        return jax.random.normal(k, shape, jnp.float32) / jnp.sqrt(fan_in)

    return dict(
        w1=nrm(ks[0], (KSIZE * N_CHANNELS, 64), KSIZE * N_CHANNELS),
        b1=nrm(ks[1], (64,), 64),
        w2=nrm(ks[2], (KSIZE * 64, 128), KSIZE * 64),
        b2=nrm(ks[3], (128,), 128),
        w3=nrm(ks[4], (KSIZE * 128, 256), KSIZE * 128),
        b3=nrm(ks[5], (256,), 256),
        # Flatten order here is h*256 + c (kernel layout); permute rows when
        # importing real PyTorch weights (PyTorch order is c*9 + h).
        w4=nrm(ks[6], (9 * 256, 64), 9 * 256),
        b4=nrm(ks[7], (64,), 64),
        w5=nrm(ks[8], (64, N_CLASSES), 64),
        b5=nrm(ks[9], (N_CLASSES,), N_CLASSES),
    )


@jax.jit
def classifier_forward(x_nchw, params):
    """x_nchw: (N, 3, 128, 1) float32, PyTorch NCHW.  Returns (N, 6) log-probs."""
    n = x_nchw.shape[0]
    bt = min(BT_MAX, n)
    n_pad = -(-n // bt) * bt

    # NCHW (W=1) -> (N, H, C); bf16 matmul operands (f32 accumulation in-kernel).
    x = jnp.transpose(x_nchw[..., 0], (0, 2, 1)).astype(jnp.bfloat16)
    if n_pad != n:
        x = jnp.pad(x, ((0, n_pad - n), (0, 0), (0, 0)))

    # Kernel-layout operands: bf16 weights, (1, C) f32 biases, and a lane-dense
    # (64, 128) final layer whose padding lanes get a -1e9 bias.
    w1 = params["w1"].astype(jnp.bfloat16)
    w2 = params["w2"].astype(jnp.bfloat16)
    w3 = params["w3"].astype(jnp.bfloat16)
    w4 = params["w4"].astype(jnp.bfloat16)
    b1 = params["b1"].reshape(1, -1)
    b2 = params["b2"].reshape(1, -1)
    b3 = params["b3"].reshape(1, -1)
    b4 = params["b4"].reshape(1, -1)
    w5 = jnp.zeros((64, OUT_LANES), jnp.bfloat16).at[:, :N_CLASSES].set(
        params["w5"].astype(jnp.bfloat16))
    b5 = jnp.full((1, OUT_LANES), -1e9, jnp.float32).at[0, :N_CLASSES].set(
        params["b5"])

    flat = (w1, b1, w2, b2, w3, b3, w4, b4, w5, b5)
    in_specs = [pl.BlockSpec((bt, H_IN, N_CHANNELS), lambda i: (i, 0, 0))]
    in_specs += [_const_spec(p.shape) for p in flat]

    out = pl.pallas_call(
        classifier_kernel,
        out_shape=jax.ShapeDtypeStruct((n_pad, OUT_LANES), jnp.float32),
        grid_spec=pltpu.PrefetchScalarGridSpec(
            num_scalar_prefetch=0,
            grid=(n_pad // bt,),
            in_specs=in_specs,
            out_specs=pl.BlockSpec((bt, OUT_LANES), lambda i: (i, 0)),
        ),
        compiler_params=pltpu.CompilerParams(
            dimension_semantics=("parallel",)),   # v7x: shard batch over 2 TCs
    )(x, *flat)
    return out[:n, :N_CLASSES]


if __name__ == "__main__":
    key = jax.random.PRNGKey(0)
    k_x, k_p = jax.random.split(key)

    # Input consistent with the module: (N, C, H, W) = (2, 3, 128, 1)
    x = jax.random.normal(k_x, (2, N_CHANNELS, H_IN, 1), jnp.float32)
    params = init_params(k_p)

    logp = classifier_forward(x, params)
    jax.block_until_ready(logp)

    # sanity: log_softmax rows should (approximately) exponentiate-sum to 1
    assert logp.shape == (2, N_CLASSES)
    assert bool(jnp.all(jnp.abs(jnp.sum(jnp.exp(logp), axis=1) - 1.0) < 1e-4))
    print("KERNEL_OK")
</pallas_src>

<mosaic_0001>
module attributes {stable_mosaic.version = 11 : i64} {
  func.func @classifier_kernel(%arg0: i32, %arg1: memref<2x128x3xbf16, #tpu.memory_space<vmem>>, %arg2: memref<27x64xbf16, #tpu.memory_space<vmem>>, %arg3: memref<1x64xf32, #tpu.memory_space<vmem>>, %arg4: memref<576x128xbf16, #tpu.memory_space<vmem>>, %arg5: memref<1x128xf32, #tpu.memory_space<vmem>>, %arg6: memref<1152x256xbf16, #tpu.memory_space<vmem>>, %arg7: memref<1x256xf32, #tpu.memory_space<vmem>>, %arg8: memref<2304x64xbf16, #tpu.memory_space<vmem>>, %arg9: memref<1x64xf32, #tpu.memory_space<vmem>>, %arg10: memref<64x128xbf16, #tpu.memory_space<vmem>>, %arg11: memref<1x128xf32, #tpu.memory_space<vmem>>, %arg12: memref<2x128xf32, #tpu.memory_space<vmem>>) attributes {dimension_semantics = [#tpu.dimension_semantics<parallel>], iteration_bounds = array<i64: 1>, scalar_prefetch = 0 : i64, scratch_operands = 0 : i64, tpu.core_type = #tpu.core_type<tc>, window_params = [{transform_indices = @transform_0, window_bounds = array<i64: 2, 128, 3>}, {pipeline_mode = #tpu.pipeline_mode<synchronous>, transform_indices = @transform_1, window_bounds = array<i64: 27, 64>}, {pipeline_mode = #tpu.pipeline_mode<synchronous>, transform_indices = @transform_2, window_bounds = array<i64: 1, 64>}, {pipeline_mode = #tpu.pipeline_mode<synchronous>, transform_indices = @transform_3, window_bounds = array<i64: 576, 128>}, {pipeline_mode = #tpu.pipeline_mode<synchronous>, transform_indices = @transform_4, window_bounds = array<i64: 1, 128>}, {pipeline_mode = #tpu.pipeline_mode<synchronous>, transform_indices = @transform_5, window_bounds = array<i64: 1152, 256>}, {pipeline_mode = #tpu.pipeline_mode<synchronous>, transform_indices = @transform_6, window_bounds = array<i64: 1, 256>}, {pipeline_mode = #tpu.pipeline_mode<synchronous>, transform_indices = @transform_7, window_bounds = array<i64: 2304, 64>}, {pipeline_mode = #tpu.pipeline_mode<synchronous>, transform_indices = @transform_8, window_bounds = array<i64: 1, 64>}, {pipeline_mode = #tpu.pipeline_mode<synchronous>, transform_indices = @transform_9, window_bounds = array<i64: 64, 128>}, {pipeline_mode = #tpu.pipeline_mode<synchronous>, transform_indices = @transform_10, window_bounds = array<i64: 1, 128>}, {transform_indices = @transform_11, window_bounds = array<i64: 2, 128>}]} {
    %c0 = arith.constant 0 : index
    %c0_0 = arith.constant 0 : index
    %c0_1 = arith.constant 0 : index
    %0 = vector.load %arg1[%c0, %c0_0, %c0_1] : memref<2x128x3xbf16, #tpu.memory_space<vmem>>, vector<2x128x3xbf16>
    %1 = vector.extract_strided_slice %0 {offsets = [0, 0, 0], sizes = [2, 120, 3], strides = [1, 1, 1]} : vector<2x128x3xbf16> to vector<2x120x3xbf16>
    %2 = vector.extract_strided_slice %0 {offsets = [0, 1, 0], sizes = [2, 120, 3], strides = [1, 1, 1]} : vector<2x128x3xbf16> to vector<2x120x3xbf16>
    %3 = vector.extract_strided_slice %0 {offsets = [0, 2, 0], sizes = [2, 120, 3], strides = [1, 1, 1]} : vector<2x128x3xbf16> to vector<2x120x3xbf16>
    %4 = vector.extract_strided_slice %0 {offsets = [0, 3, 0], sizes = [2, 120, 3], strides = [1, 1, 1]} : vector<2x128x3xbf16> to vector<2x120x3xbf16>
    %5 = vector.extract_strided_slice %0 {offsets = [0, 4, 0], sizes = [2, 120, 3], strides = [1, 1, 1]} : vector<2x128x3xbf16> to vector<2x120x3xbf16>
    %6 = vector.extract_strided_slice %0 {offsets = [0, 5, 0], sizes = [2, 120, 3], strides = [1, 1, 1]} : vector<2x128x3xbf16> to vector<2x120x3xbf16>
    %7 = vector.extract_strided_slice %0 {offsets = [0, 6, 0], sizes = [2, 120, 3], strides = [1, 1, 1]} : vector<2x128x3xbf16> to vector<2x120x3xbf16>
    %8 = vector.extract_strided_slice %0 {offsets = [0, 7, 0], sizes = [2, 120, 3], strides = [1, 1, 1]} : vector<2x128x3xbf16> to vector<2x120x3xbf16>
    %9 = vector.extract_strided_slice %0 {offsets = [0, 8, 0], sizes = [2, 120, 3], strides = [1, 1, 1]} : vector<2x128x3xbf16> to vector<2x120x3xbf16>
    %10 = tpu.concatenate %1, %2, %3, %4, %5, %6, %7, %8, %9 in 2 : vector<2x120x3xbf16>, vector<2x120x3xbf16>, vector<2x120x3xbf16>, vector<2x120x3xbf16>, vector<2x120x3xbf16>, vector<2x120x3xbf16>, vector<2x120x3xbf16>, vector<2x120x3xbf16>, vector<2x120x3xbf16> -> vector<2x120x27xbf16>
    %11 = vector.shape_cast %10 : vector<2x120x27xbf16> to vector<240x27xbf16>
    %c0_2 = arith.constant 0 : index
    %c0_3 = arith.constant 0 : index
    %12 = vector.load %arg2[%c0_2, %c0_3] : memref<27x64xbf16, #tpu.memory_space<vmem>>, vector<27x64xbf16>
    %cst = arith.constant dense<0.000000e+00> : vector<240x64xf32>
    %13 = tpu.matmul %11, %12, %cst {dimension_numbers = #tpu.dot_dimension_numbers<[1], [0], [0], [1], [0, 0, 1, 1], [], []>} : vector<240x27xbf16>, vector<27x64xbf16>, vector<240x64xf32> -> vector<240x64xf32>
    %c0_4 = arith.constant 0 : index
    %c0_5 = arith.constant 0 : index
    %14 = vector.load %arg3[%c0_4, %c0_5] : memref<1x64xf32, #tpu.memory_space<vmem>>, vector<1x64xf32>
    %15 = vector.broadcast %14 : vector<1x64xf32> to vector<240x64xf32>
    %16 = arith.addf %13, %15 : vector<240x64xf32>
    %cst_6 = arith.constant 0.000000e+00 : f32
    %17 = vector.broadcast %cst_6 : f32 to vector<240x64xf32>
    %18 = arith.cmpf ogt, %16, %17 : vector<240x64xf32>
    %19 = math.exp %16 : vector<240x64xf32>
    %cst_7 = arith.constant 1.000000e+00 : f32
    %20 = vector.broadcast %cst_7 : f32 to vector<240x64xf32>
    %21 = arith.subf %19, %20 : vector<240x64xf32>
    %cst_8 = arith.constant 1.67326319 : f32
    %22 = vector.broadcast %cst_8 : f32 to vector<240x64xf32>
    %23 = arith.mulf %22, %21 : vector<240x64xf32>
    %24 = arith.select %18, %16, %23 : vector<240x64xi1>, vector<240x64xf32>
    %cst_9 = arith.constant 1.05070102 : f32
    %25 = vector.broadcast %cst_9 : f32 to vector<240x64xf32>
    %26 = arith.mulf %25, %24 : vector<240x64xf32>
    %27 = vector.shape_cast %26 : vector<240x64xf32> to vector<120x2x64xf32>
    %cst_10 = arith.constant dense<0xFF800000> : vector<120x64xf32>
    %28 = vector.multi_reduction <maximumf>, %27, %cst_10 [1] : vector<120x2x64xf32> to vector<120x64xf32>
    %29 = vector.shape_cast %28 : vector<120x64xf32> to vector<2x60x64xf32>
    %30 = arith.truncf %29 : vector<2x60x64xf32> to vector<2x60x64xbf16>
    %31 = vector.extract_strided_slice %30 {offsets = [0, 0, 0], sizes = [2, 52, 64], strides = [1, 1, 1]} : vector<2x60x64xbf16> to vector<2x52x64xbf16>
    %32 = vector.extract_strided_slice %30 {offsets = [0, 1, 0], sizes = [2, 52, 64], strides = [1, 1, 1]} : vector<2x60x64xbf16> to vector<2x52x64xbf16>
    %33 = vector.extract_strided_slice %30 {offsets = [0, 2, 0], sizes = [2, 52, 64], strides = [1, 1, 1]} : vector<2x60x64xbf16> to vector<2x52x64xbf16>
    %34 = vector.extract_strided_slice %30 {offsets = [0, 3, 0], sizes = [2, 52, 64], strides = [1, 1, 1]} : vector<2x60x64xbf16> to vector<2x52x64xbf16>
    %35 = vector.extract_strided_slice %30 {offsets = [0, 4, 0], sizes = [2, 52, 64], strides = [1, 1, 1]} : vector<2x60x64xbf16> to vector<2x52x64xbf16>
    %36 = vector.extract_strided_slice %30 {offsets = [0, 5, 0], sizes = [2, 52, 64], strides = [1, 1, 1]} : vector<2x60x64xbf16> to vector<2x52x64xbf16>
    %37 = vector.extract_strided_slice %30 {offsets = [0, 6, 0], sizes = [2, 52, 64], strides = [1, 1, 1]} : vector<2x60x64xbf16> to vector<2x52x64xbf16>
    %38 = vector.extract_strided_slice %30 {offsets = [0, 7, 0], sizes = [2, 52, 64], strides = [1, 1, 1]} : vector<2x60x64xbf16> to vector<2x52x64xbf16>
    %39 = vector.extract_strided_slice %30 {offsets = [0, 8, 0], sizes = [2, 52, 64], strides = [1, 1, 1]} : vector<2x60x64xbf16> to vector<2x52x64xbf16>
    %40 = tpu.concatenate %31, %32, %33, %34, %35, %36, %37, %38, %39 in 2 : vector<2x52x64xbf16>, vector<2x52x64xbf16>, vector<2x52x64xbf16>, vector<2x52x64xbf16>, vector<2x52x64xbf16>, vector<2x52x64xbf16>, vector<2x52x64xbf16>, vector<2x52x64xbf16>, vector<2x52x64xbf16> -> vector<2x52x576xbf16>
    %41 = vector.shape_cast %40 : vector<2x52x576xbf16> to vector<104x576xbf16>
    %c0_11 = arith.constant 0 : index
    %c0_12 = arith.constant 0 : index
    %42 = vector.load %arg4[%c0_11, %c0_12] : memref<576x128xbf16, #tpu.memory_space<vmem>>, vector<576x128xbf16>
    %cst_13 = arith.constant dense<0.000000e+00> : vector<104x128xf32>
    %43 = tpu.matmul %41, %42, %cst_13 {dimension_numbers = #tpu.dot_dimension_numbers<[1], [0], [0], [1], [0, 0, 1, 1], [], []>} : vector<104x576xbf16>, vector<576x128xbf16>, vector<104x128xf32> -> vector<104x128xf32>
    %c0_14 = arith.constant 0 : index
    %c0_15 = arith.constant 0 : index
    %44 = vector.load %arg5[%c0_14, %c0_15] : memref<1x128xf32, #tpu.memory_space<vmem>>, vector<1x128xf32>
    %45 = vector.broadcast %44 : vector<1x128xf32> to vector<104x128xf32>
    %46 = arith.addf %43, %45 : vector<104x128xf32>
    %cst_16 = arith.constant 0.000000e+00 : f32
    %47 = vector.broadcast %cst_16 : f32 to vector<104x128xf32>
    %48 = arith.cmpf ogt, %46, %47 : vector<104x128xf32>
    %49 = math.exp %46 : vector<104x128xf32>
    %cst_17 = arith.constant 1.000000e+00 : f32
    %50 = vector.broadcast %cst_17 : f32 to vector<104x128xf32>
    %51 = arith.subf %49, %50 : vector<104x128xf32>
    %cst_18 = arith.constant 1.67326319 : f32
    %52 = vector.broadcast %cst_18 : f32 to vector<104x128xf32>
    %53 = arith.mulf %52, %51 : vector<104x128xf32>
    %54 = arith.select %48, %46, %53 : vector<104x128xi1>, vector<104x128xf32>
    %cst_19 = arith.constant 1.05070102 : f32
    %55 = vector.broadcast %cst_19 : f32 to vector<104x128xf32>
    %56 = arith.mulf %55, %54 : vector<104x128xf32>
    %57 = vector.shape_cast %56 : vector<104x128xf32> to vector<52x2x128xf32>
    %cst_20 = arith.constant dense<0xFF800000> : vector<52x128xf32>
    %58 = vector.multi_reduction <maximumf>, %57, %cst_20 [1] : vector<52x2x128xf32> to vector<52x128xf32>
    %59 = vector.shape_cast %58 : vector<52x128xf32> to vector<2x26x128xf32>
    %60 = arith.truncf %59 : vector<2x26x128xf32> to vector<2x26x128xbf16>
    %61 = vector.extract_strided_slice %60 {offsets = [0, 0, 0], sizes = [2, 18, 128], strides = [1, 1, 1]} : vector<2x26x128xbf16> to vector<2x18x128xbf16>
    %62 = vector.extract_strided_slice %60 {offsets = [0, 1, 0], sizes = [2, 18, 128], strides = [1, 1, 1]} : vector<2x26x128xbf16> to vector<2x18x128xbf16>
    %63 = vector.extract_strided_slice %60 {offsets = [0, 2, 0], sizes = [2, 18, 128], strides = [1, 1, 1]} : vector<2x26x128xbf16> to vector<2x18x128xbf16>
    %64 = vector.extract_strided_slice %60 {offsets = [0, 3, 0], sizes = [2, 18, 128], strides = [1, 1, 1]} : vector<2x26x128xbf16> to vector<2x18x128xbf16>
    %65 = vector.extract_strided_slice %60 {offsets = [0, 4, 0], sizes = [2, 18, 128], strides = [1, 1, 1]} : vector<2x26x128xbf16> to vector<2x18x128xbf16>
    %66 = vector.extract_strided_slice %60 {offsets = [0, 5, 0], sizes = [2, 18, 128], strides = [1, 1, 1]} : vector<2x26x128xbf16> to vector<2x18x128xbf16>
    %67 = vector.extract_strided_slice %60 {offsets = [0, 6, 0], sizes = [2, 18, 128], strides = [1, 1, 1]} : vector<2x26x128xbf16> to vector<2x18x128xbf16>
    %68 = vector.extract_strided_slice %60 {offsets = [0, 7, 0], sizes = [2, 18, 128], strides = [1, 1, 1]} : vector<2x26x128xbf16> to vector<2x18x128xbf16>
    %69 = vector.extract_strided_slice %60 {offsets = [0, 8, 0], sizes = [2, 18, 128], strides = [1, 1, 1]} : vector<2x26x128xbf16> to vector<2x18x128xbf16>
    %70 = tpu.concatenate %61, %62, %63, %64, %65, %66, %67, %68, %69 in 2 : vector<2x18x128xbf16>, vector<2x18x128xbf16>, vector<2x18x128xbf16>, vector<2x18x128xbf16>, vector<2x18x128xbf16>, vector<2x18x128xbf16>, vector<2x18x128xbf16>, vector<2x18x128xbf16>, vector<2x18x128xbf16> -> vector<2x18x1152xbf16>
    %71 = vector.shape_cast %70 : vector<2x18x1152xbf16> to vector<36x1152xbf16>
    %c0_21 = arith.constant 0 : index
    %c0_22 = arith.constant 0 : index
    %72 = vector.load %arg6[%c0_21, %c0_22] : memref<1152x256xbf16, #tpu.memory_space<vmem>>, vector<1152x256xbf16>
    %cst_23 = arith.constant dense<0.000000e+00> : vector<36x256xf32>
    %73 = tpu.matmul %71, %72, %cst_23 {dimension_numbers = #tpu.dot_dimension_numbers<[1], [0], [0], [1], [0, 0, 1, 1], [], []>} : vector<36x1152xbf16>, vector<1152x256xbf16>, vector<36x256xf32> -> vector<36x256xf32>
    %c0_24 = arith.constant 0 : index
    %c0_25 = arith.constant 0 : index
    %74 = vector.load %arg7[%c0_24, %c0_25] : memref<1x256xf32, #tpu.memory_space<vmem>>, vector<1x256xf32>
    %75 = vector.broadcast %74 : vector<1x256xf32> to vector<36x256xf32>
    %76 = arith.addf %73, %75 : vector<36x256xf32>
    %cst_26 = arith.constant 0.000000e+00 : f32
    %77 = vector.broadcast %cst_26 : f32 to vector<36x256xf32>
    %78 = arith.cmpf ogt, %76, %77 : vector<36x256xf32>
    %79 = math.exp %76 : vector<36x256xf32>
    %cst_27 = arith.constant 1.000000e+00 : f32
    %80 = vector.broadcast %cst_27 : f32 to vector<36x256xf32>
    %81 = arith.subf %79, %80 : vector<36x256xf32>
    %cst_28 = arith.constant 1.67326319 : f32
    %82 = vector.broadcast %cst_28 : f32 to vector<36x256xf32>
    %83 = arith.mulf %82, %81 : vector<36x256xf32>
    %84 = arith.select %78, %76, %83 : vector<36x256xi1>, vector<36x256xf32>
    %cst_29 = arith.constant 1.05070102 : f32
    %85 = vector.broadcast %cst_29 : f32 to vector<36x256xf32>
    %86 = arith.mulf %85, %84 : vector<36x256xf32>
    %87 = vector.shape_cast %86 : vector<36x256xf32> to vector<18x2x256xf32>
    %cst_30 = arith.constant dense<0xFF800000> : vector<18x256xf32>
    %88 = vector.multi_reduction <maximumf>, %87, %cst_30 [1] : vector<18x2x256xf32> to vector<18x256xf32>
    %89 = vector.shape_cast %88 : vector<18x256xf32> to vector<2x9x256xf32>
    %90 = arith.truncf %89 : vector<2x9x256xf32> to vector<2x9x256xbf16>
    %91 = vector.shape_cast %90 : vector<2x9x256xbf16> to vector<2x2304xbf16>
    %c0_31 = arith.constant 0 : index
    %c0_32 = arith.constant 0 : index
    %92 = vector.load %arg8[%c0_31, %c0_32] : memref<2304x64xbf16, #tpu.memory_space<vmem>>, vector<2304x64xbf16>
    %cst_33 = arith.constant dense<0.000000e+00> : vector<2x64xf32>
    %93 = tpu.matmul %91, %92, %cst_33 {dimension_numbers = #tpu.dot_dimension_numbers<[1], [0], [0], [1], [0, 0, 1, 1], [], []>} : vector<2x2304xbf16>, vector<2304x64xbf16>, vector<2x64xf32> -> vector<2x64xf32>
    %c0_34 = arith.constant 0 : index
    %c0_35 = arith.constant 0 : index
    %94 = vector.load %arg9[%c0_34, %c0_35] : memref<1x64xf32, #tpu.memory_space<vmem>>, vector<1x64xf32>
    %95 = vector.broadcast %94 : vector<1x64xf32> to vector<2x64xf32>
    %96 = arith.addf %93, %95 : vector<2x64xf32>
    %cst_36 = arith.constant 0.000000e+00 : f32
    %97 = vector.broadcast %cst_36 : f32 to vector<2x64xf32>
    %98 = arith.cmpf ogt, %96, %97 : vector<2x64xf32>
    %99 = math.exp %96 : vector<2x64xf32>
    %cst_37 = arith.constant 1.000000e+00 : f32
    %100 = vector.broadcast %cst_37 : f32 to vector<2x64xf32>
    %101 = arith.subf %99, %100 : vector<2x64xf32>
    %cst_38 = arith.constant 1.67326319 : f32
    %102 = vector.broadcast %cst_38 : f32 to vector<2x64xf32>
    %103 = arith.mulf %102, %101 : vector<2x64xf32>
    %104 = arith.select %98, %96, %103 : vector<2x64xi1>, vector<2x64xf32>
    %cst_39 = arith.constant 1.05070102 : f32
    %105 = vector.broadcast %cst_39 : f32 to vector<2x64xf32>
    %106 = arith.mulf %105, %104 : vector<2x64xf32>
    %107 = arith.truncf %106 : vector<2x64xf32> to vector<2x64xbf16>
    %c0_40 = arith.constant 0 : index
    %c0_41 = arith.constant 0 : index
    %108 = vector.load %arg10[%c0_40, %c0_41] : memref<64x128xbf16, #tpu.memory_space<vmem>>, vector<64x128xbf16>
    %cst_42 = arith.constant dense<0.000000e+00> : vector<2x128xf32>
    %109 = tpu.matmul %107, %108, %cst_42 {dimension_numbers = #tpu.dot_dimension_numbers<[1], [0], [0], [1], [0, 0, 1, 1], [], []>} : vector<2x64xbf16>, vector<64x128xbf16>, vector<2x128xf32> -> vector<2x128xf32>
    %c0_43 = arith.constant 0 : index
    %c0_44 = arith.constant 0 : index
    %110 = vector.load %arg11[%c0_43, %c0_44] : memref<1x128xf32, #tpu.memory_space<vmem>>, vector<1x128xf32>
    %111 = vector.broadcast %110 : vector<1x128xf32> to vector<2x128xf32>
    %112 = arith.addf %109, %111 : vector<2x128xf32>
    %cst_45 = arith.constant dense<0xFF800000> : vector<2xf32>
    %113 = vector.multi_reduction <maximumf>, %112, %cst_45 [1] : vector<2x128xf32> to vector<2xf32>
    %114 = vector.shape_cast %113 : vector<2xf32> to vector<2x1xf32>
    %115 = vector.broadcast %114 : vector<2x1xf32> to vector<2x128xf32>
    %116 = arith.subf %112, %115 : vector<2x128xf32>
    %117 = math.exp %116 : vector<2x128xf32>
    %cst_46 = arith.constant dense<0.000000e+00> : vector<2xf32>
    %118 = vector.multi_reduction <add>, %117, %cst_46 [1] : vector<2x128xf32> to vector<2xf32>
    %119 = vector.shape_cast %118 : vector<2xf32> to vector<2x1xf32>
    %120 = math.log %119 : vector<2x1xf32>
    %121 = vector.broadcast %120 : vector<2x1xf32> to vector<2x128xf32>
    %122 = arith.subf %116, %121 : vector<2x128xf32>
    %c0_47 = arith.constant 0 : index
    %c0_48 = arith.constant 0 : index
    %123 = vector.load %arg12[%c0_47, %c0_48] : memref<2x128xf32, #tpu.memory_space<vmem>>, vector<2x128xf32>
    tpu.vector_store %arg12[%c0_47, %c0_48], %122 {strides = array<i32>} : memref<2x128xf32, #tpu.memory_space<vmem>>, vector<2x128xf32>,
    return
  }
  func.func @transform_0(%arg0: i32) -> (i32, i32, i32) {
    %c0_i32 = arith.constant 0 : i32
    %c0_i32_0 = arith.constant 0 : i32
    %c0_i32_1 = arith.constant 0 : i32
    return %arg0, %c0_i32, %c0_i32_0 : i32, i32, i32
  }
  func.func @transform_1(%arg0: i32) -> (i32, i32) {
    %c0_i32 = arith.constant 0 : i32
    %c0_i32_0 = arith.constant 0 : i32
    %c0_i32_1 = arith.constant 0 : i32
    return %c0_i32, %c0_i32_0 : i32, i32
  }
  func.func @transform_2(%arg0: i32) -> (i32, i32) {
    %c0_i32 = arith.constant 0 : i32
    %c0_i32_0 = arith.constant 0 : i32
    %c0_i32_1 = arith.constant 0 : i32
    return %c0_i32, %c0_i32_0 : i32, i32
  }
  func.func @transform_3(%arg0: i32) -> (i32, i32) {
    %c0_i32 = arith.constant 0 : i32
    %c0_i32_0 = arith.constant 0 : i32
    %c0_i32_1 = arith.constant 0 : i32
    return %c0_i32, %c0_i32_0 : i32, i32
  }
  func.func @transform_4(%arg0: i32) -> (i32, i32) {
    %c0_i32 = arith.constant 0 : i32
    %c0_i32_0 = arith.constant 0 : i32
    %c0_i32_1 = arith.constant 0 : i32
    return %c0_i32, %c0_i32_0 : i32, i32
  }
  func.func @transform_5(%arg0: i32) -> (i32, i32) {
    %c0_i32 = arith.constant 0 : i32
    %c0_i32_0 = arith.constant 0 : i32
    %c0_i32_1 = arith.constant 0 : i32
    return %c0_i32, %c0_i32_0 : i32, i32
  }
  func.func @transform_6(%arg0: i32) -> (i32, i32) {
    %c0_i32 = arith.constant 0 : i32
    %c0_i32_0 = arith.constant 0 : i32
    %c0_i32_1 = arith.constant 0 : i32
    return %c0_i32, %c0_i32_0 : i32, i32
  }
  func.func @transform_7(%arg0: i32) -> (i32, i32) {
    %c0_i32 = arith.constant 0 : i32
    %c0_i32_0 = arith.constant 0 : i32
    %c0_i32_1 = arith.constant 0 : i32
    return %c0_i32, %c0_i32_0 : i32, i32
  }
  func.func @transform_8(%arg0: i32) -> (i32, i32) {
    %c0_i32 = arith.constant 0 : i32
    %c0_i32_0 = arith.constant 0 : i32
    %c0_i32_1 = arith.constant 0 : i32
    return %c0_i32, %c0_i32_0 : i32, i32
  }
  func.func @transform_9(%arg0: i32) -> (i32, i32) {
    %c0_i32 = arith.constant 0 : i32
    %c0_i32_0 = arith.constant 0 : i32
    %c0_i32_1 = arith.constant 0 : i32
    return %c0_i32, %c0_i32_0 : i32, i32
  }
  func.func @transform_10(%arg0: i32) -> (i32, i32) {
    %c0_i32 = arith.constant 0 : i32
    %c0_i32_0 = arith.constant 0 : i32
    %c0_i32_1 = arith.constant 0 : i32
    return %c0_i32, %c0_i32_0 : i32, i32
  }
  func.func @transform_11(%arg0: i32) -> (i32, i32) {
    %c0_i32 = arith.constant 0 : i32
    %c0_i32_0 = arith.constant 0 : i32
    return %arg0, %c0_i32 : i32, i32
  }
}

</mosaic_0001>

<bundles_post_ra>
// kernel: classifier_forward.1
= control target key start
LH: loop header
LB: loop body
LE: loop exit
PB: predicated region body
PF: predicated region fallthrough
CT: control target
= control target key end

     0   :  { %vm471_vm0 = vcmask 1045504   ;;  %vm313_vm1 = vcmask 1046528   ;;  %vm629_vm2 = vcmask 1044480   ;;  %vm20311_vm3 = vsmask.f32 7424  ;;  %s13279_s25 = smov 12   ;;  %s20298_s0 = inlined_call_operand.vmem [shape: bf16[2,128,3], index: 0, kind: input, shape index: {}]   ;;  %s20299_s1 = inlined_call_operand.vmem [shape: bf16[27,64], index: 1, kind: input, shape index: {}]   ;;  %s20300_s2 = inlined_call_operand.vmem [shape: f32[1,64], index: 2, kind: input, shape index: {}]   ;;  %s20301_s3 = inlined_call_operand.vmem [shape: bf16[576,128], index: 3, kind: input, shape index: {}]   ;;  %s20302_s4 = inlined_call_operand.vmem [shape: f32[1,128], index: 4, kind: input, shape index: {}]   ;;  %s20303_s5 = inlined_call_operand.vmem [shape: bf16[1152,256], index: 5, kind: input, shape index: {}]   ;;  %s20304_s6 = inlined_call_operand.vmem [shape: f32[1,256], index: 6, kind: input, shape index: {}]   ;;  %s20305_s7 = inlined_call_operand.vmem [shape: bf16[2304,64], index: 7, kind: input, shape index: {}]   ;;  %s20306_s8 = inlined_call_operand.vmem [shape: f32[1,64], index: 8, kind: input, shape index: {}]   ;;  %s20307_s9 = inlined_call_operand.vmem [shape: bf16[64,128], index: 9, kind: input, shape index: {}]   ;;  %s20308_s10 = inlined_call_operand.vmem [shape: f32[1,128], index: 10, kind: input, shape index: {}]   ;;  %s20309_s11 = inlined_call_operand.hbm [shape: f32[2,128], index: 11, kind: output, shape index: {}]  }
   0x1   :  { %v40_v0 = vld [vmem:[%s20298_s0] sm:$0xf]  ;;  %v13362_v1 = vld [vmem:[%s20298_s0 + $0x4] sm:$0xf]  ;;  %v13367_v2 = vld [vmem:[%s20298_s0 + $0x8] sm:$0xf] }
   0x2   :  { %v13372_v3 = vld [vmem:[%s20298_s0 + $0xc] sm:$0xf]  ;;  %v13375_v4 = vcombine.low %v40_v0, %v13362_v1  ;;  %vm376_vm4 = vsmask.f32 6400  ;;  %s13280_s26 = smov 6   ;;  %s13281_s12 = smov 18   ;;  %v11675_v47 = vcombine.low %v13362_v1, %v13367_v2 }
   0x3   :  { %v13379_v5 = vcombine.low %v13367_v2, %v13372_v3  ;;  %v13405_v32 = vld [vmem:[%s20298_s0 + $0x10] sm:$0xf]  ;;  %v13410_v33 = vld [vmem:[%s20298_s0 + $0x14] sm:$0xf]  ;;  %vm534_vm5 = vsmask.f32 5376 }
   0x4   :  { %v472_v6 = vrot.slane %v13375_v4, 2  ;;  %v314_v7 = vrot.slane %v13375_v4, 1  ;;  %v630_v8 = vrot.slane %v13375_v4, 3  ;;  %v156_v9 = vshrl.u32 %v13375_v4, 16  ;;  %s13282_s13 = smov 3   ;;  %s13283_s14 = smov 9  }
   0x5   :  { %v473_v10 = vrot.slane %v13379_v5, 2  ;;  %v315_v11 = vrot.slane %v13379_v5, 1  ;;  %v631_v12 = vrot.slane %v13379_v5, 3  ;;  %v158_v13 = vshll.u32 %v13375_v4, 16  ;;  %s13284_s15 = smov 15   ;;  %s13285_s16 = smov 24  }
   0x6   :  { %v163_v14 = vshll.u32 %v13379_v5, 16  ;;  %v167_v15 = vshrl.u32 %v13379_v5, 16  ;;  %v377_v16 = vrot.slane %v156_v9, 1  ;;  %v535_v26 = vrot.slane %v156_v9, 2  ;;  %s13286_s17 = smov 21  }
   0x7   :  { %v474_v17 = vsel %vm471_vm0, %v472_v6, %v473_v10  ;;  %v316_v18 = vsel %vm313_vm1, %v314_v7, %v315_v11  ;;  %v160_v19 = vrot.slane %v158_v13, 1  ;;  %v378_v21 = vrot.slane %v158_v13, 2  ;;  %v13438_v57 = vld [vmem:[%s20298_s0 + $0x18] sm:$0xf]  ;;  %v13444_v62 = vld [vmem:[%s20298_s0 + $0x1c] sm:$0xf] }
   0x8   :  { %502 = vrot.lane.b32.xlu1 %v474_v17, %s13279_s25  ;;  %344 = vrot.lane.b32.xlu0 %v316_v18, %s13280_s26  ;;  %v165_v20 = vrot.slane %v163_v14, 1  ;;  %v380_v22 = vrot.slane %v167_v15, 1  ;;  %v381_v23 = vrot.slane %v163_v14, 2  ;;  %v632_v24 = vsel %vm629_vm2, %v630_v8, %v631_v12 }
   0x9   :  { %v161_v25 = vor.u32 %v160_v19, %v156_v9  ;;  %v536_v27 = vrot.slane %v158_v13, 3  ;;  %v379_v28 = vor.u32 %v378_v21, %v377_v16  ;;  %v538_v30 = vrot.slane %v167_v15, 2  ;;  %v13474_v21 = vld [vmem:[%s20298_s0 + $0x20] sm:$0xf] }
   0xa   :  { %v382_v29 = vor.u32 %v381_v23, %v380_v22  ;;  %v539_v31 = vrot.slane %v163_v14, 3  ;;  %v693_v36 = vrot.slane %v156_v9, 3  ;;  %v694_v38 = vrot.slane %v158_v13, 4  ;;  %v13479_v22 = vld [vmem:[%s20298_s0 + $0x24] sm:$0xf] }
   0xb   :  { %v166_v34 = vsel %vm20311_vm3, %v161_v25, %v165_v20  ;;  %v537_v35 = vor.u32 %v536_v27, %v535_v26  ;;  %v696_v39 = vrot.slane %v167_v15, 3  ;;  %v697_v41 = vrot.slane %v163_v14, 4 }
   0xc   :  { %660 = vrot.lane.b32.xlu1 %v632_v24, %s13281_s12  ;;  %281 = vrot.lane.b32.xlu0 %v166_v34, %s13282_s13  ;;  %v540_v37 = vor.u32 %v539_v31, %v538_v30  ;;  %v383_v40 = vsel %vm376_vm4, %v379_v28, %v382_v29  ;;  %v13418_v42 = vcombine.low %v13405_v32, %v13410_v33  ;;  %vm20310_vm6 = vsmask.f32 4352 }
   0xd   :  { %v695_v44 = vor.u32 %v694_v38, %v693_v36  ;;  %v698_v45 = vor.u32 %v697_v41, %v696_v39  ;;  %v169_v51 = vor.u32 %v167_v15, %v165_v20  ;;  %v13451_v1 = vcombine.low %v13438_v57, %v13444_v62  ;;  %v12720_v36 = vld [vmem:[%s20299_s1] sm:$0xff]  }
   0xe   :  { %v541_v43 = vsel %vm534_vm5, %v537_v35, %v540_v37  ;;  %v171_v46 = vshll.u32 %v13418_v42, 16  ;;  %v317_v48 = vrot.slane %v13418_v42, 1  ;;  %v175_v49 = vshrl.u32 %v13418_v42, 16 }
   0xf   :  { %v699_v50 = vsel %vm20310_vm6, %v695_v44, %v698_v45  ;;  %v475_v56 = vrot.slane %v13418_v42, 2  ;;  %v633_v63 = vrot.slane %v13418_v42, 3  ;;  %v179_v9 = vshll.u32 %v13451_v1, 16 }
  0x10   :  { %439 = vrot.lane.b32.xlu1 %v383_v40, %s13283_s14  ;;  %597 = vrot.lane.b32.xlu0 %v541_v43, %s13284_s15  ;;  %v173_v52 = vrot.slane %v171_v46, 1  ;;  %v384_v53 = vrot.slane %v175_v49, 1  ;;  %v385_v54 = vrot.slane %v171_v46, 2  ;;  %v318_v55 = vsel %vm313_vm1, %v315_v11, %v317_v48 }
  0x11   :  { %v542_v60 = vrot.slane %v175_v49, 2  ;;  %v543_v61 = vrot.slane %v171_v46, 3  ;;  %v700_v0 = vrot.slane %v175_v49, 3  ;;  %v476_v2 = vsel %vm471_vm0, %v473_v10, %v475_v56 }
  0x12   :  { %v174_v58 = vsel %vm20311_vm3, %v169_v51, %v173_v52  ;;  %v386_v59 = vor.u32 %v385_v54, %v384_v53  ;;  %v701_v8 = vrot.slane %v171_v46, 4  ;;  %v634_v11 = vsel %vm629_vm2, %v631_v12, %v633_v63  ;;  %v13515_v51 = vld [vmem:[%s20298_s0 + $0x28] sm:$0xf] }
  0x13   :  { %v544_v7 = vor.u32 %v543_v61, %v542_v60  ;;  %v183_v15 = vshrl.u32 %v13451_v1, 16  ;;  %v11676_v10 = vcombine.low %v13372_v3, %v13405_v32  ;;  %v319_v16 = vrot.slane %v13451_v1, 1 }
  0x14   :  { %803 = vrot.lane.b32.xlu1 %v11675_v47, %s13285_s16  ;;  %755 = vrot.lane.b32.xlu0 %v699_v50, %s13286_s17  ;;  %v387_v6 = vsel %vm376_vm4, %v382_v29, %v386_v59  ;;  %v702_v14 = vor.u32 %v701_v8, %v700_v0  ;;  %v181_v17 = vrot.slane %v179_v9, 1  ;;  %v177_v19 = vor.u32 %v175_v49, %v173_v52  ;;  %v13520_v52 = vld [vmem:[%s20298_s0 + $0x2c] sm:$0xf] }
  0x15   :  { %v545_v13 = vsel %vm534_vm5, %v540_v37, %v544_v7  ;;  %v388_v20 = vrot.slane %v183_v15, 1  ;;  %v389_v12 = vrot.slane %v179_v9, 2  ;;  %v320_v3 = vsel %vm313_vm1, %v317_v48, %v319_v16 }
  0x16   :  { %v703_v18 = vsel %vm20310_vm6, %v698_v45, %v702_v14  ;;  %v477_v23 = vrot.slane %v13451_v1, 2  ;;  %v182_v24 = vsel %vm20311_vm3, %v177_v19, %v181_v17  ;;  %v546_v26 = vrot.slane %v183_v15, 2 }
  0x17   :  { %v390_v25 = vor.u32 %v389_v12, %v388_v20  ;;  %v547_v27 = vrot.slane %v179_v9, 3  ;;  %v13488_v28 = vcombine.low %v13474_v21, %v13479_v22  ;;  %v635_v30 = vrot.slane %v13451_v1, 3 }
  0x18   :  { %346 = vrot.lane.b32.xlu1 %v318_v55, %s13280_s26  ;;  %283 = vrot.lane.b32.xlu0 %v174_v58, %s13282_s13  ;;  %v478_v29 = vsel %vm471_vm0, %v475_v56, %v477_v23  ;;  %v704_v34 = vrot.slane %v183_v15, 3  ;;  %v705_v35 = vrot.slane %v179_v9, 4  ;;  %v20314_v43 = vmov 0.0   ;;  %v12721_v58 = vld [vmem:[%s20299_s1 + $0x8] sm:$0x3f]  }
  0x19   :  { %v391_v31 = vsel %vm376_vm4, %v386_v59, %v390_v25  ;;  %v548_v32 = vor.u32 %v547_v27, %v546_v26  ;;  %v187_v37 = vshll.u32 %v13488_v28, 16  ;;  %v191_v38 = vshrl.u32 %v13488_v28, 16  ;;  %12516 = vmatprep.subr.bf16.mxu0 %v20314_v43 }
  0x1a   :  { %v636_v39 = vsel %vm629_vm2, %v633_v63, %v635_v30  ;;  %v706_v41 = vor.u32 %v705_v35, %v704_v34  ;;  %12517 = vmatpush3.bf16.msra.mxu0 %v12720_v36  ;;  %v11677_v44 = vcombine.low %v13410_v33, %v13438_v57  ;;  %v321_v45 = vrot.slane %v13488_v28, 1 }
  0x1b   :  { %v549_v40 = vsel %vm534_vm5, %v544_v7, %v548_v32  ;;  %12518 = vmatprep.subr.bf16.mxu0 %v20314_v43  ;;  %v185_v46 = vor.u32 %v183_v15, %v181_v17  ;;  %v189_v48 = vrot.slane %v187_v37, 1  ;;  %v392_v49 = vrot.slane %v191_v38, 1 }
  0x1c   :  { %504 = vrot.lane.b32.xlu1 %v476_v2, %s13279_s25  ;;  %441 = vrot.lane.b32.xlu0 %v387_v6, %s13283_s14  ;;  %v707_v47 = vsel %vm20310_vm6, %v702_v14, %v706_v41  ;;  %v393_v50 = vrot.slane %v187_v37, 2  ;;  %v322_v33 = vsel %vm313_vm1, %v319_v16, %v321_v45  ;;  %v479_v53 = vrot.slane %v13488_v28, 2 }
  0x1d   :  { %v190_v54 = vsel %vm20311_vm3, %v185_v46, %v189_v48  ;;  %v550_v56 = vrot.slane %v191_v38, 2  ;;  %v551_v57 = vrot.slane %v187_v37, 3  ;;  %v637_v60 = vrot.slane %v13488_v28, 3 }
  0x1e   :  { %v394_v55 = vor.u32 %v393_v50, %v392_v49  ;;  %v480_v59 = vsel %vm471_vm0, %v477_v23, %v479_v53  ;;  %v13536_v61 = vcombine.low %v13515_v51, %v13520_v52  ;;  %v708_v2 = vrot.slane %v191_v38, 3 }
  0x1f   :  { %v552_v0 = vor.u32 %v551_v57, %v550_v56  ;;  %v709_v6 = vrot.slane %v187_v37, 4  ;;  %v13288_v7 = vmov 65535   ;;  %v638_v9 = vsel %vm629_vm2, %v635_v30, %v637_v60 }
  0x20   :  { %662 = vrot.lane.b32.xlu1 %v634_v11, %s13281_s12  ;;  %599 = vrot.lane.b32.xlu0 %v545_v13, %s13284_s15  ;;  %v395_v63 = vsel %vm376_vm4, %v390_v25, %v394_v55  ;;  %v1232_v8 = vsel %vm629_vm2, 4294967295, %v13288_v7  ;;  %v195_v11 = vshll.u32 %v13536_v61, 16  ;;  %vm20312_vm7 = vmmov 0  }
  0x21   :  { %v1233_v13 = vsel %vm471_vm0, %v1232_v8, 0  ;;  %v553_v14 = vsel %vm534_vm5, %v548_v32, %v552_v0  ;;  %v710_v15 = vor.u32 %v709_v6, %v708_v2  ;;  %12520 = vmatprep.mubr.msk.bf16.mxu0 %vm20312_vm7, %v20314_v43  ;;  %v11678_v17 = vcombine.low %v13444_v62, %v13474_v21  ;;  %v13563_v62 = vld [vmem:[%s20298_s0 + $0x30] sm:$0xf]  ;;  %v13568_v21 = vld [vmem:[%s20298_s0 + $0x34] sm:$0xf] }
  0x22   :  { %v1235_v16 = vand.u32 %v12721_v58, %v1233_v13  ;;  %v193_v19 = vor.u32 %v191_v38, %v189_v48  ;;  %v197_v12 = vrot.slane %v195_v11, 1  ;;  %v397_v23 = vrot.slane %v195_v11, 2  ;;  %v13627_v13 = vld [vmem:[%s20298_s0 + $0x48] sm:$0xf] }
  0x23   :  { %v711_v20 = vsel %vm20310_vm6, %v706_v41, %v710_v15  ;;  %v481_v25 = vrot.slane %v13536_v61, 2  ;;  %v555_v30 = vrot.slane %v195_v11, 3  ;;  %v639_v32 = vrot.slane %v13536_v61, 3 }
  0x24   :  { %805 = vrot.lane.b32.xlu1 %v11676_v10, %s13285_s16  ;;  %757 = vrot.lane.b32.xlu0 %v703_v18, %s13286_s17  ;;  %v199_v10 = vshrl.u32 %v13536_v61, 16  ;;  %v323_v18 = vrot.slane %v13536_v61, 1  ;;  %v198_v26 = vsel %vm20311_vm3, %v193_v19, %v197_v12  ;;  %v713_v37 = vrot.slane %v195_v11, 4  ;;  %v13622_v11 = vld [vmem:[%s20298_s0 + $0x44] sm:$0xf] }
  0x25   :  { %12519 = vmatpush3.bf16.msra.mxu0 %v1235_v16  ;;  %v13578_v38 = vcombine.low %v13563_v62, %v13568_v21  ;;  %v11679_v46 = vcombine.low %v13479_v22, %v13515_v51  ;;  %v13599_v22 = vld [vmem:[%s20298_s0 + $0x38] sm:$0xf]  ;;  %v13604_v51 = vld [vmem:[%s20298_s0 + $0x3c] sm:$0xf]  ;;  %vm835_vm8 = vcmask 23552   ;;  %vm870_vm9 = vcmask 48128  }
  0x26   :  { %12580 = vmatprep.subr.bf16.mxu0 %v20314_v43  ;;  %v712_v34 = vrot.slane %v199_v10, 3  ;;  %v201_v48 = vor.u32 %v199_v10, %v197_v12  ;;  %v13614_v8 = vcombine.low %v13599_v22, %v13604_v51  ;;  %vm903_vm10 = vcmask 72704  }
  0x27   :  { %vm936_vm11 = vcmask 97280   ;;  %vm969_vm12 = vcmask 121856   ;;  %vm1002_vm13 = vcmask 146432   ;;  %vm1035_vm14 = vcmask 171008  }
  0x28   :  { %348 = vrot.lane.b32.xlu1 %v320_v3, %s13280_s26  ;;  %285 = vrot.lane.b32.xlu0 %v182_v24, %s13282_s13  ;;  %v396_v3 = vrot.slane %v199_v10, 1  ;;  %v324_v24 = vsel %vm313_vm1, %v321_v45, %v323_v18  ;;  %v714_v41 = vor.u32 %v713_v37, %v712_v34  ;;  %v207_v45 = vshrl.u32 %v13578_v38, 16 }
  0x29   :  { %v327_v12 = vrot.slane %v13614_v8, 1  ;;  %vm1068_vm15 = vcmask 195584  }
  0x2a   :  { %v398_v27 = vor.u32 %v397_v23, %v396_v3  ;;  %v715_v49 = vsel %vm20310_vm6, %v710_v15, %v714_v41  ;;  %v558_v58 = vrot.slane %v207_v45, 2 }
  0x2c   :  { %506 = vrot.lane.b32.xlu1 %v478_v29, %s13279_s25  ;;  %443 = vrot.lane.b32.xlu0 %v391_v31, %s13283_s14  ;;  %v554_v29 = vrot.slane %v199_v10, 2  ;;  %v482_v31 = vsel %vm471_vm0, %v479_v53, %v481_v25  ;;  %v399_v35 = vsel %vm376_vm4, %v394_v55, %v398_v27  ;;  %v483_v55 = vrot.slane %v13578_v38, 2 }
  0x2e   :  { %v556_v36 = vor.u32 %v555_v30, %v554_v29  ;;  %v485_v29 = vrot.slane %v13614_v8, 2 }
  0x30   :  { %664 = vrot.lane.b32.xlu1 %v636_v39, %s13281_s12  ;;  %601 = vrot.lane.b32.xlu0 %v549_v40, %s13284_s15  ;;  %v640_v39 = vsel %vm629_vm2, %v637_v60, %v639_v32  ;;  %v557_v40 = vsel %vm534_vm5, %v552_v0, %v556_v36  ;;  %v484_v60 = vsel %vm471_vm0, %v481_v25, %v483_v55  ;;  %v716_v0 = vrot.slane %v207_v45, 3 }
  0x34   :  { %807 = vrot.lane.b32.xlu1 %v11677_v44, %s13285_s16  ;;  %759 = vrot.lane.b32.xlu0 %v707_v47, %s13286_s17  ;;  %v203_v44 = vshll.u32 %v13578_v38, 16  ;;  %v325_v47 = vrot.slane %v13578_v38, 1 }
  0x36   :  { %v205_v50 = vrot.slane %v203_v44, 1  ;;  %v401_v53 = vrot.slane %v203_v44, 2  ;;  %v717_v7 = vrot.slane %v203_v44, 4 }
  0x38   :  { %350 = vrot.lane.b32.xlu1 %v322_v33, %s13280_s26  ;;  %287 = vrot.lane.b32.xlu0 %v190_v54, %s13282_s13  ;;  %v400_v33 = vrot.slane %v207_v45, 1  ;;  %v326_v54 = vsel %vm313_vm1, %v323_v18, %v325_v47  ;;  %v206_v56 = vsel %vm20311_vm3, %v201_v48, %v205_v50  ;;  %v13638_v16 = vor.u32 %v717_v7, %v716_v0 }
  0x39   :  { %v13644_v18 = vshrl.u32 %v13614_v8, 16  ;;  %v209_v3 = vor.u32 %v207_v45, %v205_v50 }
  0x3a   :  { %v402_v57 = vor.u32 %v401_v53, %v400_v33 }
  0x3b   :  { %v562_v30 = vrot.slane %v13644_v18, 2 }
  0x3c   :  { %508 = vrot.lane.b32.xlu1 %v480_v59, %s13279_s25  ;;  %445 = vrot.lane.b32.xlu0 %v395_v63, %s13283_s14  ;;  %v559_v59 = vrot.slane %v203_v44, 3  ;;  %v641_v63 = vrot.slane %v13578_v38, 3  ;;  %v403_v2 = vsel %vm376_vm4, %v398_v27, %v402_v57 }
  0x3e   :  { %v560_v6 = vor.u32 %v559_v59, %v558_v58  ;;  %v642_v15 = vsel %vm629_vm2, %v639_v32, %v641_v63 }
  0x40   :  { %666 = vrot.lane.b32.xlu1 %v638_v9, %s13281_s12  ;;  %603 = vrot.lane.b32.xlu0 %v553_v14, %s13284_s15  ;;  %v56_v9 = vld [vmem:[%s20298_s0 + $0x40] sm:$0xf]  ;;  %v13632_v14 = vld [vmem:[%s20298_s0 + $0x4c] sm:$0xf]  ;;  %v561_v10 = vsel %vm534_vm5, %v556_v36, %v560_v6 }
  0x41   :  { %v13647_v19 = vcombine.low %v56_v9, %v13622_v11  ;;  %v13656_v23 = vcombine.low %v13627_v13, %v13632_v14 }
  0x43   :  { %v13677_v32 = vshll.u32 %v13647_v19, 16  ;;  %v13682_v34 = vshll.u32 %v13656_v23, 16  ;;  %v13698_v44 = vshrl.u32 %v13656_v23, 16  ;;  %v329_v33 = vrot.slane %v13647_v19, 1 }
  0x44   :  { %809 = vrot.lane.b32.xlu1 %v11678_v17, %s13285_s16  ;;  %761 = vrot.lane.b32.xlu0 %v711_v20, %s13286_s17  ;;  %v13641_v17 = vshll.u32 %v13614_v8, 16  ;;  %v11680_v20 = vcombine.low %v13520_v52, %v13563_v62  ;;  %v13667_v52 = vld [vmem:[%s20298_s0 + $0x50] sm:$0xf]  ;;  %v13672_v62 = vld [vmem:[%s20298_s0 + $0x54] sm:$0xf]  ;;  %v330_v53 = vrot.slane %v13656_v23, 1 }
  0x45   :  { %v13706_v48 = vcombine.low %v13667_v52, %v13672_v62  ;;  %v412_v58 = vrot.slane %v13682_v34, 2  ;;  %v487_v0 = vrot.slane %v13647_v19, 2  ;;  %v567_v9 = vrot.slane %v13677_v32, 3 }
  0x46   :  { %v213_v25 = vrot.slane %v13641_v17, 1  ;;  %v405_v27 = vrot.slane %v13641_v17, 2  ;;  %v721_v50 = vrot.slane %v13641_v17, 4 }
  0x48   :  { %352 = vrot.lane.b32.xlu1 %v324_v24, %s13280_s26  ;;  %289 = vrot.lane.b32.xlu0 %v198_v26, %s13282_s13  ;;  %v719_v24 = vsel %vm20310_vm6, %v714_v41, %v13638_v16  ;;  %v404_v26 = vrot.slane %v13644_v18, 1  ;;  %v214_v36 = vsel %vm20311_vm3, %v209_v3, %v213_v25  ;;  %v13695_v41 = vshrl.u32 %v13647_v19, 16 }
  0x49   :  { %v646_v3 = vrot.slane %v13656_v23, 3 }
  0x4a   :  { %v13688_v37 = vor.u32 %v405_v27, %v404_v26  ;;  %v725_v26 = vrot.slane %v13677_v32, 4 }
  0x4c   :  { %510 = vrot.lane.b32.xlu1 %v482_v31, %s13279_s25  ;;  %447 = vrot.lane.b32.xlu0 %v399_v35, %s13283_s14  ;;  %v563_v31 = vrot.slane %v13641_v17, 3  ;;  %v328_v35 = vsel %vm313_vm1, %v325_v47, %v327_v12  ;;  %v720_v47 = vrot.slane %v13644_v18, 3  ;;  %v645_v17 = vrot.slane %v13647_v19, 3 }
  0x4e   :  { %v13700_v45 = vor.u32 %v563_v31, %v562_v30  ;;  %v13758_v30 = vor.u32 %v721_v50, %v720_v47  ;;  %v11681_v50 = vcombine.low %v13568_v21, %v13599_v22 }
  0x50   :  { %668 = vrot.lane.b32.xlu1 %v640_v39, %s13281_s12  ;;  %605 = vrot.lane.b32.xlu0 %v557_v40, %s13284_s15  ;;  %v486_v39 = vsel %vm471_vm0, %v483_v55, %v485_v29  ;;  %v643_v40 = vrot.slane %v13614_v8, 3  ;;  %v408_v55 = vrot.slane %v13695_v41, 1  ;;  %v565_v7 = vsel %vm534_vm5, %v560_v6, %v13700_v45 }
  0x51   :  { %v723_v47 = vsel %vm20310_vm6, %v13638_v16, %v13758_v30  ;;  %v331_v16 = vsel %vm313_vm1, %v329_v33, %v330_v53  ;;  %vm1184_vm6 = vcmask 220160  }
  0x52   :  { %v644_v59 = vsel %vm629_vm2, %v641_v63, %v643_v40  ;;  %v569_v63 = vrot.slane %v13698_v44, 2 }
  0x54   :  { %811 = vrot.lane.b32.xlu1 %v11679_v46, %s13285_s16  ;;  %763 = vrot.lane.b32.xlu0 %v715_v49, %s13286_s17  ;;  %v223_v46 = vrot.slane %v13677_v32, 1  ;;  %v228_v49 = vrot.slane %v13682_v34, 1 }
  0x56   :  { %v224_v6 = vor.u32 %v223_v46, %v13695_v41  ;;  %v217_v46 = vor.u32 %v13644_v18, %v213_v25 }
  0x58   :  { %354 = vrot.lane.b32.xlu1 %v326_v54, %s13280_s26  ;;  %291 = vrot.lane.b32.xlu0 %v206_v56, %s13282_s13  ;;  %v407_v54 = vsel %vm376_vm4, %v402_v57, %v13688_v37  ;;  %v409_v56 = vrot.slane %v13677_v32, 2  ;;  %v566_v57 = vrot.slane %v13695_v41, 2  ;;  %v229_v31 = vsel %vm20311_vm3, %v224_v6, %v228_v49 }
  0x5c   :  { %512 = vrot.lane.b32.xlu1 %v484_v60, %s13279_s25  ;;  %449 = vrot.lane.b32.xlu0 %v403_v2, %s13283_s14  ;;  %v411_v60 = vrot.slane %v13698_v44, 1  ;;  %v488_v2 = vrot.slane %v13656_v23, 2 }
  0x60   :  { %670 = vrot.lane.b32.xlu1 %v642_v15, %s13281_s12  ;;  %607 = vrot.lane.b32.xlu0 %v561_v10, %s13284_s15  ;;  %v13730_v15 = vshll.u32 %v13706_v48, 16  ;;  %v570_v10 = vrot.slane %v13682_v34, 3 }
  0x62   :  { %v574_v18 = vrot.slane %v13730_v15, 3  ;;  %v732_v6 = vrot.slane %v13730_v15, 4 }
  0x64   :  { %813 = vrot.lane.b32.xlu1 %v11680_v20, %s13285_s16  ;;  %765 = vrot.lane.b32.xlu0 %v719_v24, %s13286_s17  ;;  %v13738_v20 = vshrl.u32 %v13706_v48, 16  ;;  %v724_v24 = vrot.slane %v13695_v41, 3 }
  0x66   :  { %v573_v27 = vrot.slane %v13738_v20, 2 }
  0x68   :  { %356 = vrot.lane.b32.xlu1 %v328_v35, %s13280_s26  ;;  %293 = vrot.lane.b32.xlu0 %v214_v36, %s13282_s13  ;;  %v236_v35 = vrot.slane %v13730_v15, 1  ;;  %v416_v36 = vrot.slane %v13730_v15, 2 }
  0x6c   :  { %514 = vrot.lane.b32.xlu1 %v486_v39, %s13279_s25  ;;  %451 = vrot.lane.b32.xlu0 %v407_v54, %s13283_s14  ;;  %v415_v54 = vrot.slane %v13738_v20, 1  ;;  %v13763_v39 = vld [vmem:[%s20298_s0 + $0x58] sm:$0xf] }
  0x70   :  { %672 = vrot.lane.b32.xlu1 %v644_v59, %s13281_s12  ;;  %609 = vrot.lane.b32.xlu0 %v565_v7, %s13284_s15  ;;  %v13768_v59 = vld [vmem:[%s20298_s0 + $0x5c] sm:$0xf]  ;;  %v731_v7 = vrot.slane %v13738_v20, 3 }
  0x74   :  { %297 = vrot.lane.b32.xlu1 %v229_v31, %s13282_s13  ;;  %295 = vrot.lane.b32.xlu0 %v217_v46, %s13282_s13  ;;  %v13787_v31 = vcombine.low %v13763_v39, %v13768_v59  ;;  %v410_v46 = vor.u32 %v409_v56, %v408_v55 }
  0x76   :  { %v13797_v21 = vshll.u32 %v13787_v31, 16 }
  0x78   :  { %358 = vrot.lane.b32.xlu1 %v327_v12, %s13280_s26  ;;  %767 = vrot.lane.b32.xlu0 %v723_v47, %s13286_s17  ;;  %v13792_v12 = vor.u32 %v412_v58, %v411_v60  ;;  %v13808_v60 = vshrl.u32 %v13787_v31, 16  ;;  %v736_v32 = vrot.slane %v13797_v21, 4 }
  0x7a   :  { %v503_v47 = vpop.permute.xlu1 %502  ;;  %v345_v25 = vpop.permute.xlu0 %344  ;;  %v414_v33 = vsel %vm376_vm4, %v410_v46, %v13792_v12  ;;  %v13820_v46 = vor.u32 %v570_v10, %v569_v63  ;;  %v735_v41 = vrot.slane %v13808_v60, 3 }
  0x7c   :  { %815 = vrot.lane.b32.xlu1 %v11681_v50, %s13285_s16  ;;  %360 = vrot.lane.b32.xlu0 %v331_v16, %s13280_s26  ;;  %v489_v16 = vsel %vm471_vm0, %v487_v0, %v488_v2  ;;  %v244_v0 = vrot.slane %v13797_v21, 1 }
  0x7e   :  { %v661_v55 = vpop.permute.xlu1 %660  ;;  %v282_v56 = vpop.permute.xlu0 %281 }
  0x7f   :  { %v837_v58 = vsel %vm835_vm8, %v13375_v4, %v282_v56  ;;  %v568_v4 = vor.u32 %v567_v9, %v566_v57  ;;  %v650_v57 = vrot.slane %v13787_v31, 3 }
  0x80   :  { %455 = vrot.lane.b32.xlu1 %v414_v33, %s13283_s14  ;;  %453 = vrot.lane.b32.xlu0 %v13688_v37, %s13283_s14  ;;  %v872_v37 = vsel %vm870_vm9, %v837_v58, %v345_v25 }
  0x81   :  { %v572_v63 = vsel %vm534_vm5, %v568_v4, %v13820_v46 }
  0x82   :  { %v440_v33 = vpop.permute.xlu1 %439  ;;  %v598_v56 = vpop.permute.xlu0 %597 }
  0x83   :  { %v905_v22 = vsel %vm903_vm10, %v872_v37, %v440_v33  ;;  %v13858_v37 = vld [vmem:[%s20298_s0 + $0x60] sm:$0xf] }
  0x84   :  { %v938_v50 = vsel %vm936_vm11, %v905_v22, %v503_v47  ;;  %518 = vrot.lane.b32.xlu1 %v489_v16, %s13279_s25  ;;  %516 = vrot.lane.b32.xlu0 %v485_v29, %s13279_s25  ;;  %v419_v22 = vrot.slane %v13808_v60, 1  ;;  %v232_v16 = vor.u32 %v13698_v44, %v228_v49  ;;  %v577_v49 = vrot.slane %v13808_v60, 2 }
  0x85   :  { %v971_v9 = vsel %vm969_vm12, %v938_v50, %v598_v56  ;;  %v420_v50 = vrot.slane %v13797_v21, 2 }
  0x86   :  { %v804_v10 = vpop.permute.xlu1 %803  ;;  %v1004_v25 = vsel %vm1002_vm13, %v971_v9, %v661_v55  ;;  %v756_v58 = vpop.permute.xlu0 %755  ;;  %v647_v55 = vsel %vm629_vm2, %v645_v17, %v646_v3  ;;  %v13863_v17 = vld [vmem:[%s20298_s0 + $0x64] sm:$0xf]  ;;  %v237_v56 = vsel %vm20311_vm3, %v232_v16, %v236_v35  ;;  %v726_v9 = vor.u32 %v725_v26, %v724_v24 }
  0x87   :  { %v1037_v47 = vsel %vm1035_vm14, %v1004_v25, %v756_v58  ;;  %vm20576_vm3 = vsmask.f32 4352 }
  0x88   :  { %613 = vrot.lane.b32.xlu1 %v572_v63, %s13284_s15  ;;  %611 = vrot.lane.b32.xlu0 %v13700_v45, %s13284_s15  ;;  %v1070_v29 = vsel %vm1068_vm15, %v1037_v47, %v804_v10  ;;  %v20573_v63 = vrot.slane %v13698_v44, 3  ;;  %v20574_v10 = vrot.slane %v13682_v34, 4  ;;  %v13891_v44 = vcombine.low %v13858_v37, %v13863_v17 }
  0x89   :  { %12521 = vmatmul.mubr.msk.bf16.vlgmr.msra.gmra.mrb[0].mxu0 %vm1184_vm6, %v1070_v29  ;;  %v20575_v34 = vrot.slane %v13706_v48, 1 }
  0x8a   :  { %v347_v4 = vpop.permute.xlu1 %346  ;;  %v284_v45 = vpop.permute.xlu0 %283  ;;  %12524 = vmatprep.mubr.msk.bf16.mxu0 %vm20312_vm7, %v20314_v43  ;;  %v729_v25 = vor.u32 %v20574_v10, %v20573_v63 }
  0x8b   :  { %v839_v33 = vsel %vm835_vm8, %v13379_v5, %v284_v45  ;;  %v578_v5 = vrot.slane %v13797_v21, 3  ;;  %v333_v24 = vsel %vm313_vm1, %v330_v53, %v20575_v34  ;;  %v11682_v45 = vcombine.low %v13604_v51, %v13604_v51 }
  0x8c   :  { %676 = vrot.lane.b32.xlu1 %v647_v55, %s13281_s12  ;;  %674 = vrot.lane.b32.xlu0 %v643_v40, %s13281_s12  ;;  %v874_v40 = vsel %vm870_vm9, %v839_v33, %v347_v4  ;;  %v730_v26 = vsel %vm20576_vm3, %v726_v9, %v729_v25  ;;  %v11683_v4 = vcombine.low %v13622_v11, %v13627_v13  ;;  %v13908_v53 = vshll.u32 %v13891_v44, 16 }
  0x8d   :  { %v336_v33 = vrot.slane %v13891_v44, 1  ;;  %v13921_v11 = vshrl.u32 %v13891_v44, 16  ;;  %v494_v13 = vrot.slane %v13891_v44, 2 }
  0x8e   :  { %v505_v8 = vpop.permute.xlu1 %504  ;;  %v442_v58 = vpop.permute.xlu0 %441  ;;  %v582_v15 = vrot.slane %v13908_v53, 3 }
  0x8f   :  { %v907_v47 = vsel %vm903_vm10, %v874_v40, %v442_v58  ;;  %v575_v58 = vor.u32 %v574_v18, %v573_v27  ;;  %v20578_v27 = vrot.slane %v13706_v48, 3 }
  0x90   :  { %769 = vrot.lane.b32.xlu1 %v13758_v30, %s13286_s17  ;;  %299 = vrot.lane.b32.xlu0 %v237_v56, %s13282_s13  ;;  %v940_v30 = vsel %vm936_vm11, %v907_v47, %v505_v8  ;;  %v417_v56 = vor.u32 %v416_v36, %v415_v54  ;;  %v20577_v54 = vrot.slane %v13706_v48, 2 }
  0x91   :  { %v649_v18 = vsel %vm629_vm2, %v646_v3, %v20578_v27  ;;  %v423_v3 = vrot.slane %v13921_v11, 1  ;;  %v740_v27 = vrot.slane %v13908_v53, 4 }
  0x92   :  { %v663_v29 = vpop.permute.xlu1 %662  ;;  %v600_v55 = vpop.permute.xlu0 %599  ;;  %v418_v36 = vsel %vm376_vm4, %v13792_v12, %v417_v56  ;;  %v491_v40 = vsel %vm471_vm0, %v488_v2, %v20577_v54  ;;  %v252_v12 = vrot.slane %v13908_v53, 1  ;;  %v424_v2 = vrot.slane %v13908_v53, 2 }
  0x93   :  { %v973_v16 = vsel %vm969_vm12, %v940_v30, %v600_v55 }
  0x94   :  { %362 = vrot.lane.b32.xlu1 %v333_v24, %s13280_s26  ;;  %771 = vrot.lane.b32.xlu0 %v730_v26, %s13286_s17  ;;  %v1006_v63 = vsel %vm1002_vm13, %v973_v16, %v663_v29  ;;  %v576_v26 = vsel %vm534_vm5, %v13820_v46, %v575_v58  ;;  %v11684_v46 = vcombine.low %v13632_v14, %v13667_v52  ;;  %v13972_v14 = vld [vmem:[%s20298_s0 + $0x68] sm:$0xf]  ;;  %v13977_v52 = vld [vmem:[%s20298_s0 + $0x6c] sm:$0xf] }
  0x96   :  { %v806_v9 = vpop.permute.xlu1 %805  ;;  %v758_v10 = vpop.permute.xlu0 %757 }
  0x97   :  { %v1039_v8 = vsel %vm1035_vm14, %v1006_v63, %v758_v10 }
  0x98   :  { %819 = vrot.lane.b32.xlu1 %v11683_v4, %s13285_s16  ;;  %817 = vrot.lane.b32.xlu0 %v11682_v45, %s13285_s16  ;;  %v1072_v51 = vsel %vm1068_vm15, %v1039_v8, %v806_v9  ;;  %v581_v4 = vrot.slane %v13921_v11, 2  ;;  %v20581_v8 = vrot.slane %v13706_v48, 1 }
  0x99   :  { %12525 = vmatmul.mubr.msk.bf16.gmra.mrb[4].mxu0 %vm1184_vm6, %v1072_v51 }
  0x9a   :  { %v349_v47 = vpop.permute.xlu1 %348  ;;  %v286_v34 = vpop.permute.xlu0 %285  ;;  %12528 = vmatprep.mubr.msk.bf16.mxu0 %vm20312_vm7, %v20314_v43 }
  0x9b   :  { %v841_v24 = vsel %vm835_vm8, %v13418_v42, %v286_v34  ;;  %v733_v42 = vor.u32 %v732_v6, %v731_v7  ;;  %v240_v7 = vor.u32 %v13738_v20, %v236_v35  ;;  %v652_v20 = vrot.slane %v13891_v44, 3 }
  0x9c   :  { %457 = vrot.lane.b32.xlu0 %v418_v36, %s13283_s14  ;;  %520 = vrot.lane.b32.xlu1 %v491_v40, %s13279_s25  ;;  %v876_v30 = vsel %vm870_vm9, %v841_v24, %v349_v47  ;;  %v421_v36 = vor.u32 %v420_v50, %v419_v22  ;;  %v20582_v50 = vrot.slane %v13787_v31, 2 }
  0x9d   :  { %v734_v45 = vsel %vm20576_vm3, %v729_v25, %v733_v42  ;;  %vm20579_vm3 = vsmask.f32 7424  ;;  %v20580_v25 = vrot.slane %v13787_v31, 1 }
  0x9e   :  { %v507_v29 = vpop.permute.xlu1 %506  ;;  %v444_v55 = vpop.permute.xlu0 %443  ;;  %v245_v35 = vsel %vm20579_vm3, %v240_v7, %v244_v0  ;;  %v422_v22 = vsel %vm376_vm4, %v417_v56, %v421_v36  ;;  %vm20585_vm3 = vsmask.f32 4352 }
  0x9f   :  { %v909_v16 = vsel %vm903_vm10, %v876_v30, %v444_v55  ;;  %v335_v51 = vsel %vm313_vm1, %v20581_v8, %v20580_v25  ;;  %v579_v55 = vor.u32 %v578_v5, %v577_v49  ;;  %v20584_v49 = vrot.slane %v13706_v48, 3 }
  0xa0   :  { %615 = vrot.lane.b32.xlu0 %v576_v26, %s13284_s15  ;;  %678 = vrot.lane.b32.xlu1 %v649_v18, %s13281_s12  ;;  %v942_v9 = vsel %vm936_vm11, %v909_v16, %v507_v29  ;;  %v739_v26 = vrot.slane %v13921_v11, 3  ;;  %v14004_v18 = vcombine.low %v13972_v14, %v13977_v52  ;;  %v20583_v29 = vrot.slane %v13706_v48, 2 }
  0xa1   :  { %v651_v5 = vsel %vm629_vm2, %v20584_v49, %v650_v57 }
  0xa2   :  { %v665_v6 = vpop.permute.xlu1 %664  ;;  %v602_v63 = vpop.permute.xlu0 %601  ;;  %v493_v30 = vsel %vm471_vm0, %v20583_v29, %v20582_v50  ;;  %v14024_v56 = vshll.u32 %v14004_v18, 16  ;;  %v338_v7 = vrot.slane %v14004_v18, 1  ;;  %v14044_v25 = vshrl.u32 %v14004_v18, 16 }
  0xa3   :  { %v975_v10 = vsel %vm969_vm12, %v942_v9, %v602_v63  ;;  %v496_v8 = vrot.slane %v14004_v18, 2 }
  0xa4   :  { %773 = vrot.lane.b32.xlu0 %v734_v45, %s13286_s17  ;;  %821 = vrot.lane.b32.xlu1 %v11684_v46, %s13285_s16  ;;  %v1008_v40 = vsel %vm1002_vm13, %v975_v10, %v665_v6  ;;  %v580_v6 = vsel %vm534_vm5, %v575_v58, %v579_v55  ;;  %v11685_v58 = vcombine.low %v13672_v62, %v13763_v39  ;;  %v260_v62 = vrot.slane %v14024_v56, 1 }
  0xa5   :  { %v654_v39 = vrot.slane %v14004_v18, 3 }
  0xa6   :  { %v808_v54 = vpop.permute.xlu1 %807  ;;  %v760_v47 = vpop.permute.xlu0 %759 }
  0xa7   :  { %v1041_v34 = vsel %vm1035_vm14, %v1008_v40, %v760_v47 }
  0xa8   :  { %301 = vrot.lane.b32.xlu0 %v245_v35, %s13282_s13  ;;  %364 = vrot.lane.b32.xlu1 %v335_v51, %s13280_s26  ;;  %v1074_v24 = vsel %vm1068_vm15, %v1041_v34, %v808_v54 }
  0xa9   :  { %12529 = vmatmul.mubr.msk.bf16.gmra.mrb[8].mxu0 %vm1184_vm6, %v1074_v24 }
  0xaa   :  { %v351_v16 = vpop.permute.xlu1 %350  ;;  %v288_v46 = vpop.permute.xlu0 %287  ;;  %12532 = vmatprep.mubr.msk.bf16.mxu0 %vm20312_vm7, %v20314_v43 }
  0xab   :  { %v843_v45 = vsel %vm835_vm8, %v13451_v1, %v288_v46  ;;  %v737_v1 = vor.u32 %v736_v32, %v735_v41  ;;  %v248_v32 = vor.u32 %v13808_v60, %v244_v0  ;;  %v20587_v60 = vrot.slane %v13787_v31, 1 }
  0xac   :  { %459 = vrot.lane.b32.xlu0 %v422_v22, %s13283_s14  ;;  %522 = vrot.lane.b32.xlu1 %v493_v30, %s13279_s25  ;;  %v878_v63 = vsel %vm870_vm9, %v843_v45, %v351_v16  ;;  %v427_v30 = vrot.slane %v14044_v25, 1  ;;  %v428_v16 = vrot.slane %v14024_v56, 2  ;;  %v583_v45 = vor.u32 %v582_v15, %v581_v4 }
  0xad   :  { %v738_v41 = vsel %vm20585_vm3, %v733_v42, %v737_v1  ;;  %vm20586_vm3 = vsmask.f32 7424  ;;  %v337_v0 = vsel %vm313_vm1, %v20587_v60, %v336_v33  ;;  %v425_v42 = vor.u32 %v424_v2, %v423_v3 }
  0xae   :  { %v509_v9 = vpop.permute.xlu1 %508  ;;  %v446_v10 = vpop.permute.xlu0 %445  ;;  %v253_v21 = vsel %vm20586_vm3, %v248_v32, %v252_v12  ;;  %v20588_v3 = vrot.slane %v13787_v31, 2  ;;  %v585_v4 = vrot.slane %v14044_v25, 2  ;;  %v586_v15 = vrot.slane %v14024_v56, 3 }
  0xaf   :  { %v911_v35 = vsel %vm903_vm10, %v878_v63, %v446_v10  ;;  %v426_v2 = vsel %vm376_vm4, %v421_v36, %v425_v42  ;;  %v14094_v36 = vld [vmem:[%s20298_s0 + $0x70] sm:$0xf]  ;;  %v653_v63 = vsel %vm629_vm2, %v650_v57, %v652_v20  ;;  %v741_v10 = vor.u32 %v740_v27, %v739_v26 }
  0xb0   :  { %617 = vrot.lane.b32.xlu0 %v580_v6, %s13284_s15  ;;  %680 = vrot.lane.b32.xlu1 %v651_v5, %s13281_s12  ;;  %v944_v54 = vsel %vm936_vm11, %v911_v35, %v509_v9  ;;  %v495_v46 = vsel %vm471_vm0, %v20588_v3, %v494_v13  ;;  %v14099_v9 = vld [vmem:[%s20298_s0 + $0x74] sm:$0xf]  ;;  %v743_v57 = vrot.slane %v14044_v25, 3  ;;  %vm20589_vm3 = vsmask.f32 4352 }
  0xb1   :  { %v14125_v26 = vcombine.low %v14094_v36, %v14099_v9  ;;  %v742_v27 = vsel %vm20589_vm3, %v737_v1, %v741_v10  ;;  %vm20590_vm3 = vsmask.f32 7424 }
  0xb2   :  { %v667_v51 = vpop.permute.xlu1 %666  ;;  %v604_v40 = vpop.permute.xlu0 %603 }
  0xb3   :  { %v977_v47 = vsel %vm969_vm12, %v944_v54, %v604_v40  ;;  %v256_v54 = vor.u32 %v13921_v11, %v252_v12  ;;  %v340_v60 = vrot.slane %v14125_v26, 1  ;;  %v339_v11 = vsel %vm313_vm1, %v336_v33, %v338_v7 }
  0xb4   :  { %775 = vrot.lane.b32.xlu0 %v738_v41, %s13286_s17  ;;  %823 = vrot.lane.b32.xlu1 %v11685_v58, %s13285_s16  ;;  %v1010_v24 = vsel %vm1002_vm13, %v977_v47, %v667_v51  ;;  %v744_v51 = vrot.slane %v14024_v56, 4  ;;  %v429_v12 = vor.u32 %v428_v16, %v427_v30  ;;  %v497_v30 = vsel %vm471_vm0, %v494_v13, %v496_v8 }
  0xb5   :  { %v261_v53 = vsel %vm20590_vm3, %v256_v54, %v260_v62  ;;  %v587_v16 = vor.u32 %v586_v15, %v585_v4  ;;  %v655_v13 = vsel %vm629_vm2, %v652_v20, %v654_v39  ;;  %vm20591_vm3 = vsmask.f32 4352 }
  0xb6   :  { %v810_v34 = vpop.permute.xlu1 %809  ;;  %v762_v22 = vpop.permute.xlu0 %761  ;;  %v430_v33 = vsel %vm376_vm4, %v425_v42, %v429_v12 }
  0xb7   :  { %v1043_v50 = vsel %vm1035_vm14, %v1010_v24, %v762_v22 }
  0xb8   :  { %303 = vrot.lane.b32.xlu0 %v253_v21, %s13282_s13  ;;  %366 = vrot.lane.b32.xlu1 %v337_v0, %s13280_s26  ;;  %v1076_v29 = vsel %vm1068_vm15, %v1043_v50, %v810_v34  ;;  %v14153_v50 = vshrl.u32 %v14125_v26, 16 }
  0xb9   :  { %12533 = vmatmul.mubr.msk.bf16.gmra.mrb[12].mxu0 %vm1184_vm6, %v1076_v29  ;;  %v498_v29 = vrot.slane %v14125_v26, 2 }
  0xba   :  { %v353_v6 = vpop.permute.xlu1 %352  ;;  %v290_v49 = vpop.permute.xlu0 %289  ;;  %12536 = vmatprep.mubr.msk.bf16.mxu0 %vm20312_vm7, %v20314_v43  ;;  %v589_v56 = vrot.slane %v14153_v50, 2 }
  0xbb   :  { %v845_v5 = vsel %vm835_vm8, %v13488_v28, %v290_v49  ;;  %v584_v28 = vsel %vm534_vm5, %v579_v55, %v583_v45  ;;  %v11686_v55 = vcombine.low %v13768_v59, %v13858_v37  ;;  %v14136_v37 = vshll.u32 %v14125_v26, 16 }
  0xbc   :  { %461 = vrot.lane.b32.xlu0 %v426_v2, %s13283_s14  ;;  %524 = vrot.lane.b32.xlu1 %v495_v46, %s13279_s25  ;;  %v880_v58 = vsel %vm870_vm9, %v845_v5, %v353_v6  ;;  %v588_v49 = vsel %vm534_vm5, %v583_v45, %v587_v16  ;;  %v745_v5 = vor.u32 %v744_v51, %v743_v57 }
  0xbd   :  { %v268_v42 = vrot.slane %v14136_v37, 1  ;;  %v432_v6 = vrot.slane %v14136_v37, 2  ;;  %v11687_v45 = vcombine.low %v13863_v17, %v13972_v14  ;;  %v14194_v17 = vld [vmem:[%s20298_s0 + $0x78] sm:$0xf]  ;;  %v14199_v14 = vld [vmem:[%s20298_s0 + $0x7c] sm:$0xf] }
  0xbe   :  { %v511_v35 = vpop.permute.xlu1 %510  ;;  %v448_v41 = vpop.permute.xlu0 %447  ;;  %v746_v20 = vsel %vm20591_vm3, %v741_v10, %v745_v5  ;;  %vm20592_vm3 = vsmask.f32 7424  ;;  %v341_v10 = vsel %vm313_vm1, %v338_v7, %v340_v60  ;;  %v14220_v7 = vcombine.low %v14194_v17, %v14199_v14 }
  0xbf   :  { %v913_v32 = vsel %vm903_vm10, %v880_v58, %v448_v41  ;;  %v264_v58 = vor.u32 %v14044_v25, %v260_v62  ;;  %v656_v25 = vrot.slane %v14125_v26, 3 }
  0xc0   :  { %619 = vrot.lane.b32.xlu0 %v584_v28, %s13284_s15  ;;  %682 = vrot.lane.b32.xlu1 %v653_v63, %s13281_s12  ;;  %v946_v47 = vsel %vm936_vm11, %v913_v32, %v511_v35  ;;  %v431_v63 = vrot.slane %v14153_v50, 1  ;;  %v590_v35 = vrot.slane %v14136_v37, 3 }
  0xc1   :  { %v269_v62 = vsel %vm20592_vm3, %v264_v58, %v268_v42 }
  0xc2   :  { %v669_v40 = vpop.permute.xlu1 %668  ;;  %v606_v21 = vpop.permute.xlu0 %605  ;;  %v433_v51 = vor.u32 %v432_v6, %v431_v63 }
  0xc3   :  { %v979_v59 = vsel %vm969_vm12, %v946_v47, %v606_v21 }
  0xc4   :  { %777 = vrot.lane.b32.xlu0 %v742_v27, %s13286_s17  ;;  %825 = vrot.lane.b32.xlu1 %v11686_v55, %s13285_s16  ;;  %v1012_v0 = vsel %vm1002_vm13, %v979_v59, %v669_v40  ;;  %v747_v59 = vrot.slane %v14153_v50, 3 }
  0xc6   :  { %v812_v1 = vpop.permute.xlu1 %811  ;;  %v764_v34 = vpop.permute.xlu0 %763 }
  0xc7   :  { %v1045_v24 = vsel %vm1035_vm14, %v1012_v0, %v764_v34  ;;  %v591_v0 = vor.u32 %v590_v35, %v589_v56 }
  0xc8   :  { %305 = vrot.lane.b32.xlu0 %v261_v53, %s13282_s13  ;;  %368 = vrot.lane.b32.xlu1 %v339_v11, %s13280_s26  ;;  %v1078_v22 = vsel %vm1068_vm15, %v1045_v24, %v812_v1  ;;  %v748_v53 = vrot.slane %v14136_v37, 4  ;;  %v434_v11 = vsel %vm376_vm4, %v429_v12, %v433_v51  ;;  %v499_v1 = vsel %vm471_vm0, %v496_v8, %v498_v29 }
  0xc9   :  { %12537 = vmatmul.mubr.msk.bf16.gmra.mrb[16].mxu0 %vm1184_vm6, %v1078_v22 }
  0xca   :  { %v355_v2 = vpop.permute.xlu1 %354  ;;  %v292_v3 = vpop.permute.xlu0 %291  ;;  %12540 = vmatprep.mubr.msk.bf16.mxu0 %vm20312_vm7, %v20314_v43 }
  0xcb   :  { %v847_v46 = vsel %vm835_vm8, %v13536_v61, %v292_v3 }
  0xcc   :  { %463 = vrot.lane.b32.xlu0 %v430_v33, %s13283_s14  ;;  %526 = vrot.lane.b32.xlu1 %v497_v30, %s13279_s25  ;;  %v882_v61 = vsel %vm870_vm9, %v847_v46, %v355_v2 }
  0xce   :  { %v513_v4 = vpop.permute.xlu1 %512  ;;  %v450_v15 = vpop.permute.xlu0 %449 }
  0xcf   :  { %v915_v28 = vsel %vm903_vm10, %v882_v61, %v450_v15 }
  0xd0   :  { %621 = vrot.lane.b32.xlu0 %v588_v49, %s13284_s15  ;;  %684 = vrot.lane.b32.xlu1 %v655_v13, %s13281_s12  ;;  %v948_v32 = vsel %vm936_vm11, %v915_v28, %v513_v4 }
  0xd2   :  { %v671_v41 = vpop.permute.xlu1 %670  ;;  %v608_v55 = vpop.permute.xlu0 %607 }
  0xd3   :  { %v981_v57 = vsel %vm969_vm12, %v948_v32, %v608_v55 }
  0xd4   :  { %779 = vrot.lane.b32.xlu0 %v746_v20, %s13286_s17  ;;  %827 = vrot.lane.b32.xlu1 %v11687_v45, %s13285_s16  ;;  %v1014_v54 = vsel %vm1002_vm13, %v981_v57, %v671_v41 }
  0xd6   :  { %v814_v27 = vpop.permute.xlu1 %813  ;;  %v766_v40 = vpop.permute.xlu0 %765 }
  0xd7   :  { %v1047_v47 = vsel %vm1035_vm14, %v1014_v54, %v766_v40 }
  0xd8   :  { %307 = vrot.lane.b32.xlu0 %v269_v62, %s13282_s13  ;;  %370 = vrot.lane.b32.xlu1 %v341_v10, %s13280_s26  ;;  %v1080_v21 = vsel %vm1068_vm15, %v1047_v47, %v814_v27 }
  0xd9   :  { %12541 = vmatmul.mubr.msk.bf16.gmra.mrb[20].mxu0 %vm1184_vm6, %v1080_v21 }
  0xda   :  { %v357_v34 = vpop.permute.xlu1 %356  ;;  %v294_v24 = vpop.permute.xlu0 %293  ;;  %12544 = vmatprep.mubr.msk.bf16.mxu0 %vm20312_vm7, %v20314_v43 }
  0xdb   :  { %16 = vsyncpa [#allocation3], 0  ;;  %v14234_v37 = vshll.u32 %v14220_v7, 16  ;;  %v278_v12 = vshrl.u32 %v14220_v7, 16  ;;  %v592_v22 = vsel %vm534_vm5, %v587_v16, %v591_v0  ;;  %v657_v8 = vsel %vm629_vm2, %v654_v39, %v656_v25  ;;  %s13291_s18 = smov 64  }
  0xdc   :  { %465 = vrot.lane.b32.xlu0 %v434_v11, %s13283_s14  ;;  %528 = vrot.lane.b32.xlu1 %v499_v1, %s13279_s25  ;;  %v749_v33 = vor.u32 %v748_v53, %v747_v59  ;;  %v11688_v3 = vcombine.low %v13977_v52, %v14094_v36  ;;  %v272_v46 = vor.u32 %v14153_v50, %v268_v42  ;;  %vm20593_vm3 = vsmask.f32 4352 }
  0xdd   :  { %v276_v16 = vrot.slane %v14234_v37, 1  ;;  %v435_v6 = vrot.slane %v278_v12, 1  ;;  %v436_v49 = vrot.slane %v14234_v37, 2  ;;  %v342_v39 = vrot.slane %v14220_v7, 1 }
  0xde   :  { %v515_v30 = vpop.permute.xlu1 %514  ;;  %v452_v2 = vpop.permute.xlu0 %451  ;;  %v750_v13 = vsel %vm20593_vm3, %v745_v5, %v749_v33  ;;  %v849_v4 = vsel %vm835_vm8, %v13578_v38, %v294_v24  ;;  %vm20594_vm7 = vsmask.f32 7424  ;;  %v500_v42 = vrot.slane %v14220_v7, 2 }
  0xdf   :  { %v277_v36 = vsel %vm20594_vm7, %v272_v46, %v276_v16  ;;  %v437_v50 = vor.u32 %v436_v49, %v435_v6  ;;  %v884_v15 = vsel %vm870_vm9, %v849_v4, %v357_v34  ;;  %v343_v5 = vsel %vm313_vm1, %v340_v60, %v342_v39 }
  0xe0   :  { %623 = vrot.lane.b32.xlu0 %v592_v22, %s13284_s15  ;;  %686 = vrot.lane.b32.xlu1 %v657_v8, %s13281_s12  ;;  %v593_v28 = vrot.slane %v278_v12, 2  ;;  %v594_v38 = vrot.slane %v14234_v37, 3  ;;  %v917_v45 = vsel %vm903_vm10, %v884_v15, %v452_v2  ;;  %v501_v58 = vsel %vm471_vm0, %v498_v29, %v500_v42  ;;  %vm20595_vm0 = vmmov %vm20593_vm3 }
  0xe1   :  { %v438_v20 = vsel %vm376_vm4, %v433_v51, %v437_v50  ;;  %v950_v41 = vsel %vm936_vm11, %v917_v45, %v515_v30  ;;  %v751_v32 = vrot.slane %v278_v12, 3  ;;  %v752_v55 = vrot.slane %v14234_v37, 4 }
  0xe2   :  { %v673_v61 = vpop.permute.xlu1 %672  ;;  %v610_v52 = vpop.permute.xlu0 %609  ;;  %v595_v60 = vor.u32 %v594_v38, %v593_v28  ;;  %v658_v10 = vrot.slane %v14220_v7, 3  ;;  %v11689_v7 = vcombine.low %v14099_v9, %v14194_v17  ;;  %vm20596_vm1 = vmmov 0  }
  0xe3   :  { %v983_v57 = vsel %vm969_vm12, %v950_v41, %v610_v52  ;;  %v753_v27 = vor.u32 %v752_v55, %v751_v32  ;;  %vm3429_vm7 = vcmask 1041409  }
  0xe4   :  { %781 = vrot.lane.b32.xlu0 %v750_v13, %s13286_s17  ;;  %829 = vrot.lane.b32.xlu1 %v11688_v3, %s13285_s16  ;;  %v1016_v51 = vsel %vm1002_vm13, %v983_v57, %v673_v61  ;;  %v596_v29 = vsel %vm534_vm5, %v591_v0, %v595_v60  ;;  %v659_v21 = vsel %vm629_vm2, %v656_v25, %v658_v10  ;;  %vm2260_vm5 = vcmask 517120  }
  0xe5   :  { %v754_v53 = vsel %vm20595_vm0, %v749_v33, %v753_v27  ;;  %v280_v25 = vor.u32 %v278_v12, %v276_v16  ;;  %v13251_v12 = vld [vmem:[%s20298_s0 + $0x38] sm:$0xf]  ;;  %v11690_v33 = vcombine.low %v14199_v14, %v14199_v14 }
  0xe6   :  { %v298_v63 = vpop.permute.xlu1 %297  ;;  %v296_v35 = vpop.permute.xlu0 %295  ;;  %v11664_v8 = vcombine.low %v13251_v12, %v13251_v12 }
  0xe7   :  { %v854_v3 = vsel %vm835_vm8, %v13647_v19, %v298_v63 }
  0xe8   :  { %309 = vrot.lane.b32.xlu0 %v277_v36, %s13282_s13  ;;  %372 = vrot.lane.b32.xlu1 %v343_v5, %s13280_s26  ;;  %v852_v46 = vsel %vm835_vm8, %v11664_v8, %v296_v35 }
  0xea   :  { %v359_v56 = vpop.permute.xlu1 %358  ;;  %v768_v62 = vpop.permute.xlu0 %767 }
  0xeb   :  { %v1049_v54 = vsel %vm1035_vm14, %v1016_v51, %v768_v62  ;;  %v886_v16 = vsel %vm870_vm9, %v852_v46, %v359_v56 }
  0xec   :  { %467 = vrot.lane.b32.xlu0 %v438_v20, %s13283_s14  ;;  %530 = vrot.lane.b32.xlu1 %v501_v58, %s13279_s25 }
  0xee   :  { %v816_v40 = vpop.permute.xlu1 %815  ;;  %v361_v47 = vpop.permute.xlu0 %360 }
  0xef   :  { %v1082_v59 = vsel %vm1068_vm15, %v1049_v54, %v816_v40  ;;  %v888_v6 = vsel %vm870_vm9, %v854_v3, %v361_v47 }
  0xf0   :  { %625 = vrot.lane.b32.xlu0 %v596_v29, %s13284_s15  ;;  %12545 = vmatmul.mubr.msk.bf16.gmra.mrb[24].mxu0 %vm1184_vm6, %v1082_v59 }
  0xf1   :  { %688 = vrot.lane.b32.xlu1 %v659_v21, %s13281_s12  ;;  %12548 = vmatprep.mubr.msk.bf16.mxu0 %vm20596_vm1, %v20314_v43 }
  0xf2   :  { %v456_v11 = vpop.permute.xlu1 %455  ;;  %v454_v1 = vpop.permute.xlu0 %453 }
  0xf3   :  { %v921_v49 = vsel %vm903_vm10, %v888_v6, %v456_v11  ;;  %v919_v13 = vsel %vm903_vm10, %v886_v16, %v454_v1 }
  0xf4   :  { %783 = vrot.lane.b32.xlu0 %v754_v53, %s13286_s17 }
  0xf5   :  { %831 = vrot.lane.b32.xlu1 %v11689_v7, %s13285_s16 }
  0xf6   :  { %v519_v0 = vpop.permute.xlu1 %518  ;;  %v517_v34 = vpop.permute.xlu0 %516 }
  0xf7   :  { %v954_v4 = vsel %vm936_vm11, %v921_v49, %v519_v0  ;;  %v952_v19 = vsel %vm936_vm11, %v919_v13, %v517_v34 }
  0xf8   :  { %311 = vrot.lane.b32.xlu0 %v280_v25, %s13282_s13 }
  0xf9   :  { %374 = vrot.lane.b32.xlu1 %v342_v39, %s13280_s26 }
  0xfa   :  { %v614_v24 = vpop.permute.xlu1 %613  ;;  %v612_v37 = vpop.permute.xlu0 %611 }
  0xfb   :  { %v987_v61 = vsel %vm969_vm12, %v954_v4, %v614_v24  ;;  %v985_v52 = vsel %vm969_vm12, %v952_v19, %v612_v37 }
  0xfc   :  { %469 = vrot.lane.b32.xlu0 %v437_v50, %s13283_s14 }
  0xfd   :  { %532 = vrot.lane.b32.xlu1 %v500_v42, %s13279_s25 }
  0xfe   :  { %v677_v9 = vpop.permute.xlu1 %676  ;;  %v675_v22 = vpop.permute.xlu0 %674 }
  0xff   :  { %v1020_v36 = vsel %vm1002_vm13, %v987_v61, %v677_v9  ;;  %v1018_v50 = vsel %vm1002_vm13, %v985_v52, %v675_v22 }
 0x100   :  { %627 = vrot.lane.b32.xlu0 %v595_v60, %s13284_s15 }
 0x101   :  { %690 = vrot.lane.b32.xlu1 %v658_v10, %s13281_s12 }
 0x102   :  { %v770_v30 = vpop.permute.xlu1 %769  ;;  %v300_v2 = vpop.permute.xlu0 %299 }
 0x103   :  { %v1051_v42 = vsel %vm1035_vm14, %v1018_v50, %v770_v30  ;;  %v856_v35 = vsel %vm835_vm8, %v13656_v23, %v300_v2 }
 0x104   :  { %785 = vrot.lane.b32.xlu0 %v753_v27, %s13286_s17 }
 0x105   :  { %833 = vrot.lane.b32.xlu1 %v11690_v33, %s13285_s16 }
 0x106   :  { %v363_v14 = vpop.permute.xlu1 %362  ;;  %v772_v39 = vpop.permute.xlu0 %771 }
 0x107   :  { %v1053_v15 = vsel %vm1035_vm14, %v1020_v36, %v772_v39  ;;  %v890_v20 = vsel %vm870_vm9, %v856_v35, %v363_v14 }
 0x10a   :  { %v820_v5 = vpop.permute.xlu1 %819  ;;  %v818_v28 = vpop.permute.xlu0 %817 }
 0x10b   :  { %v1086_v38 = vsel %vm1068_vm15, %v1053_v15, %v820_v5  ;;  %v1084_v45 = vsel %vm1068_vm15, %v1051_v42, %v818_v28 }
 0x10c   :  { %v11692_v63 = vcombine.low %v1084_v45, %v1086_v38  ;;  %v1133_v27 = vunpack.c.h.b16 %v1086_v38 }
 0x10e   :  { %12549 = vmatmul.mubr.msk.bf16.gmra.mrb[28].mxu0 %vm1184_vm6, %v11692_v63  ;;  %v458_v58 = vpop.permute.xlu0 %457  ;;  %v521_v41 = vpop.permute.xlu1 %520 }
 0x10f   :  { %v923_v60 = vsel %vm903_vm10, %v890_v20, %v458_v58  ;;  %12552 = vmatprep.mubr.msk.bf16.mxu0 %vm20596_vm1, %v20314_v43 }
 0x110   :  { %v956_v32 = vsel %vm936_vm11, %v923_v60, %v521_v41 }
 0x112   :  { %v616_v55 = vpop.permute.xlu0 %615  ;;  %v679_v57 = vpop.permute.xlu1 %678 }
 0x113   :  { %v989_v56 = vsel %vm969_vm12, %v956_v32, %v616_v55 }
 0x114   :  { %v1022_v62 = vsel %vm1002_vm13, %v989_v56, %v679_v57 }
 0x116   :  { %v774_v23 = vpop.permute.xlu0 %773  ;;  %v822_v10 = vpop.permute.xlu1 %821 }
 0x117   :  { %v1055_v51 = vsel %vm1035_vm14, %v1022_v62, %v774_v23 }
 0x118   :  { %v1088_v29 = vsel %vm1068_vm15, %v1055_v51, %v822_v10 }
 0x119   :  { %v1134_v54 = vunpack.c.l.b16 %v1088_v29  ;;  %v1135_v8 = vunpack.c.h.b16 %v1088_v29 }
 0x11a   :  { %v302_v40 = vpop.permute.xlu0 %301  ;;  %v365_v47 = vpop.permute.xlu1 %364 }
 0x11b   :  { %v1166_v21 = vpack.c.b16 %v1134_v54, %v1133_v27  ;;  %v858_v59 = vsel %vm835_vm8, %v13706_v48, %v302_v40 }
 0x11c   :  { %v892_v53 = vsel %vm870_vm9, %v858_v59, %v365_v47 }
 0x11d   :  { %12553 = vmatmul.mubr.msk.bf16.gmra.mrb[32].mxu0 %vm1184_vm6, %v1166_v21 }
 0x11e   :  { %v460_v7 = vpop.permute.xlu0 %459  ;;  %v523_v11 = vpop.permute.xlu1 %522  ;;  %12556 = vmatprep.mubr.msk.bf16.mxu0 %vm20596_vm1, %v20314_v43 }
 0x11f   :  { %v925_v1 = vsel %vm903_vm10, %v892_v53, %v460_v7 }
 0x120   :  { %v958_v25 = vsel %vm936_vm11, %v925_v1, %v523_v11 }
 0x122   :  { %v618_v0 = vpop.permute.xlu0 %617  ;;  %v681_v34 = vpop.permute.xlu1 %680 }
 0x123   :  { %v991_v24 = vsel %vm969_vm12, %v958_v25, %v618_v0 }
 0x124   :  { %v1024_v37 = vsel %vm1002_vm13, %v991_v24, %v681_v34 }
 0x126   :  { %v776_v48 = vpop.permute.xlu0 %775  ;;  %v824_v9 = vpop.permute.xlu1 %823 }
 0x127   :  { %v1057_v22 = vsel %vm1035_vm14, %v1024_v37, %v776_v48 }
 0x128   :  { %v1090_v12 = vsel %vm1068_vm15, %v1057_v22, %v824_v9 }
 0x129   :  { %v1136_v33 = vunpack.c.l.b16 %v1090_v12  ;;  %v1137_v42 = vunpack.c.h.b16 %v1090_v12 }
 0x12a   :  { %v304_v30 = vpop.permute.xlu0 %303  ;;  %v367_v2 = vpop.permute.xlu1 %366 }
 0x12b   :  { %v1167_v3 = vpack.c.b16 %v1136_v33, %v1135_v8  ;;  %v860_v46 = vsel %vm835_vm8, %v13787_v31, %v304_v30  ;;  %v14386_v8 = vld [vmem:[%s20300_s2] ss:$0 sm:$0xff] }
 0x12c   :  { %v894_v16 = vsel %vm870_vm9, %v860_v46, %v367_v2 }
 0x12d   :  { %12557 = vmatmul.mubr.msk.bf16.gmra.mrb[36].mxu0 %vm1184_vm6, %v1167_v3 }
 0x12e   :  { %v462_v6 = vpop.permute.xlu0 %461  ;;  %v525_v49 = vpop.permute.xlu1 %524  ;;  %12560 = vmatprep.mubr.msk.bf16.mxu0 %vm20596_vm1, %v20314_v43 }
 0x12f   :  { %v927_v13 = vsel %vm903_vm10, %v894_v16, %v462_v6 }
 0x130   :  { %v960_v14 = vsel %vm936_vm11, %v927_v13, %v525_v49 }
 0x132   :  { %v620_v39 = vpop.permute.xlu0 %619  ;;  %v683_v4 = vpop.permute.xlu1 %682 }
 0x133   :  { %v993_v19 = vsel %vm969_vm12, %v960_v14, %v620_v39 }
 0x134   :  { %v1026_v61 = vsel %vm1002_vm13, %v993_v19, %v683_v4 }
 0x136   :  { %v778_v31 = vpop.permute.xlu0 %777  ;;  %v826_v52 = vpop.permute.xlu1 %825 }
 0x137   :  { %v1059_v36 = vsel %vm1035_vm14, %v1026_v61, %v778_v31 }
 0x138   :  { %v1092_v50 = vsel %vm1068_vm15, %v1059_v36, %v826_v52 }
 0x139   :  { %v1138_v15 = vunpack.c.l.b16 %v1092_v50  ;;  %v1139_v10 = vunpack.c.h.b16 %v1092_v50 }
 0x13a   :  { %v306_v5 = vpop.permute.xlu0 %305  ;;  %v369_v28 = vpop.permute.xlu1 %368 }
 0x13b   :  { %v1168_v38 = vpack.c.b16 %v1138_v15, %v1137_v42  ;;  %v862_v45 = vsel %vm835_vm8, %v13891_v44, %v306_v5  ;;  %v13290_v15 = vmov 1983009808  }
 0x13c   :  { %v896_v63 = vsel %vm870_vm9, %v862_v45, %v369_v28  ;;  %v1632_v5 = vunpack.c.l.s4 %v13290_v15  ;;  %v1634_v28 = vlaneseq }
 0x13d   :  { %12561 = vmatmul.mubr.msk.bf16.gmra.mrb[40].mxu0 %vm1184_vm6, %v1168_v38 }
 0x13e   :  { %v464_v35 = vpop.permute.xlu0 %463  ;;  %v527_v20 = vpop.permute.xlu1 %526  ;;  %12564 = vmatprep.mubr.msk.bf16.mxu0 %vm20596_vm1, %v20314_v43 }
 0x13f   :  { %v929_v58 = vsel %vm903_vm10, %v896_v63, %v464_v35 }
 0x140   :  { %v962_v41 = vsel %vm936_vm11, %v929_v58, %v527_v20 }
 0x142   :  { %v622_v60 = vpop.permute.xlu0 %621  ;;  %v685_v32 = vpop.permute.xlu1 %684 }
 0x143   :  { %v995_v55 = vsel %vm969_vm12, %v962_v41, %v622_v60  ;;  %v1633_v41 = vunpack.c.0.s8 %v1632_v5  ;;  %v14405_v60 = vshrl.u32 %v1634_v28, 7 }
 0x144   :  { %v1028_v57 = vsel %vm1002_vm13, %v995_v55, %v685_v32 }
 0x145   :  { %20597 = vst [vmem:[#allocation5_spill] sm:$0xff] %v14405_v60 }
 0x146   :  { %v780_v44 = vpop.permute.xlu0 %779  ;;  %v828_v56 = vpop.permute.xlu1 %827 }
 0x147   :  { %v1061_v62 = vsel %vm1035_vm14, %v1028_v57, %v780_v44 }
 0x148   :  { %v1094_v23 = vsel %vm1068_vm15, %v1061_v62, %v828_v56 }
 0x149   :  { %v1140_v51 = vunpack.c.l.b16 %v1094_v23  ;;  %v1141_v48 = vunpack.c.h.b16 %v1094_v23  ;;  %v12739_v23 = vld [vmem:[%s20301_s3 + $0x100] sm:$0xff]  }
 0x14a   :  { %v308_v29 = vpop.permute.xlu0 %307  ;;  %v371_v27 = vpop.permute.xlu1 %370  ;;  %12581 = vmatpush3.bf16.msra.mxu0 %v12739_v23 }
 0x14b   :  { %v1169_v54 = vpack.c.b16 %v1140_v51, %v1139_v10  ;;  %v864_v40 = vsel %vm835_vm8, %v14004_v18, %v308_v29  ;;  %12582 = vmatprep.subr.bf16.mxu0 %v20314_v43 }
 0x14c   :  { %v898_v47 = vsel %vm870_vm9, %v864_v40, %v371_v27  ;;  %v14417_v27 = vsub.s32 %v1633_v41, %v14405_v60 }
 0x14d   :  { %12565 = vmatmul.mubr.msk.bf16.gmra.mrb[44].mxu0 %vm1184_vm6, %v1169_v54  ;;  %v11672_v54 = vcombine.low %v14194_v17, %v14194_v17 }
 0x14e   :  { %v466_v21 = vpop.permute.xlu0 %465  ;;  %v529_v59 = vpop.permute.xlu1 %528  ;;  %12568 = vmatprep.mubr.msk.bf16.mxu0 %vm20596_vm1, %v20314_v43  ;;  %20598 = vst [vmem:[#allocation6_spill] sm:$0xff] %v14417_v27 }
 0x14f   :  { %v931_v53 = vsel %vm903_vm10, %v898_v47, %v466_v21 }
 0x150   :  { %v964_v7 = vsel %vm936_vm11, %v931_v53, %v529_v59 }
 0x152   :  { %v624_v11 = vpop.permute.xlu0 %623  ;;  %v687_v1 = vpop.permute.xlu1 %686 }
 0x153   :  { %v997_v25 = vsel %vm969_vm12, %v964_v7, %v624_v11 }
 0x154   :  { %v1030_v0 = vsel %vm1002_vm13, %v997_v25, %v687_v1 }
 0x156   :  { %v782_v18 = vpop.permute.xlu0 %781  ;;  %v830_v34 = vpop.permute.xlu1 %829 }
 0x157   :  { %v1063_v24 = vsel %vm1035_vm14, %v1030_v0, %v782_v18 }
 0x158   :  { %v1096_v37 = vsel %vm1068_vm15, %v1063_v24, %v830_v34 }
 0x159   :  { %v1142_v9 = vunpack.c.l.b16 %v1096_v37  ;;  %v1143_v35 = vunpack.c.h.b16 %v1096_v37 }
 0x15a   :  { %v310_v22 = vpop.permute.xlu0 %309  ;;  %v373_v12 = vpop.permute.xlu1 %372 }
 0x15b   :  { %v1170_v33 = vpack.c.b16 %v1142_v9, %v1141_v48  ;;  %v866_v30 = vsel %vm835_vm8, %v14125_v26, %v310_v22 }
 0x15c   :  { %v1271_v2 = vpop.f32.mrb[0].mxu0  ;;  %v900_v16 = vsel %vm870_vm9, %v866_v30, %v373_v12 }
 0x15d   :  { %v1272_v3 = vadd.f32 %v14386_v8, %v1271_v2  ;;  %v12522_v46 = vpop.f32.mrb[1].mxu0  ;;  %12569 = vmatmul.mubr.msk.bf16.gmra.mrb[48].mxu0 %vm1184_vm6, %v1170_v33 }
 0x15e   :  { %v1274_v6 = vpop.f32.mrb[2].mxu0  ;;  %v468_v49 = vpop.permute.xlu0 %467  ;;  %12572 = vmatprep.mubr.msk.bf16.mxu0 %vm20596_vm1, %v20314_v43 }
 0x15f   :  { %v1420_v13 = vmul.f32 1.442695, %v1272_v3  ;;  %v1275_v14 = vadd.f32 %v14386_v8, %v1274_v6  ;;  %v933_v39 = vsel %vm903_vm10, %v900_v16, %v468_v49  ;;  %v531_v4 = vpop.permute.xlu1 %530  ;;  %v12523_v26 = vpop.f32.mrb[3].mxu0  ;;  %vm1390_vm2 = vcmp.gt.f32.partialorder %v1272_v3, 0.0 }
 0x160   :  { %v966_v61 = vsel %vm936_vm11, %v933_v39, %v531_v4 }
 0x161   :  { %13139 = vpow2.f32 %v1420_v13  ;;  %v1422_v19 = vmul.f32 1.442695, %v1275_v14  ;;  %vm1391_vm4 = vcmp.gt.f32.partialorder %v1275_v14, 0.0 }
 0x162   :  { %v626_v31 = vpop.permute.xlu0 %625 }
 0x163   :  { %13141 = vpow2.f32 %v1422_v19  ;;  %v999_v52 = vsel %vm969_vm12, %v966_v61, %v626_v31  ;;  %v689_v36 = vpop.permute.xlu1 %688 }
 0x164   :  { %v1032_v50 = vsel %vm1002_vm13, %v999_v52, %v689_v36 }
 0x166   :  { %v784_v42 = vpop.permute.xlu0 %783 }
 0x167   :  { %v1065_v38 = vsel %vm1035_vm14, %v1032_v50, %v784_v42  ;;  %v832_v45 = vpop.permute.xlu1 %831 }
 0x168   :  { %v14402_v63 = vsel %vm1068_vm15, %v1065_v38, %v832_v45 }
 0x169   :  { %v1144_v20 = vunpack.c.l.b16 %v14402_v63 }
 0x16a   :  { %v312_v53 = vpop.permute.xlu0 %311 }
 0x16b   :  { %v13140_v58 = vpop.eup %13139  ;;  %v1171_v32 = vpack.c.b16 %v1144_v20, %v1143_v35  ;;  %v869_v34 = vsel %vm835_vm8, %v11672_v54, %v312_v53  ;;  %v375_v24 = vpop.permute.xlu1 %374 }
 0x16c   :  { %v11710_v55 = vadd.f32 -1.0, %v13140_v58  ;;  %v1279_v57 = vpop.f32.mrb[4].mxu0  ;;  %v902_v30 = vsel %vm870_vm9, %v869_v34, %v375_v24 }
 0x16d   :  { %v13142_v44 = vpop.eup %13141  ;;  %v14408_v56 = vadd.f32 %v14386_v8, %v1279_v57  ;;  %v12526_v62 = vpop.f32.mrb[5].mxu0  ;;  %12573 = vmatmul.mubr.msk.bf16.gmra.mrb[52].mxu0 %vm1184_vm6, %v1171_v32 }
 0x16e   :  { %v1510_v10 = vmul.f32 1.6732632, %v11710_v55  ;;  %v11711_v51 = vadd.f32 -1.0, %v13142_v44  ;;  %v1282_v29 = vpop.f32.mrb[6].mxu0  ;;  %12576 = vmatprep.mubr.msk.bf16.mxu0 %vm20596_vm1, %v20314_v43  ;;  %v470_v28 = vpop.permute.xlu0 %469 }
 0x16f   :  { %v14422_v40 = vadd.f32 %v14386_v8, %v1282_v29  ;;  %v12527_v47 = vpop.f32.mrb[7].mxu0  ;;  %v1424_v7 = vmul.f32 1.442695, %v14408_v56  ;;  %v533_v58 = vpop.permute.xlu1 %532  ;;  %vm1392_vm8 = vcmp.gt.f32.partialorder %v14408_v56, 0.0 }
 0x170   :  { %v1540_v21 = vsel %vm1390_vm2, %v1272_v3, %v1510_v10  ;;  %v1511_v59 = vmul.f32 1.6732632, %v11711_v51  ;;  %vm3439_vm2 = vcmask 1046534  }
 0x171   :  { %v1570_v11 = vmul.f32 1.050701, %v1540_v21  ;;  %v1426_v25 = vmul.f32 1.442695, %v14422_v40  ;;  %13143 = vpow2.f32 %v1424_v7  ;;  %vm1393_vm9 = vcmp.gt.f32.partialorder %v14422_v40, 0.0 }
 0x172   :  { %v1541_v1 = vsel %vm1391_vm4, %v1275_v14, %v1511_v59  ;;  %vm3441_vm4 = vcmask 1047559  }
 0x173   :  { %v1630_v0 = vcombine.high %v1570_v11, %v1570_v11  ;;  %v1637_v17 = vrot.slane %v1570_v11, %v14417_v27  ;;  %v1571_v18 = vmul.f32 1.050701, %v1541_v1  ;;  %13145 = vpow2.f32 %v1426_v25 }
 0x175   :  { %v1644_v37 = vrot.slane %v1630_v0, %v14417_v27  ;;  %v1645_v48 = vcombine.high %v1637_v17, %v1637_v17  ;;  %v2261_v9 = vsel %vm2260_vm5, %v1637_v17, -inf  ;;  %v1647_v22 = vcombine.high %v1571_v18, %v1571_v18 }
 0x176   :  { %v2262_v12 = vrot.slane %v2261_v9, 4  ;;  %v1654_v33 = vrot.slane %v1571_v18, %v14417_v27 }
 0x177   :  { %v1646_v2 = vcombine.high %v1644_v37, %v1644_v37  ;;  %v2268_v3 = vsel %vm2260_vm5, %v1645_v48, -inf  ;;  %v2275_v46 = vsel %vm2260_vm5, %v1644_v37, -inf  ;;  %v1661_v16 = vrot.slane %v1647_v22, %v14417_v27 }
 0x178   :  { %v2263_v6 = vmax.f32 %v2261_v9, %v2262_v12  ;;  %v2269_v49 = vrot.slane %v2268_v3, 4  ;;  %v2276_v13 = vrot.slane %v2275_v46, 4  ;;  %v1662_v14 = vcombine.high %v1654_v33, %v1654_v33  ;;  %v628_v9 = vpop.permute.xlu0 %627 }
 0x179   :  { %v2282_v39 = vsel %vm2260_vm5, %v1646_v2, -inf  ;;  %v1663_v4 = vcombine.high %v1661_v16, %v1661_v16  ;;  %v2289_v26 = vsel %vm2260_vm5, %v1654_v33, -inf  ;;  %v2303_v19 = vsel %vm2260_vm5, %v1661_v16, -inf }
 0x17a   :  { %v2264_v61 = vrot.slane %v2263_v6, 2  ;;  %v2270_v31 = vmax.f32 %v2268_v3, %v2269_v49  ;;  %v2277_v52 = vmax.f32 %v2275_v46, %v2276_v13  ;;  %v2283_v36 = vrot.slane %v2282_v39, 4  ;;  %v691_v3 = vpop.permute.xlu1 %690 }
 0x17b   :  { %v2290_v50 = vrot.slane %v2289_v26, 4  ;;  %v2296_v42 = vsel %vm2260_vm5, %v1662_v14, -inf  ;;  %v2304_v15 = vrot.slane %v2303_v19, 4  ;;  %v2310_v5 = vsel %vm2260_vm5, %v1663_v4, -inf  ;;  %v13144_v23 = vpop.eup %13143 }
 0x17c   :  { %v2265_v38 = vmax.f32 %v2263_v6, %v2264_v61  ;;  %v2271_v45 = vrot.slane %v2270_v31, 2  ;;  %v2278_v35 = vrot.slane %v2277_v52, 2  ;;  %v2284_v20 = vmax.f32 %v2282_v39, %v2283_v36  ;;  %v14441_v41 = vpop.f32.mrb[8].mxu0 }
 0x17d   :  { %v2291_v32 = vmax.f32 %v2289_v26, %v2290_v50  ;;  %v2297_v55 = vrot.slane %v2296_v42, 4  ;;  %v2305_v57 = vmax.f32 %v2303_v19, %v2304_v15  ;;  %v2311_v44 = vrot.slane %v2310_v5, 4  ;;  %v12530_v62 = vpop.f32.mrb[9].mxu0  ;;  %v13146_v1 = vpop.eup %13145 }
 0x17e   :  { %v2266_v10 = vrot.slane %v2265_v38, 1  ;;  %v2272_v51 = vmax.f32 %v2270_v31, %v2271_v45  ;;  %v2279_v29 = vmax.f32 %v2277_v52, %v2278_v35  ;;  %v2285_v54 = vrot.slane %v2284_v20, 2  ;;  %v14443_v47 = vpop.f32.mrb[10].mxu0  ;;  %v786_v50 = vpop.permute.xlu0 %785 }
 0x17f   :  { %v2292_v21 = vrot.slane %v2291_v32, 2  ;;  %v2298_v59 = vmax.f32 %v2296_v42, %v2297_v55  ;;  %v2306_v53 = vrot.slane %v2305_v57, 2  ;;  %v2312_v7 = vmax.f32 %v2310_v5, %v2311_v44  ;;  %v12531_v11 = vpop.f32.mrb[11].mxu0 }
 0x180   :  { %v2267_v25 = vmax.f32 %v2265_v38, %v2266_v10  ;;  %v2273_v0 = vrot.slane %v2272_v51, 1  ;;  %v2280_v17 = vrot.slane %v2279_v29, 1  ;;  %v2286_v18 = vmax.f32 %v2284_v20, %v2285_v54  ;;  %v12740_v10 = vld [vmem:[%s20301_s3 + $0x108] sm:$0xff]  }
 0x181   :  { %v2293_v34 = vmax.f32 %v2291_v32, %v2292_v21  ;;  %v2299_v24 = vrot.slane %v2298_v59, 2  ;;  %v2307_v37 = vmax.f32 %v2305_v57, %v2306_v53  ;;  %v2313_v48 = vrot.slane %v2312_v7, 2  ;;  %12583 = vmatpush3.bf16.msra.mxu0 %v12740_v10 }
 0x182   :  { %v2274_v22 = vmax.f32 %v2272_v51, %v2273_v0  ;;  %v2287_v12 = vrot.slane %v2286_v18, 1  ;;  %v3101_v33 = vpack.c.bf16 %v2267_v25, %v2267_v25  ;;  %v935_v2 = vsel %vm903_vm10, %v902_v30, %v470_v28  ;;  %v834_v28 = vpop.permute.xlu1 %833  ;;  %12584 = vmatprep.subr.bf16.mxu0 %v20314_v43 }
 0x183   :  { %v2281_v46 = vmax.f32 %v2279_v29, %v2280_v17  ;;  %v2300_v16 = vmax.f32 %v2298_v59, %v2299_v24  ;;  %v2314_v49 = vmax.f32 %v2312_v7, %v2313_v48  ;;  %v2294_v14 = vrot.slane %v2293_v34, 1 }
 0x184   :  { %v3102_v6 = vpack.c.bf16 %v2274_v22, %v2274_v22  ;;  %v2288_v13 = vmax.f32 %v2286_v18, %v2287_v12  ;;  %v2308_v39 = vrot.slane %v2307_v37, 1  ;;  %v968_v4 = vsel %vm936_vm11, %v935_v2, %v533_v58 }
 0x185   :  { %v3325_v26 = vunpack.c.l.b16 %v3101_v33  ;;  %v11712_v61 = vadd.f32 -1.0, %v13144_v23  ;;  %v1001_v31 = vsel %vm969_vm12, %v968_v4, %v628_v9  ;;  %v3103_v52 = vpack.c.bf16 %v2281_v46, %v2281_v46  ;;  %v12741_v9 = vld [vmem:[%s20301_s3 + $0x110] sm:$0xff]  }
 0x186   :  { %v3326_v19 = vunpack.c.l.b16 %v3102_v6  ;;  %v2301_v36 = vrot.slane %v2300_v16, 1  ;;  %v1145_v30 = vunpack.c.h.b16 %v14402_v63  ;;  %v2315_v15 = vrot.slane %v2314_v49, 1  ;;  %12585 = vmatpush3.bf16.msra.mxu0 %v12741_v9 }
 0x187   :  { %v1512_v5 = vmul.f32 1.6732632, %v11712_v61  ;;  %v3104_v38 = vpack.c.bf16 %v2288_v13, %v2288_v13  ;;  %v14454_v45 = vmax.f32 %v2293_v34, %v2294_v14  ;;  %v14456_v35 = vmax.f32 %v2307_v37, %v2308_v39  ;;  %12586 = vmatprep.subr.bf16.mxu0 %v20314_v43 }
 0x188   :  { %v14451_v42 = vsel %vm3429_vm7, %v3326_v19, %v3325_v26  ;;  %v1034_v20 = vsel %vm1002_vm13, %v1001_v31, %v691_v3  ;;  %v11713_v58 = vadd.f32 -1.0, %v13146_v1  ;;  %v14463_v55 = vadd.f32 %v14386_v8, %v14441_v41  ;;  %v12742_v26 = vld [vmem:[%s20301_s3 + $0x118] sm:$0xff]  }
 0x189   :  { %20599 = vst [vmem:[#allocation7_spill] sm:$0xff] %v14451_v42  ;;  %v1542_v63 = vsel %vm1392_vm8, %v14408_v56, %v1512_v5  ;;  %v1067_v32 = vsel %vm1035_vm14, %v1034_v20, %v786_v50  ;;  %v14465_v57 = vunpack.c.l.b16 %v3103_v52  ;;  %v14467_v44 = vmax.f32 %v2300_v16, %v2301_v36 }
 0x18a   :  { %v1572_v62 = vmul.f32 1.050701, %v1542_v63  ;;  %v1100_v23 = vsel %vm1068_vm15, %v1067_v32, %v834_v28  ;;  %v14473_v51 = vmax.f32 %v2314_v49, %v2315_v15  ;;  %v1513_v56 = vmul.f32 1.6732632, %v11713_v58  ;;  %12587 = vmatpush3.bf16.msra.mxu0 %v12742_v26 }
 0x18b   :  { %20600 = vst [vmem:[#allocation8_spill] sm:$0xff] %v14465_v57  ;;  %v1146_v29 = vunpack.c.l.b16 %v1100_v23  ;;  %v1428_v54 = vmul.f32 1.442695, %v14463_v55  ;;  %v3105_v41 = vpack.c.bf16 %v14454_v45, %v14454_v45  ;;  %v14483_v7 = vadd.f32 %v14386_v8, %v14443_v47 }
 0x18c   :  { %v14476_v21 = vpop.f32.mrb[12].mxu0  ;;  %v1664_v59 = vcombine.high %v1572_v62, %v1572_v62  ;;  %v1671_v53 = vrot.slane %v1572_v62, %v14417_v27  ;;  %v14485_v1 = vunpack.c.l.b16 %v3104_v38  ;;  %v3107_v25 = vpack.c.bf16 %v14456_v35, %v14456_v35 }
 0x18d   :  { %v12534_v11 = vpop.f32.mrb[13].mxu0  ;;  %v1543_v0 = vsel %vm1393_vm9, %v14422_v40, %v1513_v56  ;;  %v1172_v17 = vpack.c.b16 %v1146_v29, %v1145_v30  ;;  %v14502_v22 = vsel %vm3429_vm7, %v14465_v57, %v3326_v19  ;;  %13147 = vpow2.f32 %v1428_v54 }
 0x18e   :  { %20601 = vst [vmem:[#allocation9_spill] sm:$0xff] %v14485_v1  ;;  %v14492_v18 = vpop.f32.mrb[14].mxu0  ;;  %v1678_v34 = vrot.slane %v1664_v59, %v14417_v27  ;;  %v1679_v47 = vcombine.high %v1671_v53, %v1671_v53  ;;  %v2317_v24 = vsel %vm2260_vm5, %v1671_v53, -inf  ;;  %v1573_v37 = vmul.f32 1.050701, %v1543_v0 }
 0x18f   :  { %v12535_v48 = vpop.f32.mrb[15].mxu0  ;;  %v2318_v40 = vrot.slane %v2317_v24, 4  ;;  %12577 = vmatmul.mubr.msk.bf16.gmra.mrb[56].mxu0 %vm1184_vm6, %v1172_v17  ;;  %v1430_v12 = vmul.f32 1.442695, %v14483_v7  ;;  %v3106_v14 = vpack.c.bf16 %v14467_v44, %v14467_v44  ;;  %vm3431_vm6 = vcmask 1042434  }
 0x190   :  { %v1680_v33 = vcombine.high %v1678_v34, %v1678_v34  ;;  %v2324_v2 = vsel %vm2260_vm5, %v1679_v47, -inf  ;;  %v2331_v3 = vsel %vm2260_vm5, %v1678_v34, -inf  ;;  %v1681_v46 = vcombine.high %v1573_v37, %v1573_v37  ;;  %12588 = vmatprep.mubr.msk.bf16.mxu0 %vm20596_vm1, %v20314_v43 }
 0x191   :  { %v2319_v16 = vmax.f32 %v2317_v24, %v2318_v40  ;;  %v2325_v6 = vrot.slane %v2324_v2, 4  ;;  %v2332_v49 = vrot.slane %v2331_v3, 4  ;;  %v1688_v13 = vrot.slane %v1573_v37, %v14417_v27 }
 0x192   :  { %v2338_v39 = vsel %vm2260_vm5, %v1680_v33, -inf  ;;  %v1695_v4 = vrot.slane %v1681_v46, %v14417_v27  ;;  %13149 = vpow2.f32 %v1430_v12  ;;  %v3108_v0 = vpack.c.bf16 %v14473_v51, %v14473_v51 }
 0x193   :  { %v2320_v19 = vrot.slane %v2319_v16, 2  ;;  %v2326_v61 = vmax.f32 %v2324_v2, %v2325_v6  ;;  %v2333_v31 = vmax.f32 %v2331_v3, %v2332_v49  ;;  %v2339_v52 = vrot.slane %v2338_v39, 4 }
 0x194   :  { %v1696_v36 = vcombine.high %v1688_v13, %v1688_v13  ;;  %v1697_v30 = vcombine.high %v1695_v4, %v1695_v4  ;;  %v2345_v50 = vsel %vm2260_vm5, %v1688_v13, -inf  ;;  %v2359_v15 = vsel %vm2260_vm5, %v1695_v4, -inf }
 0x195   :  { %v2321_v5 = vmax.f32 %v2319_v16, %v2320_v19  ;;  %v2327_v28 = vrot.slane %v2326_v61, 2  ;;  %v2334_v38 = vrot.slane %v2333_v31, 2  ;;  %v2340_v20 = vmax.f32 %v2338_v39, %v2339_v52 }
 0x196   :  { %v2346_v63 = vrot.slane %v2345_v50, 4  ;;  %v2352_v58 = vsel %vm2260_vm5, %v1696_v36, -inf  ;;  %v2360_v32 = vrot.slane %v2359_v15, 4  ;;  %v2366_v44 = vsel %vm2260_vm5, %v1697_v30, -inf }
 0x197   :  { %v2322_v62 = vrot.slane %v2321_v5, 1  ;;  %v2328_v23 = vmax.f32 %v2326_v61, %v2327_v28  ;;  %v2335_v10 = vmax.f32 %v2333_v31, %v2334_v38  ;;  %v2341_v56 = vrot.slane %v2340_v20, 2  ;;  %v13148_v11 = vpop.eup %13147 }
 0x198   :  { %v2347_v29 = vmax.f32 %v2345_v50, %v2346_v63  ;;  %v2353_v54 = vrot.slane %v2352_v58, 4  ;;  %v2361_v59 = vmax.f32 %v2359_v15, %v2360_v32  ;;  %v2367_v53 = vrot.slane %v2366_v44, 4 }
 0x199   :  { %v14528_v17 = vunpack.c.l.b16 %v3105_v41  ;;  %v2329_v34 = vrot.slane %v2328_v23, 1  ;;  %v2342_v47 = vmax.f32 %v2340_v20, %v2341_v56  ;;  %v14533_v40 = vunpack.c.l.b16 %v3107_v25 }
 0x19a   :  { %v2348_v24 = vrot.slane %v2347_v29, 2  ;;  %v2354_v37 = vmax.f32 %v2352_v58, %v2353_v54  ;;  %v2362_v48 = vrot.slane %v2361_v59, 2  ;;  %v2368_v9 = vmax.f32 %v2366_v44, %v2367_v53 }
 0x19b   :  { %20602 = vst [vmem:[#allocation10_spill] sm:$0xff] %v14528_v17  ;;  %20603 = vst [vmem:[#allocation11_spill] sm:$0xff] %v14533_v40  ;;  %v2323_v12 = vmax.f32 %v2321_v5, %v2322_v62  ;;  %v2336_v33 = vrot.slane %v2335_v10, 1  ;;  %v2343_v2 = vrot.slane %v2342_v47, 1  ;;  %v14535_v49 = vunpack.c.l.b16 %v3106_v14 }
 0x19c   :  { %v1303_v51 = vpop.f32.mrb[16].mxu0  ;;  %v13150_v3 = vpop.eup %13149  ;;  %v2349_v46 = vmax.f32 %v2347_v29, %v2348_v24  ;;  %v2355_v45 = vrot.slane %v2354_v37, 2  ;;  %v2363_v41 = vmax.f32 %v2361_v59, %v2362_v48  ;;  %v2369_v16 = vrot.slane %v2368_v9, 2 }
 0x19d   :  { %v12538_v6 = vpop.f32.mrb[17].mxu0  ;;  %20604 = vst [vmem:[#allocation12_spill] sm:$0xff] %v14535_v49  ;;  %v14537_v13 = vunpack.c.l.b16 %v3108_v0  ;;  %v2330_v39 = vmax.f32 %v2328_v23, %v2329_v34  ;;  %v14541_v35 = vadd.f32 %v14386_v8, %v14476_v21  ;;  %v14545_v52 = vmax.f32 %v2335_v10, %v2336_v33 }
 0x19e   :  { %v14543_v25 = vpop.f32.mrb[18].mxu0  ;;  %v2350_v4 = vrot.slane %v2349_v46, 1  ;;  %v2356_v26 = vmax.f32 %v2354_v37, %v2355_v45  ;;  %v2364_v19 = vrot.slane %v2363_v41, 1  ;;  %v2370_v61 = vmax.f32 %v2368_v9, %v2369_v16 }
 0x19f   :  { %20605 = vst [vmem:[#allocation13_spill] sm:$0xff] %v14537_v13  ;;  %v12539_v31 = vpop.f32.mrb[19].mxu0  ;;  %vm1394_vm10 = vcmp.gt.f32.partialorder %v14463_v55, 0.0  ;;  %v11714_v14 = vadd.f32 -1.0, %v13148_v11  ;;  %v14551_v36 = vsel %vm3431_vm6, %v14485_v1, %v14502_v22  ;;  %v14553_v30 = vmax.f32 %v2342_v47, %v2343_v2 }
 0x1a0   :  { %v3109_v21 = vpack.c.bf16 %v2323_v12, %v2323_v12  ;;  %v2357_v50 = vrot.slane %v2356_v26, 1  ;;  %v2371_v15 = vrot.slane %v2370_v61, 1  ;;  %v3110_v5 = vpack.c.bf16 %v2330_v39, %v2330_v39 }
 0x1a1   :  { %v1514_v28 = vmul.f32 1.6732632, %v11714_v14  ;;  %vm1395_vm11 = vcmp.gt.f32.partialorder %v14483_v7, 0.0  ;;  %v11715_v38 = vadd.f32 -1.0, %v13150_v3  ;;  %v14556_v20 = vmax.f32 %v2349_v46, %v2350_v4 }
 0x1a2   :  { %v14558_v63 = vmax.f32 %v2356_v26, %v2357_v50  ;;  %v14560_v58 = vmax.f32 %v2363_v41, %v2364_v19  ;;  %v1432_v32 = vmul.f32 1.442695, %v14541_v35  ;;  %v14566_v62 = vadd.f32 %v14386_v8, %v14492_v18 }
 0x1a3   :  { %v1544_v22 = vsel %vm1394_vm10, %v14463_v55, %v1514_v28  ;;  %v1515_v44 = vmul.f32 1.6732632, %v11715_v38  ;;  %v14569_v23 = vadd.f32 %v14386_v8, %v1303_v51  ;;  %v3111_v10 = vpack.c.bf16 %v14545_v52, %v14545_v52 }
 0x1a4   :  { %v3112_v56 = vpack.c.bf16 %v14553_v30, %v14553_v30  ;;  %v14575_v29 = vunpack.c.l.b16 %v3109_v21  ;;  %v14577_v54 = vmax.f32 %v2370_v61, %v2371_v15  ;;  %v14579_v59 = vunpack.c.l.b16 %v3110_v5 }
 0x1a5   :  { %v1574_v55 = vmul.f32 1.050701, %v1544_v22  ;;  %v1545_v18 = vsel %vm1395_vm11, %v14483_v7, %v1515_v44  ;;  %v1434_v53 = vmul.f32 1.442695, %v14566_v62  ;;  %v3113_v11 = vpack.c.bf16 %v14556_v20, %v14556_v20 }
 0x1a6   :  { %20606 = vst [vmem:[#allocation14_spill] sm:$0xff] %v14575_v29  ;;  %20607 = vst [vmem:[#allocation15_spill] sm:$0xff] %v14579_v59  ;;  %v3115_v0 = vpack.c.bf16 %v14560_v58, %v14560_v58  ;;  %v1575_v34 = vmul.f32 1.050701, %v1545_v18  ;;  %13151 = vpow2.f32 %v1432_v32  ;;  %v3114_v47 = vpack.c.bf16 %v14558_v63, %v14558_v63 }
 0x1a7   :  { %v1698_v24 = vcombine.high %v1574_v55, %v1574_v55  ;;  %v1705_v37 = vrot.slane %v1574_v55, %v14417_v27  ;;  %v1436_v48 = vmul.f32 1.442695, %v14569_v23  ;;  %13153 = vpow2.f32 %v1434_v53 }
 0x1a8   :  { %v1715_v9 = vcombine.high %v1575_v34, %v1575_v34  ;;  %v1722_v12 = vrot.slane %v1575_v34, %v14417_v27  ;;  %vm3433_vm12 = vcmask 1043459   ;;  %vm3435_vm13 = vcmask 1044484  }
 0x1a9   :  { %v1712_v33 = vrot.slane %v1698_v24, %v14417_v27  ;;  %v1713_v2 = vcombine.high %v1705_v37, %v1705_v37  ;;  %v2373_v51 = vsel %vm2260_vm5, %v1705_v37, -inf  ;;  %13155 = vpow2.f32 %v1436_v48 }
 0x1aa   :  { %v2374_v3 = vrot.slane %v2373_v51, 4  ;;  %v1729_v46 = vrot.slane %v1715_v9, %v14417_v27  ;;  %v1730_v45 = vcombine.high %v1722_v12, %v1722_v12  ;;  %v2401_v41 = vsel %vm2260_vm5, %v1722_v12, -inf }
 0x1ab   :  { %v1714_v16 = vcombine.high %v1712_v33, %v1712_v33  ;;  %v2380_v6 = vsel %vm2260_vm5, %v1713_v2, -inf  ;;  %v2387_v39 = vsel %vm2260_vm5, %v1712_v33, -inf  ;;  %v2402_v4 = vrot.slane %v2401_v41, 4 }
 0x1ac   :  { %v14602_v26 = vpop.f32.mrb[20].mxu0  ;;  %v2375_v19 = vmax.f32 %v2373_v51, %v2374_v3  ;;  %v2381_v61 = vrot.slane %v2380_v6, 4  ;;  %v2388_v31 = vrot.slane %v2387_v39, 4  ;;  %v1731_v14 = vcombine.high %v1729_v46, %v1729_v46 }
 0x1ad   :  { %v12542_v21 = vpop.f32.mrb[21].mxu0  ;;  %v2394_v50 = vsel %vm2260_vm5, %v1714_v16, -inf  ;;  %v2403_v15 = vmax.f32 %v2401_v41, %v2402_v4  ;;  %v2408_v5 = vsel %vm2260_vm5, %v1730_v45, -inf  ;;  %v2415_v28 = vsel %vm2260_vm5, %v1729_v46, -inf }
 0x1ae   :  { %v14607_v38 = vpop.f32.mrb[22].mxu0  ;;  %v2376_v32 = vrot.slane %v2375_v19, 2  ;;  %v2382_v22 = vmax.f32 %v2380_v6, %v2381_v61  ;;  %v2389_v44 = vmax.f32 %v2387_v39, %v2388_v31  ;;  %v2395_v55 = vrot.slane %v2394_v50, 4 }
 0x1af   :  { %v12543_v18 = vpop.f32.mrb[23].mxu0  ;;  %v2404_v53 = vrot.slane %v2403_v15, 2  ;;  %v2409_v34 = vrot.slane %v2408_v5, 4  ;;  %v2416_v24 = vrot.slane %v2415_v28, 4  ;;  %v2422_v37 = vsel %vm2260_vm5, %v1731_v14, -inf }
 0x1b0   :  { %v13152_v48 = vpop.eup %13151  ;;  %v2377_v9 = vmax.f32 %v2375_v19, %v2376_v32  ;;  %v2383_v12 = vrot.slane %v2382_v22, 2  ;;  %v2390_v33 = vrot.slane %v2389_v44, 2  ;;  %v2396_v2 = vmax.f32 %v2394_v50, %v2395_v55 }
 0x1b1   :  { %v2405_v51 = vmax.f32 %v2403_v15, %v2404_v53  ;;  %v2410_v3 = vmax.f32 %v2408_v5, %v2409_v34  ;;  %v2417_v46 = vmax.f32 %v2415_v28, %v2416_v24  ;;  %v2423_v45 = vrot.slane %v2422_v37, 4  ;;  %v13154_v41 = vpop.eup %13153 }
 0x1b2   :  { %v2378_v16 = vrot.slane %v2377_v9, 1  ;;  %v2384_v6 = vmax.f32 %v2382_v22, %v2383_v12  ;;  %v2391_v39 = vmax.f32 %v2389_v44, %v2390_v33  ;;  %v2397_v4 = vrot.slane %v2396_v2, 2 }
 0x1b3   :  { %v13156_v61 = vpop.eup %13155  ;;  %v2406_v31 = vrot.slane %v2405_v51, 1  ;;  %v2411_v21 = vrot.slane %v2410_v3, 2  ;;  %v2418_v18 = vrot.slane %v2417_v46, 2  ;;  %v2424_v14 = vmax.f32 %v2422_v37, %v2423_v45 }
 0x1b4   :  { %v2379_v43 = vmax.f32 %v2377_v9, %v2378_v16  ;;  %v2385_v19 = vrot.slane %v2384_v6, 1  ;;  %v2392_v32 = vrot.slane %v2391_v39, 1  ;;  %v2398_v7 = vmax.f32 %v2396_v2, %v2397_v4 }
 0x1b5   :  { %v2407_v50 = vmax.f32 %v2405_v51, %v2406_v31  ;;  %v2412_v15 = vmax.f32 %v2410_v3, %v2411_v21  ;;  %v2419_v5 = vmax.f32 %v2417_v46, %v2418_v18  ;;  %v2425_v28 = vrot.slane %v2424_v14, 2 }
 0x1b6   :  { %vm1396_vm14 = vcmp.gt.f32.partialorder %v14541_v35, 0.0  ;;  %v14614_v22 = vunpack.c.l.b16 %v3111_v10  ;;  %v14619_v44 = vunpack.c.l.b16 %v3112_v56  ;;  %v14624_v55 = vunpack.c.l.b16 %v3113_v11 }
 0x1b7   :  { %v2399_v53 = vrot.slane %v2398_v7, 1  ;;  %v14629_v34 = vunpack.c.l.b16 %v3115_v0  ;;  %v2386_v24 = vmax.f32 %v2384_v6, %v2385_v19  ;;  %v2393_v52 = vmax.f32 %v2391_v39, %v2392_v32 }
 0x1b8   :  { %20608 = vst [vmem:[#allocation16_spill] sm:$0xff] %v14614_v22  ;;  %20609 = vst [vmem:[#allocation17_spill] sm:$0xff] %v14619_v44  ;;  %v2426_v10 = vmax.f32 %v2424_v14, %v2425_v28  ;;  %vm3437_vm15 = vcmask 1045509   ;;  %v14634_v30 = vunpack.c.l.b16 %v3114_v47  ;;  %v3117_v56 = vpack.c.bf16 %v2379_v43, %v2379_v43 }
 0x1b9   :  { %20610 = vst [vmem:[#allocation18_spill] sm:$0xff] %v14624_v55  ;;  %20611 = vst [vmem:[#allocation19_spill] sm:$0xff] %v14629_v34  ;;  %v2413_v37 = vrot.slane %v2412_v15, 1  ;;  %vm1397_vm3 = vcmp.gt.f32.partialorder %v14566_v62, 0.0  ;;  %v20613_v20 = vpack.c.bf16 %v14577_v54, %v14577_v54  ;;  %v2420_v58 = vrot.slane %v2419_v5, 1 }
 0x1ba   :  { %20612 = vst [vmem:[#allocation20_spill] sm:$0xff] %v14634_v30  ;;  %v2427_v0 = vrot.slane %v2426_v10, 1  ;;  %v3121_v9 = vpack.c.bf16 %v2407_v50, %v2407_v50  ;;  %v14642_v12 = vmax.f32 %v2398_v7, %v2399_v53  ;;  %v11716_v33 = vadd.f32 -1.0, %v13152_v48 }
 0x1bb   :  { %v14640_v11 = vunpack.c.l.b16 %v20613_v20  ;;  %vm1398_vm0 = vcmp.gt.f32.partialorder %v14569_v23, 0.0  ;;  %v14647_v63 = vadd.f32 %v14386_v8, %v14543_v25  ;;  %v3118_v43 = vpack.c.bf16 %v2386_v24, %v2386_v24 }
 0x1bc   :  { %v3119_v47 = vpack.c.bf16 %v2393_v52, %v2393_v52  ;;  %v11717_v2 = vadd.f32 -1.0, %v13154_v41  ;;  %v3540_v54 = vsel %vm3433_vm12, %v14528_v17, %v14551_v36  ;;  %v14652_v51 = vunpack.c.l.b16 %v3117_v56 }
 0x1bd   :  { %20614 = vst [vmem:[#allocation21_spill] sm:$0xff] %v14640_v11  ;;  %v14654_v3 = vmax.f32 %v2412_v15, %v2413_v37  ;;  %v1516_v7 = vmul.f32 1.6732632, %v11716_v33  ;;  %v11718_v46 = vadd.f32 -1.0, %v13156_v61  ;;  %v14656_v48 = vmax.f32 %v2419_v5, %v2420_v58 }
 0x1be   :  { %20615 = vst [vmem:[#allocation22_spill] sm:$0xff] %v14652_v51  ;;  %v14658_v45 = vmax.f32 %v2426_v10, %v2427_v0  ;;  %v14660_v16 = vunpack.c.l.b16 %v3121_v9  ;;  %v1517_v8 = vmul.f32 1.6732632, %v11717_v2  ;;  %v1438_v6 = vmul.f32 1.442695, %v14647_v63 }
 0x1bf   :  { %v1546_v36 = vsel %vm1396_vm14, %v14541_v35, %v1516_v7  ;;  %v1518_v41 = vmul.f32 1.6732632, %v11718_v46  ;;  %v14668_v39 = vunpack.c.l.b16 %v3118_v43  ;;  %v3541_v31 = vsel %vm3435_vm13, %v14535_v49, %v3540_v54 }
 0x1c0   :  { %20616 = vst [vmem:[#allocation23_spill] sm:$0xff] %v14660_v16  ;;  %v1576_v4 = vmul.f32 1.050701, %v1546_v36  ;;  %v1547_v61 = vsel %vm1397_vm3, %v14566_v62, %v1517_v8  ;;  %v14675_v21 = vunpack.c.l.b16 %v3119_v47  ;;  %13157 = vpow2.f32 %v1438_v6 }
 0x1c1   :  { %20617 = vst [vmem:[#allocation24_spill] sm:$0xff] %v14668_v39  ;;  %v1577_v14 = vmul.f32 1.050701, %v1547_v61  ;;  %v1548_v35 = vsel %vm1398_vm0, %v14569_v23, %v1518_v41  ;;  %v14690_v28 = vsel %vm3437_vm15, %v14533_v40, %v3541_v31  ;;  %vm1399_vm8 = vcmp.gt.f32.partialorder %v14647_v63, 0.0 }
 0x1c2   :  { %20618 = vst [vmem:[#allocation25_spill] sm:$0xff] %v14675_v21  ;;  %v1732_v62 = vcombine.high %v1576_v4, %v1576_v4  ;;  %v1739_v50 = vrot.slane %v1576_v4, %v14417_v27  ;;  %v14696_v10 = vmul.f32 1.050701, %v1548_v35  ;;  %vm4338_vm11 = vcmask 523264  }
 0x1c3   :  { %v1749_v15 = vcombine.high %v1577_v14, %v1577_v14  ;;  %v1756_v5 = vrot.slane %v1577_v14, %v14417_v27  ;;  %v14692_v53 = vpop.f32.mrb[24].mxu0 }
 0x1c4   :  { %v1746_v23 = vrot.slane %v1732_v62, %v14417_v27  ;;  %v1747_v24 = vcombine.high %v1739_v50, %v1739_v50  ;;  %v2429_v52 = vsel %vm2260_vm5, %v1739_v50, -inf  ;;  %v12546_v56 = vpop.f32.mrb[25].mxu0 }
 0x1c5   :  { %v2430_v37 = vrot.slane %v2429_v52, 4  ;;  %v1763_v20 = vrot.slane %v1749_v15, %v14417_v27  ;;  %v1764_v58 = vcombine.high %v1756_v5, %v1756_v5  ;;  %v2457_v0 = vsel %vm2260_vm5, %v1756_v5, -inf  ;;  %v14700_v9 = vpop.f32.mrb[26].mxu0 }
 0x1c6   :  { %v1748_v33 = vcombine.high %v1746_v23, %v1746_v23  ;;  %v2436_v43 = vsel %vm2260_vm5, %v1747_v24, -inf  ;;  %v2443_v47 = vsel %vm2260_vm5, %v1746_v23, -inf  ;;  %v2458_v2 = vrot.slane %v2457_v0, 4  ;;  %v12547_v54 = vpop.f32.mrb[27].mxu0 }
 0x1c7   :  { %v2431_v7 = vmax.f32 %v2429_v52, %v2430_v37  ;;  %v2437_v46 = vrot.slane %v2436_v43, 4  ;;  %v2444_v8 = vrot.slane %v2443_v47, 4  ;;  %v1765_v36 = vcombine.high %v1763_v20, %v1763_v20 }
 0x1c8   :  { %v2450_v41 = vsel %vm2260_vm5, %v1748_v33, -inf  ;;  %v2459_v6 = vmax.f32 %v2457_v0, %v2458_v2  ;;  %v2464_v4 = vsel %vm2260_vm5, %v1764_v58, -inf  ;;  %v2471_v61 = vsel %vm2260_vm5, %v1763_v20, -inf }
 0x1c9   :  { %v2432_v31 = vrot.slane %v2431_v7, 2  ;;  %v2438_v14 = vmax.f32 %v2436_v43, %v2437_v46  ;;  %v2445_v35 = vmax.f32 %v2443_v47, %v2444_v8  ;;  %v2451_v62 = vrot.slane %v2450_v41, 4 }
 0x1ca   :  { %v2460_v50 = vrot.slane %v2459_v6, 2  ;;  %v2465_v15 = vrot.slane %v2464_v4, 4  ;;  %v2472_v5 = vrot.slane %v2471_v61, 4  ;;  %v2478_v23 = vsel %vm2260_vm5, %v1765_v36, -inf  ;;  %v13158_v20 = vpop.eup %13157 }
 0x1cb   :  { %v2433_v24 = vmax.f32 %v2431_v7, %v2432_v31  ;;  %v2439_v52 = vrot.slane %v2438_v14, 2  ;;  %v2446_v56 = vrot.slane %v2445_v35, 2  ;;  %v2452_v37 = vmax.f32 %v2450_v41, %v2451_v62 }
 0x1cc   :  { %v2461_v0 = vmax.f32 %v2459_v6, %v2460_v50  ;;  %v2466_v33 = vmax.f32 %v2464_v4, %v2465_v15  ;;  %v2473_v58 = vmax.f32 %v2471_v61, %v2472_v5  ;;  %v2479_v2 = vrot.slane %v2478_v23, 4 }
 0x1cd   :  { %v2434_v54 = vrot.slane %v2433_v24, 1  ;;  %v2440_v32 = vmax.f32 %v2438_v14, %v2439_v52  ;;  %v2447_v43 = vmax.f32 %v2445_v35, %v2446_v56  ;;  %v2453_v47 = vrot.slane %v2452_v37, 2 }
 0x1ce   :  { %v2462_v46 = vrot.slane %v2461_v0, 1  ;;  %v2467_v8 = vrot.slane %v2466_v33, 2  ;;  %v2474_v19 = vrot.slane %v2473_v58, 2  ;;  %v2480_v18 = vmax.f32 %v2478_v23, %v2479_v2 }
 0x1cf   :  { %v2435_v25 = vmax.f32 %v2433_v24, %v2434_v54  ;;  %v2441_v36 = vrot.slane %v2440_v32, 1  ;;  %v2448_v7 = vrot.slane %v2447_v43, 1  ;;  %v2454_v31 = vmax.f32 %v2452_v37, %v2453_v47 }
 0x1d0   :  { %v2463_v60 = vmax.f32 %v2461_v0, %v2462_v46  ;;  %v2468_v41 = vmax.f32 %v2466_v33, %v2467_v8  ;;  %v2475_v62 = vmax.f32 %v2473_v58, %v2474_v19  ;;  %v2481_v6 = vrot.slane %v2480_v18, 2 }
 0x1d1   :  { %v20619_v4 = vpack.c.bf16 %v14642_v12, %v14642_v12  ;;  %v20621_v14 = vpack.c.bf16 %v14654_v3, %v14654_v3  ;;  %v2442_v50 = vmax.f32 %v2440_v32, %v2441_v36  ;;  %v2455_v15 = vrot.slane %v2454_v31, 1 }
 0x1d2   :  { %v2449_v5 = vmax.f32 %v2447_v43, %v2448_v7  ;;  %v3125_v23 = vpack.c.bf16 %v2435_v25, %v2435_v25  ;;  %v2469_v24 = vrot.slane %v2468_v41, 1  ;;  %v1766_v52 = vcombine.high %v14696_v10, %v14696_v10 }
 0x1d3   :  { %v14711_v61 = vunpack.c.l.b16 %v20619_v4  ;;  %v14716_v35 = vunpack.c.l.b16 %v20621_v14  ;;  %v20623_v12 = vpack.c.bf16 %v14656_v48, %v14656_v48  ;;  %v20625_v3 = vpack.c.bf16 %v14658_v45, %v14658_v45 }
 0x1d4   :  { %v2476_v32 = vrot.slane %v2475_v62, 1  ;;  %v3543_v25 = vsel %vm3439_vm2, %v14537_v13, %v14690_v28  ;;  %v2456_v37 = vmax.f32 %v2454_v31, %v2455_v15  ;;  %v2482_v0 = vmax.f32 %v2480_v18, %v2481_v6 }
 0x1d5   :  { %20620 = vst [vmem:[#allocation26_spill] sm:$0xff] %v14711_v61  ;;  %20622 = vst [vmem:[#allocation27_spill] sm:$0xff] %v14716_v35  ;;  %v14724_v19 = vunpack.c.l.b16 %v20623_v12  ;;  %v14729_v56 = vunpack.c.l.b16 %v20625_v3  ;;  %v3129_v33 = vpack.c.bf16 %v2463_v60, %v2463_v60  ;;  %v14736_v58 = vsel %vm3441_vm4, %v14575_v29, %v3543_v25 }
 0x1d6   :  { %v3126_v48 = vpack.c.bf16 %v2442_v50, %v2442_v50  ;;  %v1773_v2 = vrot.slane %v14696_v10, %v14417_v27  ;;  %v3545_v45 = vsel %vm3429_vm7, %v14614_v22, %v14579_v59  ;;  %v3758_v54 = vsel %vm3429_vm7, %v14528_v17, %v14485_v1 }
 0x1d7   :  { %20624 = vst [vmem:[#allocation28_spill] sm:$0xff] %v14724_v19  ;;  %20626 = vst [vmem:[#allocation29_spill] sm:$0xff] %v14729_v56  ;;  %v3127_v28 = vpack.c.bf16 %v2449_v5, %v2449_v5  ;;  %v14746_v43 = vunpack.c.l.b16 %v3125_v23  ;;  %v2470_v60 = vmax.f32 %v2468_v41, %v2469_v24  ;;  %v1780_v18 = vrot.slane %v1766_v52, %v14417_v27 }
 0x1d8   :  { %v14749_v47 = vmax.f32 %v2475_v62, %v2476_v32  ;;  %v1781_v46 = vcombine.high %v1773_v2, %v1773_v2  ;;  %v2485_v8 = vsel %vm2260_vm5, %v1773_v2, -inf  ;;  %v11719_v10 = vadd.f32 -1.0, %v13158_v20 }
 0x1d9   :  { %20627 = vst [vmem:[#allocation30_spill] sm:$0xff] %v14746_v43  ;;  %v3128_v36 = vpack.c.bf16 %v2456_v37, %v2456_v37  ;;  %v2483_v7 = vrot.slane %v2482_v0, 1  ;;  %v14752_v31 = vunpack.c.l.b16 %v3129_v33  ;;  %v1782_v6 = vcombine.high %v1780_v18, %v1780_v18 }
 0x1da   :  { %v2486_v4 = vrot.slane %v2485_v8, 4  ;;  %v2492_v14 = vsel %vm2260_vm5, %v1781_v46, -inf  ;;  %v2499_v50 = vsel %vm2260_vm5, %v1780_v18, -inf  ;;  %v1519_v15 = vmul.f32 1.6732632, %v11719_v10 }
 0x1db   :  { %20628 = vst [vmem:[#allocation31_spill] sm:$0xff] %v14752_v31  ;;  %v14756_v41 = vunpack.c.l.b16 %v3126_v48  ;;  %v2493_v5 = vrot.slane %v2492_v14, 4  ;;  %v2500_v62 = vrot.slane %v2499_v50, 4  ;;  %v2506_v23 = vsel %vm2260_vm5, %v1782_v6, -inf }
 0x1dc   :  { %v2487_v24 = vmax.f32 %v2485_v8, %v2486_v4  ;;  %v2507_v52 = vrot.slane %v2506_v23, 4  ;;  %v1549_v20 = vsel %vm1399_vm8, %v14647_v63, %v1519_v15  ;;  %v3546_v12 = vsel %vm3431_vm6, %v14619_v44, %v3545_v45 }
 0x1dd   :  { %20629 = vst [vmem:[#allocation32_spill] sm:$0xff] %v14756_v41  ;;  %v2494_v3 = vmax.f32 %v2492_v14, %v2493_v5  ;;  %v2501_v32 = vmax.f32 %v2499_v50, %v2500_v62  ;;  %v1579_v25 = vmul.f32 1.050701, %v1549_v20  ;;  %v3547_v37 = vsel %vm3433_vm12, %v14624_v55, %v3546_v12 }
 0x1de   :  { %v14766_v33 = vunpack.c.l.b16 %v3127_v28  ;;  %v14768_v48 = vmax.f32 %v2482_v0, %v2483_v7  ;;  %v2488_v2 = vrot.slane %v2487_v24, 2  ;;  %v2508_v18 = vmax.f32 %v2506_v23, %v2507_v52 }
 0x1df   :  { %v2495_v46 = vrot.slane %v2494_v3, 2  ;;  %v2502_v8 = vrot.slane %v2501_v32, 2  ;;  %v1783_v10 = vcombine.high %v1579_v25, %v1579_v25  ;;  %v1790_v63 = vrot.slane %v1579_v25, %v14417_v27 }
 0x1e0   :  { %20630 = vst [vmem:[#allocation33_spill] sm:$0xff] %v14766_v33  ;;  %v3130_v6 = vpack.c.bf16 %v2470_v60, %v2470_v60  ;;  %v2489_v4 = vmax.f32 %v2487_v24, %v2488_v2  ;;  %v2509_v45 = vrot.slane %v2508_v18, 2  ;;  %v3548_v14 = vsel %vm3435_vm13, %v14634_v30, %v3547_v37 }
 0x1e1   :  { %v2496_v50 = vmax.f32 %v2494_v3, %v2495_v46  ;;  %v2503_v15 = vmax.f32 %v2501_v32, %v2502_v8  ;;  %v1797_v28 = vrot.slane %v1783_v10, %v14417_v27  ;;  %v1798_v5 = vcombine.high %v1790_v63, %v1790_v63  ;;  %v14779_v52 = vpop.f32.mrb[28].mxu0 }
 0x1e2   :  { %v14774_v0 = vunpack.c.l.b16 %v3128_v36  ;;  %v3131_v7 = vpack.c.bf16 %v14749_v47, %v14749_v47  ;;  %v2510_v62 = vmax.f32 %v2508_v18, %v2509_v45  ;;  %v2513_v23 = vsel %vm2260_vm5, %v1790_v63, -inf  ;;  %v12550_v3 = vpop.f32.mrb[29].mxu0 }
 0x1e3   :  { %v3132_v60 = vpack.c.bf16 %v14768_v48, %v14768_v48  ;;  %v1799_v24 = vcombine.high %v1797_v28, %v1797_v28  ;;  %v2514_v20 = vrot.slane %v2513_v23, 4  ;;  %v3759_v12 = vsel %vm3431_vm6, %v14535_v49, %v3758_v54  ;;  %v14789_v37 = vpop.f32.mrb[30].mxu0 }
 0x1e4   :  { %20631 = vst [vmem:[#allocation34_spill] sm:$0xff] %v14774_v0  ;;  %v2490_v32 = vrot.slane %v2489_v4, 1  ;;  %v2520_v36 = vsel %vm2260_vm5, %v1798_v5, -inf  ;;  %v2527_v25 = vsel %vm2260_vm5, %v1797_v28, -inf  ;;  %v3549_v47 = vsel %vm3437_vm15, %v14629_v34, %v3548_v14  ;;  %20632 = vst [vmem:[#allocation35_spill] sm:$0xff] %v14789_v37  ;;  %v12551_v8 = vpop.f32.mrb[31].mxu0 }
 0x1e5   :  { %v2497_v2 = vrot.slane %v2496_v50, 1  ;;  %v2504_v18 = vrot.slane %v2503_v15, 1  ;;  %v2515_v46 = vmax.f32 %v2513_v23, %v2514_v20  ;;  %v2521_v48 = vrot.slane %v2520_v36, 4 }
 0x1e6   :  { %v14791_v10 = vunpack.c.l.b16 %v3130_v6  ;;  %v2511_v63 = vrot.slane %v2510_v62, 1  ;;  %v2528_v54 = vrot.slane %v2527_v25, 4  ;;  %v2534_v45 = vsel %vm2260_vm5, %v1799_v24, -inf }
 0x1e7   :  { %v14794_v3 = vunpack.c.l.b16 %v3131_v7  ;;  %v2516_v5 = vrot.slane %v2515_v46, 2  ;;  %v2522_v28 = vmax.f32 %v2520_v36, %v2521_v48  ;;  %v3760_v14 = vsel %vm3433_vm12, %v14533_v40, %v3759_v12 }
 0x1e8   :  { %20633 = vst [vmem:[#allocation36_spill] sm:$0xff] %v14791_v10  ;;  %v2491_v49 = vmax.f32 %v2489_v4, %v2490_v32  ;;  %v2529_v17 = vmax.f32 %v2527_v25, %v2528_v54  ;;  %v2535_v1 = vrot.slane %v2534_v45, 4  ;;  %v3550_v23 = vsel %vm3439_vm2, %v14640_v11, %v3549_v47 }
 0x1e9   :  { %20634 = vst [vmem:[#allocation37_spill] sm:$0xff] %v14794_v3  ;;  %v2498_v20 = vmax.f32 %v2496_v50, %v2497_v2  ;;  %v2505_v6 = vmax.f32 %v2503_v15, %v2504_v18  ;;  %v2517_v8 = vmax.f32 %v2515_v46, %v2516_v5  ;;  %v2523_v57 = vrot.slane %v2522_v28, 2 }
 0x1ea   :  { %v2512_v42 = vmax.f32 %v2510_v62, %v2511_v63  ;;  %v2530_v37 = vrot.slane %v2529_v17, 2  ;;  %v2536_v24 = vmax.f32 %v2534_v45, %v2535_v1  ;;  %v3551_v7 = vsel %vm3441_vm4, %v14652_v51, %v3550_v23  ;;  %v14824_v63 = vld [vmem:[%s20300_s2] ss:$0 sm:$0xff] }
 0x1eb   :  { %v2518_v36 = vrot.slane %v2517_v8, 1  ;;  %v2524_v48 = vmax.f32 %v2522_v28, %v2523_v57  ;;  %v3628_v12 = vpack.c.b16 %v3551_v7, %v14736_v58  ;;  %v3761_v4 = vsel %vm3435_vm13, %v14537_v13, %v3760_v14 }
 0x1ec   :  { %v2531_v32 = vmax.f32 %v2529_v17, %v2530_v37  ;;  %v2537_v25 = vrot.slane %v2536_v24, 2  ;;  %v3762_v50 = vsel %vm3437_vm15, %v14575_v29, %v3761_v4  ;;  %v3765_v15 = vsel %vm3429_vm7, %v14624_v55, %v14619_v44 }
 0x1ed   :  { %v3133_v1 = vpack.c.bf16 %v2491_v49, %v2491_v49  ;;  %v3134_v62 = vpack.c.bf16 %v2498_v20, %v2498_v20  ;;  %v2525_v47 = vrot.slane %v2524_v48, 1  ;;  %3636 = vrot.lane.b32.xlu0 %v3628_v12, %s13291_s18  ;;  %v3766_v57 = vsel %vm3431_vm6, %v14634_v30, %v3765_v15 }
 0x1ee   :  { %v14813_v58 = vunpack.c.l.b16 %v3132_v60  ;;  %v3135_v17 = vpack.c.bf16 %v2505_v6, %v2505_v6  ;;  %v2519_v37 = vmax.f32 %v2517_v8, %v2518_v36  ;;  %v3767_v2 = vsel %vm3433_vm12, %v14629_v34, %v3766_v57 }
 0x1ef   :  { %v3136_v18 = vpack.c.bf16 %v2512_v42, %v2512_v42  ;;  %v3763_v46 = vsel %vm3439_vm2, %v14579_v59, %v3762_v50  ;;  %v3768_v49 = vsel %vm3435_vm13, %v14640_v11, %v3767_v2  ;;  %v14828_v60 = vadd.f32 %v14824_v63, %v14602_v26 }
 0x1f0   :  { %20635 = vst [vmem:[#allocation38_spill] sm:$0xff] %v14813_v58  ;;  %v2532_v54 = vrot.slane %v2531_v32, 1  ;;  %v2538_v45 = vmax.f32 %v2536_v24, %v2537_v25  ;;  %v3769_v42 = vsel %vm3437_vm15, %v14652_v51, %v3768_v49  ;;  %v14834_v5 = vadd.f32 %v14824_v63, %v14607_v38  ;;  %v14842_v6 = vpop.f32.mrb[32].mxu0 }
 0x1f1   :  { %v14836_v28 = vunpack.c.l.b16 %v3133_v1  ;;  %v14838_v14 = vunpack.c.l.b16 %v3134_v62  ;;  %v2526_v23 = vmax.f32 %v2524_v48, %v2525_v47  ;;  %v3770_v20 = vsel %vm3439_vm2, %v14668_v39, %v3769_v42  ;;  %v12554_v7 = vpop.f32.mrb[33].mxu0 }
 0x1f2   :  { %v3137_v26 = vpack.c.bf16 %v2519_v37, %v2519_v37  ;;  %v3764_v8 = vsel %vm3441_vm4, %v14614_v22, %v3763_v46  ;;  %v3771_v24 = vsel %vm3441_vm4, %v14675_v21, %v3770_v20  ;;  %v1440_v38 = vmul.f32 1.442695, %v14828_v60  ;;  %v14854_v25 = vpop.f32.mrb[34].mxu0 }
 0x1f3   :  { %20636 = vst [vmem:[#allocation39_spill] sm:$0xff] %v14836_v28  ;;  %20637 = vst [vmem:[#allocation40_spill] sm:$0xff] %v14838_v14  ;;  %v14849_v36 = vunpack.c.l.b16 %v3135_v17  ;;  %v14851_v12 = vunpack.c.l.b16 %v3136_v18  ;;  %v3848_v48 = vpack.c.b16 %v3771_v24, %v3764_v8  ;;  %v1442_v4 = vmul.f32 1.442695, %v14834_v5  ;;  %v12555_v62 = vpop.f32.mrb[35].mxu0 }
 0x1f4   :  { %v14856_v50 = vmax.f32 %v2531_v32, %v2532_v54  ;;  %v2539_v15 = vrot.slane %v2538_v45, 1  ;;  %13159 = vpow2.f32 %v1440_v38  ;;  %v3443_v1 = vsel %vm3429_vm7, %v14579_v59, %v14575_v29 }
 0x1f5   :  { %20638 = vst [vmem:[#allocation41_spill] sm:$0xff] %v14849_v36  ;;  %20639 = vst [vmem:[#allocation42_spill] sm:$0xff] %v14851_v12  ;;  %v3138_v47 = vpack.c.bf16 %v2526_v23, %v2526_v23  ;;  %3856 = vrot.lane.b32.xlu1 %v3848_v48, %s13291_s18  ;;  %13161 = vpow2.f32 %v1442_v4  ;;  %v3444_v57 = vsel %vm3431_vm6, %v14614_v22, %v3443_v1  ;;  %v14867_v32 = vunpack.c.l.b16 %v3137_v26 }
 0x1f6   :  { %v3450_v17 = vsel %vm3429_vm7, %v14668_v39, %v14652_v51  ;;  %v3445_v37 = vsel %vm3433_vm12, %v14619_v44, %v3444_v57  ;;  %v14875_v18 = vadd.f32 %v14824_v63, %v14692_v53  ;;  %v14883_v54 = vadd.f32 %v14824_v63, %v14700_v9 }
 0x1f7   :  { %20640 = vst [vmem:[#allocation43_spill] sm:$0xff] %v14867_v32  ;;  %v3451_v2 = vsel %vm3431_vm6, %v14675_v21, %v3450_v17  ;;  %v3446_v46 = vsel %vm3435_vm13, %v14624_v55, %v3445_v37  ;;  %v3552_v42 = vsel %vm3429_vm7, %v14675_v21, %v14668_v39  ;;  %v14888_v23 = vmax.f32 %v2538_v45, %v2539_v15 }
 0x1f8   :  { %v3452_v49 = vsel %vm3433_vm12, %v14711_v61, %v3451_v2  ;;  %v3447_v53 = vsel %vm3437_vm15, %v14634_v30, %v3446_v46  ;;  %v1444_v26 = vmul.f32 1.442695, %v14875_v18  ;;  %v3139_v8 = vpack.c.bf16 %v14856_v50, %v14856_v50 }
 0x1f9   :  { %v3453_v20 = vsel %vm3435_vm13, %v14660_v16, %v3452_v49  ;;  %v3448_v9 = vsel %vm3439_vm2, %v14629_v34, %v3447_v53  ;;  %v1446_v45 = vmul.f32 1.442695, %v14883_v54  ;;  %vm1400_vm9 = vcmp.gt.f32.partialorder %v14828_v60, 0.0 }
 0x1fa   :  { %v3454_v24 = vsel %vm3437_vm15, %v14716_v35, %v3453_v20  ;;  %v14905_v38 = vsel %vm3441_vm4, %v14640_v11, %v3448_v9  ;;  %13163 = vpow2.f32 %v1444_v26  ;;  %v3553_v48 = vsel %vm3431_vm6, %v14711_v61, %v3552_v42 }
 0x1fb   :  { %20641 = vst [vmem:[#allocation44_spill] sm:$0xff] %v14905_v38  ;;  %v3455_v7 = vsel %vm3439_vm2, %v14724_v19, %v3454_v24  ;;  %13165 = vpow2.f32 %v1446_v45  ;;  %v3554_v50 = vsel %vm3433_vm12, %v14660_v16, %v3553_v48  ;;  %v3559_v15 = vsel %vm3429_vm7, %v14766_v33, %v14756_v41 }
 0x1fc   :  { %v14913_v4 = vsel %vm3441_vm4, %v14729_v56, %v3455_v7  ;;  %v3555_v57 = vsel %vm3435_vm13, %v14716_v35, %v3554_v50  ;;  %v3560_v17 = vsel %vm3431_vm6, %v14774_v0, %v3559_v15  ;;  %v14928_v37 = vunpack.c.l.b16 %v3138_v47 }
 0x1fd   :  { %20642 = vst [vmem:[#allocation45_spill] sm:$0xff] %v14913_v4  ;;  %v4330_v1 = vpack.c.b16 %v14913_v4, %v14905_v38  ;;  %v11740_v62 = vpack.c.b16 %v14913_v4, %v14913_v4  ;;  %v3556_v2 = vsel %vm3437_vm15, %v14724_v19, %v3555_v57  ;;  %v3561_v46 = vsel %vm3433_vm12, %v14752_v31, %v3560_v17 }
 0x1fe   :  { %20643 = vst [vmem:[#allocation46_spill] sm:$0xff] %v14928_v37  ;;  %v3772_v49 = vsel %vm3429_vm7, %v14660_v16, %v14711_v61  ;;  %v13160_v42 = vpop.eup %13159  ;;  %v3562_v26 = vsel %vm3435_vm13, %v14791_v10, %v3561_v46  ;;  %v3779_v47 = vsel %vm3429_vm7, %v14752_v31, %v14774_v0  ;;  %v3557_v45 = vsel %vm3439_vm2, %v14729_v56, %v3556_v2 }
 0x1ff   :  { %v4510_v53 = vrot.slane %v4330_v1, %v14417_v27  ;;  %v4517_v20 = vrot.slane %v11740_v62, %v14417_v27  ;;  %v13162_v9 = vpop.eup %13161  ;;  %v11720_v24 = vadd.f32 -1.0, %v13160_v42  ;;  %v3563_v7 = vsel %vm3437_vm15, %v14794_v3, %v3562_v26 }
 0x200   :  { %v3773_v48 = vsel %vm3431_vm6, %v14716_v35, %v3772_v49  ;;  %v11721_v50 = vadd.f32 -1.0, %v13162_v9  ;;  %v3564_v62 = vsel %vm3439_vm2, %v14813_v58, %v3563_v7  ;;  %v3140_v57 = vpack.c.bf16 %v14888_v23, %v14888_v23  ;;  %v14958_v42 = vpop.f32.mrb[36].mxu0 }
 0x201   :  { %v4518_v15 = vcombine.high %v4510_v53, %v4510_v53  ;;  %v4519_v1 = vcombine.high %v4517_v20, %v4517_v20  ;;  %v1520_v17 = vmul.f32 1.6732632, %v11720_v24  ;;  %v3558_v46 = vsel %vm3441_vm4, %v14746_v43, %v3557_v45  ;;  %v12558_v4 = vpop.f32.mrb[37].mxu0 }
 0x202   :  { %v3565_v2 = vsel %vm3441_vm4, %v14836_v28, %v3564_v62  ;;  %v1521_v26 = vmul.f32 1.6732632, %v11721_v50  ;;  %vm1401_vm10 = vcmp.gt.f32.partialorder %v14834_v5, 0.0  ;;  %v3774_v23 = vsel %vm3433_vm12, %v14724_v19, %v3773_v48  ;;  %v14968_v45 = vpop.f32.mrb[38].mxu0 }
 0x203   :  { %v4948_v49 = vcombine.low %v4510_v53, %v4518_v15  ;;  %v4949_v9 = vcombine.low %v4517_v20, %v4519_v1  ;;  %v3629_v35 = vpack.c.b16 %v3565_v2, %v3558_v46  ;;  %v1550_v7 = vsel %vm1400_vm9, %v14828_v60, %v1520_v17  ;;  %v12559_v60 = vpop.f32.mrb[39].mxu0 }
 0x204   :  { %v3780_v24 = vsel %vm3431_vm6, %v14791_v10, %v3779_v47  ;;  %v13164_v62 = vpop.eup %13163  ;;  %v1580_v50 = vmul.f32 1.050701, %v1550_v7  ;;  %v1551_v53 = vsel %vm1401_vm10, %v14834_v5, %v1521_v26  ;;  %v14974_v1 = vunpack.c.l.b16 %v3139_v8 }
 0x205   :  { %v4956_v4 = vrot.slane %v4948_v49, %v14417_v27  ;;  %v4963_v20 = vrot.slane %v4949_v9, %v14417_v27  ;;  %3638 = vrot.lane.b32.xlu0 %v3629_v35, %s13291_s18  ;;  %v13166_v15 = vpop.eup %13165  ;;  %v14976_v48 = vunpack.c.l.b16 %v3140_v57  ;;  %v1581_v17 = vmul.f32 1.050701, %v1551_v53 }
 0x206   :  { %20644 = vst [vmem:[#allocation47_spill] sm:$0xff] %v14974_v1  ;;  %v1800_v47 = vcombine.high %v1580_v50, %v1580_v50  ;;  %v1807_v46 = vrot.slane %v1580_v50, %v14417_v27  ;;  %v14981_v5 = vsel %vm3435_vm13, %v14729_v56, %v3774_v23  ;;  %v11722_v35 = vadd.f32 -1.0, %v13164_v62 }
 0x207   :  { %20645 = vst [vmem:[#allocation48_spill] sm:$0xff] %v14976_v48  ;;  %v4964_v2 = vcombine.low %v4956_v4, %v4963_v20  ;;  %v1817_v26 = vcombine.high %v1581_v17, %v1581_v17  ;;  %v1824_v49 = vrot.slane %v1581_v17, %v14417_v27  ;;  %v14986_v8 = vsel %vm3433_vm12, %v14794_v3, %v3780_v24 }
 0x208   :  { %v1814_v57 = vrot.slane %v1800_v47, %v14417_v27  ;;  %v1815_v9 = vcombine.high %v1807_v46, %v1807_v46  ;;  %v2541_v7 = vsel %vm2260_vm5, %v1807_v46, -inf  ;;  %v11723_v50 = vadd.f32 -1.0, %v13166_v15 }
 0x209   :  { %12589 = vmatmul.mubr.msk.bf16.vlgmr.msra.gmra.mrb[60].mxu0 %vm4338_vm11, %v4964_v2  ;;  %v2542_v53 = vrot.slane %v2541_v7, 4  ;;  %v1831_v23 = vrot.slane %v1817_v26, %v14417_v27  ;;  %v1832_v4 = vcombine.high %v1824_v49, %v1824_v49  ;;  %v2569_v20 = vsel %vm2260_vm5, %v1824_v49, -inf }
 0x20a   :  { %v20646_v60 = vmov 0.0   ;;  %v1816_v62 = vcombine.high %v1814_v57, %v1814_v57  ;;  %v2548_v24 = vsel %vm2260_vm5, %v1815_v9, -inf  ;;  %v2555_v17 = vsel %vm2260_vm5, %v1814_v57, -inf }
 0x20b   :  { %12592 = vmatprep.mubr.msk.bf16.mxu0 %vm20596_vm1, %v20646_v60  ;;  %v2570_v47 = vrot.slane %v2569_v20, 4  ;;  %v2543_v56 = vmax.f32 %v2541_v7, %v2542_v53  ;;  %v2549_v46 = vrot.slane %v2548_v24, 4  ;;  %v2556_v19 = vrot.slane %v2555_v17, 4 }
 0x20c   :  { %v1833_v2 = vcombine.high %v1831_v23, %v1831_v23  ;;  %v2562_v15 = vsel %vm2260_vm5, %v1816_v62, -inf  ;;  %v2576_v26 = vsel %vm2260_vm5, %v1832_v4, -inf  ;;  %v2583_v49 = vsel %vm2260_vm5, %v1831_v23, -inf }
 0x20d   :  { %v2571_v16 = vmax.f32 %v2569_v20, %v2570_v47  ;;  %v2544_v61 = vrot.slane %v2543_v56, 2  ;;  %v2550_v21 = vmax.f32 %v2548_v24, %v2549_v46  ;;  %v2557_v38 = vmax.f32 %v2555_v17, %v2556_v19 }
 0x20e   :  { %v2563_v59 = vrot.slane %v2562_v15, 4  ;;  %v2577_v9 = vrot.slane %v2576_v26, 4  ;;  %v2584_v51 = vrot.slane %v2583_v49, 4  ;;  %v2590_v57 = vsel %vm2260_vm5, %v1833_v2, -inf }
 0x20f   :  { %v2572_v39 = vrot.slane %v2571_v16, 2  ;;  %v2545_v7 = vmax.f32 %v2543_v56, %v2544_v61  ;;  %v2551_v53 = vrot.slane %v2550_v21, 2  ;;  %v2558_v11 = vrot.slane %v2557_v38, 2 }
 0x210   :  { %v2564_v29 = vmax.f32 %v2562_v15, %v2563_v59  ;;  %v2578_v62 = vmax.f32 %v2576_v26, %v2577_v9  ;;  %v2585_v20 = vmax.f32 %v2583_v49, %v2584_v51  ;;  %v2591_v47 = vrot.slane %v2590_v57, 4 }
 0x211   :  { %v2573_v34 = vmax.f32 %v2571_v16, %v2572_v39  ;;  %vm1402_vm14 = vcmp.gt.f32.partialorder %v14875_v18, 0.0  ;;  %v2546_v23 = vrot.slane %v2545_v7, 1  ;;  %v2552_v4 = vmax.f32 %v2550_v21, %v2551_v53 }
 0x212   :  { %v2559_v24 = vmax.f32 %v2557_v38, %v2558_v11  ;;  %v2565_v19 = vrot.slane %v2564_v29, 2  ;;  %v2579_v46 = vrot.slane %v2578_v62, 2  ;;  %v2586_v13 = vrot.slane %v2585_v20, 2 }
 0x213   :  { %v2574_v17 = vrot.slane %v2573_v34, 1  ;;  %v2592_v30 = vmax.f32 %v2590_v57, %v2591_v47  ;;  %v2547_v55 = vmax.f32 %v2545_v7, %v2546_v23  ;;  %v2553_v2 = vrot.slane %v2552_v4, 1 }
 0x214   :  { %v2560_v61 = vrot.slane %v2559_v24, 1  ;;  %v2566_v56 = vmax.f32 %v2564_v29, %v2565_v19  ;;  %v2580_v59 = vmax.f32 %v2578_v62, %v2579_v46  ;;  %v2587_v16 = vmax.f32 %v2585_v20, %v2586_v13  ;;  %v12744_v19 = vld [vmem:[%s20301_s3] sm:$0xff]   ;;  %v15051_v46 = vpop.f32.mrb[40].mxu0 }
 0x215   :  { %v2575_v44 = vmax.f32 %v2573_v34, %v2574_v17  ;;  %v2593_v39 = vrot.slane %v2592_v30, 2  ;;  %v15002_v51 = vmax.f32 %v2552_v4, %v2553_v2  ;;  %v1522_v26 = vmul.f32 1.6732632, %v11722_v35  ;;  %v12745_v17 = vld [vmem:[%s20301_s3 + $0x48] sm:$0xff]  }
 0x216   :  { %v2567_v15 = vrot.slane %v2566_v56, 1  ;;  %v3776_v11 = vsel %vm3437_vm15, %v14746_v43, %v14981_v5  ;;  %v15007_v21 = vmax.f32 %v2559_v24, %v2560_v61  ;;  %v2581_v38 = vrot.slane %v2580_v59, 1  ;;  %v12743_v24 = vld [vmem:[%s20301_s3 + $0x40] sm:$0xff]  }
 0x217   :  { %v2588_v49 = vrot.slane %v2587_v16, 1  ;;  %v2594_v9 = vmax.f32 %v2592_v30, %v2593_v39  ;;  %v3141_v57 = vpack.c.bf16 %v2547_v55, %v2547_v55  ;;  %v3145_v7 = vpack.c.bf16 %v2575_v44, %v2575_v44  ;;  %12186 = vmatprep.subr.bf16.mxu1 %v12743_v24 }
 0x218   :  { %vm1403_vm3 = vcmp.gt.f32.partialorder %v14883_v54, 0.0  ;;  %v1523_v29 = vmul.f32 1.6732632, %v11723_v50  ;;  %v15010_v13 = vmax.f32 %v2566_v56, %v2567_v15  ;;  %v15012_v34 = vmax.f32 %v2580_v59, %v2581_v38  ;;  %v12562_v59 = vpop.f32.mrb[41].mxu0  ;;  %12187 = vmatpush3.bf16.msra.mxu1 %v12744_v19 }
 0x219   :  { %v15014_v53 = vmax.f32 %v2587_v16, %v2588_v49  ;;  %v2595_v35 = vrot.slane %v2594_v9, 1  ;;  %v1552_v5 = vsel %vm1402_vm14, %v14875_v18, %v1522_v26  ;;  %v3777_v62 = vsel %vm3439_vm2, %v14756_v41, %v3776_v11  ;;  %12188 = vmatprep.subr.bf16.mxu1 %v12745_v17 }
 0x21a   :  { %v3782_v44 = vsel %vm3435_vm13, %v14813_v58, %v14986_v8  ;;  %v3457_v55 = vsel %vm3429_vm7, %v14756_v41, %v14746_v43  ;;  %v1582_v18 = vmul.f32 1.050701, %v1552_v5  ;;  %v15033_v47 = vunpack.c.l.b16 %v3141_v57  ;;  %v12746_v57 = vld [vmem:[%s20301_s3 + $0x8] sm:$0xff]  }
 0x21b   :  { %v15031_v20 = vmax.f32 %v2594_v9, %v2595_v35  ;;  %v15035_v23 = vunpack.c.l.b16 %v3145_v7  ;;  %v1553_v8 = vsel %vm1403_vm3, %v14883_v54, %v1523_v29  ;;  %v3783_v4 = vsel %vm3437_vm15, %v14836_v28, %v3782_v44 }
 0x21c   :  { %20647 = vst [vmem:[#allocation49_spill] sm:$0xff] %v15033_v47  ;;  %v1834_v56 = vcombine.high %v1582_v18, %v1582_v18  ;;  %v1841_v16 = vrot.slane %v1582_v18, %v14417_v27  ;;  %v1583_v39 = vmul.f32 1.050701, %v1553_v8  ;;  %v3778_v15 = vsel %vm3441_vm4, %v14766_v33, %v3777_v62  ;;  %12189 = vmatpush3.bf16.msra.mxu1 %v12746_v57 }
 0x21d   :  { %20648 = vst [vmem:[#allocation50_spill] sm:$0xff] %v15035_v23  ;;  %v3784_v26 = vsel %vm3439_vm2, %v14838_v14, %v3783_v4  ;;  %v3458_v9 = vsel %vm3431_vm6, %v14766_v33, %v3457_v55 }
 0x21e   :  { %v1848_v38 = vrot.slane %v1834_v56, %v14417_v27  ;;  %v3785_v49 = vsel %vm3441_vm4, %v14849_v36, %v3784_v26  ;;  %v1849_v7 = vcombine.high %v1841_v16, %v1841_v16  ;;  %v2597_v29 = vsel %vm2260_vm5, %v1841_v16, -inf }
 0x21f   :  { %v1851_v35 = vcombine.high %v1583_v39, %v1583_v39  ;;  %v1858_v5 = vrot.slane %v1583_v39, %v14417_v27  ;;  %v2598_v44 = vrot.slane %v2597_v29, 4  ;;  %v3849_v8 = vpack.c.b16 %v3785_v49, %v3778_v15 }
 0x220   :  { %v1850_v62 = vcombine.high %v1848_v38, %v1848_v38  ;;  %v2611_v18 = vsel %vm2260_vm5, %v1848_v38, -inf  ;;  %v2604_v4 = vsel %vm2260_vm5, %v1849_v7, -inf }
 0x221   :  { %v2612_v55 = vrot.slane %v2611_v18, 4  ;;  %v1865_v24 = vrot.slane %v1851_v35, %v14417_v27  ;;  %v1866_v19 = vcombine.high %v1858_v5, %v1858_v5  ;;  %v2599_v56 = vmax.f32 %v2597_v29, %v2598_v44  ;;  %3858 = vrot.lane.b32.xlu1 %v3849_v8, %s13291_s18 }
 0x222   :  { %v2605_v59 = vrot.slane %v2604_v4, 4  ;;  %v2618_v26 = vsel %vm2260_vm5, %v1850_v62, -inf  ;;  %v2625_v16 = vsel %vm2260_vm5, %v1858_v5, -inf }
 0x223   :  { %v2613_v17 = vmax.f32 %v2611_v18, %v2612_v55  ;;  %v2619_v39 = vrot.slane %v2618_v26, 4  ;;  %v1867_v11 = vcombine.high %v1865_v24, %v1865_v24  ;;  %v2626_v38 = vrot.slane %v2625_v16, 4 }
 0x224   :  { %v2600_v15 = vrot.slane %v2599_v56, 2  ;;  %v2606_v49 = vmax.f32 %v2604_v4, %v2605_v59  ;;  %v2632_v7 = vsel %vm2260_vm5, %v1866_v19, -inf  ;;  %v2639_v35 = vsel %vm2260_vm5, %v1865_v24, -inf }
 0x225   :  { %v2614_v61 = vrot.slane %v2613_v17, 2  ;;  %v2620_v29 = vmax.f32 %v2618_v26, %v2619_v39  ;;  %v2627_v44 = vmax.f32 %v2625_v16, %v2626_v38  ;;  %v2633_v2 = vrot.slane %v2632_v7, 4 }
 0x226   :  { %v2601_v62 = vmax.f32 %v2599_v56, %v2600_v15  ;;  %v2607_v54 = vrot.slane %v2606_v49, 2  ;;  %v2640_v5 = vrot.slane %v2639_v35, 4  ;;  %v2646_v8 = vsel %vm2260_vm5, %v1867_v11, -inf }
 0x227   :  { %v2615_v57 = vmax.f32 %v2613_v17, %v2614_v61  ;;  %v2621_v18 = vrot.slane %v2620_v29, 2  ;;  %v2628_v55 = vrot.slane %v2627_v44, 2  ;;  %v2634_v50 = vmax.f32 %v2632_v7, %v2633_v2 }
 0x228   :  { %v2602_v30 = vrot.slane %v2601_v62, 1  ;;  %v2608_v41 = vmax.f32 %v2606_v49, %v2607_v54  ;;  %v2641_v4 = vmax.f32 %v2639_v35, %v2640_v5  ;;  %v2647_v59 = vrot.slane %v2646_v8, 4 }
 0x229   :  { %v2616_v19 = vrot.slane %v2615_v57, 1  ;;  %v2622_v43 = vmax.f32 %v2620_v29, %v2621_v18  ;;  %v2629_v24 = vmax.f32 %v2627_v44, %v2628_v55  ;;  %v2635_v33 = vrot.slane %v2634_v50, 2 }
 0x22a   :  { %v2603_v26 = vmax.f32 %v2601_v62, %v2602_v30  ;;  %v2609_v16 = vrot.slane %v2608_v41, 1  ;;  %v2642_v39 = vrot.slane %v2641_v4, 2  ;;  %v2648_v56 = vmax.f32 %v2646_v8, %v2647_v59 }
 0x22b   :  { %v2617_v38 = vmax.f32 %v2615_v57, %v2616_v19  ;;  %v2623_v15 = vrot.slane %v2622_v43, 1  ;;  %v2630_v22 = vrot.slane %v2629_v24, 1  ;;  %v2636_v11 = vmax.f32 %v2634_v50, %v2635_v33  ;;  %v12748_v19 = vld [vmem:[%s20301_s3 + $0x10] sm:$0xff]  }
 0x22c   :  { %v2610_v61 = vmax.f32 %v2608_v41, %v2609_v16  ;;  %v2643_v17 = vmax.f32 %v2641_v4, %v2642_v39  ;;  %v2649_v40 = vrot.slane %v2648_v56, 2  ;;  %v3459_v54 = vsel %vm3433_vm12, %v14774_v0, %v3458_v9  ;;  %v15138_v39 = vpop.f32.mrb[42].mxu0 }
 0x22d   :  { %v2624_v2 = vmax.f32 %v2622_v43, %v2623_v15  ;;  %v3149_v49 = vpack.c.bf16 %v2603_v26, %v2603_v26  ;;  %v2631_v7 = vmax.f32 %v2629_v24, %v2630_v22  ;;  %v2637_v35 = vrot.slane %v2636_v11, 1 }
 0x22e   :  { %v20649_v30 = vpack.c.bf16 %v15002_v51, %v15002_v51  ;;  %v3150_v44 = vpack.c.bf16 %v2610_v61, %v2610_v61  ;;  %v3151_v62 = vpack.c.bf16 %v2617_v38, %v2617_v38  ;;  %v2644_v5 = vrot.slane %v2643_v17, 1  ;;  %v12563_v61 = vpop.f32.mrb[43].mxu0 }
 0x22f   :  { %v20651_v41 = vpack.c.bf16 %v15007_v21, %v15007_v21  ;;  %v20653_v50 = vpack.c.bf16 %v15010_v13, %v15010_v13  ;;  %v20655_v22 = vpack.c.bf16 %v15012_v34, %v15012_v34  ;;  %v15107_v51 = vmax.f32 %v2648_v56, %v2649_v40  ;;  %v12747_v13 = vld [vmem:[%s20301_s3 + $0x50] sm:$0xff]  }
 0x230   :  { %v15090_v29 = vunpack.c.l.b16 %v20649_v30  ;;  %v20657_v8 = vpack.c.bf16 %v15014_v53, %v15014_v53  ;;  %v3152_v21 = vpack.c.bf16 %v2624_v2, %v2624_v2  ;;  %v2638_v18 = vmax.f32 %v2636_v11, %v2637_v35  ;;  %12190 = vmatprep.subr.bf16.mxu1 %v12747_v13  ;;  %v12749_v35 = vld [vmem:[%s20301_s3 + $0x58] sm:$0xff]  }
 0x231   :  { %v15095_v33 = vunpack.c.l.b16 %v20651_v41  ;;  %v15100_v43 = vunpack.c.l.b16 %v20653_v50  ;;  %v15105_v9 = vunpack.c.l.b16 %v20655_v22  ;;  %v3460_v55 = vsel %vm3435_vm13, %v14752_v31, %v3459_v54  ;;  %12191 = vmatpush3.bf16.msra.mxu1 %v12748_v19  ;;  %v12751_v41 = vld [vmem:[%s20301_s3 + $0x60] sm:$0xff]  }
 0x232   :  { %20650 = vst [vmem:[#allocation51_spill] sm:$0xff] %v15090_v29  ;;  %v15112_v57 = vunpack.c.l.b16 %v20657_v8  ;;  %v20659_v34 = vpack.c.bf16 %v15031_v20, %v15031_v20  ;;  %v15124_v40 = vunpack.c.l.b16 %v3149_v49  ;;  %v3153_v59 = vpack.c.bf16 %v2631_v7, %v2631_v7  ;;  %v20665_v49 = vld [vmem:[#allocation35_spill] sm:$0xff]  ;;  %12192 = vmatprep.subr.bf16.mxu1 %v12749_v35 }
 0x233   :  { %20652 = vst [vmem:[#allocation52_spill] sm:$0xff] %v15095_v33  ;;  %20654 = vst [vmem:[#allocation53_spill] sm:$0xff] %v15100_v43  ;;  %v3461_v53 = vsel %vm3437_vm15, %v14791_v10, %v3460_v55  ;;  %v15131_v24 = vunpack.c.l.b16 %v3150_v44  ;;  %v15133_v26 = vunpack.c.l.b16 %v3151_v62  ;;  %v2645_v16 = vmax.f32 %v2643_v17, %v2644_v5  ;;  %v12750_v5 = vld [vmem:[%s20301_s3 + $0x18] sm:$0xff]  }
 0x234   :  { %20656 = vst [vmem:[#allocation54_spill] sm:$0xff] %v15105_v9  ;;  %20658 = vst [vmem:[#allocation55_spill] sm:$0xff] %v15112_v57  ;;  %v15122_v4 = vunpack.c.l.b16 %v20659_v34  ;;  %v3464_v20 = vsel %vm3429_vm7, %v14838_v14, %v14836_v28  ;;  %v2651_v56 = vrot.slane %v15107_v51, 1  ;;  %v3462_v38 = vsel %vm3439_vm2, %v14794_v3, %v3461_v53 }
 0x235   :  { %20661 = vst [vmem:[#allocation57_spill] sm:$0xff] %v15124_v40  ;;  %20662 = vst [vmem:[#allocation58_spill] sm:$0xff] %v15131_v24  ;;  %v3465_v15 = vsel %vm3431_vm6, %v14849_v36, %v3464_v20  ;;  %v15147_v11 = vadd.f32 %v14824_v63, %v14779_v52  ;;  %v15149_v17 = vunpack.c.l.b16 %v3152_v21  ;;  %v3154_v54 = vpack.c.bf16 %v2638_v18, %v2638_v18  ;;  %v15181_v18 = vpop.f32.mrb[44].mxu0 }
 0x236   :  { %20660 = vst [vmem:[#allocation56_spill] sm:$0xff] %v15122_v4  ;;  %20663 = vst [vmem:[#allocation59_spill] sm:$0xff] %v15133_v26  ;;  %v3466_v2 = vsel %vm3433_vm12, %v14851_v12, %v3465_v15  ;;  %v15155_v7 = vadd.f32 %v14824_v63, %v20665_v49  ;;  %v15160_v30 = vunpack.c.l.b16 %v3153_v59  ;;  %v3566_v62 = vsel %vm3429_vm7, %v14849_v36, %v14838_v14  ;;  %v12752_v59 = vld [vmem:[%s20301_s3 + $0x20] sm:$0xff]   ;;  %v12566_v53 = vpop.f32.mrb[45].mxu0 }
 0x237   :  { %20664 = vst [vmem:[#allocation60_spill] sm:$0xff] %v15149_v17  ;;  %v3467_v52 = vsel %vm3435_vm13, %v14867_v32, %v3466_v2  ;;  %v1448_v44 = vmul.f32 1.442695, %v15147_v11  ;;  %v3155_v50 = vpack.c.bf16 %v2645_v16, %v2645_v16  ;;  %v15176_v22 = vsel %vm3441_vm4, %v14813_v58, %v3462_v38  ;;  %12193 = vmatpush3.bf16.msra.mxu1 %v12750_v5  ;;  %v12753_v38 = vld [vmem:[%s20301_s3 + $0x68] sm:$0xff]  }
 0x238   :  { %20666 = vst [vmem:[#allocation35_spill] sm:$0xff] %v15160_v30  ;;  %v3468_v8 = vsel %vm3437_vm15, %v14928_v37, %v3467_v52  ;;  %v1450_v21 = vmul.f32 1.442695, %v15155_v7  ;;  %v3567_v13 = vsel %vm3431_vm6, %v14851_v12, %v3566_v62  ;;  %v3573_v34 = vsel %vm3429_vm7, %v15095_v33, %v15090_v29  ;;  %12194 = vmatprep.subr.bf16.mxu1 %v12751_v41 }
 0x239   :  { %v3469_v55 = vsel %vm3439_vm2, %v14974_v1, %v3468_v8  ;;  %13167 = vpow2.f32 %v1448_v44  ;;  %v3568_v16 = vsel %vm3433_vm12, %v14867_v32, %v3567_v13  ;;  %v3574_v20 = vsel %vm3431_vm6, %v15100_v43, %v3573_v34 }
 0x23a   :  { %v15195_v19 = vsel %vm3441_vm4, %v14976_v48, %v3469_v55  ;;  %13169 = vpow2.f32 %v1450_v21  ;;  %v3569_v2 = vsel %vm3435_vm13, %v14928_v37, %v3568_v16  ;;  %v3575_v49 = vsel %vm3433_vm12, %v15035_v23, %v3574_v20  ;;  %v12754_v21 = vld [vmem:[%s20301_s3 + $0x28] sm:$0xff]  }
 0x23b   :  { %20667 = vst [vmem:[#allocation61_spill] sm:$0xff] %v15195_v19  ;;  %v4331_v15 = vpack.c.b16 %v15195_v19, %v15176_v22  ;;  %v11741_v61 = vpack.c.b16 %v15195_v19, %v15195_v19  ;;  %v15212_v35 = vunpack.c.l.b16 %v3154_v54  ;;  %v3570_v52 = vsel %vm3437_vm15, %v14974_v1, %v3569_v2  ;;  %12195 = vmatpush3.bf16.msra.mxu1 %v12752_v59 }
 0x23c   :  { %v3576_v44 = vsel %vm3435_vm13, %v15105_v9, %v3575_v49  ;;  %v15220_v62 = vadd.f32 %v14824_v63, %v14842_v6  ;;  %v15222_v5 = vunpack.c.l.b16 %v3155_v50  ;;  %v3571_v55 = vsel %vm3439_vm2, %v14976_v48, %v3570_v52  ;;  %12196 = vmatprep.subr.bf16.mxu1 %v12753_v38 }
 0x23d   :  { %20668 = vst [vmem:[#allocation62_spill] sm:$0xff] %v15212_v35  ;;  %v4563_v41 = vrot.slane %v4331_v15, %v14417_v27  ;;  %v4570_v8 = vrot.slane %v11741_v61, %v14417_v27  ;;  %v3577_v54 = vsel %vm3437_vm15, %v15112_v57, %v3576_v44  ;;  %v15238_v13 = vadd.f32 %v14824_v63, %v14854_v25 }
 0x23e   :  { %20669 = vst [vmem:[#allocation63_spill] sm:$0xff] %v15222_v5  ;;  %v3578_v6 = vsel %vm3439_vm2, %v15122_v4, %v3577_v54  ;;  %v1452_v50 = vmul.f32 1.442695, %v15220_v62  ;;  %vm1404_vm0 = vcmp.gt.f32.partialorder %v15147_v11, 0.0  ;;  %v3572_v59 = vsel %vm3441_vm4, %v15033_v47, %v3571_v55 }
 0x23f   :  { %v4571_v34 = vcombine.high %v4563_v41, %v4563_v41  ;;  %v4572_v53 = vcombine.high %v4570_v8, %v4570_v8  ;;  %v3579_v16 = vsel %vm3441_vm4, %v15124_v40, %v3578_v6  ;;  %vm1405_vm8 = vcmp.gt.f32.partialorder %v15155_v7, 0.0  ;;  %12197 = vmatpush3.bf16.msra.mxu1 %v12754_v21 }
 0x240   :  { %v3630_v20 = vpack.c.b16 %v3579_v16, %v3572_v59  ;;  %13171 = vpow2.f32 %v1452_v50  ;;  %v3786_v25 = vsel %vm3429_vm7, %v14867_v32, %v14851_v12  ;;  %v3793_v2 = vsel %vm3429_vm7, %v15035_v23, %v15100_v43 }
 0x241   :  { %v5001_v15 = vcombine.low %v4563_v41, %v4571_v34  ;;  %v5002_v38 = vcombine.low %v4570_v8, %v4572_v53  ;;  %v3787_v61 = vsel %vm3431_vm6, %v14928_v37, %v3786_v25  ;;  %v1454_v49 = vmul.f32 1.442695, %v15238_v13 }
 0x242   :  { %3640 = vrot.lane.b32.xlu0 %v3630_v20, %s13291_s18  ;;  %v3788_v52 = vsel %vm3433_vm12, %v14974_v1, %v3787_v61  ;;  %v3794_v44 = vsel %vm3431_vm6, %v15105_v9, %v3793_v2  ;;  %v3580_v41 = vsel %vm3429_vm7, %v15133_v26, %v15131_v24  ;;  %vm1406_vm9 = vcmp.gt.f32.partialorder %v15220_v62, 0.0 }
 0x243   :  { %v13168_v8 = vpop.eup %13167  ;;  %v5009_v54 = vrot.slane %v5001_v15, %v14417_v27  ;;  %v5016_v55 = vrot.slane %v5002_v38, %v14417_v27  ;;  %v3789_v21 = vsel %vm3435_vm13, %v14976_v48, %v3788_v52  ;;  %v3795_v6 = vsel %vm3433_vm12, %v15112_v57, %v3794_v44 }
 0x244   :  { %v13170_v50 = vpop.eup %13169  ;;  %v11724_v34 = vadd.f32 -1.0, %v13168_v8  ;;  %v3790_v53 = vsel %vm3437_vm15, %v15033_v47, %v3789_v21  ;;  %v3796_v59 = vsel %vm3435_vm13, %v15122_v4, %v3795_v6  ;;  %v3581_v16 = vsel %vm3431_vm6, %v15149_v17, %v3580_v41 }
 0x245   :  { %v5017_v20 = vcombine.low %v5009_v54, %v5016_v55  ;;  %v11725_v25 = vadd.f32 -1.0, %v13170_v50  ;;  %v3791_v15 = vsel %vm3439_vm2, %v15090_v29, %v3790_v53  ;;  %v3797_v38 = vsel %vm3437_vm15, %v15124_v40, %v3796_v59 }
 0x246   :  { %v1524_v61 = vmul.f32 1.6732632, %v11724_v34  ;;  %v3792_v2 = vsel %vm3441_vm4, %v15095_v33, %v3791_v15  ;;  %v3798_v52 = vsel %vm3439_vm2, %v15131_v24, %v3797_v38  ;;  %v3582_v44 = vsel %vm3433_vm12, %v15160_v30, %v3581_v16 }
 0x247   :  { %12593 = vmatmul.mubr.msk.bf16.gmra.mrb[64].mxu0 %vm4338_vm11, %v5017_v20  ;;  %v1525_v41 = vmul.f32 1.6732632, %v11725_v25  ;;  %v3799_v8 = vsel %vm3441_vm4, %v15133_v26, %v3798_v52  ;;  %v3631_v54 = vpack.c.b16 %v3582_v44, %v3582_v44  ;;  %v3800_v55 = vsel %vm3429_vm7, %v15160_v30, %v15149_v17 }
 0x248   :  { %v1554_v21 = vsel %vm1404_vm0, %v15147_v11, %v1524_v61  ;;  %v3850_v6 = vpack.c.b16 %v3799_v8, %v3792_v2  ;;  %v3801_v50 = vsel %vm3431_vm6, %v15212_v35, %v3800_v55  ;;  %v15298_v34 = vadd.f32 %v14824_v63, %v14958_v42  ;;  %12596 = vmatprep.mubr.msk.bf16.mxu0 %vm20596_vm1, %v20646_v60 }
 0x249   :  { %v1584_v53 = vmul.f32 1.050701, %v1554_v21  ;;  %v1555_v59 = vsel %vm1405_vm8, %v15155_v7, %v1525_v41  ;;  %3642 = vrot.lane.b32.xlu0 %v3631_v54, %s13291_s18  ;;  %v3802_v11 = vsel %vm3433_vm12, %v15222_v5, %v3801_v50  ;;  %v15313_v15 = vmax.f32 %v15107_v51, %v2651_v56 }
 0x24a   :  { %v13172_v16 = vpop.eup %13171  ;;  %v1585_v20 = vmul.f32 1.050701, %v1555_v59  ;;  %3860 = vrot.lane.b32.xlu1 %v3850_v6, %s13291_s18  ;;  %v3851_v25 = vpack.c.b16 %v3802_v11, %v3802_v11  ;;  %v1456_v42 = vmul.f32 1.442695, %v15298_v34  ;;  %13173 = vpow2.f32 %v1454_v49 }
 0x24b   :  { %v1868_v38 = vcombine.high %v1584_v53, %v1584_v53  ;;  %v1875_v7 = vrot.slane %v1584_v53, %v14417_v27  ;;  %v15317_v52 = vadd.f32 -1.0, %v13172_v16  ;;  %vm1407_vm10 = vcmp.gt.f32.partialorder %v15238_v13, 0.0 }
 0x24c   :  { %v1885_v61 = vcombine.high %v1585_v20, %v1585_v20  ;;  %v1892_v2 = vrot.slane %v1585_v20, %v14417_v27  ;;  %13175 = vpow2.f32 %v1456_v42  ;;  %v12755_v20 = vld [vmem:[%s20301_s3 + $0x70] sm:$0xff]   ;;  %v15329_v42 = vpop.f32.mrb[46].mxu0  ;;  %vm1408_vm14 = vcmp.gt.f32.partialorder %v15298_v34, 0.0 }
 0x24d   :  { %v1882_v44 = vrot.slane %v1868_v38, %v14417_v27  ;;  %v1883_v41 = vcombine.high %v1875_v7, %v1875_v7  ;;  %v2653_v8 = vsel %vm2260_vm5, %v1875_v7, -inf  ;;  %12198 = vmatprep.subr.bf16.mxu1 %v12755_v20 }
 0x24e   :  { %v2654_v54 = vrot.slane %v2653_v8, 4  ;;  %v1899_v55 = vrot.slane %v1885_v61, %v14417_v27  ;;  %v1900_v51 = vcombine.high %v1892_v2, %v1892_v2  ;;  %v2681_v56 = vsel %vm2260_vm5, %v1892_v2, -inf  ;;  %3862 = vrot.lane.b32.xlu1 %v3851_v25, %s13291_s18  ;;  %v12756_v2 = vld [vmem:[%s20301_s3 + $0x30] sm:$0xff]  }
 0x24f   :  { %v1884_v21 = vcombine.high %v1882_v44, %v1882_v44  ;;  %v2660_v6 = vsel %vm2260_vm5, %v1883_v41, -inf  ;;  %v2667_v50 = vsel %vm2260_vm5, %v1882_v44, -inf  ;;  %v2682_v49 = vrot.slane %v2681_v56, 4  ;;  %v12567_v44 = vpop.f32.mrb[47].mxu0  ;;  %v12757_v41 = vld [vmem:[%s20301_s3 + $0x78] sm:$0xff]   ;;  %12199 = vmatpush3.bf16.msra.mxu1 %v12756_v2 }
 0x250   :  { %v2655_v53 = vmax.f32 %v2653_v8, %v2654_v54  ;;  %v2661_v59 = vrot.slane %v2660_v6, 4  ;;  %v2668_v11 = vrot.slane %v2667_v50, 4  ;;  %v1901_v16 = vcombine.high %v1899_v55, %v1899_v55  ;;  %v12758_v44 = vld [vmem:[%s20301_s3 + $0x38] sm:$0xff]   ;;  %12200 = vmatprep.subr.bf16.mxu1 %v12757_v41 }
 0x251   :  { %v2674_v38 = vsel %vm2260_vm5, %v1884_v21, -inf  ;;  %v2683_v7 = vmax.f32 %v2681_v56, %v2682_v49  ;;  %v2688_v25 = vsel %vm2260_vm5, %v1900_v51, -inf  ;;  %v2695_v61 = vsel %vm2260_vm5, %v1899_v55, -inf  ;;  %v15340_v21 = vpop.f32.mrb[48].mxu0 }
 0x252   :  { %v2656_v8 = vrot.slane %v2655_v53, 2  ;;  %v2662_v54 = vmax.f32 %v2660_v6, %v2661_v59  ;;  %v2669_v48 = vmax.f32 %v2667_v50, %v2668_v11  ;;  %v2675_v19 = vrot.slane %v2674_v38, 4  ;;  %v12570_v1 = vpop.f32.mrb[49].mxu0 }
 0x253   :  { %v2684_v56 = vrot.slane %v2683_v7, 2  ;;  %v2689_v51 = vrot.slane %v2688_v25, 4  ;;  %v2696_v49 = vrot.slane %v2695_v61, 4  ;;  %v2702_v55 = vsel %vm2260_vm5, %v1901_v16, -inf  ;;  %12201 = vmatpush3.bf16.msra.mxu1 %v12758_v44 }
 0x254   :  { %v2657_v37 = vmax.f32 %v2655_v53, %v2656_v8  ;;  %v2663_v32 = vrot.slane %v2662_v54, 2  ;;  %v2670_v12 = vrot.slane %v2669_v48, 2  ;;  %v2676_v6 = vmax.f32 %v2674_v38, %v2675_v19  ;;  %v13174_v36 = vpop.eup %13173 }
 0x255   :  { %v2685_v50 = vmax.f32 %v2683_v7, %v2684_v56  ;;  %v2690_v59 = vmax.f32 %v2688_v25, %v2689_v51  ;;  %v2697_v11 = vmax.f32 %v2695_v61, %v2696_v49  ;;  %v2703_v20 = vrot.slane %v2702_v55, 4 }
 0x256   :  { %v2658_v14 = vrot.slane %v2657_v37, 1  ;;  %v2664_v28 = vmax.f32 %v2662_v54, %v2663_v32  ;;  %v2671_v58 = vmax.f32 %v2669_v48, %v2670_v12  ;;  %v2677_v16 = vrot.slane %v2676_v6, 2  ;;  %v13176_v2 = vpop.eup %13175 }
 0x257   :  { %v2686_v3 = vrot.slane %v2685_v50, 1  ;;  %v2691_v10 = vrot.slane %v2690_v59, 2  ;;  %v2698_v31 = vrot.slane %v2697_v11, 2  ;;  %v2704_v0 = vmax.f32 %v2702_v55, %v2703_v20 }
 0x258   :  { %v3156_v1 = vpack.c.bf16 %v15313_v15, %v15313_v15  ;;  %v2665_v19 = vrot.slane %v2664_v28, 1  ;;  %v2678_v53 = vmax.f32 %v2676_v6, %v2677_v16  ;;  %v2672_v38 = vrot.slane %v2671_v58, 1 }
 0x259   :  { %v2687_v7 = vmax.f32 %v2685_v50, %v2686_v3  ;;  %v2692_v25 = vmax.f32 %v2690_v59, %v2691_v10  ;;  %v2705_v61 = vrot.slane %v2704_v0, 2  ;;  %v1526_v41 = vmul.f32 1.6732632, %v15317_v52 }
 0x25a   :  { %v15351_v12 = vadd.f32 %v14824_v63, %v14968_v45  ;;  %v2659_v32 = vmax.f32 %v2657_v37, %v2658_v14  ;;  %v2699_v8 = vmax.f32 %v2697_v11, %v2698_v31  ;;  %v15353_v54 = vunpack.c.l.b16 %v3156_v1 }
 0x25b   :  { %v2693_v48 = vrot.slane %v2692_v25, 1  ;;  %v15355_v56 = vmax.f32 %v2664_v28, %v2665_v19  ;;  %v2679_v15 = vrot.slane %v2678_v53, 1  ;;  %v15358_v51 = vmax.f32 %v2671_v58, %v2672_v38 }
 0x25c   :  { %20670 = vst [vmem:[#allocation64_spill] sm:$0xff] %v15353_v54  ;;  %v3161_v3 = vpack.c.bf16 %v2687_v7, %v2687_v7  ;;  %v2706_v52 = vmax.f32 %v2704_v0, %v2705_v61  ;;  %v1556_v63 = vsel %vm1406_vm9, %v15220_v62, %v1526_v41  ;;  %v15364_v31 = vmul.f32 1.442695, %v15351_v12 }
 0x25d   :  { %v2694_v10 = vmax.f32 %v2692_v25, %v2693_v48  ;;  %v3157_v14 = vpack.c.bf16 %v2659_v32, %v2659_v32  ;;  %v2700_v28 = vrot.slane %v2699_v8, 1  ;;  %v1586_v45 = vmul.f32 1.050701, %v1556_v63 }
 0x25e   :  { %v15366_v49 = vmax.f32 %v2678_v53, %v2679_v15  ;;  %v3158_v58 = vpack.c.bf16 %v15355_v56, %v15355_v56  ;;  %v11727_v55 = vadd.f32 -1.0, %v13174_v36  ;;  %v11728_v44 = vadd.f32 -1.0, %v13176_v2 }
 0x25f   :  { %v3162_v37 = vpack.c.bf16 %v2694_v10, %v2694_v10  ;;  %v3159_v0 = vpack.c.bf16 %v15358_v51, %v15358_v51  ;;  %v3377_v62 = vunpack.c.l.b16 %v3161_v3  ;;  %v1902_v50 = vcombine.high %v1586_v45, %v1586_v45 }
 0x260   :  { %v2707_v59 = vrot.slane %v2706_v52, 1  ;;  %v1909_v11 = vrot.slane %v1586_v45, %v14417_v27  ;;  %v1527_v20 = vmul.f32 1.6732632, %v11727_v55  ;;  %v1528_v16 = vmul.f32 1.6732632, %v11728_v44 }
 0x261   :  { %v15372_v6 = vunpack.c.l.b16 %v3162_v37  ;;  %v15375_v1 = vunpack.c.l.b16 %v3157_v14  ;;  %v2701_v19 = vmax.f32 %v2699_v8, %v2700_v28  ;;  %v1916_v36 = vrot.slane %v1902_v50, %v14417_v27 }
 0x262   :  { %v1917_v38 = vcombine.high %v1909_v11, %v1909_v11  ;;  %v2709_v7 = vsel %vm2260_vm5, %v1909_v11, -inf  ;;  %v1557_v25 = vsel %vm1407_vm10, %v15238_v13, %v1527_v20  ;;  %v2708_v8 = vmax.f32 %v2706_v52, %v2707_v59 }
 0x263   :  { %20671 = vst [vmem:[#allocation65_spill] sm:$0xff] %v15375_v1  ;;  %v15379_v53 = vsel %vm3429_vm7, %v15372_v6, %v3377_v62  ;;  %v1918_v61 = vcombine.high %v1916_v36, %v1916_v36  ;;  %v2710_v41 = vrot.slane %v2709_v7, 4  ;;  %v2723_v32 = vsel %vm2260_vm5, %v1916_v36, -inf }
 0x264   :  { %20672 = vst [vmem:[#allocation66_spill] sm:$0xff] %v15379_v53  ;;  %v1587_v48 = vmul.f32 1.050701, %v1557_v25  ;;  %v2716_v56 = vsel %vm2260_vm5, %v1917_v38, -inf  ;;  %v2724_v15 = vrot.slane %v2723_v32, 4  ;;  %v1558_v10 = vsel %vm1408_vm14, %v15298_v34, %v1528_v16  ;;  %v15397_v16 = vpop.f32.mrb[50].mxu0 }
 0x265   :  { %v2711_v3 = vmax.f32 %v2709_v7, %v2710_v41  ;;  %v2717_v63 = vrot.slane %v2716_v56, 4  ;;  %v2730_v14 = vsel %vm2260_vm5, %v1918_v61, -inf  ;;  %v3163_v37 = vpack.c.bf16 %v2701_v19, %v2701_v19  ;;  %v12571_v25 = vpop.f32.mrb[51].mxu0 }
 0x266   :  { %v1919_v28 = vcombine.high %v1587_v48, %v1587_v48  ;;  %v2725_v13 = vmax.f32 %v2723_v32, %v2724_v15  ;;  %v2731_v45 = vrot.slane %v2730_v14, 4  ;;  %v1926_v55 = vrot.slane %v1587_v48, %v14417_v27 }
 0x267   :  { %v2712_v44 = vrot.slane %v2711_v3, 2  ;;  %v2718_v62 = vmax.f32 %v2716_v56, %v2717_v63  ;;  %v1588_v50 = vmul.f32 1.050701, %v1558_v10  ;;  %13177 = vpow2.f32 %v15364_v31 }
 0x268   :  { %v1933_v52 = vrot.slane %v1919_v28, %v14417_v27  ;;  %v2726_v59 = vrot.slane %v2725_v13, 2  ;;  %v2732_v11 = vmax.f32 %v2730_v14, %v2731_v45  ;;  %v1934_v20 = vcombine.high %v1926_v55, %v1926_v55 }
 0x269   :  { %v2737_v34 = vsel %vm2260_vm5, %v1926_v55, -inf  ;;  %v2713_v36 = vmax.f32 %v2711_v3, %v2712_v44  ;;  %v2719_v38 = vrot.slane %v2718_v62, 2  ;;  %v15403_v3 = vunpack.c.l.b16 %v3158_v58 }
 0x26a   :  { %v1935_v7 = vcombine.high %v1933_v52, %v1933_v52  ;;  %v2738_v19 = vrot.slane %v2737_v34, 4  ;;  %v2727_v61 = vmax.f32 %v2725_v13, %v2726_v59  ;;  %v2733_v41 = vrot.slane %v2732_v11, 2 }
 0x26b   :  { %v2744_v32 = vsel %vm2260_vm5, %v1934_v20, -inf  ;;  %v2751_v48 = vsel %vm2260_vm5, %v1933_v52, -inf  ;;  %v2714_v56 = vrot.slane %v2713_v36, 1  ;;  %v2720_v15 = vmax.f32 %v2718_v62, %v2719_v38  ;;  %20673 = vst [vmem:[#allocation67_spill] sm:$0xff] %v15403_v3 }
 0x26c   :  { %v2739_v10 = vmax.f32 %v2737_v34, %v2738_v19  ;;  %v2745_v63 = vrot.slane %v2744_v32, 4  ;;  %v2734_v14 = vmax.f32 %v2732_v11, %v2733_v41  ;;  %v2752_v28 = vrot.slane %v2751_v48, 4 }
 0x26d   :  { %v2758_v45 = vsel %vm2260_vm5, %v1935_v7, -inf  ;;  %v2728_v55 = vrot.slane %v2727_v61, 1  ;;  %v3164_v59 = vpack.c.bf16 %v2708_v8, %v2708_v8  ;;  %v15405_v25 = vunpack.c.l.b16 %v3163_v37 }
 0x26e   :  { %v2740_v44 = vrot.slane %v2739_v10, 2  ;;  %v2746_v13 = vmax.f32 %v2744_v32, %v2745_v63  ;;  %v2753_v20 = vmax.f32 %v2751_v48, %v2752_v28  ;;  %v2759_v52 = vrot.slane %v2758_v45, 4 }
 0x26f   :  { %20674 = vst [vmem:[#allocation68_spill] sm:$0xff] %v15405_v25  ;;  %v2715_v2 = vmax.f32 %v2713_v36, %v2714_v56  ;;  %v2721_v62 = vrot.slane %v2720_v15, 1  ;;  %v1936_v38 = vcombine.high %v1588_v50, %v1588_v50  ;;  %v2735_v11 = vrot.slane %v2734_v14, 1 }
 0x270   :  { %v2747_v34 = vrot.slane %v2746_v13, 2  ;;  %v2741_v19 = vmax.f32 %v2739_v10, %v2740_v44  ;;  %v2760_v41 = vmax.f32 %v2758_v45, %v2759_v52  ;;  %v1943_v7 = vrot.slane %v1588_v50, %v14417_v27 }
 0x271   :  { %v15411_v31 = vunpack.c.l.b16 %v3159_v0  ;;  %v2729_v58 = vmax.f32 %v2727_v61, %v2728_v55  ;;  %v2754_v8 = vrot.slane %v2753_v20, 2  ;;  %v3471_v37 = vsel %vm3429_vm7, %v15090_v29, %v15033_v47  ;;  %v13178_v52 = vpop.eup %13177 }
 0x272   :  { %v20676_v36 = vpack.c.bf16 %v15366_v49, %v15366_v49  ;;  %v15421_v48 = vunpack.c.l.b16 %v3164_v59  ;;  %v2748_v56 = vmax.f32 %v2746_v13, %v2747_v34  ;;  %v2761_v50 = vrot.slane %v2760_v41, 2 }
 0x273   :  { %20675 = vst [vmem:[#allocation69_spill] sm:$0xff] %v15411_v31  ;;  %v15426_v51 = vsel %vm3429_vm7, %v15405_v25, %v15372_v6  ;;  %v2722_v0 = vmax.f32 %v2720_v15, %v2721_v62  ;;  %v3165_v61 = vpack.c.bf16 %v2715_v2, %v2715_v2  ;;  %v1950_v10 = vrot.slane %v1936_v38, %v14417_v27 }
 0x274   :  { %v15419_v32 = vunpack.c.l.b16 %v20676_v36  ;;  %20678 = vst [vmem:[#allocation71_spill] sm:$0xff] %v15421_v48  ;;  %v2736_v63 = vmax.f32 %v2734_v14, %v2735_v11  ;;  %v2742_v28 = vrot.slane %v2741_v19, 1  ;;  %v1951_v45 = vcombine.high %v1943_v7, %v1943_v7 }
 0x275   :  { %vm1409_vm3 = vcmp.gt.f32.partialorder %v15351_v12, 0.0  ;;  %v3472_v49 = vsel %vm3431_vm6, %v15095_v33, %v3471_v37  ;;  %v3167_v55 = vpack.c.bf16 %v2729_v58, %v2729_v58  ;;  %v2755_v44 = vmax.f32 %v2753_v20, %v2754_v8 }
 0x276   :  { %20677 = vst [vmem:[#allocation70_spill] sm:$0xff] %v15419_v32  ;;  %v1952_v13 = vcombine.high %v1950_v10, %v1950_v10  ;;  %v2765_v59 = vsel %vm2260_vm5, %v1943_v7, -inf  ;;  %v2749_v6 = vrot.slane %v2748_v56, 1  ;;  %v2762_v34 = vmax.f32 %v2760_v41, %v2761_v50  ;;  %v3857_v32 = vpop.permute.xlu1 %3856 }
 0x277   :  { %v2766_v15 = vrot.slane %v2765_v59, 4  ;;  %v2772_v2 = vsel %vm2260_vm5, %v1951_v45, -inf  ;;  %v3166_v62 = vpack.c.bf16 %v2722_v0, %v2722_v0  ;;  %v15434_v14 = vunpack.c.l.b16 %v3165_v61  ;;  %v15438_v45 = vpop.f32.mrb[52].mxu0 }
 0x278   :  { %v2773_v38 = vrot.slane %v2772_v2, 4  ;;  %v2779_v11 = vsel %vm2260_vm5, %v1950_v10, -inf  ;;  %v3168_v36 = vpack.c.bf16 %v2736_v63, %v2736_v63  ;;  %v2743_v25 = vmax.f32 %v2741_v19, %v2742_v28  ;;  %v12574_v19 = vpop.f32.mrb[53].mxu0 }
 0x279   :  { %20679 = vst [vmem:[#allocation72_spill] sm:$0xff] %v15434_v14  ;;  %v2767_v37 = vmax.f32 %v2765_v59, %v2766_v15  ;;  %v2780_v58 = vrot.slane %v2779_v11, 4  ;;  %v2756_v20 = vrot.slane %v2755_v44, 1  ;;  %v2786_v7 = vsel %vm2260_vm5, %v1952_v13, -inf }
 0x27a   :  { %v2774_v8 = vmax.f32 %v2772_v2, %v2773_v38  ;;  %v11729_v53 = vadd.f32 -1.0, %v13178_v52  ;;  %v2750_v29 = vmax.f32 %v2748_v56, %v2749_v6  ;;  %v2763_v41 = vrot.slane %v2762_v34, 1 }
 0x27b   :  { %v2768_v50 = vrot.slane %v2767_v37, 2  ;;  %v2781_v47 = vmax.f32 %v2779_v11, %v2780_v58  ;;  %v2787_v61 = vrot.slane %v2786_v7, 4  ;;  %v3473_v10 = vsel %vm3433_vm12, %v15100_v43, %v3472_v49 }
 0x27c   :  { %v2775_v0 = vrot.slane %v2774_v8, 2  ;;  %v1529_v33 = vmul.f32 1.6732632, %v11729_v53  ;;  %v15442_v63 = vunpack.c.l.b16 %v3166_v62  ;;  %v15444_v28 = vunpack.c.l.b16 %v3167_v55 }
 0x27d   :  { %v3169_v59 = vpack.c.bf16 %v2743_v25, %v2743_v25  ;;  %v3474_v56 = vsel %vm3435_vm13, %v15035_v23, %v3473_v10  ;;  %v15448_v13 = vmax.f32 %v2755_v44, %v2756_v20  ;;  %v2782_v52 = vrot.slane %v2781_v47, 2 }
 0x27e   :  { %20680 = vst [vmem:[#allocation73_spill] sm:$0xff] %v15442_v63  ;;  %20681 = vst [vmem:[#allocation74_spill] sm:$0xff] %v15444_v28  ;;  %v2788_v6 = vmax.f32 %v2786_v7, %v2787_v61  ;;  %v1559_v53 = vsel %vm1409_vm3, %v15351_v12, %v1529_v33  ;;  %v3170_v15 = vpack.c.bf16 %v2750_v29, %v2750_v29  ;;  %v15460_v11 = vunpack.c.l.b16 %v3168_v36 }
 0x27f   :  { %v2769_v2 = vmax.f32 %v2767_v37, %v2768_v50  ;;  %v1589_v49 = vmul.f32 1.050701, %v1559_v53  ;;  %v3475_v62 = vsel %vm3437_vm15, %v15105_v9, %v3474_v56  ;;  %v15455_v55 = vmax.f32 %v2762_v34, %v2763_v41 }
 0x280   :  { %v2776_v25 = vmax.f32 %v2774_v8, %v2775_v0  ;;  %v2789_v38 = vrot.slane %v2788_v6, 2  ;;  %v3478_v44 = vsel %vm3429_vm7, %v15131_v24, %v15124_v40  ;;  %20682 = vst [vmem:[#allocation75_spill] sm:$0xff] %v15460_v11  ;;  %v15462_v58 = vunpack.c.l.b16 %v3169_v59 }
 0x281   :  { %v1953_v20 = vcombine.high %v1589_v49, %v1589_v49  ;;  %v1960_v29 = vrot.slane %v1589_v49, %v14417_v27  ;;  %v3171_v33 = vpack.c.bf16 %v15448_v13, %v15448_v13  ;;  %v2783_v12 = vmax.f32 %v2781_v47, %v2782_v52 }
 0x282   :  { %20683 = vst [vmem:[#allocation76_spill] sm:$0xff] %v15462_v58  ;;  %v3476_v34 = vsel %vm3439_vm2, %v15112_v57, %v3475_v62  ;;  %v3479_v37 = vsel %vm3431_vm6, %v15133_v26, %v3478_v44  ;;  %v15471_v8 = vunpack.c.l.b16 %v3170_v15  ;;  %v2770_v7 = vrot.slane %v2769_v2, 1 }
 0x283   :  { %v1967_v36 = vrot.slane %v1953_v20, %v14417_v27  ;;  %v1968_v41 = vcombine.high %v1960_v29, %v1960_v29  ;;  %v3172_v50 = vpack.c.bf16 %v15455_v55, %v15455_v55  ;;  %v2777_v0 = vrot.slane %v2776_v25, 1 }
 0x284   :  { %20684 = vst [vmem:[#allocation77_spill] sm:$0xff] %v15471_v8  ;;  %v2790_v61 = vmax.f32 %v2788_v6, %v2789_v38  ;;  %v2793_v10 = vsel %vm2260_vm5, %v1960_v29, -inf  ;;  %v15479_v59 = vsel %vm3441_vm4, %v15122_v4, %v3476_v34  ;;  %v15483_v56 = vsel %vm3433_vm12, %v15149_v17, %v3479_v37  ;;  %v15490_v6 = vld [vmem:[%s20300_s2] ss:$0 sm:$0xff] }
 0x285   :  { %v1969_v47 = vcombine.high %v1967_v36, %v1967_v36  ;;  %v2794_v19 = vrot.slane %v2793_v10, 4  ;;  %20685 = vst [vmem:[#allocation78_spill] sm:$0xff] %v15479_v59  ;;  %20686 = vst [vmem:[#allocation79_spill] sm:$0xff] %v15483_v56  ;;  %v2784_v13 = vrot.slane %v2783_v12, 1  ;;  %v2800_v52 = vsel %vm2260_vm5, %v1968_v41, -inf }
 0x286   :  { %v2807_v53 = vsel %vm2260_vm5, %v1967_v36, -inf  ;;  %v15494_v15 = vadd.f32 %v15490_v6, %v15051_v46  ;;  %v2771_v49 = vmax.f32 %v2769_v2, %v2770_v7  ;;  %v2801_v55 = vrot.slane %v2800_v52, 4 }
 0x287   :  { %v2795_v62 = vmax.f32 %v2793_v10, %v2794_v19  ;;  %v2808_v38 = vrot.slane %v2807_v53, 4  ;;  %v2778_v44 = vmax.f32 %v2776_v25, %v2777_v0  ;;  %v2791_v20 = vrot.slane %v2790_v61, 1 }
 0x288   :  { %v2814_v29 = vsel %vm2260_vm5, %v1969_v47, -inf  ;;  %v4316_v34 = vsel %vm3435_vm13, %v15160_v30, %v15483_v56  ;;  %v2802_v36 = vmax.f32 %v2800_v52, %v2801_v55  ;;  %v2785_v26 = vmax.f32 %v2783_v12, %v2784_v13 }
 0x289   :  { %v2796_v37 = vrot.slane %v2795_v62, 2  ;;  %v2809_v41 = vmax.f32 %v2807_v53, %v2808_v38  ;;  %v2815_v17 = vrot.slane %v2814_v29, 4  ;;  %v4317_v46 = vsel %vm3437_vm15, %v15212_v35, %v4316_v34  ;;  %v20707_v35 = vld [vmem:[#allocation21_spill] sm:$0xff] }
 0x28a   :  { %v1460_v2 = vmul.f32 1.442695, %v15494_v15  ;;  %v15505_v25 = vadd.f32 %v15490_v6, %v15138_v39  ;;  %v2803_v0 = vrot.slane %v2802_v36, 2  ;;  %v3173_v19 = vpack.c.bf16 %v2771_v49, %v2771_v49 }
 0x28b   :  { %v2797_v7 = vmax.f32 %v2795_v62, %v2796_v37  ;;  %v2810_v10 = vrot.slane %v2809_v41, 2  ;;  %v2816_v47 = vmax.f32 %v2814_v29, %v2815_v17  ;;  %v4318_v52 = vsel %vm3439_vm2, %v15222_v5, %v4317_v46  ;;  %v20687_v62 = vld [vmem:[#allocation7_spill] sm:$0xff]  ;;  %v20688_v37 = vld [vmem:[#allocation8_spill] sm:$0xff]  ;;  %v20689_v46 = vld [vmem:[#allocation9_spill] sm:$0xff] }
 0x28c   :  { %13179 = vpow2.f32 %v1460_v2  ;;  %v1462_v12 = vmul.f32 1.442695, %v15505_v25  ;;  %v2792_v13 = vmax.f32 %v2790_v61, %v2791_v20  ;;  %v3174_v53 = vpack.c.bf16 %v2778_v44, %v2778_v44  ;;  %v20698_v5 = vld [vmem:[#allocation11_spill] sm:$0xff] }
 0x28d   :  { %v2804_v55 = vmax.f32 %v2802_v36, %v2803_v0  ;;  %v2817_v38 = vrot.slane %v2816_v47, 2  ;;  %v2811_v34 = vmax.f32 %v2809_v41, %v2810_v10  ;;  %v4319_v39 = vsel %vm3441_vm4, %v15353_v54, %v4318_v52 }
 0x28e   :  { %13181 = vpow2.f32 %v1462_v12  ;;  %v3432_v17 = vsel %vm3431_vm6, %v20688_v37, %v20687_v62  ;;  %v2798_v49 = vrot.slane %v2797_v7, 1  ;;  %v3656_v2 = vsel %vm3429_vm7, %v20689_v46, %v20688_v37  ;;  %v20693_v62 = vld [vmem:[#allocation10_spill] sm:$0xff] }
 0x28f   :  { %v2805_v29 = vrot.slane %v2804_v55, 1  ;;  %v2818_v56 = vmax.f32 %v2816_v47, %v2817_v38  ;;  %v3175_v61 = vpack.c.bf16 %v2785_v26, %v2785_v26  ;;  %v4332_v44 = vpack.c.b16 %v4319_v39, %v15479_v59 }
 0x290   :  { %v11742_v20 = vpack.c.b16 %v4319_v39, %v4319_v39  ;;  %v3434_v36 = vsel %vm3433_vm12, %v20689_v46, %v3432_v17  ;;  %v15521_v41 = vunpack.c.l.b16 %v3171_v33  ;;  %v15523_v0 = vunpack.c.l.b16 %v3172_v50 }
 0x291   :  { %v3176_v10 = vpack.c.bf16 %v2792_v13, %v2792_v13  ;;  %v15525_v52 = vunpack.c.l.b16 %v3173_v19  ;;  %v2812_v12 = vrot.slane %v2811_v34, 1  ;;  %v4616_v47 = vrot.slane %v4332_v44, %v14417_v27 }
 0x292   :  { %20690 = vst [vmem:[#allocation7_spill] sm:$0xff] %v15521_v41  ;;  %20691 = vst [vmem:[#allocation8_spill] sm:$0xff] %v15523_v0  ;;  %v4623_v38 = vrot.slane %v11742_v20, %v14417_v27  ;;  %v3657_v26 = vsel %vm3431_vm6, %v20693_v62, %v3656_v2  ;;  %v2799_v37 = vmax.f32 %v2797_v7, %v2798_v49  ;;  %v2819_v54 = vrot.slane %v2818_v56, 1  ;;  %v20697_v2 = vld [vmem:[#allocation12_spill] sm:$0xff] }
 0x293   :  { %20692 = vst [vmem:[#allocation9_spill] sm:$0xff] %v15525_v52  ;;  %v15531_v39 = vmax.f32 %v2804_v55, %v2805_v29  ;;  %v3436_v33 = vsel %vm3435_vm13, %v20693_v62, %v3434_v36  ;;  %v15535_v50 = vunpack.c.l.b16 %v3174_v53  ;;  %v15537_v13 = vunpack.c.l.b16 %v3175_v61  ;;  %v20706_v36 = vld [vmem:[#allocation14_spill] sm:$0xff] }
 0x294   :  { %v4624_v19 = vcombine.high %v4616_v47, %v4616_v47  ;;  %v4625_v17 = vcombine.high %v4623_v38, %v4623_v38  ;;  %v15539_v46 = vunpack.c.l.b16 %v3176_v10  ;;  %vm1410_vm0 = vcmp.gt.f32.partialorder %v15494_v15, 0.0 }
 0x295   :  { %20694 = vst [vmem:[#allocation80_spill] sm:$0xff] %v15535_v50  ;;  %20695 = vst [vmem:[#allocation81_spill] sm:$0xff] %v15537_v13  ;;  %vm1411_vm8 = vcmp.gt.f32.partialorder %v15505_v25, 0.0  ;;  %v3658_v7 = vsel %vm3433_vm12, %v20697_v2, %v3657_v26  ;;  %v15545_v49 = vmax.f32 %v2811_v34, %v2812_v12  ;;  %v3438_v53 = vsel %vm3437_vm15, %v20697_v2, %v3436_v33  ;;  %v20699_v12 = vld [vmem:[#allocation16_spill] sm:$0xff] }
 0x296   :  { %20696 = vst [vmem:[#allocation82_spill] sm:$0xff] %v15539_v46  ;;  %v13180_v55 = vpop.eup %13179  ;;  %v5054_v29 = vcombine.low %v4616_v47, %v4624_v19  ;;  %v5055_v44 = vcombine.low %v4623_v38, %v4625_v17  ;;  %v15549_v61 = vmax.f32 %v2818_v56, %v2819_v54  ;;  %v3177_v20 = vpack.c.bf16 %v2799_v37, %v2799_v37  ;;  %v20700_v47 = vld [vmem:[#allocation17_spill] sm:$0xff]  ;;  %v20701_v37 = vld [vmem:[#allocation18_spill] sm:$0xff] }
 0x297   :  { %v11730_v10 = vadd.f32 -1.0, %v13180_v55  ;;  %v3659_v34 = vsel %vm3435_vm13, %v20698_v5, %v3658_v7  ;;  %v3663_v38 = vsel %vm3429_vm7, %v20700_v47, %v20699_v12  ;;  %v3440_v56 = vsel %vm3439_vm2, %v20698_v5, %v3438_v53  ;;  %v20702_v55 = vld [vmem:[#allocation20_spill] sm:$0xff] }
 0x298   :  { %v13182_v62 = vpop.eup %13181  ;;  %v5062_v30 = vrot.slane %v5054_v29, %v14417_v27  ;;  %v5069_v26 = vrot.slane %v5055_v44, %v14417_v27  ;;  %v3664_v19 = vsel %vm3431_vm6, %v20701_v37, %v3663_v38  ;;  %v15568_v44 = vadd.f32 %v15490_v6, %v15181_v18 }
 0x299   :  { %v1530_v33 = vmul.f32 1.6732632, %v11730_v10  ;;  %v11731_v54 = vadd.f32 -1.0, %v13182_v62  ;;  %v3665_v29 = vsel %vm3433_vm12, %v20702_v55, %v3664_v19  ;;  %v15572_v7 = vadd.f32 %v15490_v6, %v15329_v42  ;;  %v20703_v10 = vld [vmem:[#allocation13_spill] sm:$0xff]  ;;  %v15581_v19 = vpop.f32.mrb[54].mxu0 }
 0x29a   :  { %v5070_v17 = vcombine.low %v5062_v30, %v5069_v26  ;;  %v3660_v38 = vsel %vm3437_vm15, %v20703_v10, %v3659_v34  ;;  %v20704_v30 = vld [vmem:[#allocation19_spill] sm:$0xff]  ;;  %20705 = vst [vmem:[#allocation83_spill] sm:$0xff] %v15581_v19  ;;  %v15604_v34 = vunpack.c.l.b16 %v3177_v20  ;;  %vm1412_vm9 = vcmp.gt.f32.partialorder %v15568_v44, 0.0 }
 0x29b   :  { %v1560_v62 = vsel %vm1410_vm0, %v15494_v15, %v1530_v33  ;;  %v1531_v53 = vmul.f32 1.6732632, %v11731_v54  ;;  %v3666_v26 = vsel %vm3435_vm13, %v20704_v30, %v3665_v29  ;;  %v3661_v42 = vsel %vm3439_vm2, %v20706_v36, %v3660_v38  ;;  %v12575_v33 = vpop.f32.mrb[55].mxu0  ;;  %v20708_v29 = vld [vmem:[#allocation22_spill] sm:$0xff] }
 0x29c   :  { %12597 = vmatmul.mubr.msk.bf16.gmra.mrb[68].mxu0 %vm4338_vm11, %v5070_v17  ;;  %v1590_v18 = vmul.f32 1.050701, %v1560_v62  ;;  %v3667_v37 = vsel %vm3437_vm15, %v20707_v35, %v3666_v26  ;;  %v1464_v15 = vmul.f32 1.442695, %v15568_v44  ;;  %v1466_v62 = vmul.f32 1.442695, %v15572_v7 }
 0x29d   :  { %v1561_v54 = vsel %vm1411_vm8, %v15505_v25, %v1531_v53  ;;  %v3668_v17 = vsel %vm3439_vm2, %v20708_v29, %v3667_v37  ;;  %12600 = vmatprep.mubr.msk.bf16.mxu0 %vm20596_vm1, %v20646_v60  ;;  %v20709_v33 = vld [vmem:[#allocation24_spill] sm:$0xff]  ;;  %20710 = vst [vmem:[#allocation84_spill] sm:$0xff] %v15604_v34  ;;  %v15608_v25 = vsel %vm3441_vm4, %v20703_v10, %v3440_v56  ;;  %v20711_v37 = vld [vmem:[#allocation15_spill] sm:$0xff]  ;;  %vm1413_vm10 = vcmp.gt.f32.partialorder %v15572_v7, 0.0 }
 0x29e   :  { %v1970_v38 = vcombine.high %v1590_v18, %v1590_v18  ;;  %v1977_v26 = vrot.slane %v1590_v18, %v14417_v27  ;;  %v1591_v47 = vmul.f32 1.050701, %v1561_v54  ;;  %v15602_v12 = vsel %vm3441_vm4, %v20709_v33, %v3668_v17 }
 0x29f   :  { %v15612_v53 = vsel %vm3441_vm4, %v20711_v37, %v3661_v42  ;;  %13183 = vpow2.f32 %v1464_v15 }
 0x2a0   :  { %v1984_v29 = vrot.slane %v1970_v38, %v14417_v27  ;;  %v1985_v35 = vcombine.high %v1977_v26, %v1977_v26  ;;  %v2821_v18 = vsel %vm2260_vm5, %v1977_v26, -inf  ;;  %v1987_v54 = vcombine.high %v1591_v47, %v1591_v47 }
 0x2a1   :  { %v2822_v36 = vrot.slane %v2821_v18, 4  ;;  %v1994_v17 = vrot.slane %v1591_v47, %v14417_v27  ;;  %v3746_v20 = vpack.c.b16 %v15602_v12, %v15612_v53  ;;  %13185 = vpow2.f32 %v1466_v62  ;;  %v15625_v12 = vpop.f32.mrb[56].mxu0 }
 0x2a2   :  { %v1986_v56 = vcombine.high %v1984_v29, %v1984_v29  ;;  %v2828_v33 = vsel %vm2260_vm5, %v1985_v35, -inf  ;;  %v2835_v42 = vsel %vm2260_vm5, %v1984_v29, -inf  ;;  %v2001_v15 = vrot.slane %v1987_v54, %v14417_v27  ;;  %20712 = vst [vmem:[#allocation85_spill] sm:$0xff] %v15625_v12  ;;  %v12578_v29 = vpop.f32.mrb[57].mxu0 }
 0x2a3   :  { %v2823_v37 = vmax.f32 %v2821_v18, %v2822_v36  ;;  %v2829_v38 = vrot.slane %v2828_v33, 4  ;;  %v2836_v30 = vrot.slane %v2835_v42, 4  ;;  %v2002_v55 = vcombine.high %v1994_v17, %v1994_v17 }
 0x2a4   :  { %v2842_v26 = vsel %vm2260_vm5, %v1986_v56, -inf  ;;  %v2003_v10 = vcombine.high %v2001_v15, %v2001_v15  ;;  %v2849_v47 = vsel %vm2260_vm5, %v1994_v17, -inf  ;;  %v2863_v5 = vsel %vm2260_vm5, %v2001_v15, -inf }
 0x2a5   :  { %v2824_v62 = vrot.slane %v2823_v37, 2  ;;  %v2830_v53 = vmax.f32 %v2828_v33, %v2829_v38  ;;  %v2837_v35 = vmax.f32 %v2835_v42, %v2836_v30  ;;  %v2843_v2 = vrot.slane %v2842_v26, 4 }
 0x2a6   :  { %v2850_v24 = vrot.slane %v2849_v47, 4  ;;  %v2856_v36 = vsel %vm2260_vm5, %v2002_v55, -inf  ;;  %v2864_v18 = vrot.slane %v2863_v5, 4  ;;  %v2870_v54 = vsel %vm2260_vm5, %v2003_v10, -inf }
 0x2a7   :  { %v2825_v40 = vmax.f32 %v2823_v37, %v2824_v62  ;;  %v2831_v56 = vrot.slane %v2830_v53, 2  ;;  %v2838_v4 = vrot.slane %v2837_v35, 2  ;;  %v2844_v57 = vmax.f32 %v2842_v26, %v2843_v2 }
 0x2a8   :  { %v2851_v17 = vmax.f32 %v2849_v47, %v2850_v24  ;;  %v2857_v59 = vrot.slane %v2856_v36, 4  ;;  %v2865_v15 = vmax.f32 %v2863_v5, %v2864_v18  ;;  %v2871_v9 = vrot.slane %v2870_v54, 4  ;;  %v3637_v47 = vpop.permute.xlu0 %3636 }
 0x2a9   :  { %v13184_v23 = vpop.eup %13183  ;;  %v2826_v43 = vrot.slane %v2825_v40, 1  ;;  %v2832_v33 = vmax.f32 %v2830_v53, %v2831_v56  ;;  %v2839_v30 = vmax.f32 %v2837_v35, %v2838_v4  ;;  %v2845_v42 = vrot.slane %v2844_v57, 2  ;;  %v20713_v35 = vld [vmem:[#allocation44_spill] sm:$0xff] }
 0x2aa   :  { %v2852_v38 = vrot.slane %v2851_v17, 2  ;;  %v2858_v29 = vmax.f32 %v2856_v36, %v2857_v59  ;;  %v2866_v60 = vrot.slane %v2865_v15, 2  ;;  %v2872_v55 = vmax.f32 %v2870_v54, %v2871_v9 }
 0x2ab   :  { %v13186_v12 = vpop.eup %13185  ;;  %v2827_v10 = vmax.f32 %v2825_v40, %v2826_v43  ;;  %v2833_v37 = vrot.slane %v2832_v33, 1  ;;  %v2840_v62 = vrot.slane %v2839_v30, 1  ;;  %v2846_v31 = vmax.f32 %v2844_v57, %v2845_v42 }
 0x2ac   :  { %v2853_v2 = vmax.f32 %v2851_v17, %v2852_v38  ;;  %v2859_v24 = vrot.slane %v2858_v29, 2  ;;  %v2867_v26 = vmax.f32 %v2865_v15, %v2866_v60  ;;  %v2873_v5 = vrot.slane %v2872_v55, 2 }
 0x2ad   :  { %v3180_v53 = vpack.c.bf16 %v15549_v61, %v15549_v61  ;;  %v2847_v4 = vrot.slane %v2846_v31, 1  ;;  %v3526_v59 = vpack.c.b16 %v20713_v35, %v15608_v25  ;;  %v4365_v9 = vsel %vm4338_vm11, %v3746_v20, %v3857_v32 }
 0x2ae   :  { %v2834_v36 = vmax.f32 %v2832_v33, %v2833_v37  ;;  %v2841_v18 = vmax.f32 %v2839_v30, %v2840_v62  ;;  %v2860_v43 = vmax.f32 %v2858_v29, %v2859_v24  ;;  %v2874_v40 = vmax.f32 %v2872_v55, %v2873_v5  ;;  %v15653_v29 = vpop.f32.mrb[58].mxu0 }
 0x2af   :  { %v20714_v57 = vpack.c.bf16 %v15531_v39, %v15531_v39  ;;  %v20716_v60 = vpack.c.bf16 %v15545_v49, %v15545_v49  ;;  %v4341_v61 = vsel %vm4338_vm11, %v3526_v59, %v3637_v47  ;;  %v15647_v25 = vadd.f32 %v15490_v6, %v15340_v21  ;;  %20719 = vst [vmem:[#allocation88_spill] sm:$0xff] %v15653_v29 }
 0x2b0   :  { %v2848_v32 = vmax.f32 %v2846_v31, %v2847_v4  ;;  %v3181_v20 = vpack.c.bf16 %v2827_v10, %v2827_v10  ;;  %v2854_v17 = vrot.slane %v2853_v2, 1  ;;  %v2868_v15 = vrot.slane %v2867_v26, 1  ;;  %v12579_v10 = vpop.f32.mrb[59].mxu0 }
 0x2b1   :  { %v15637_v54 = vunpack.c.l.b16 %v20714_v57  ;;  %v15642_v56 = vunpack.c.l.b16 %v20716_v60  ;;  %v15649_v33 = vunpack.c.l.b16 %v3180_v53  ;;  %v4467_v39 = vcombine.low %v4341_v61, %v4365_v9 }
 0x2b2   :  { %v3182_v49 = vpack.c.bf16 %v2834_v36, %v2834_v36  ;;  %v3183_v30 = vpack.c.bf16 %v2841_v18, %v2841_v18  ;;  %v2861_v42 = vrot.slane %v2860_v43, 1  ;;  %v2875_v38 = vrot.slane %v2874_v40, 1 }
 0x2b3   :  { %20715 = vst [vmem:[#allocation44_spill] sm:$0xff] %v15637_v54  ;;  %20717 = vst [vmem:[#allocation86_spill] sm:$0xff] %v15642_v56  ;;  %v4468_v55 = vcombine.high %v4341_v61, %v4365_v9  ;;  %v11732_v21 = vadd.f32 -1.0, %v13184_v23  ;;  %v11733_v37 = vadd.f32 -1.0, %v13186_v12  ;;  %v1468_v31 = vmul.f32 1.442695, %v15647_v25 }
 0x2b4   :  { %20718 = vst [vmem:[#allocation87_spill] sm:$0xff] %v15649_v33  ;;  %v3184_v62 = vpack.c.bf16 %v2848_v32, %v2848_v32  ;;  %v15656_v24 = vunpack.c.l.b16 %v3181_v20  ;;  %v15658_v5 = vmax.f32 %v2853_v2, %v2854_v17  ;;  %v15660_v47 = vmax.f32 %v2867_v26, %v2868_v15 }
 0x2b5   :  { %v1532_v53 = vmul.f32 1.6732632, %v11732_v21  ;;  %v1533_v4 = vmul.f32 1.6732632, %v11733_v37  ;;  %v4477_v35 = vrot.slane %v4467_v39, %v14417_v27  ;;  %v4484_v59 = vrot.slane %v4468_v55, %v14417_v27 }
 0x2b6   :  { %20720 = vst [vmem:[#allocation89_spill] sm:$0xff] %v15656_v24  ;;  %v15664_v36 = vunpack.c.l.b16 %v3182_v49  ;;  %v15666_v23 = vunpack.c.l.b16 %v3183_v30  ;;  %v15668_v12 = vmax.f32 %v2860_v43, %v2861_v42  ;;  %v15670_v9 = vmax.f32 %v2874_v40, %v2875_v38 }
 0x2b7   :  { %v1562_v2 = vsel %vm1412_vm9, %v15568_v44, %v1532_v53  ;;  %v1563_v26 = vsel %vm1413_vm10, %v15572_v7, %v1533_v4  ;;  %v4922_v18 = vrot.slane %v4477_v35, %v14417_v27  ;;  %v4936_v57 = vrot.slane %v4484_v59, %v14417_v27 }
 0x2b8   :  { %20721 = vst [vmem:[#allocation90_spill] sm:$0xff] %v15664_v36  ;;  %20722 = vst [vmem:[#allocation91_spill] sm:$0xff] %v15666_v23  ;;  %v1592_v61 = vmul.f32 1.050701, %v1562_v2  ;;  %v1593_v43 = vmul.f32 1.050701, %v1563_v26  ;;  %v3584_v40 = vsel %vm3431_vm6, %v15421_v48, %v15426_v51  ;;  %v15691_v30 = vunpack.c.l.b16 %v3184_v62 }
 0x2b9   :  { %v4945_v32 = vcombine.high %v4922_v18, %v4936_v57  ;;  %v4944_v20 = vcombine.low %v4922_v18, %v4936_v57  ;;  %v3585_v7 = vsel %vm3433_vm12, %v15434_v14, %v3584_v40  ;;  %v3186_v42 = vpack.c.bf16 %v15668_v12, %v15668_v12 }
 0x2ba   :  { %v2004_v17 = vcombine.high %v1592_v61, %v1592_v61  ;;  %v2011_v15 = vrot.slane %v1592_v61, %v14417_v27  ;;  %v2021_v39 = vcombine.high %v1593_v43, %v1593_v43  ;;  %v2028_v49 = vrot.slane %v1593_v43, %v14417_v27  ;;  %20723 = vst [vmem:[#allocation92_spill] sm:$0xff] %v15691_v30 }
 0x2bb   :  { %5553 = vmatprep.mubr.bf16.mxu1 %v4945_v32  ;;  %13187 = vpow2.f32 %v1468_v31  ;;  %v15698_v51 = vsel %vm3429_vm7, %v15521_v41, %v15471_v8  ;;  %v3586_v31 = vsel %vm3435_vm13, %v15442_v63, %v3585_v7  ;;  %vm1414_vm14 = vcmp.gt.f32.partialorder %v15647_v25, 0.0 }
 0x2bc   :  { %v2018_v38 = vrot.slane %v2004_v17, %v14417_v27  ;;  %v2019_v55 = vcombine.high %v2011_v15, %v2011_v15  ;;  %v2877_v21 = vsel %vm2260_vm5, %v2011_v15, -inf  ;;  %v2035_v37 = vrot.slane %v2021_v39, %v14417_v27  ;;  %5554 = vmatmul.mubr.bf16.vlgmr.msra.gmra.mrb[0].mxu1 %v4944_v20 }
 0x2bd   :  { %v2878_v10 = vrot.slane %v2877_v21, 4  ;;  %v2036_v62 = vcombine.high %v2028_v49, %v2028_v49  ;;  %v2905_v53 = vsel %vm2260_vm5, %v2028_v49, -inf }
 0x2be   :  { %v2020_v4 = vcombine.high %v2018_v38, %v2018_v38  ;;  %v2884_v35 = vsel %vm2260_vm5, %v2019_v55, -inf  ;;  %v2891_v59 = vsel %vm2260_vm5, %v2018_v38, -inf  ;;  %v2037_v12 = vcombine.high %v2035_v37, %v2035_v37 }
 0x2bf   :  { %v2879_v2 = vmax.f32 %v2877_v21, %v2878_v10  ;;  %v2885_v26 = vrot.slane %v2884_v35, 4  ;;  %v2892_v18 = vrot.slane %v2891_v59, 4  ;;  %v2906_v57 = vrot.slane %v2905_v53, 4 }
 0x2c0   :  { %v2898_v61 = vsel %vm2260_vm5, %v2020_v4, -inf  ;;  %v2912_v43 = vsel %vm2260_vm5, %v2036_v62, -inf  ;;  %v2919_v40 = vsel %vm2260_vm5, %v2035_v37, -inf  ;;  %v2926_v32 = vsel %vm2260_vm5, %v2037_v12, -inf }
 0x2c1   :  { %v2880_v20 = vrot.slane %v2879_v2, 2  ;;  %v2886_v7 = vmax.f32 %v2884_v35, %v2885_v26  ;;  %v2893_v17 = vmax.f32 %v2891_v59, %v2892_v18  ;;  %v2899_v15 = vrot.slane %v2898_v61, 4 }
 0x2c2   :  { %v2907_v39 = vmax.f32 %v2905_v53, %v2906_v57  ;;  %v2913_v49 = vrot.slane %v2912_v43, 4  ;;  %v2920_v38 = vrot.slane %v2919_v40, 4  ;;  %v2927_v55 = vrot.slane %v2926_v32, 4 }
 0x2c3   :  { %v2881_v21 = vmax.f32 %v2879_v2, %v2880_v20  ;;  %v2887_v10 = vrot.slane %v2886_v7, 2  ;;  %v2894_v44 = vrot.slane %v2893_v17, 2  ;;  %v2900_v60 = vmax.f32 %v2898_v61, %v2899_v15 }
 0x2c4   :  { %v2908_v29 = vrot.slane %v2907_v39, 2  ;;  %v2914_v4 = vmax.f32 %v2912_v43, %v2913_v49  ;;  %v2921_v30 = vmax.f32 %v2919_v40, %v2920_v38  ;;  %v2928_v62 = vmax.f32 %v2926_v32, %v2927_v55 }
 0x2c5   :  { %v13188_v3 = vpop.eup %13187  ;;  %v2882_v37 = vrot.slane %v2881_v21, 1  ;;  %v2888_v1 = vmax.f32 %v2886_v7, %v2887_v10  ;;  %v2895_v12 = vmax.f32 %v2893_v17, %v2894_v44  ;;  %v2901_v19 = vrot.slane %v2900_v60, 2 }
 0x2c6   :  { %v2909_v35 = vmax.f32 %v2907_v39, %v2908_v29  ;;  %v2915_v59 = vrot.slane %v2914_v4, 2  ;;  %v2922_v26 = vrot.slane %v2921_v30, 2  ;;  %v2929_v53 = vrot.slane %v2928_v62, 2 }
 0x2c7   :  { %v2883_v18 = vmax.f32 %v2881_v21, %v2882_v37  ;;  %v2889_v57 = vrot.slane %v2888_v1, 1  ;;  %v2896_v23 = vrot.slane %v2895_v12, 1  ;;  %v2902_v2 = vmax.f32 %v2900_v60, %v2901_v19 }
 0x2c8   :  { %v2910_v20 = vrot.slane %v2909_v35, 1  ;;  %v2916_v36 = vmax.f32 %v2914_v4, %v2915_v59  ;;  %v2923_v61 = vmax.f32 %v2921_v30, %v2922_v26  ;;  %v2930_v15 = vmax.f32 %v2928_v62, %v2929_v53 }
 0x2c9   :  { %v3188_v43 = vpack.c.bf16 %v15670_v9, %v15670_v9  ;;  %v20724_v44 = vpack.c.bf16 %v15658_v5, %v15658_v5  ;;  %v20726_v40 = vpack.c.bf16 %v15660_v47, %v15660_v47  ;;  %v2903_v19 = vrot.slane %v2902_v2, 1 }
 0x2ca   :  { %v15725_v60 = vunpack.c.l.b16 %v3186_v42  ;;  %v2890_v30 = vmax.f32 %v2888_v1, %v2889_v57  ;;  %v2897_v7 = vmax.f32 %v2895_v12, %v2896_v23  ;;  %v3189_v17 = vpack.c.bf16 %v2883_v18, %v2883_v18 }
 0x2cb   :  { %v15718_v29 = vunpack.c.l.b16 %v20724_v44  ;;  %v15723_v32 = vunpack.c.l.b16 %v20726_v40  ;;  %v2917_v39 = vrot.slane %v2916_v36, 1  ;;  %v2924_v49 = vrot.slane %v2923_v61, 1 }
 0x2cc   :  { %20727 = vst [vmem:[#allocation94_spill] sm:$0xff] %v15725_v60  ;;  %v3587_v9 = vsel %vm3437_vm15, %v15444_v28, %v3586_v31  ;;  %v3591_v5 = vsel %vm3431_vm6, %v15523_v0, %v15698_v51  ;;  %v15732_v38 = vmax.f32 %v2902_v2, %v2903_v19  ;;  %v15734_v47 = vmax.f32 %v2909_v35, %v2910_v20 }
 0x2cd   :  { %20725 = vst [vmem:[#allocation93_spill] sm:$0xff] %v15718_v29  ;;  %v2931_v55 = vrot.slane %v2930_v15, 1  ;;  %v3592_v42 = vsel %vm3433_vm12, %v15525_v52, %v3591_v5  ;;  %v15738_v1 = vunpack.c.l.b16 %v3188_v43  ;;  %v11734_v23 = vadd.f32 -1.0, %v13188_v3 }
 0x2ce   :  { %v15742_v21 = vadd.f32 %v15490_v6, %v15397_v16  ;;  %v3803_v31 = vsel %vm3429_vm7, %v15434_v14, %v15421_v48  ;;  %v3190_v51 = vpack.c.bf16 %v2890_v30, %v2890_v30  ;;  %v3191_v10 = vpack.c.bf16 %v2897_v7, %v2897_v7  ;;  %v20742_v48 = vld [vmem:[#allocation37_spill] sm:$0xff] }
 0x2cf   :  { %v15747_v4 = vunpack.c.l.b16 %v3189_v17  ;;  %v3588_v62 = vsel %vm3439_vm2, %v15460_v11, %v3587_v9  ;;  %v15751_v37 = vmax.f32 %v2916_v36, %v2917_v39  ;;  %v15753_v12 = vmax.f32 %v2923_v61, %v2924_v49 }
 0x2d0   :  { %v1534_v3 = vmul.f32 1.6732632, %v11734_v23  ;;  %v3593_v16 = vsel %vm3435_vm13, %v15535_v50, %v3592_v42  ;;  %v3192_v35 = vpack.c.bf16 %v15732_v38, %v15732_v38  ;;  %v15759_v59 = vmax.f32 %v2930_v15, %v2931_v55  ;;  %v3639_v38 = vpop.permute.xlu0 %3638 }
 0x2d1   :  { %v3193_v26 = vpack.c.bf16 %v15734_v47, %v15734_v47  ;;  %v3594_v53 = vsel %vm3437_vm15, %v15537_v13, %v3593_v16  ;;  %v3589_v18 = vsel %vm3441_vm4, %v15462_v58, %v3588_v62  ;;  %v1470_v2 = vmul.f32 1.442695, %v15742_v21 }
 0x2d2   :  { %v1564_v36 = vsel %vm1414_vm14, %v15647_v25, %v1534_v3  ;;  %v3595_v57 = vsel %vm3439_vm2, %v15539_v46, %v3594_v53  ;;  %v3804_v15 = vsel %vm3431_vm6, %v15442_v63, %v3803_v31  ;;  %v3810_v43 = vsel %vm3429_vm7, %v15525_v52, %v15523_v0 }
 0x2d3   :  { %v1594_v20 = vmul.f32 1.050701, %v1564_v36  ;;  %v3596_v61 = vsel %vm3441_vm4, %v15604_v34, %v3595_v57  ;;  %13189 = vpow2.f32 %v1470_v2  ;;  %v3805_v44 = vsel %vm3433_vm12, %v15444_v28, %v3804_v15 }
 0x2d4   :  { %v3632_v25 = vpack.c.b16 %v3596_v61, %v3589_v18  ;;  %v3811_v40 = vsel %vm3431_vm6, %v15535_v50, %v3810_v43  ;;  %v3806_v7 = vsel %vm3435_vm13, %v15460_v11, %v3805_v44  ;;  %v15789_v39 = vunpack.c.l.b16 %v3190_v51 }
 0x2d5   :  { %v2038_v19 = vcombine.high %v1594_v20, %v1594_v20  ;;  %v2045_v30 = vrot.slane %v1594_v20, %v14417_v27  ;;  %v3812_v17 = vsel %vm3433_vm12, %v15537_v13, %v3811_v40  ;;  %v15791_v49 = vunpack.c.l.b16 %v3191_v10 }
 0x2d6   :  { %3644 = vrot.lane.b32.xlu0 %v3632_v25, %s13291_s18  ;;  %v3807_v9 = vsel %vm3437_vm15, %v15462_v58, %v3806_v7  ;;  %v3813_v5 = vsel %vm3435_vm13, %v15539_v46, %v3812_v17  ;;  %v4023_v3 = vsel %vm3429_vm7, %v15444_v28, %v15442_v63  ;;  %v4030_v44 = vsel %vm3429_vm7, %v15537_v13, %v15535_v50 }
 0x2d7   :  { %v2052_v55 = vrot.slane %v2038_v19, %v14417_v27  ;;  %v2053_v42 = vcombine.high %v2045_v30, %v2045_v30  ;;  %v2933_v23 = vsel %vm2260_vm5, %v2045_v30, -inf  ;;  %v3808_v31 = vsel %vm3439_vm2, %v15471_v8, %v3807_v9 }
 0x2d8   :  { %v2934_v51 = vrot.slane %v2933_v23, 4  ;;  %v3809_v10 = vsel %vm3441_vm4, %v15521_v41, %v3808_v31  ;;  %v3814_v62 = vsel %vm3437_vm15, %v15604_v34, %v3813_v5  ;;  %v4024_v25 = vsel %vm3431_vm6, %v15460_v11, %v4023_v3 }
 0x2d9   :  { %v2054_v16 = vcombine.high %v2052_v55, %v2052_v55  ;;  %v2940_v53 = vsel %vm2260_vm5, %v2053_v42, -inf  ;;  %v2947_v36 = vsel %vm2260_vm5, %v2052_v55, -inf  ;;  %v3815_v18 = vsel %vm3439_vm2, %v15637_v54, %v3814_v62  ;;  %v20728_v55 = vld [vmem:[#allocation25_spill] sm:$0xff]  ;;  %v20729_v42 = vld [vmem:[#allocation26_spill] sm:$0xff] }
 0x2da   :  { %v2935_v57 = vmax.f32 %v2933_v23, %v2934_v51  ;;  %v2941_v2 = vrot.slane %v2940_v53, 4  ;;  %v2948_v20 = vrot.slane %v2947_v36, 4  ;;  %v3816_v61 = vsel %vm3441_vm4, %v15642_v56, %v3815_v18 }
 0x2db   :  { %v2954_v15 = vsel %vm2260_vm5, %v2054_v16, -inf  ;;  %v3852_v43 = vpack.c.b16 %v3816_v61, %v3809_v10  ;;  %v3194_v17 = vpack.c.bf16 %v15751_v37, %v15751_v37  ;;  %v4025_v9 = vsel %vm3433_vm12, %v15462_v58, %v4024_v25  ;;  %v20730_v61 = vld [vmem:[#allocation23_spill] sm:$0xff] }
 0x2dc   :  { %v2936_v40 = vrot.slane %v2935_v57, 2  ;;  %v2942_v19 = vmax.f32 %v2940_v53, %v2941_v2  ;;  %v2949_v30 = vmax.f32 %v2947_v36, %v2948_v20  ;;  %v2955_v7 = vrot.slane %v2954_v15, 4 }
 0x2dd   :  { %3864 = vrot.lane.b32.xlu1 %v3852_v43, %s13291_s18  ;;  %v4031_v5 = vsel %vm3431_vm6, %v15539_v46, %v4030_v44  ;;  %v3670_v23 = vsel %vm3429_vm7, %v20729_v42, %v20728_v55  ;;  %v13190_v31 = vpop.eup %13189  ;;  %v3195_v51 = vpack.c.bf16 %v15753_v12, %v15753_v12  ;;  %v3196_v37 = vpack.c.bf16 %v15759_v59, %v15759_v59 }
 0x2de   :  { %v2937_v10 = vmax.f32 %v2935_v57, %v2936_v40  ;;  %v2943_v62 = vrot.slane %v2942_v19, 2  ;;  %v2956_v3 = vmax.f32 %v2954_v15, %v2955_v7  ;;  %v2950_v16 = vrot.slane %v2949_v30, 2  ;;  %v20731_v40 = vld [vmem:[#allocation45_spill] sm:$0xff]  ;;  %v20732_v7 = vld [vmem:[#allocation27_spill] sm:$0xff] }
 0x2df   :  { %v11735_v53 = vadd.f32 -1.0, %v13190_v31  ;;  %v4032_v36 = vsel %vm3433_vm12, %v15604_v34, %v4031_v5  ;;  %v4026_v20 = vsel %vm3435_vm13, %v15471_v8, %v4025_v9  ;;  %v3671_v43 = vsel %vm3431_vm6, %v20730_v61, %v3670_v23 }
 0x2e0   :  { %v2944_v18 = vmax.f32 %v2942_v19, %v2943_v62  ;;  %v2957_v2 = vrot.slane %v2956_v3, 2  ;;  %v15844_v12 = vunpack.c.l.b16 %v3192_v35  ;;  %v15849_v59 = vunpack.c.l.b16 %v3193_v26 }
 0x2e1   :  { %v1535_v57 = vmul.f32 1.6732632, %v11735_v53  ;;  %v4033_v15 = vsel %vm3435_vm13, %v15637_v54, %v4032_v36  ;;  %v15853_v25 = vunpack.c.l.b16 %v3194_v17  ;;  %v2938_v44 = vrot.slane %v2937_v10, 1  ;;  %v20736_v36 = vld [vmem:[#allocation34_spill] sm:$0xff] }
 0x2e2   :  { %vm1415_vm3 = vcmp.gt.f32.partialorder %v15742_v21, 0.0  ;;  %v3527_v19 = vpack.c.b16 %v15176_v22, %v20731_v40  ;;  %v4027_v47 = vsel %vm3437_vm15, %v15521_v41, %v4026_v20  ;;  %v4034_v26 = vsel %vm3437_vm15, %v15642_v56, %v4033_v15 }
 0x2e3   :  { %v1565_v35 = vsel %vm1415_vm3, %v15742_v21, %v1535_v57  ;;  %v3672_v9 = vsel %vm3433_vm12, %v20732_v7, %v3671_v43  ;;  %v15865_v17 = vunpack.c.l.b16 %v3195_v51  ;;  %v2945_v5 = vrot.slane %v2944_v18, 1  ;;  %v20735_v21 = vld [vmem:[#allocation33_spill] sm:$0xff] }
 0x2e4   :  { %v2951_v23 = vmax.f32 %v2949_v30, %v2950_v16  ;;  %v2958_v31 = vmax.f32 %v2956_v3, %v2957_v2  ;;  %v15867_v62 = vunpack.c.l.b16 %v3196_v37  ;;  %v1595_v22 = vmul.f32 1.050701, %v1565_v35  ;;  %v20737_v30 = vld [vmem:[#allocation28_spill] sm:$0xff] }
 0x2e5   :  { %20733 = vst [vmem:[#allocation45_spill] sm:$0xff] %v15865_v17  ;;  %v15870_v53 = vsel %vm4338_vm11, %v3527_v19, %v3639_v38  ;;  %v3677_v20 = vsel %vm3429_vm7, %v20736_v36, %v20735_v21  ;;  %v15875_v57 = vmax.f32 %v2937_v10, %v2938_v44  ;;  %v4028_v43 = vsel %vm3439_vm2, %v15523_v0, %v4027_v47  ;;  %v20744_v21 = vld [vmem:[#allocation39_spill] sm:$0xff] }
 0x2e6   :  { %20734 = vst [vmem:[#allocation95_spill] sm:$0xff] %v15867_v62  ;;  %v4035_v51 = vsel %vm3439_vm2, %v15649_v33, %v4034_v26  ;;  %v3673_v3 = vsel %vm3435_vm13, %v20737_v30, %v3672_v9  ;;  %v2055_v37 = vcombine.high %v1595_v22, %v1595_v22  ;;  %v2062_v16 = vrot.slane %v1595_v22, %v14417_v27  ;;  %v20738_v26 = vld [vmem:[#allocation29_spill] sm:$0xff] }
 0x2e7   :  { %v4029_v2 = vsel %vm3441_vm4, %v15525_v52, %v4028_v43  ;;  %v4036_v15 = vsel %vm3441_vm4, %v15656_v24, %v4035_v51  ;;  %v15888_v10 = vmax.f32 %v2944_v18, %v2945_v5  ;;  %v2952_v44 = vrot.slane %v2951_v23, 1  ;;  %v20739_v43 = vld [vmem:[#allocation30_spill] sm:$0xff]  ;;  %v20740_v51 = vld [vmem:[#allocation31_spill] sm:$0xff] }
 0x2e8   :  { %v2959_v40 = vrot.slane %v2958_v31, 1  ;;  %v4072_v19 = vpack.c.b16 %v4036_v15, %v4029_v2  ;;  %v2069_v38 = vrot.slane %v2055_v37, %v14417_v27  ;;  %v2070_v35 = vcombine.high %v2062_v16, %v2062_v16  ;;  %v20741_v15 = vld [vmem:[#allocation36_spill] sm:$0xff] }
 0x2e9   :  { %v2961_v47 = vsel %vm2260_vm5, %v2062_v16, -inf  ;;  %v3674_v9 = vsel %vm3437_vm15, %v20738_v26, %v3673_v3  ;;  %v3678_v18 = vsel %vm3431_vm6, %v20740_v51, %v3677_v20  ;;  %v4243_v5 = vsel %vm3429_vm7, %v15462_v58, %v15460_v11  ;;  %v20743_v51 = vld [vmem:[#allocation38_spill] sm:$0xff]  ;;  %v3859_v26 = vpop.permute.xlu1 %3858 }
 0x2ea   :  { %v2962_v22 = vrot.slane %v2961_v47, 4  ;;  %4084 = vrot.lane.b32.xlu0 %v4072_v19, %s13291_s18  ;;  %v3675_v28 = vsel %vm3439_vm2, %v20739_v43, %v3674_v9  ;;  %v2071_v37 = vcombine.high %v2069_v38, %v2069_v38  ;;  %v2968_v2 = vsel %vm2260_vm5, %v2070_v35, -inf }
 0x2eb   :  { %v2975_v16 = vsel %vm2260_vm5, %v2069_v38, -inf  ;;  %v3679_v3 = vsel %vm3433_vm12, %v20741_v15, %v3678_v18  ;;  %v2969_v19 = vrot.slane %v2968_v2, 4  ;;  %v4244_v11 = vsel %vm3431_vm6, %v15471_v8, %v4243_v5 }
 0x2ec   :  { %v2963_v63 = vmax.f32 %v2961_v47, %v2962_v22  ;;  %v2976_v14 = vrot.slane %v2975_v16, 4  ;;  %v3680_v9 = vsel %vm3435_vm13, %v20742_v48, %v3679_v3  ;;  %v2982_v20 = vsel %vm2260_vm5, %v2071_v37, -inf }
 0x2ed   :  { %v3681_v36 = vsel %vm3437_vm15, %v20743_v51, %v3680_v9  ;;  %v4250_v38 = vsel %vm3429_vm7, %v15604_v34, %v15539_v46  ;;  %v2970_v18 = vmax.f32 %v2968_v2, %v2969_v19  ;;  %v2983_v22 = vrot.slane %v2982_v20, 4 }
 0x2ee   :  { %v2964_v35 = vrot.slane %v2963_v63, 2  ;;  %v2977_v47 = vmax.f32 %v2975_v16, %v2976_v14  ;;  %v3682_v15 = vsel %vm3439_vm2, %v20744_v21, %v3681_v36  ;;  %v4245_v37 = vsel %vm3433_vm12, %v15521_v41, %v4244_v11  ;;  %v20745_v16 = vld [vmem:[#allocation40_spill] sm:$0xff] }
 0x2ef   :  { %v4251_v3 = vsel %vm3431_vm6, %v15637_v54, %v4250_v38  ;;  %v15924_v5 = vadd.f32 %v15490_v6, %v15438_v45  ;;  %v2953_v9 = vmax.f32 %v2951_v23, %v2952_v44  ;;  %v2971_v51 = vrot.slane %v2970_v18, 2  ;;  %v20746_v21 = vld [vmem:[#allocation32_spill] sm:$0xff] }
 0x2f0   :  { %v2978_v48 = vrot.slane %v2977_v47, 2  ;;  %v2984_v43 = vmax.f32 %v2982_v20, %v2983_v22  ;;  %v2960_v2 = vmax.f32 %v2958_v31, %v2959_v40  ;;  %v3197_v14 = vpack.c.bf16 %v15875_v57, %v15875_v57 }
 0x2f1   :  { %v3683_v36 = vsel %vm3441_vm4, %v20745_v16, %v3682_v15  ;;  %v4252_v11 = vsel %vm3433_vm12, %v15642_v56, %v4251_v3  ;;  %v2965_v19 = vmax.f32 %v2963_v63, %v2964_v35  ;;  %v2972_v38 = vmax.f32 %v2970_v18, %v2971_v51 }
 0x2f2   :  { %v3676_v45 = vsel %vm3441_vm4, %v20746_v21, %v3675_v28  ;;  %v4246_v23 = vsel %vm3435_vm13, %v15523_v0, %v4245_v37  ;;  %v2979_v44 = vmax.f32 %v2977_v47, %v2978_v48  ;;  %v1472_v40 = vmul.f32 1.442695, %v15924_v5 }
 0x2f3   :  { %v3747_v31 = vpack.c.b16 %v3683_v36, %v3676_v45  ;;  %v4247_v57 = vsel %vm3437_vm15, %v15525_v52, %v4246_v23  ;;  %v3198_v15 = vpack.c.bf16 %v15888_v10, %v15888_v10  ;;  %v3199_v20 = vpack.c.bf16 %v2953_v9, %v2953_v9  ;;  %v20748_v36 = vld [vmem:[#allocation90_spill] sm:$0xff] }
 0x2f4   :  { %v2985_v63 = vrot.slane %v2984_v43, 2  ;;  %v4253_v51 = vsel %vm3435_vm13, %v15649_v33, %v4252_v11  ;;  %v4248_v35 = vsel %vm3439_vm2, %v15535_v50, %v4247_v57  ;;  %13191 = vpow2.f32 %v1472_v40  ;;  %v20751_v57 = vld [vmem:[#allocation91_spill] sm:$0xff] }
 0x2f5   :  { %v4368_v28 = vsel %vm4338_vm11, %v3747_v31, %v3859_v26  ;;  %v4254_v48 = vsel %vm3437_vm15, %v15656_v24, %v4253_v51  ;;  %v3200_v18 = vpack.c.bf16 %v2960_v2, %v2960_v2  ;;  %v15948_v47 = vunpack.c.l.b16 %v3197_v14  ;;  %v20752_v51 = vld [vmem:[#allocation83_spill] sm:$0xff] }
 0x2f6   :  { %v2966_v22 = vrot.slane %v2965_v19, 1  ;;  %v2973_v37 = vrot.slane %v2972_v38, 1  ;;  %v2980_v10 = vrot.slane %v2979_v44, 1  ;;  %v4520_v3 = vcombine.low %v15870_v53, %v4368_v28 }
 0x2f7   :  { %20747 = vst [vmem:[#allocation96_spill] sm:$0xff] %v15948_v47  ;;  %v4521_v9 = vcombine.high %v15870_v53, %v4368_v28  ;;  %v4255_v26 = vsel %vm3439_vm2, %v20748_v36, %v4254_v48  ;;  %v15954_v11 = vunpack.c.l.b16 %v3198_v15  ;;  %v15956_v45 = vunpack.c.l.b16 %v3199_v20 }
 0x2f8   :  { %v2986_v23 = vmax.f32 %v2984_v43, %v2985_v63  ;;  %v4249_v2 = vsel %vm3441_vm4, %v15537_v13, %v4248_v35  ;;  %v4530_v14 = vrot.slane %v4520_v3, %v14417_v27  ;;  %v4256_v40 = vsel %vm3441_vm4, %v20751_v57, %v4255_v26 }
 0x2f9   :  { %20749 = vst [vmem:[#allocation97_spill] sm:$0xff] %v15954_v11  ;;  %20750 = vst [vmem:[#allocation98_spill] sm:$0xff] %v15956_v45  ;;  %v4537_v31 = vrot.slane %v4521_v9, %v14417_v27  ;;  %v15966_v53 = vadd.f32 %v15490_v6, %v20752_v51  ;;  %v15968_v28 = vunpack.c.l.b16 %v3200_v18  ;;  %v2967_v15 = vmax.f32 %v2965_v19, %v2966_v22  ;;  %v20755_v18 = vld [vmem:[#allocation67_spill] sm:$0xff]  ;;  %v20757_v51 = vld [vmem:[#allocation85_spill] sm:$0xff] }
 0x2fa   :  { %v15970_v20 = vmax.f32 %v2972_v38, %v2973_v37  ;;  %v4292_v43 = vpack.c.b16 %v4256_v40, %v4249_v2  ;;  %v15972_v63 = vmax.f32 %v2979_v44, %v2980_v10  ;;  %vm1416_vm0 = vcmp.gt.f32.partialorder %v15924_v5, 0.0  ;;  %v20754_v44 = vld [vmem:[#allocation65_spill] sm:$0xff] }
 0x2fb   :  { %20753 = vst [vmem:[#allocation83_spill] sm:$0xff] %v15968_v28  ;;  %v1474_v35 = vmul.f32 1.442695, %v15966_v53  ;;  %v4975_v48 = vrot.slane %v4530_v14, %v14417_v27  ;;  %v4989_v3 = vrot.slane %v4537_v31, %v14417_v27  ;;  %v2987_v9 = vrot.slane %v2986_v23, 1  ;;  %v20756_v31 = vld [vmem:[#allocation69_spill] sm:$0xff] }
 0x2fc   :  { %4304 = vrot.lane.b32.xlu1 %v4292_v43, %s13291_s18  ;;  %v3488_v19 = vsel %vm3429_vm7, %v15471_v8, %v15462_v58  ;;  %v3495_v38 = vsel %vm3429_vm7, %v15637_v54, %v15604_v34  ;;  %v4320_v22 = vsel %vm3429_vm7, %v20755_v18, %v20754_v44  ;;  %v15998_v43 = vadd.f32 %v15490_v6, %v20757_v51 }
 0x2fd   :  { %13193 = vpow2.f32 %v1474_v35  ;;  %v4998_v37 = vcombine.high %v4975_v48, %v4989_v3  ;;  %v4997_v10 = vcombine.low %v4975_v48, %v4989_v3  ;;  %v3489_v26 = vsel %vm3431_vm6, %v15521_v41, %v3488_v19  ;;  %v20758_v19 = vld [vmem:[#allocation70_spill] sm:$0xff] }
 0x2fe   :  { %v3490_v2 = vsel %vm3433_vm12, %v15523_v0, %v3489_v26  ;;  %v3496_v14 = vsel %vm3431_vm6, %v15642_v56, %v3495_v38  ;;  %v4321_v40 = vsel %vm3431_vm6, %v20756_v31, %v4320_v22  ;;  %v13192_v8 = vpop.eup %13191  ;;  %v3201_v35 = vpack.c.bf16 %v2967_v15, %v2967_v15  ;;  %v16006_v38 = vpop.f32.mrb[60].mxu0 }
 0x2ff   :  { %5561 = vmatprep.mubr.bf16.mxu1 %v4998_v37  ;;  %v3491_v48 = vsel %vm3435_vm13, %v15525_v52, %v3490_v2  ;;  %v3497_v3 = vsel %vm3433_vm12, %v15649_v33, %v3496_v14  ;;  %v4322_v26 = vsel %vm3433_vm12, %v20758_v19, %v4321_v40  ;;  %20759 = vst [vmem:[#allocation85_spill] sm:$0xff] %v16006_v38  ;;  %v11736_v58 = vadd.f32 -1.0, %v13192_v8  ;;  %v12590_v37 = vpop.f32.mrb[61].mxu0  ;;  %v20761_v19 = vld [vmem:[#allocation92_spill] sm:$0xff] }
 0x300   :  { %5562 = vmatmul.mubr.bf16.gmra.mrb[4].mxu1 %v4997_v10  ;;  %v3492_v6 = vsel %vm3437_vm15, %v15535_v50, %v3491_v48  ;;  %v3498_v15 = vsel %vm3435_vm13, %v15656_v24, %v3497_v3  ;;  %v3597_v22 = vsel %vm3429_vm7, %v15642_v56, %v15637_v54  ;;  %v16015_v2 = vmax.f32 %v2986_v23, %v2987_v9 }
 0x301   :  { %v3493_v14 = vsel %vm3439_vm2, %v15537_v13, %v3492_v6  ;;  %v3499_v8 = vsel %vm3437_vm15, %v20748_v36, %v3498_v15  ;;  %v1476_v10 = vmul.f32 1.442695, %v15998_v43  ;;  %v1536_v40 = vmul.f32 1.6732632, %v11736_v58  ;;  %v16037_v6 = vpop.f32.mrb[62].mxu0 }
 0x302   :  { %v16024_v51 = vsel %vm3441_vm4, %v15539_v46, %v3493_v14  ;;  %v3500_v48 = vsel %vm3439_vm2, %v20751_v57, %v3499_v8  ;;  %v4333_v3 = vpack.c.b16 %v4322_v26, %v4322_v26  ;;  %v3598_v9 = vsel %vm3431_vm6, %v15649_v33, %v3597_v22  ;;  %20763 = vst [vmem:[#allocation100_spill] sm:$0xff] %v16037_v6  ;;  %v12591_v22 = vpop.f32.mrb[63].mxu0 }
 0x303   :  { %20760 = vst [vmem:[#allocation70_spill] sm:$0xff] %v16024_v51  ;;  %v16030_v23 = vsel %vm3441_vm4, %v20761_v19, %v3500_v48  ;;  %13195 = vpow2.f32 %v1476_v10  ;;  %v3604_v58 = vsel %vm3429_vm7, %v15723_v32, %v15725_v60  ;;  %v1566_v15 = vsel %vm1416_vm0, %v15924_v5, %v1536_v40 }
 0x304   :  { %20762 = vst [vmem:[#allocation99_spill] sm:$0xff] %v16030_v23  ;;  %v4334_v26 = vpack.c.b16 %v16030_v23, %v16024_v51  ;;  %v11743_v37 = vpack.c.b16 %v16030_v23, %v16030_v23  ;;  %v3599_v14 = vsel %vm3433_vm12, %v15656_v24, %v3598_v9  ;;  %v1596_v48 = vmul.f32 1.050701, %v1566_v15 }
 0x305   :  { %v3600_v5 = vsel %vm3435_vm13, %v20748_v36, %v3599_v14  ;;  %v16054_v40 = vunpack.c.l.b16 %v3201_v35  ;;  %vm1417_vm8 = vcmp.gt.f32.partialorder %v15966_v53, 0.0  ;;  %v4649_v6 = vrot.slane %v4333_v3, %v14417_v27 }
 0x306   :  { %v4693_v38 = vrot.slane %v4334_v26, %v14417_v27  ;;  %v2072_v22 = vcombine.high %v1596_v48, %v1596_v48  ;;  %v2079_v23 = vrot.slane %v1596_v48, %v14417_v27  ;;  %v3601_v8 = vsel %vm3437_vm15, %v20751_v57, %v3600_v5 }
 0x307   :  { %v13194_v9 = vpop.eup %13193  ;;  %v3605_v15 = vsel %vm3431_vm6, %v15738_v1, %v3604_v58  ;;  %v16065_v35 = vrot.slane %v11743_v37, %v14417_v27  ;;  %v16074_v58 = vsel %vm3439_vm2, %v20761_v19, %v3601_v8  ;;  %vm1418_vm9 = vcmp.gt.f32.partialorder %v15998_v43, 0.0 }
 0x308   :  { %v11737_v10 = vadd.f32 -1.0, %v13194_v9  ;;  %v4701_v14 = vcombine.high %v4693_v38, %v4693_v38  ;;  %v3606_v3 = vsel %vm3433_vm12, %v15747_v4, %v3605_v15  ;;  %v2086_v26 = vrot.slane %v2072_v22, %v14417_v27 }
 0x309   :  { %v2087_v51 = vcombine.high %v2079_v23, %v2079_v23  ;;  %v2989_v56 = vsel %vm2260_vm5, %v2079_v23, -inf  ;;  %v5107_v48 = vcombine.low %v4649_v6, %v4693_v38  ;;  %v3607_v22 = vsel %vm3435_vm13, %v15789_v39, %v3606_v3 }
 0x30a   :  { %v2990_v54 = vrot.slane %v2989_v56, 4  ;;  %v1537_v34 = vmul.f32 1.6732632, %v11737_v10  ;;  %v5108_v5 = vcombine.low %v4701_v14, %v16065_v35  ;;  %v2088_v37 = vcombine.high %v2086_v26, %v2086_v26 }
 0x30b   :  { %v2996_v9 = vsel %vm2260_vm5, %v2087_v51, -inf  ;;  %v3003_v46 = vsel %vm2260_vm5, %v2086_v26, -inf  ;;  %v5115_v14 = vrot.slane %v5107_v48, %v14417_v27  ;;  %v3608_v41 = vsel %vm3437_vm15, %v15791_v49, %v3607_v22 }
 0x30c   :  { %v2991_v15 = vmax.f32 %v2989_v56, %v2990_v54  ;;  %v2997_v13 = vrot.slane %v2996_v9, 4  ;;  %v3004_v23 = vrot.slane %v3003_v46, 4  ;;  %v1567_v38 = vsel %vm1417_vm8, %v15966_v53, %v1537_v34 }
 0x30d   :  { %v13196_v6 = vpop.eup %13195  ;;  %v3010_v10 = vsel %vm2260_vm5, %v2088_v37, -inf  ;;  %v1597_v8 = vmul.f32 1.050701, %v1567_v38  ;;  %v5122_v51 = vrot.slane %v5108_v5, %v14417_v27  ;;  %vm6162_vm3 = vcmask 1041408  }
 0x30e   :  { %v2992_v50 = vrot.slane %v2991_v15, 2  ;;  %v2998_v26 = vmax.f32 %v2996_v9, %v2997_v13  ;;  %v3005_v52 = vmax.f32 %v3003_v46, %v3004_v23  ;;  %v3011_v0 = vrot.slane %v3010_v10, 4 }
 0x30f   :  { %v2089_v3 = vcombine.high %v1597_v8, %v1597_v8  ;;  %v2096_v54 = vrot.slane %v1597_v8, %v14417_v27  ;;  %v5123_v56 = vcombine.low %v5115_v14, %v5122_v51  ;;  %v11738_v13 = vadd.f32 -1.0, %v13196_v6 }
 0x310   :  { %v2993_v34 = vmax.f32 %v2991_v15, %v2992_v50  ;;  %v2999_v53 = vrot.slane %v2998_v26, 2  ;;  %v3006_v31 = vrot.slane %v3005_v52, 2  ;;  %v3012_v37 = vmax.f32 %v3010_v10, %v3011_v0 }
 0x311   :  { %v2103_v38 = vrot.slane %v2089_v3, %v14417_v27  ;;  %v2104_v48 = vcombine.high %v2096_v54, %v2096_v54  ;;  %v3017_v5 = vsel %vm2260_vm5, %v2096_v54, -inf  ;;  %12601 = vmatmul.mubr.msk.bf16.gmra.mrb[72].mxu0 %vm4338_vm11, %v5123_v56  ;;  %v20764_v14 = vmov 0.0  }
 0x312   :  { %v2994_v46 = vrot.slane %v2993_v34, 1  ;;  %v3000_v9 = vmax.f32 %v2998_v26, %v2999_v53  ;;  %v3007_v23 = vmax.f32 %v3005_v52, %v3006_v31  ;;  %v3013_v8 = vrot.slane %v3012_v37, 2  ;;  %12604 = vmatprep.mubr.msk.bf16.mxu0 %vm20596_vm1, %v20764_v14 }
 0x313   :  { %v2105_v22 = vcombine.high %v2103_v38, %v2103_v38  ;;  %v3018_v50 = vrot.slane %v3017_v5, 4  ;;  %v3024_v15 = vsel %vm2260_vm5, %v2104_v48, -inf  ;;  %v3031_v0 = vsel %vm2260_vm5, %v2103_v38, -inf }
 0x314   :  { %v3001_v10 = vrot.slane %v3000_v9, 1  ;;  %v3008_v51 = vrot.slane %v3007_v23, 1  ;;  %v3014_v3 = vmax.f32 %v3012_v37, %v3013_v8  ;;  %v3609_v54 = vsel %vm3439_vm2, %v15844_v12, %v3608_v41 }
 0x315   :  { %v3019_v6 = vmax.f32 %v3017_v5, %v3018_v50  ;;  %v3025_v56 = vrot.slane %v3024_v15, 4  ;;  %v3032_v26 = vrot.slane %v3031_v0, 4  ;;  %v3038_v52 = vsel %vm2260_vm5, %v2105_v22, -inf }
 0x316   :  { %v2995_v31 = vmax.f32 %v2993_v34, %v2994_v46  ;;  %v3002_v53 = vmax.f32 %v3000_v9, %v3001_v10  ;;  %v3015_v18 = vrot.slane %v3014_v3, 1  ;;  %v1538_v44 = vmul.f32 1.6732632, %v11738_v13 }
 0x317   :  { %v3020_v16 = vrot.slane %v3019_v6, 2  ;;  %v3026_v21 = vmax.f32 %v3024_v15, %v3025_v56  ;;  %v3033_v48 = vmax.f32 %v3031_v0, %v3032_v26  ;;  %v3039_v30 = vrot.slane %v3038_v52, 4 }
 0x318   :  { %v3204_v38 = vpack.c.bf16 %v16015_v2, %v16015_v2  ;;  %v3009_v37 = vmax.f32 %v3007_v23, %v3008_v51  ;;  %v3610_v41 = vsel %vm3441_vm4, %v15849_v59, %v3609_v54  ;;  %v3016_v5 = vmax.f32 %v3014_v3, %v3015_v18  ;;  %v13254_v2 = vld [vmem:[%s20300_s2] ss:$0 sm:$0xff] }
 0x319   :  { %v3027_v8 = vrot.slane %v3026_v21, 2  ;;  %v3034_v22 = vrot.slane %v3033_v48, 2  ;;  %v3040_v34 = vmax.f32 %v3038_v52, %v3039_v30  ;;  %v3205_v46 = vpack.c.bf16 %v2995_v31, %v2995_v31  ;;  %v20765_v23 = vld [vmem:[#allocation88_spill] sm:$0xff] }
 0x31a   :  { %v1568_v13 = vsel %vm1418_vm9, %v15998_v43, %v1538_v44  ;;  %v3603_v9 = vsel %vm3441_vm4, %v15718_v29, %v16074_v58  ;;  %v16112_v50 = vadd.f32 %v13254_v2, %v20765_v23  ;;  %v16114_v15 = vpop.f32.mrb[64].mxu0  ;;  %v3206_v18 = vpack.c.bf16 %v3002_v53, %v3002_v53 }
 0x31b   :  { %20766 = vst [vmem:[#allocation88_spill] sm:$0xff] %v16114_v15  ;;  %v3021_v0 = vmax.f32 %v3019_v6, %v3020_v16  ;;  %v3028_v10 = vmax.f32 %v3026_v21, %v3027_v8  ;;  %v3035_v30 = vmax.f32 %v3033_v48, %v3034_v22  ;;  %v12594_v51 = vpop.f32.mrb[65].mxu0  ;;  %v20767_v44 = vpack.c.bf16 %v15970_v20, %v15970_v20 }
 0x31c   :  { %v20769_v58 = vpack.c.bf16 %v15972_v63, %v15972_v63  ;;  %v1598_v54 = vmul.f32 1.050701, %v1568_v13  ;;  %v3633_v56 = vpack.c.b16 %v3610_v41, %v3603_v9  ;;  %v16126_v26 = vpop.f32.mrb[66].mxu0  ;;  %v16128_v52 = vunpack.c.l.b16 %v3204_v38 }
 0x31d   :  { %v16119_v43 = vunpack.c.l.b16 %v20767_v44  ;;  %20770 = vst [vmem:[#allocation102_spill] sm:$0xff] %v16126_v26  ;;  %v3207_v16 = vpack.c.bf16 %v3009_v37, %v3009_v37  ;;  %v3208_v21 = vpack.c.bf16 %v3016_v5, %v3016_v5  ;;  %v3041_v6 = vrot.slane %v3040_v34, 2  ;;  %v12595_v31 = vpop.f32.mrb[67].mxu0 }
 0x31e   :  { %v16124_v3 = vunpack.c.l.b16 %v20769_v58  ;;  %v16130_v53 = vunpack.c.l.b16 %v3205_v46  ;;  %v2106_v20 = vcombine.high %v1598_v54, %v1598_v54  ;;  %v2113_v48 = vrot.slane %v1598_v54, %v14417_v27  ;;  %3646 = vrot.lane.b32.xlu0 %v3633_v56, %s13291_s18 }
 0x31f   :  { %20768 = vst [vmem:[#allocation101_spill] sm:$0xff] %v16119_v43  ;;  %v1478_v63 = vmul.f32 1.442695, %v16112_v50  ;;  %v16135_v8 = vunpack.c.l.b16 %v3206_v18  ;;  %v3022_v41 = vrot.slane %v3021_v0, 1  ;;  %v3029_v22 = vrot.slane %v3028_v10, 1 }
 0x320   :  { %v3036_v13 = vrot.slane %v3035_v30, 1  ;;  %v2120_v38 = vrot.slane %v2106_v20, %v14417_v27  ;;  %v2121_v37 = vcombine.high %v2113_v48, %v2113_v48  ;;  %v3045_v5 = vsel %vm2260_vm5, %v2113_v48, -inf }
 0x321   :  { %13197 = vpow2.f32 %v1478_v63  ;;  %v16139_v46 = vunpack.c.l.b16 %v3207_v16  ;;  %v16141_v9 = vunpack.c.l.b16 %v3208_v21  ;;  %v3042_v2 = vmax.f32 %v3040_v34, %v3041_v6 }
 0x322   :  { %v3817_v23 = vsel %vm3429_vm7, %v15656_v24, %v15649_v33  ;;  %v2122_v18 = vcombine.high %v2120_v38, %v2120_v38  ;;  %v3046_v51 = vrot.slane %v3045_v5, 4  ;;  %v3052_v44 = vsel %vm2260_vm5, %v2121_v37, -inf  ;;  %v20776_v33 = vld [vmem:[#allocation53_spill] sm:$0xff] }
 0x323   :  { %v3059_v58 = vsel %vm2260_vm5, %v2120_v38, -inf  ;;  %v3023_v54 = vmax.f32 %v3021_v0, %v3022_v41  ;;  %v3030_v56 = vmax.f32 %v3028_v10, %v3029_v22  ;;  %v3037_v31 = vmax.f32 %v3035_v30, %v3036_v13 }
 0x324   :  { %v3053_v20 = vrot.slane %v3052_v44, 4  ;;  %v3047_v48 = vmax.f32 %v3045_v5, %v3046_v51  ;;  %v3060_v16 = vrot.slane %v3059_v58, 4  ;;  %v3066_v21 = vsel %vm2260_vm5, %v2122_v18, -inf }
 0x325   :  { %v3818_v34 = vsel %vm3431_vm6, %v20748_v36, %v3817_v23  ;;  %v3043_v6 = vrot.slane %v3042_v2, 1  ;;  %v3067_v26 = vrot.slane %v3066_v21, 4  ;;  %v3824_v10 = vsel %vm3429_vm7, %v15747_v4, %v15738_v1 }
 0x326   :  { %v3054_v63 = vmax.f32 %v3052_v44, %v3053_v20  ;;  %v3819_v15 = vsel %vm3433_vm12, %v20751_v57, %v3818_v34  ;;  %v3048_v37 = vrot.slane %v3047_v48, 2  ;;  %v3061_v24 = vmax.f32 %v3059_v58, %v3060_v16 }
 0x327   :  { %v3820_v0 = vsel %vm3435_vm13, %v20761_v19, %v3819_v15  ;;  %v3068_v41 = vmax.f32 %v3066_v21, %v3067_v26  ;;  %v3825_v13 = vsel %vm3431_vm6, %v15789_v39, %v3824_v10  ;;  %v3209_v38 = vpack.c.bf16 %v3023_v54, %v3023_v54 }
 0x328   :  { %v3055_v30 = vrot.slane %v3054_v63, 2  ;;  %v3821_v22 = vsel %vm3437_vm15, %v15718_v29, %v3820_v0  ;;  %v3049_v5 = vmax.f32 %v3047_v48, %v3048_v37  ;;  %v3062_v23 = vrot.slane %v3061_v24, 2 }
 0x329   :  { %v3826_v18 = vsel %vm3433_vm12, %v15791_v49, %v3825_v13  ;;  %v3069_v15 = vrot.slane %v3068_v41, 2  ;;  %v3822_v44 = vsel %vm3439_vm2, %v15725_v60, %v3821_v22  ;;  %v16168_v20 = vmax.f32 %v3042_v2, %v3043_v6 }
 0x32a   :  { %v3056_v51 = vmax.f32 %v3054_v63, %v3055_v30  ;;  %v3827_v26 = vsel %vm3435_vm13, %v15844_v12, %v3826_v18  ;;  %v3063_v16 = vmax.f32 %v3061_v24, %v3062_v23  ;;  %v4037_v48 = vsel %vm3429_vm7, %v20751_v57, %v20748_v36 }
 0x32b   :  { %v13198_v58 = vpop.eup %13197  ;;  %v3828_v54 = vsel %vm3437_vm15, %v15849_v59, %v3827_v26  ;;  %v3210_v21 = vpack.c.bf16 %v3030_v56, %v3030_v56  ;;  %v3211_v34 = vpack.c.bf16 %v3037_v31, %v3037_v31  ;;  %v3050_v0 = vrot.slane %v3049_v5, 1 }
 0x32c   :  { %v11739_v63 = vadd.f32 -1.0, %v13198_v58  ;;  %v3829_v37 = vsel %vm3439_vm2, %v15853_v25, %v3828_v54  ;;  %v3823_v10 = vsel %vm3441_vm4, %v15723_v32, %v3822_v44  ;;  %v4038_v2 = vsel %vm3431_vm6, %v20761_v19, %v4037_v48 }
 0x32d   :  { %v3830_v24 = vsel %vm3441_vm4, %v15865_v17, %v3829_v37  ;;  %v3057_v6 = vrot.slane %v3056_v51, 1  ;;  %v3070_v30 = vmax.f32 %v3068_v41, %v3069_v15  ;;  %v3064_v56 = vrot.slane %v3063_v16, 1 }
 0x32e   :  { %v1539_v22 = vmul.f32 1.6732632, %v11739_v63  ;;  %v3853_v13 = vpack.c.b16 %v3830_v24, %v3823_v10  ;;  %vm1419_vm10 = vcmp.gt.f32.partialorder %v16112_v50, 0.0  ;;  %v4039_v31 = vsel %vm3433_vm12, %v15718_v29, %v4038_v2 }
 0x32f   :  { %v4044_v23 = vsel %vm3429_vm7, %v15791_v49, %v15789_v39  ;;  %v16191_v44 = vunpack.c.l.b16 %v3209_v38  ;;  %v4040_v41 = vsel %vm3435_vm13, %v15725_v60, %v4039_v31  ;;  %v16197_v15 = vunpack.c.l.b16 %v3210_v21 }
 0x330   :  { %v1569_v26 = vsel %vm1419_vm10, %v16112_v50, %v1539_v22  ;;  %3866 = vrot.lane.b32.xlu1 %v3853_v13, %s13291_s18  ;;  %v16199_v58 = vunpack.c.l.b16 %v3211_v34  ;;  %v4041_v48 = vsel %vm3437_vm15, %v15723_v32, %v4040_v41  ;;  %v16203_v63 = vmax.f32 %v3049_v5, %v3050_v0 }
 0x331   :  { %v1599_v54 = vmul.f32 1.050701, %v1569_v26  ;;  %v16205_v37 = vmax.f32 %v3056_v51, %v3057_v6  ;;  %v3071_v38 = vrot.slane %v3070_v30, 1  ;;  %v4045_v50 = vsel %vm3431_vm6, %v15844_v12, %v4044_v23 }
 0x332   :  { %v16209_v10 = vmax.f32 %v3063_v16, %v3064_v56  ;;  %v4042_v34 = vsel %vm3439_vm2, %v15738_v1, %v4041_v48  ;;  %v4046_v5 = vsel %vm3433_vm12, %v15849_v59, %v4045_v50  ;;  %v4257_v51 = vsel %vm3429_vm7, %v15718_v29, %v20761_v19 }
 0x333   :  { %v2123_v24 = vcombine.high %v1599_v54, %v1599_v54  ;;  %v2130_v21 = vrot.slane %v1599_v54, %v14417_v27  ;;  %v4043_v2 = vsel %vm3441_vm4, %v15747_v4, %v4042_v34  ;;  %v4264_v16 = vsel %vm3429_vm7, %v15849_v59, %v15844_v12 }
 0x334   :  { %v4047_v13 = vsel %vm3435_vm13, %v15853_v25, %v4046_v5  ;;  %v4258_v23 = vsel %vm3431_vm6, %v15725_v60, %v4257_v51  ;;  %v4265_v26 = vsel %vm3431_vm6, %v15853_v25, %v4264_v16 }
 0x335   :  { %v2137_v0 = vrot.slane %v2123_v24, %v14417_v27  ;;  %v2138_v6 = vcombine.high %v2130_v21, %v2130_v21  ;;  %v3073_v22 = vsel %vm2260_vm5, %v2130_v21, -inf  ;;  %v4048_v31 = vsel %vm3437_vm15, %v15865_v17, %v4047_v13 }
 0x336   :  { %v3074_v56 = vrot.slane %v3073_v22, 4  ;;  %v4049_v50 = vsel %vm3439_vm2, %v15867_v62, %v4048_v31  ;;  %v4259_v16 = vsel %vm3433_vm12, %v15723_v32, %v4258_v23  ;;  %v3072_v31 = vmax.f32 %v3070_v30, %v3071_v38 }
 0x337   :  { %v2139_v41 = vcombine.high %v2137_v0, %v2137_v0  ;;  %v3080_v54 = vsel %vm2260_vm5, %v2138_v6, -inf  ;;  %v3087_v48 = vsel %vm2260_vm5, %v2137_v0, -inf  ;;  %v4050_v5 = vsel %vm3441_vm4, %v15948_v47, %v4049_v50 }
 0x338   :  { %v3075_v24 = vmax.f32 %v3073_v22, %v3074_v56  ;;  %v3081_v21 = vrot.slane %v3080_v54, 4  ;;  %v3088_v34 = vrot.slane %v3087_v48, 4  ;;  %v4073_v51 = vpack.c.b16 %v4050_v5, %v4043_v2  ;;  %v20771_v2 = vld [vmem:[#allocation41_spill] sm:$0xff] }
 0x339   :  { %v3094_v13 = vsel %vm2260_vm5, %v2139_v41, -inf  ;;  %v4266_v6 = vsel %vm3433_vm12, %v15865_v17, %v4265_v26  ;;  %v4260_v22 = vsel %vm3435_vm13, %v15738_v1, %v4259_v16  ;;  %v20772_v41 = vld [vmem:[#allocation42_spill] sm:$0xff] }
 0x33a   :  { %v3076_v18 = vrot.slane %v3075_v24, 2  ;;  %v3082_v0 = vmax.f32 %v3080_v54, %v3081_v21  ;;  %v3089_v19 = vmax.f32 %v3087_v48, %v3088_v34  ;;  %v3095_v57 = vrot.slane %v3094_v13, 4  ;;  %4086 = vrot.lane.b32.xlu0 %v4073_v51, %s13291_s18  ;;  %v20773_v48 = vld [vmem:[#allocation43_spill] sm:$0xff]  ;;  %v12759_v34 = vld [vmem:[%s20301_s3 + $0xc0] sm:$0xff]  }
 0x33b   :  { %v4267_v56 = vsel %vm3435_vm13, %v15867_v62, %v4266_v6  ;;  %v3684_v23 = vsel %vm3429_vm7, %v20772_v41, %v20771_v2  ;;  %v3213_v54 = vpack.c.bf16 %v16203_v63, %v16203_v63  ;;  %v4261_v30 = vsel %vm3437_vm15, %v15747_v4, %v4260_v22  ;;  %v20774_v22 = vld [vmem:[#allocation46_spill] sm:$0xff]  ;;  %12244 = vmatprep.subr.bf16.mxu1 %v12759_v34 }
 0x33c   :  { %v3077_v50 = vmax.f32 %v3075_v24, %v3076_v18  ;;  %v3083_v5 = vrot.slane %v3082_v0, 2  ;;  %v3090_v26 = vrot.slane %v3089_v19, 2  ;;  %v3096_v36 = vmax.f32 %v3094_v13, %v3095_v57  ;;  %v12760_v57 = vld [vmem:[%s20301_s3 + $0x80] sm:$0xff]   ;;  %v12761_v18 = vld [vmem:[%s20301_s3 + $0xc8] sm:$0xff]  }
 0x33d   :  { %v4268_v38 = vsel %vm3437_vm15, %v15948_v47, %v4267_v56  ;;  %v3685_v21 = vsel %vm3431_vm6, %v20773_v48, %v3684_v23  ;;  %v4262_v16 = vsel %vm3439_vm2, %v15789_v39, %v4261_v30  ;;  %v20775_v23 = vld [vmem:[#allocation52_spill] sm:$0xff]  ;;  %v3214_v41 = vpack.c.bf16 %v16205_v37, %v16205_v37  ;;  %12245 = vmatpush3.bf16.msra.mxu1 %v12760_v57 }
 0x33e   :  { %v3078_v63 = vrot.slane %v3077_v50, 1  ;;  %v3084_v24 = vmax.f32 %v3082_v0, %v3083_v5  ;;  %v3091_v13 = vmax.f32 %v3089_v19, %v3090_v26  ;;  %v3097_v51 = vrot.slane %v3096_v36, 2  ;;  %12246 = vmatprep.subr.bf16.mxu1 %v12761_v18 }
 0x33f   :  { %v4269_v6 = vsel %vm3439_vm2, %v15954_v11, %v4268_v38  ;;  %v3686_v56 = vsel %vm3433_vm12, %v20774_v22, %v3685_v21  ;;  %v3691_v48 = vsel %vm3429_vm7, %v20776_v33, %v20775_v23  ;;  %v3215_v19 = vpack.c.bf16 %v16209_v10, %v16209_v10  ;;  %v20777_v38 = vld [vmem:[#allocation47_spill] sm:$0xff]  ;;  %v20778_v22 = vld [vmem:[#allocation50_spill] sm:$0xff]  ;;  %v3641_v23 = vpop.permute.xlu0 %3640 }
 0x340   :  { %v3216_v0 = vpack.c.bf16 %v3072_v31, %v3072_v31  ;;  %v3085_v5 = vrot.slane %v3084_v24, 1  ;;  %v3098_v26 = vmax.f32 %v3096_v36, %v3097_v51  ;;  %v4270_v30 = vsel %vm3441_vm4, %v15956_v45, %v4269_v6 }
 0x341   :  { %v3687_v21 = vsel %vm3435_vm13, %v20777_v38, %v3686_v56  ;;  %v3692_v33 = vsel %vm3431_vm6, %v20778_v22, %v3691_v48  ;;  %v20779_v37 = vpack.c.bf16 %v16168_v20, %v16168_v20  ;;  %v3079_v10 = vmax.f32 %v3077_v50, %v3078_v63  ;;  %v20781_v56 = vld [vmem:[#allocation54_spill] sm:$0xff]  ;;  %v20783_v20 = vld [vmem:[#allocation61_spill] sm:$0xff]  ;;  %v20785_v50 = vld [vmem:[#allocation48_spill] sm:$0xff] }
 0x342   :  { %v3092_v31 = vrot.slane %v3091_v13, 1  ;;  %v4263_v36 = vsel %vm3441_vm4, %v15791_v49, %v4262_v16  ;;  %v16296_v57 = vunpack.c.l.b16 %v3213_v54  ;;  %v3086_v51 = vmax.f32 %v3084_v24, %v3085_v5  ;;  %v20787_v24 = vld [vmem:[#allocation49_spill] sm:$0xff]  ;;  %v20788_v5 = vld [vmem:[#allocation55_spill] sm:$0xff] }
 0x343   :  { %v16292_v34 = vunpack.c.l.b16 %v20779_v37  ;;  %v4293_v6 = vpack.c.b16 %v4270_v30, %v4263_v36  ;;  %v3693_v38 = vsel %vm3433_vm12, %v20781_v56, %v3692_v33  ;;  %v16300_v48 = vunpack.c.l.b16 %v3214_v41  ;;  %v20784_v37 = vld [vmem:[#allocation78_spill] sm:$0xff] }
 0x344   :  { %20780 = vst [vmem:[#allocation103_spill] sm:$0xff] %v16296_v57  ;;  %v16302_v18 = vunpack.c.l.b16 %v3215_v19  ;;  %v3528_v22 = vpack.c.b16 %v20784_v37, %v20783_v20  ;;  %v3688_v63 = vsel %vm3437_vm15, %v20785_v50, %v3687_v21  ;;  %v16308_v2 = vunpack.c.l.b16 %v3216_v0  ;;  %v12762_v41 = vld [vmem:[%s20301_s3 + $0x88] sm:$0xff]   ;;  %v20789_v0 = vld [vmem:[#allocation56_spill] sm:$0xff] }
 0x345   :  { %v3099_v54 = vrot.slane %v3098_v26, 1  ;;  %4306 = vrot.lane.b32.xlu1 %v4293_v6, %s13291_s18  ;;  %v3689_v16 = vsel %vm3439_vm2, %v20787_v24, %v3688_v63  ;;  %v3694_v33 = vsel %vm3435_vm13, %v20788_v5, %v3693_v38  ;;  %v16318_v19 = vmax.f32 %v3091_v13, %v3092_v31  ;;  %v20790_v6 = vld [vmem:[#allocation57_spill] sm:$0xff]  ;;  %12247 = vmatpush3.bf16.msra.mxu1 %v12762_v41  ;;  %v20791_v13 = vld [vmem:[#allocation51_spill] sm:$0xff]  ;;  %v3861_v31 = vpop.permute.xlu1 %3860 }
 0x346   :  { %20782 = vst [vmem:[#allocation54_spill] sm:$0xff] %v16302_v18  ;;  %20786 = vst [vmem:[#allocation61_spill] sm:$0xff] %v16308_v2  ;;  %v3217_v30 = vpack.c.bf16 %v3079_v10, %v3079_v10  ;;  %v4347_v21 = vsel %vm4338_vm11, %v3528_v22, %v3641_v23  ;;  %v3695_v36 = vsel %vm3437_vm15, %v20789_v0, %v3694_v33  ;;  %v20792_v22 = vld [vmem:[#allocation58_spill] sm:$0xff] }
 0x347   :  { %v3218_v20 = vpack.c.bf16 %v3086_v51, %v3086_v51  ;;  %v3696_v37 = vsel %vm3439_vm2, %v20790_v6, %v3695_v36  ;;  %v3502_v38 = vsel %vm3429_vm7, %v15725_v60, %v15718_v29  ;;  %v3509_v63 = vsel %vm3429_vm7, %v15853_v25, %v15849_v59 }
 0x348   :  { %v3690_v10 = vsel %vm3441_vm4, %v20791_v13, %v3689_v16  ;;  %v3697_v23 = vsel %vm3441_vm4, %v20792_v22, %v3696_v37  ;;  %v3503_v51 = vsel %vm3431_vm6, %v15723_v32, %v3502_v38  ;;  %v3510_v33 = vsel %vm3431_vm6, %v15865_v17, %v3509_v63 }
 0x349   :  { %v16339_v36 = vmax.f32 %v3098_v26, %v3099_v54  ;;  %v3748_v60 = vpack.c.b16 %v3697_v23, %v3690_v10  ;;  %v3504_v29 = vsel %vm3433_vm12, %v15738_v1, %v3503_v51  ;;  %v3511_v41 = vsel %vm3433_vm12, %v15867_v62, %v3510_v33 }
 0x34a   :  { %v16347_v37 = vunpack.c.l.b16 %v3217_v30  ;;  %v3505_v38 = vsel %vm3435_vm13, %v15747_v4, %v3504_v29  ;;  %v3512_v63 = vsel %vm3435_vm13, %v15948_v47, %v3511_v41  ;;  %v3611_v23 = vsel %vm3429_vm7, %v15865_v17, %v15853_v25 }
 0x34b   :  { %v4371_v26 = vsel %vm4338_vm11, %v3748_v60, %v3861_v31  ;;  %v3506_v54 = vsel %vm3437_vm15, %v15789_v39, %v3505_v38  ;;  %v3513_v10 = vsel %vm3437_vm15, %v15954_v11, %v3512_v63  ;;  %v16361_v30 = vunpack.c.l.b16 %v3218_v20 }
 0x34c   :  { %20793 = vst [vmem:[#allocation78_spill] sm:$0xff] %v16347_v37  ;;  %v4573_v51 = vcombine.low %v4347_v21, %v4371_v26  ;;  %v4574_v33 = vcombine.high %v4347_v21, %v4371_v26  ;;  %v3507_v29 = vsel %vm3439_vm2, %v15791_v49, %v3506_v54  ;;  %v3514_v31 = vsel %vm3439_vm2, %v15956_v45, %v3513_v10 }
 0x34d   :  { %20794 = vst [vmem:[#allocation55_spill] sm:$0xff] %v16361_v30  ;;  %v16367_v60 = vsel %vm3441_vm4, %v15844_v12, %v3507_v29  ;;  %v4702_v41 = vcombine.high %v16065_v35, %v16065_v35  ;;  %v3618_v20 = vsel %vm3429_vm7, %v16124_v3, %v16119_v43  ;;  %v16380_v63 = vsel %vm3441_vm4, %v15968_v28, %v3514_v31 }
 0x34e   :  { %20795 = vst [vmem:[#allocation58_spill] sm:$0xff] %v16367_v60  ;;  %v4583_v38 = vrot.slane %v4573_v51, %v14417_v27  ;;  %v4590_v21 = vrot.slane %v4574_v33, %v14417_v27  ;;  %20796 = vst [vmem:[#allocation104_spill] sm:$0xff] %v16380_v63  ;;  %v3612_v26 = vsel %vm3431_vm6, %v15867_v62, %v3611_v23 }
 0x34f   :  { %v4335_v54 = vpack.c.b16 %v16380_v63, %v16367_v60  ;;  %v11744_v35 = vpack.c.b16 %v16380_v63, %v16380_v63  ;;  %v3613_v10 = vsel %vm3433_vm12, %v15948_v47, %v3612_v26  ;;  %v3619_v51 = vsel %vm3431_vm6, %v16128_v52, %v3618_v20 }
 0x350   :  { %v5028_v33 = vrot.slane %v4583_v38, %v14417_v27  ;;  %v5042_v29 = vrot.slane %v4590_v21, %v14417_v27  ;;  %v3614_v31 = vsel %vm3435_vm13, %v15954_v11, %v3613_v10  ;;  %v3620_v23 = vsel %vm3433_vm12, %v16130_v53, %v3619_v51 }
 0x351   :  { %v4746_v16 = vrot.slane %v4335_v54, %v14417_v27  ;;  %v16400_v63 = vrot.slane %v11744_v35, %v14417_v27  ;;  %v3615_v26 = vsel %vm3437_vm15, %v15956_v45, %v3614_v31  ;;  %v3621_v20 = vsel %vm3435_vm13, %v16135_v8, %v3620_v23  ;;  %v12764_v23 = vld [vmem:[%s20301_s3 + $0x90] sm:$0xff]  }
 0x352   :  { %v5051_v38 = vcombine.high %v5028_v33, %v5042_v29  ;;  %v5050_v60 = vcombine.low %v5028_v33, %v5042_v29  ;;  %v3616_v21 = vsel %vm3439_vm2, %v15968_v28, %v3615_v26  ;;  %v3622_v10 = vsel %vm3437_vm15, %v16139_v46, %v3621_v20 }
 0x353   :  { %v4754_v51 = vcombine.high %v4746_v16, %v4746_v16  ;;  %v5160_v17 = vcombine.low %v4702_v41, %v4746_v16  ;;  %v3617_v54 = vsel %vm3441_vm4, %v16054_v40, %v3616_v21  ;;  %v3623_v35 = vsel %vm3439_vm2, %v16141_v9, %v3622_v10  ;;  %v12763_v41 = vld [vmem:[%s20301_s3 + $0xd0] sm:$0xff]   ;;  %v12765_v10 = vld [vmem:[%s20301_s3 + $0xd8] sm:$0xff]  }
 0x354   :  { %5569 = vmatprep.mubr.bf16.mxu1 %v5051_v38  ;;  %v3624_v31 = vsel %vm3441_vm4, %v16191_v44, %v3623_v35  ;;  %v3831_v33 = vsel %vm3429_vm7, %v15948_v47, %v15867_v62  ;;  %v3838_v29 = vsel %vm3429_vm7, %v16130_v53, %v16128_v52  ;;  %v4051_v16 = vsel %vm3429_vm7, %v15956_v45, %v15954_v11 }
 0x355   :  { %v5161_v26 = vcombine.low %v4754_v51, %v16400_v63  ;;  %v5168_v20 = vrot.slane %v5160_v17, %v14417_v27  ;;  %5570 = vmatmul.mubr.bf16.gmra.mrb[8].mxu1 %v5050_v60  ;;  %v3634_v38 = vpack.c.b16 %v3624_v31, %v3617_v54  ;;  %v3832_v21 = vsel %vm3431_vm6, %v15954_v11, %v3831_v33 }
 0x356   :  { %v3833_v35 = vsel %vm3433_vm12, %v15956_v45, %v3832_v21  ;;  %v3839_v47 = vsel %vm3431_vm6, %v16135_v8, %v3838_v29  ;;  %v4052_v51 = vsel %vm3431_vm6, %v15968_v28, %v4051_v16  ;;  %v4058_v17 = vsel %vm3429_vm7, %v16139_v46, %v16135_v8  ;;  %12248 = vmatprep.subr.bf16.mxu1 %v12763_v41 }
 0x357   :  { %v5175_v60 = vrot.slane %v5161_v26, %v14417_v27  ;;  %3648 = vrot.lane.b32.xlu0 %v3634_v38, %s13291_s18  ;;  %v3834_v54 = vsel %vm3435_vm13, %v15968_v28, %v3833_v35  ;;  %v3840_v31 = vsel %vm3433_vm12, %v16139_v46, %v3839_v47  ;;  %v4053_v33 = vsel %vm3433_vm12, %v16054_v40, %v4052_v51  ;;  %v12766_v51 = vld [vmem:[%s20301_s3 + $0x98] sm:$0xff]  }
 0x358   :  { %v3835_v29 = vsel %vm3437_vm15, %v16054_v40, %v3834_v54  ;;  %v3841_v16 = vsel %vm3435_vm13, %v16141_v9, %v3840_v31  ;;  %v4054_v41 = vsel %vm3435_vm13, %v16119_v43, %v4053_v33  ;;  %v4059_v26 = vsel %vm3431_vm6, %v16141_v9, %v4058_v17  ;;  %12249 = vmatpush3.bf16.msra.mxu1 %v12764_v23 }
 0x359   :  { %v5176_v38 = vcombine.low %v5168_v20, %v5175_v60  ;;  %v3836_v47 = vsel %vm3439_vm2, %v16119_v43, %v3835_v29  ;;  %v3842_v21 = vsel %vm3437_vm15, %v16191_v44, %v3841_v16  ;;  %v4055_v35 = vsel %vm3437_vm15, %v16124_v3, %v4054_v41  ;;  %12250 = vmatprep.subr.bf16.mxu1 %v12765_v10 }
 0x35a   :  { %v3837_v54 = vsel %vm3441_vm4, %v16124_v3, %v3836_v47  ;;  %v3843_v23 = vsel %vm3439_vm2, %v16197_v15, %v3842_v21  ;;  %v4056_v20 = vsel %vm3439_vm2, %v16128_v52, %v4055_v35  ;;  %v4060_v17 = vsel %vm3433_vm12, %v16191_v44, %v4059_v26 }
 0x35b   :  { %12605 = vmatmul.mubr.msk.bf16.gmra.mrb[76].mxu0 %vm4338_vm11, %v5176_v38  ;;  %v3844_v10 = vsel %vm3441_vm4, %v16199_v58, %v3843_v23  ;;  %v4057_v60 = vsel %vm3441_vm4, %v16130_v53, %v4056_v20  ;;  %v4061_v31 = vsel %vm3435_vm13, %v16197_v15, %v4060_v17  ;;  %v4271_v33 = vsel %vm3429_vm7, %v16054_v40, %v15968_v28  ;;  %v20802_v28 = vld [vmem:[#allocation14_spill] sm:$0xff] }
 0x35c   :  { %v3854_v29 = vpack.c.b16 %v3844_v10, %v3837_v54  ;;  %v4062_v16 = vsel %vm3437_vm15, %v16199_v58, %v4061_v31  ;;  %v4272_v41 = vsel %vm3431_vm6, %v16119_v43, %v4271_v33  ;;  %v4278_v26 = vsel %vm3429_vm7, %v16191_v44, %v16141_v9  ;;  %12608 = vmatprep.mubr.msk.bf16.mxu0 %vm20596_vm1, %v20764_v14  ;;  %v12767_v54 = vld [vmem:[%s20301_s3 + $0xe0] sm:$0xff]  }
 0x35d   :  { %v4063_v38 = vsel %vm3439_vm2, %v16292_v34, %v4062_v16  ;;  %v4273_v47 = vsel %vm3433_vm12, %v16124_v3, %v4272_v41  ;;  %v4279_v21 = vsel %vm3431_vm6, %v16197_v15, %v4278_v26  ;;  %v3625_v35 = vsel %vm3429_vm7, %v16199_v58, %v16197_v15  ;;  %12251 = vmatpush3.bf16.msra.mxu1 %v12766_v51  ;;  %v12768_v51 = vld [vmem:[%s20301_s3 + $0xa0] sm:$0xff]  }
 0x35e   :  { %3868 = vrot.lane.b32.xlu1 %v3854_v29, %s13291_s18  ;;  %v4064_v23 = vsel %vm3441_vm4, %v16296_v57, %v4063_v38  ;;  %v4274_v20 = vsel %vm3435_vm13, %v16128_v52, %v4273_v47  ;;  %v4280_v17 = vsel %vm3433_vm12, %v16199_v58, %v4279_v21  ;;  %v3626_v10 = vsel %vm3431_vm6, %v16292_v34, %v3625_v35 }
 0x35f   :  { %v4074_v31 = vpack.c.b16 %v4064_v23, %v4057_v60  ;;  %v4275_v33 = vsel %vm3437_vm15, %v16130_v53, %v4274_v20  ;;  %v4281_v29 = vsel %vm3435_vm13, %v16292_v34, %v4280_v17  ;;  %v3627_v16 = vsel %vm3433_vm12, %v16296_v57, %v3626_v10  ;;  %12252 = vmatprep.subr.bf16.mxu1 %v12767_v54  ;;  %v20797_v54 = vld [vmem:[#allocation12_spill] sm:$0xff]  ;;  %v20798_v23 = vld [vmem:[#allocation11_spill] sm:$0xff] }
 0x360   :  { %v4276_v41 = vsel %vm3439_vm2, %v16135_v8, %v4275_v33  ;;  %v4282_v26 = vsel %vm3437_vm15, %v16296_v57, %v4281_v29  ;;  %v3635_v38 = vpack.c.b16 %v3627_v16, %v3627_v16  ;;  %v3845_v60 = vsel %vm3429_vm7, %v16296_v57, %v16292_v34  ;;  %v20800_v29 = vld [vmem:[#allocation20_spill] sm:$0xff]  ;;  %v20801_v16 = vld [vmem:[#allocation19_spill] sm:$0xff] }
 0x361   :  { %4088 = vrot.lane.b32.xlu0 %v4074_v31, %s13291_s18  ;;  %v4277_v47 = vsel %vm3441_vm4, %v16139_v46, %v4276_v41  ;;  %v4283_v21 = vsel %vm3439_vm2, %v16300_v48, %v4282_v26  ;;  %v3846_v35 = vsel %vm3431_vm6, %v16300_v48, %v3845_v60  ;;  %v3978_v20 = vsel %vm3429_vm7, %v20798_v23, %v20797_v54  ;;  %v20799_v31 = vld [vmem:[#allocation13_spill] sm:$0xff] }
 0x362   :  { %v4284_v17 = vsel %vm3441_vm4, %v16302_v18, %v4283_v21  ;;  %v3847_v10 = vsel %vm3433_vm12, %v16302_v18, %v3846_v35  ;;  %v3979_v33 = vsel %vm3431_vm6, %v20799_v31, %v3978_v20  ;;  %v3985_v41 = vsel %vm3429_vm7, %v20801_v16, %v20800_v29  ;;  %12253 = vmatpush3.bf16.msra.mxu1 %v12768_v51  ;;  %v20803_v23 = vld [vmem:[#allocation21_spill] sm:$0xff]  ;;  %v20804_v21 = vld [vmem:[#allocation15_spill] sm:$0xff]  ;;  %v20805_v35 = vld [vmem:[#allocation22_spill] sm:$0xff] }
 0x363   :  { %v4294_v26 = vpack.c.b16 %v4284_v17, %v4277_v47  ;;  %v3855_v60 = vpack.c.b16 %v3847_v10, %v3847_v10  ;;  %v3980_v45 = vsel %vm3433_vm12, %v20802_v28, %v3979_v33  ;;  %v3986_v54 = vsel %vm3431_vm6, %v20803_v23, %v3985_v41  ;;  %v12769_v47 = vld [vmem:[%s20301_s3 + $0xe8] sm:$0xff]   ;;  %v20808_v33 = vld [vmem:[#allocation24_spill] sm:$0xff] }
 0x364   :  { %v3981_v11 = vsel %vm3435_vm13, %v20804_v21, %v3980_v45  ;;  %v3987_v62 = vsel %vm3433_vm12, %v20805_v35, %v3986_v54  ;;  %v4198_v20 = vsel %vm3429_vm7, %v20802_v28, %v20799_v31  ;;  %v4205_v51 = vsel %vm3429_vm7, %v20805_v35, %v20803_v23  ;;  %v20807_v45 = vld [vmem:[#allocation16_spill] sm:$0xff]  ;;  %v20809_v23 = vld [vmem:[#allocation17_spill] sm:$0xff]  ;;  %12254 = vmatprep.subr.bf16.mxu1 %v12769_v47  ;;  %v20824_v31 = vld [vmem:[#allocation42_spill] sm:$0xff] }
 0x365   :  { %v20806_v17 = vpack.c.bf16 %v16318_v19, %v16318_v19  ;;  %4308 = vrot.lane.b32.xlu1 %v4294_v26, %s13291_s18  ;;  %3650 = vrot.lane.b32.xlu0 %v3635_v38, %s13291_s18  ;;  %v3982_v54 = vsel %vm3437_vm15, %v20807_v45, %v3981_v11  ;;  %v3988_v41 = vsel %vm3435_vm13, %v20808_v33, %v3987_v62  ;;  %v12770_v62 = vld [vmem:[%s20301_s3 + $0xa8] sm:$0xff]  }
 0x366   :  { %v4199_v35 = vsel %vm3431_vm6, %v20804_v21, %v4198_v20  ;;  %v3983_v28 = vsel %vm3439_vm2, %v20809_v23, %v3982_v54  ;;  %v3989_v19 = vsel %vm3437_vm15, %v20728_v55, %v3988_v41  ;;  %v4206_v38 = vsel %vm3431_vm6, %v20808_v33, %v4205_v51  ;;  %v20810_v11 = vld [vmem:[#allocation18_spill] sm:$0xff]  ;;  %12255 = vmatpush3.bf16.msra.mxu1 %v12770_v62  ;;  %v20819_v33 = vld [vmem:[#allocation39_spill] sm:$0xff]  ;;  %v20821_v21 = vld [vmem:[#allocation40_spill] sm:$0xff] }
 0x367   :  { %v16575_v10 = vunpack.c.l.b16 %v20806_v17  ;;  %v4200_v26 = vsel %vm3433_vm12, %v20807_v45, %v4199_v35  ;;  %v3984_v20 = vsel %vm3441_vm4, %v20810_v11, %v3983_v28  ;;  %v3990_v17 = vsel %vm3439_vm2, %v20729_v42, %v3989_v19  ;;  %v20811_v28 = vld [vmem:[#allocation28_spill] sm:$0xff] }
 0x368   :  { %v4201_v54 = vsel %vm3435_vm13, %v20809_v23, %v4200_v26  ;;  %v4207_v35 = vsel %vm3433_vm12, %v20728_v55, %v4206_v38  ;;  %v3991_v51 = vsel %vm3441_vm4, %v20730_v61, %v3990_v17  ;;  %v3992_v45 = vsel %vm3429_vm7, %v20811_v28, %v20732_v7  ;;  %v20812_v17 = vld [vmem:[#allocation29_spill] sm:$0xff]  ;;  %v20813_v23 = vld [vmem:[#allocation30_spill] sm:$0xff] }
 0x369   :  { %v4202_v47 = vsel %vm3437_vm15, %v20810_v11, %v4201_v54  ;;  %v4208_v41 = vsel %vm3435_vm13, %v20729_v42, %v4207_v35  ;;  %3870 = vrot.lane.b32.xlu1 %v3855_v60, %s13291_s18  ;;  %v4068_v19 = vpack.c.b16 %v3991_v51, %v3984_v20  ;;  %v3993_v54 = vsel %vm3431_vm6, %v20812_v17, %v3992_v45  ;;  %v20814_v60 = vld [vmem:[#allocation36_spill] sm:$0xff]  ;;  %v20815_v20 = vld [vmem:[#allocation37_spill] sm:$0xff] }
 0x36a   :  { %v4203_v26 = vsel %vm3439_vm2, %v20800_v29, %v4202_v47  ;;  %v4209_v38 = vsel %vm3437_vm15, %v20730_v61, %v4208_v41  ;;  %v3994_v62 = vsel %vm3433_vm12, %v20813_v23, %v3993_v54  ;;  %v3999_v51 = vsel %vm3429_vm7, %v20815_v20, %v20814_v60  ;;  %v20816_v41 = vld [vmem:[#allocation32_spill] sm:$0xff]  ;;  %v20817_v61 = vld [vmem:[#allocation38_spill] sm:$0xff] }
 0x36b   :  { %v4204_v35 = vsel %vm3441_vm4, %v20801_v16, %v4203_v26  ;;  %v4210_v42 = vsel %vm3439_vm2, %v20732_v7, %v4209_v38  ;;  %4076 = vrot.lane.b32.xlu0 %v4068_v19, %s13291_s18  ;;  %v3995_v45 = vsel %vm3435_vm13, %v20816_v41, %v3994_v62  ;;  %v4000_v26 = vsel %vm3431_vm6, %v20817_v61, %v3999_v51  ;;  %v20818_v7 = vld [vmem:[#allocation33_spill] sm:$0xff] }
 0x36c   :  { %v4211_v47 = vsel %vm3441_vm4, %v20811_v28, %v4210_v42  ;;  %v3516_v38 = vsel %vm3429_vm7, %v16119_v43, %v16054_v40  ;;  %v3996_v55 = vsel %vm3437_vm15, %v20818_v7, %v3995_v45  ;;  %v4001_v19 = vsel %vm3433_vm12, %v20819_v33, %v4000_v26  ;;  %v20820_v28 = vld [vmem:[#allocation34_spill] sm:$0xff]  ;;  %v20823_v26 = vld [vmem:[#allocation41_spill] sm:$0xff] }
 0x36d   :  { %v4288_v54 = vpack.c.b16 %v4211_v47, %v4204_v35  ;;  %v3517_v42 = vsel %vm3431_vm6, %v16124_v3, %v3516_v38  ;;  %v3997_v62 = vsel %vm3439_vm2, %v20820_v28, %v3996_v55  ;;  %v4002_v51 = vsel %vm3435_vm13, %v20821_v21, %v4001_v19  ;;  %v20822_v47 = vld [vmem:[#allocation31_spill] sm:$0xff] }
 0x36e   :  { %v3518_v16 = vsel %vm3433_vm12, %v16128_v52, %v3517_v42  ;;  %v3523_v35 = vsel %vm3429_vm7, %v16197_v15, %v16191_v44  ;;  %v3998_v45 = vsel %vm3441_vm4, %v20822_v47, %v3997_v62  ;;  %v4003_v38 = vsel %vm3437_vm15, %v20823_v26, %v4002_v51  ;;  %v20826_v51 = vld [vmem:[#allocation43_spill] sm:$0xff] }
 0x36f   :  { %4296 = vrot.lane.b32.xlu1 %v4288_v54, %s13291_s18  ;;  %v3519_v55 = vsel %vm3435_vm13, %v16130_v53, %v3518_v16  ;;  %v3524_v19 = vsel %vm3431_vm6, %v16199_v58, %v3523_v35  ;;  %v4004_v42 = vsel %vm3439_vm2, %v20824_v31, %v4003_v38  ;;  %v4755_v62 = vcombine.high %v16400_v63, %v16400_v63 }
 0x370   :  { %v3520_v43 = vsel %vm3437_vm15, %v16135_v8, %v3519_v55  ;;  %v16669_v54 = vsel %vm3433_vm12, %v16292_v34, %v3524_v19  ;;  %v4005_v29 = vsel %vm3441_vm4, %v20826_v51, %v4004_v42  ;;  %v4212_v38 = vsel %vm3429_vm7, %v20813_v23, %v20812_v17 }
 0x371   :  { %20825 = vst [vmem:[#allocation18_spill] sm:$0xff] %v16669_v54  ;;  %v3521_v16 = vsel %vm3439_vm2, %v16139_v46, %v3520_v43  ;;  %v4323_v35 = vsel %vm3435_vm13, %v16296_v57, %v16669_v54  ;;  %v4069_v55 = vpack.c.b16 %v4005_v29, %v3998_v45  ;;  %v4213_v42 = vsel %vm3431_vm6, %v20816_v41, %v4212_v38  ;;  %v16691_v43 = vpop.f32.mrb[68].mxu0  ;;  %v20828_v45 = vld [vmem:[#allocation46_spill] sm:$0xff] }
 0x372   :  { %v16685_v19 = vsel %vm3441_vm4, %v16141_v9, %v3521_v16  ;;  %v4324_v63 = vsel %vm3437_vm15, %v16300_v48, %v4323_v35  ;;  %20827 = vst [vmem:[#allocation36_spill] sm:$0xff] %v16691_v43  ;;  %v4214_v57 = vsel %vm3433_vm12, %v20818_v7, %v4213_v42  ;;  %v4219_v29 = vsel %vm3429_vm7, %v20819_v33, %v20817_v61  ;;  %v20829_v16 = vld [vmem:[#allocation47_spill] sm:$0xff]  ;;  %v12598_v35 = vpop.f32.mrb[69].mxu0 }
 0x373   :  { %v4325_v54 = vsel %vm3439_vm2, %v16302_v18, %v4324_v63  ;;  %v4006_v23 = vsel %vm3429_vm7, %v20829_v16, %v20828_v45  ;;  %4078 = vrot.lane.b32.xlu0 %v4069_v55, %s13291_s18  ;;  %v4215_v63 = vsel %vm3435_vm13, %v20820_v28, %v4214_v57  ;;  %v4220_v42 = vsel %vm3431_vm6, %v20821_v21, %v4219_v29  ;;  %v16712_v7 = vpop.f32.mrb[70].mxu0 }
 0x374   :  { %v4326_v38 = vsel %vm3441_vm4, %v16308_v2, %v4325_v54  ;;  %v4007_v43 = vsel %vm3431_vm6, %v20785_v50, %v4006_v23  ;;  %20830 = vst [vmem:[#allocation37_spill] sm:$0xff] %v16712_v7  ;;  %v4216_v55 = vsel %vm3437_vm15, %v20822_v47, %v4215_v63  ;;  %v4221_v54 = vsel %vm3433_vm12, %v20823_v26, %v4220_v42  ;;  %v12599_v35 = vpop.f32.mrb[71].mxu0 }
 0x375   :  { %v4336_v41 = vpack.c.b16 %v4326_v38, %v16685_v19  ;;  %v11745_v17 = vpack.c.b16 %v4326_v38, %v4326_v38  ;;  %v4217_v57 = vsel %vm3439_vm2, %v20814_v60, %v4216_v55  ;;  %v4222_v29 = vsel %vm3435_vm13, %v20824_v31, %v4221_v54  ;;  %v20831_v31 = vld [vmem:[#allocation52_spill] sm:$0xff] }
 0x376   :  { %v4008_v23 = vsel %vm3433_vm12, %v20787_v24, %v4007_v43  ;;  %v4013_v38 = vsel %vm3429_vm7, %v20788_v5, %v20781_v56  ;;  %v4218_v42 = vsel %vm3441_vm4, %v20815_v20, %v4217_v57  ;;  %v4223_v55 = vsel %vm3437_vm15, %v20826_v51, %v4222_v29 }
 0x377   :  { %v4799_v7 = vrot.slane %v4336_v41, %v14417_v27  ;;  %v16730_v63 = vrot.slane %v11745_v17, %v14417_v27  ;;  %v4224_v54 = vsel %vm3439_vm2, %v20828_v45, %v4223_v55  ;;  %v4009_v43 = vsel %vm3435_vm13, %v20791_v13, %v4008_v23  ;;  %v20832_v55 = vld [vmem:[#allocation53_spill] sm:$0xff] }
 0x378   :  { %v4014_v35 = vsel %vm3431_vm6, %v20789_v0, %v4013_v38  ;;  %v4226_v17 = vsel %vm3429_vm7, %v20787_v24, %v20785_v50  ;;  %v4225_v57 = vsel %vm3441_vm4, %v20829_v16, %v4224_v54  ;;  %v4010_v29 = vsel %vm3437_vm15, %v20831_v31, %v4009_v43  ;;  %v20837_v50 = vld [vmem:[#allocation60_spill] sm:$0xff] }
 0x379   :  { %v4807_v41 = vcombine.high %v4799_v7, %v4799_v7  ;;  %v5213_v28 = vcombine.low %v4755_v62, %v4799_v7  ;;  %v4289_v51 = vpack.c.b16 %v4225_v57, %v4218_v42  ;;  %v4011_v45 = vsel %vm3439_vm2, %v20832_v55, %v4010_v29  ;;  %v20833_v62 = vld [vmem:[#allocation50_spill] sm:$0xff]  ;;  %v20836_v29 = vld [vmem:[#allocation63_spill] sm:$0xff] }
 0x37a   :  { %v4015_v23 = vsel %vm3433_vm12, %v20790_v6, %v4014_v35  ;;  %v4227_v38 = vsel %vm3431_vm6, %v20791_v13, %v4226_v17  ;;  %v4012_v54 = vsel %vm3441_vm4, %v20833_v62, %v4011_v45  ;;  %v12771_v42 = vld [vmem:[%s20301_s3 + $0xf0] sm:$0xff]   ;;  %v4233_v45 = vsel %vm3429_vm7, %v20790_v6, %v20789_v0 }
 0x37b   :  { %v5214_v24 = vcombine.low %v4807_v41, %v16730_v63  ;;  %v5221_v7 = vrot.slane %v5213_v28, %v14417_v27  ;;  %v4016_v43 = vsel %vm3435_vm13, %v20792_v22, %v4015_v23  ;;  %v12772_v35 = vld [vmem:[%s20301_s3 + $0xb0] sm:$0xff]   ;;  %4298 = vrot.lane.b32.xlu1 %v4289_v51, %s13291_s18  ;;  %v4228_v28 = vsel %vm3433_vm12, %v20831_v31, %v4227_v38 }
 0x37c   :  { %v20834_v17 = vld [vmem:[#allocation59_spill] sm:$0xff]  ;;  %v20835_v57 = vld [vmem:[#allocation62_spill] sm:$0xff]  ;;  %v4229_v51 = vsel %vm3435_vm13, %v20832_v55, %v4228_v28  ;;  %12256 = vmatprep.subr.bf16.mxu1 %v12771_v42 }
 0x37d   :  { %v4017_v41 = vsel %vm3437_vm15, %v20834_v17, %v4016_v43  ;;  %v4020_v23 = vsel %vm3429_vm7, %v20836_v29, %v20835_v57  ;;  %v5228_v13 = vrot.slane %v5214_v24, %v14417_v27  ;;  %v4234_v43 = vsel %vm3431_vm6, %v20792_v22, %v4233_v45  ;;  %v20838_v38 = vld [vmem:[#allocation35_spill] sm:$0xff]  ;;  %v20839_v24 = vld [vmem:[#allocation64_spill] sm:$0xff]  ;;  %12257 = vmatpush3.bf16.msra.mxu1 %v12772_v35 }
 0x37e   :  { %v4018_v16 = vsel %vm3439_vm2, %v20837_v50, %v4017_v41  ;;  %v4230_v6 = vsel %vm3437_vm15, %v20833_v62, %v4229_v51  ;;  %v4235_v0 = vsel %vm3433_vm12, %v20834_v17, %v4234_v43  ;;  %v4021_v26 = vsel %vm3431_vm6, %v20839_v24, %v4020_v23  ;;  %v20840_v51 = vld [vmem:[#allocation65_spill] sm:$0xff] }
 0x37f   :  { %v4019_v31 = vsel %vm3441_vm4, %v20838_v38, %v4018_v16  ;;  %v5229_v41 = vcombine.low %v5221_v7, %v5228_v13  ;;  %v4231_v28 = vsel %vm3439_vm2, %v20781_v56, %v4230_v6  ;;  %v4236_v42 = vsel %vm3435_vm13, %v20837_v50, %v4235_v0 }
 0x380   :  { %v4070_v21 = vpack.c.b16 %v4019_v31, %v4012_v54  ;;  %v4232_v16 = vsel %vm3441_vm4, %v20788_v5, %v4231_v28  ;;  %v4237_v45 = vsel %vm3437_vm15, %v20838_v38, %v4236_v42  ;;  %v4022_v43 = vsel %vm3433_vm12, %v20840_v51, %v4021_v26  ;;  %v12773_v31 = vld [vmem:[%s20301_s3 + $0xf8] sm:$0xff]  }
 0x381   :  { %v3220_v35 = vpack.c.bf16 %v16339_v36, %v16339_v36  ;;  %12609 = vmatmul.mubr.msk.bf16.gmra.mrb[80].mxu0 %vm4338_vm11, %v5229_v41  ;;  %v4238_v6 = vsel %vm3439_vm2, %v20835_v57, %v4237_v45  ;;  %v4071_v0 = vpack.c.b16 %v4022_v43, %v4022_v43  ;;  %v4327_v13 = vsel %vm3429_vm7, %v16361_v30, %v16347_v37  ;;  %v20841_v45 = vld [vmem:[#allocation67_spill] sm:$0xff] }
 0x382   :  { %4080 = vrot.lane.b32.xlu0 %v4070_v21, %s13291_s18  ;;  %v4239_v26 = vsel %vm3441_vm4, %v20836_v29, %v4238_v6  ;;  %12612 = vmatprep.mubr.msk.bf16.mxu0 %vm20596_vm1, %v20764_v14  ;;  %v4328_v21 = vsel %vm3431_vm6, %v16575_v10, %v4327_v13  ;;  %v4808_v7 = vcombine.high %v16730_v63, %v16730_v63  ;;  %v20842_v6 = vld [vmem:[#allocation69_spill] sm:$0xff] }
 0x383   :  { %v4315_v36 = vunpack.c.l.b16 %v3220_v35  ;;  %v4290_v54 = vpack.c.b16 %v4239_v26, %v4232_v16  ;;  %v4240_v23 = vsel %vm3429_vm7, %v20840_v51, %v20839_v24  ;;  %v4065_v41 = vsel %vm3429_vm7, %v16302_v18, %v16300_v48  ;;  %12258 = vmatprep.subr.bf16.mxu1 %v12773_v31  ;;  %v12774_v26 = vld [vmem:[%s20301_s3 + $0xb8] sm:$0xff]  }
 0x384   :  { %v4285_v28 = vsel %vm3429_vm7, %v16347_v37, %v16308_v2  ;;  %v4241_v43 = vsel %vm3431_vm6, %v20841_v45, %v4240_v23  ;;  %v4066_v63 = vsel %vm3431_vm6, %v16308_v2, %v4065_v41  ;;  %v20844_v23 = vld [vmem:[#allocation68_spill] sm:$0xff]  ;;  %12259 = vmatpush3.bf16.msra.mxu1 %v12774_v26 }
 0x385   :  { %v4329_v42 = vsel %vm3433_vm12, %v4315_v36, %v4328_v21  ;;  %v4286_v16 = vsel %vm3431_vm6, %v16361_v30, %v4285_v28  ;;  %4300 = vrot.lane.b32.xlu1 %v4290_v54, %s13291_s18  ;;  %v4242_v13 = vsel %vm3433_vm12, %v20842_v6, %v4241_v43  ;;  %v4067_v31 = vsel %vm3433_vm12, %v16347_v37, %v4066_v63  ;;  %v20843_v21 = vld [vmem:[#allocation66_spill] sm:$0xff]  ;;  %v20846_v6 = vld [vmem:[#allocation72_spill] sm:$0xff] }
 0x386   :  { %4082 = vrot.lane.b32.xlu0 %v4071_v0, %s13291_s18  ;;  %v4337_v35 = vpack.c.b16 %v4329_v42, %v4329_v42  ;;  %v4291_v36 = vpack.c.b16 %v4242_v13, %v4242_v13  ;;  %v3482_v41 = vsel %vm3431_vm6, %v20844_v23, %v20843_v21  ;;  %v4075_v28 = vpack.c.b16 %v4067_v31, %v4067_v31  ;;  %v20845_v0 = vld [vmem:[#allocation71_spill] sm:$0xff]  ;;  %v20856_v2 = vld [vmem:[#allocation84_spill] sm:$0xff] }
 0x387   :  { %v3483_v42 = vsel %vm3433_vm12, %v20845_v0, %v3482_v41  ;;  %v3701_v43 = vsel %vm3429_vm7, %v20845_v0, %v20844_v23  ;;  %v4287_v63 = vsel %vm3433_vm12, %v16575_v10, %v4286_v16  ;;  %v20848_v23 = vld [vmem:[#allocation7_spill] sm:$0xff]  ;;  %v20849_v10 = vld [vmem:[#allocation8_spill] sm:$0xff]  ;;  %v20850_v41 = vld [vmem:[#allocation74_spill] sm:$0xff] }
 0x388   :  { %v4832_v54 = vrot.slane %v4337_v35, %v14417_v27  ;;  %v3484_v13 = vsel %vm3435_vm13, %v20846_v6, %v3483_v42  ;;  %v3702_v21 = vsel %vm3431_vm6, %v20846_v6, %v3701_v43  ;;  %v20847_v35 = vld [vmem:[#allocation73_spill] sm:$0xff]  ;;  %v3708_v16 = vsel %vm3429_vm7, %v20849_v10, %v20848_v23  ;;  %v20858_v51 = vld [vmem:[#allocation44_spill] sm:$0xff] }
 0x389   :  { %v3921_v31 = vsel %vm3429_vm7, %v20847_v35, %v20846_v6  ;;  %4302 = vrot.lane.b32.xlu1 %v4291_v36, %s13291_s18  ;;  %v3703_v26 = vsel %vm3433_vm12, %v20847_v35, %v3702_v21  ;;  %v20851_v42 = vld [vmem:[#allocation9_spill] sm:$0xff]  ;;  %v3698_v21 = vsel %vm3429_vm7, %v20837_v50, %v20834_v17  ;;  %v3485_v30 = vsel %vm3437_vm15, %v20847_v35, %v3484_v13  ;;  %v20862_v50 = vld [vmem:[#allocation70_spill] sm:$0xff] }
 0x38a   :  { %v5248_v14 = vcombine.low %v4808_v7, %v4832_v54  ;;  %4090 = vrot.lane.b32.xlu0 %v4075_v28, %s13291_s18  ;;  %v3704_v0 = vsel %vm3435_vm13, %v20850_v41, %v3703_v26  ;;  %v3709_v43 = vsel %vm3431_vm6, %v20851_v42, %v3708_v16  ;;  %v3922_v7 = vsel %vm3431_vm6, %v20850_v41, %v3921_v31  ;;  %v20852_v28 = vld [vmem:[#allocation80_spill] sm:$0xff]  ;;  %v20853_v26 = vld [vmem:[#allocation81_spill] sm:$0xff]  ;;  %v20854_v31 = vld [vmem:[#allocation75_spill] sm:$0xff] }
 0x38b   :  { %v4295_v54 = vpack.c.b16 %v4287_v63, %v4287_v63  ;;  %v3710_v6 = vsel %vm3433_vm12, %v20852_v28, %v3709_v43  ;;  %v20855_v63 = vld [vmem:[#allocation82_spill] sm:$0xff]  ;;  %v3923_v43 = vsel %vm3433_vm12, %v20854_v31, %v3922_v7  ;;  %v3928_v13 = vsel %vm3429_vm7, %v20852_v28, %v20851_v42 }
 0x38c   :  { %v5255_v36 = vrot.slane %v5248_v14, %v14417_v27  ;;  %v3711_v37 = vsel %vm3435_vm13, %v20853_v26, %v3710_v6  ;;  %v3705_v14 = vsel %vm3437_vm15, %v20854_v31, %v3704_v0  ;;  %v3699_v35 = vsel %vm3431_vm6, %v20838_v38, %v3698_v21  ;;  %v20861_v38 = vld [vmem:[#allocation79_spill] sm:$0xff] }
 0x38d   :  { %4310 = vrot.lane.b32.xlu1 %v4295_v54, %s13291_s18  ;;  %v3712_v16 = vsel %vm3437_vm15, %v20855_v63, %v3711_v37  ;;  %v3486_v0 = vsel %vm3439_vm2, %v20850_v41, %v3485_v30  ;;  %v3929_v37 = vsel %vm3431_vm6, %v20853_v26, %v3928_v13  ;;  %v4141_v7 = vsel %vm3429_vm7, %v20854_v31, %v20850_v41  ;;  %v20857_v54 = vld [vmem:[#allocation76_spill] sm:$0xff]  ;;  %v3643_v30 = vpop.permute.xlu0 %3642  ;;  %v20859_v41 = vld [vmem:[#allocation77_spill] sm:$0xff] }
 0x38e   :  { %12613 = vmatmul.mubr.msk.bf16.gmra.mrb[84].mxu0 %vm4338_vm11, %v5255_v36  ;;  %v3713_v18 = vsel %vm3439_vm2, %v20856_v2, %v3712_v16  ;;  %v3863_v36 = vpop.permute.xlu1 %3862  ;;  %v3706_v6 = vsel %vm3439_vm2, %v20857_v54, %v3705_v14  ;;  %v3924_v16 = vsel %vm3435_vm13, %v20857_v54, %v3923_v43  ;;  %v3930_v21 = vsel %vm3433_vm12, %v20855_v63, %v3929_v37 }
 0x38f   :  { %v4142_v45 = vsel %vm3431_vm6, %v20857_v54, %v4141_v7  ;;  %v3714_v13 = vsel %vm3441_vm4, %v20858_v51, %v3713_v18  ;;  %v3931_v24 = vsel %vm3435_vm13, %v20856_v2, %v3930_v21  ;;  %v4148_v14 = vsel %vm3429_vm7, %v20855_v63, %v20853_v26  ;;  %v16936_v54 = vpop.f32.mrb[0].mxu1 }
 0x390   :  { %v4143_v29 = vsel %vm3433_vm12, %v20859_v41, %v4142_v45  ;;  %v3700_v43 = vsel %vm3433_vm12, %v20835_v57, %v3699_v35  ;;  %v3932_v37 = vsel %vm3437_vm15, %v20858_v51, %v3931_v24  ;;  %v4149_v18 = vsel %vm3431_vm6, %v20856_v2, %v4148_v14  ;;  %v16942_v63 = vpop.f32.mrb[1].mxu1  ;;  %v20860_v57 = vld [vmem:[#allocation86_spill] sm:$0xff] }
 0x391   :  { %v4144_v7 = vsel %vm3435_vm13, %v20848_v23, %v4143_v29  ;;  %v3707_v45 = vsel %vm3441_vm4, %v20859_v41, %v3706_v6  ;;  %v3925_v26 = vsel %vm3437_vm15, %v20859_v41, %v3924_v16  ;;  %v3487_v24 = vsel %vm3441_vm4, %v20854_v31, %v3486_v0  ;;  %v16950_v14 = vpop.f32.mrb[2].mxu1  ;;  %v3645_v41 = vpop.permute.xlu0 %3644 }
 0x392   :  { %v3865_v21 = vpop.permute.xlu1 %3864  ;;  %v3750_v35 = vpack.c.b16 %v3714_v13, %v3707_v45  ;;  %v3933_v29 = vsel %vm3439_vm2, %v20860_v57, %v3932_v37  ;;  %v4150_v2 = vsel %vm3433_vm12, %v20858_v51, %v4149_v18  ;;  %v3529_v6 = vpack.c.b16 %v20861_v38, %v20861_v38  ;;  %v16957_v31 = vpop.f32.mrb[3].mxu1 }
 0x393   :  { %v3749_v55 = vpack.c.b16 %v3700_v43, %v3700_v43  ;;  %v3530_v16 = vpack.c.b16 %v20862_v50, %v3487_v24  ;;  %v4145_v17 = vsel %vm3437_vm15, %v20849_v10, %v4144_v7  ;;  %v3926_v13 = vsel %vm3439_vm2, %v20848_v23, %v3925_v26  ;;  %v20863_v50 = vld [vmem:[#allocation87_spill] sm:$0xff] }
 0x394   :  { %v4377_v0 = vsel %vm4338_vm11, %v3750_v35, %v3865_v21  ;;  %v4146_v51 = vsel %vm3439_vm2, %v20851_v42, %v4145_v17  ;;  %v4151_v38 = vsel %vm3435_vm13, %v20860_v57, %v4150_v2  ;;  %v3934_v37 = vsel %vm3441_vm4, %v20863_v50, %v3933_v29  ;;  %v20864_v21 = vld [vmem:[#allocation89_spill] sm:$0xff] }
 0x395   :  { %v4374_v43 = vsel %vm4338_vm11, %v3749_v55, %v3863_v36  ;;  %v4152_v7 = vsel %vm3437_vm15, %v20863_v50, %v4151_v38  ;;  %v4350_v18 = vsel %vm4338_vm11, %v3529_v6, %v3643_v30  ;;  %v4353_v45 = vsel %vm4338_vm11, %v3530_v16, %v3645_v41  ;;  %v4085_v42 = vpop.permute.xlu0 %4084  ;;  %v20865_v36 = vld [vmem:[#allocation90_spill] sm:$0xff] }
 0x396   :  { %v4153_v23 = vsel %vm3439_vm2, %v20864_v21, %v4152_v7  ;;  %v4650_v26 = vcombine.low %v4353_v45, %v4377_v0  ;;  %v3927_v17 = vsel %vm3441_vm4, %v20849_v10, %v3926_v13  ;;  %v4147_v55 = vsel %vm3441_vm4, %v20852_v28, %v4146_v51  ;;  %v4305_v35 = vpop.permute.xlu1 %4304 }
 0x397   :  { %v4154_v24 = vsel %vm3441_vm4, %v20865_v36, %v4153_v23  ;;  %v4626_v29 = vcombine.low %v4350_v18, %v4374_v43  ;;  %v3970_v2 = vpack.c.b16 %v3934_v37, %v3927_v17  ;;  %v4651_v6 = vcombine.high %v4353_v45, %v4377_v0 }
 0x398   :  { %v4190_v30 = vpack.c.b16 %v4154_v24, %v4147_v55  ;;  %v4660_v38 = vrot.slane %v4650_v26, %v14417_v27  ;;  %v3722_v28 = vsel %vm3429_vm7, %v15738_v1, %v15723_v32  ;;  %v3715_v18 = vsel %vm3429_vm7, %v20863_v50, %v20860_v57 }
 0x399   :  { %v4401_v16 = vsel %vm4338_vm11, %v3970_v2, %v4085_v42  ;;  %v4634_v13 = vrot.slane %v4626_v29, %v14417_v27  ;;  %v16989_v51 = vrot.slane %v4651_v6, %v14417_v27  ;;  %v3723_v37 = vsel %vm3431_vm6, %v15747_v4, %v3722_v28 }
 0x39a   :  { %v4425_v41 = vsel %vm4338_vm11, %v4190_v30, %v4305_v35  ;;  %v3716_v17 = vsel %vm3431_vm6, %v20864_v21, %v3715_v18  ;;  %v3724_v42 = vsel %vm3433_vm12, %v15789_v39, %v3723_v37  ;;  %v3942_v55 = vsel %vm3429_vm7, %v15789_v39, %v15747_v4  ;;  %v20868_v37 = vld [vmem:[#allocation93_spill] sm:$0xff] }
 0x39b   :  { %v4652_v7 = vcombine.low %v4401_v16, %v4425_v41  ;;  %v4653_v10 = vcombine.high %v4401_v16, %v4425_v41  ;;  %v11747_v45 = vcombine.low %v4634_v13, %v4660_v38  ;;  %v3935_v57 = vsel %vm3429_vm7, %v20865_v36, %v20864_v21  ;;  %v20866_v16 = vld [vmem:[#allocation91_spill] sm:$0xff]  ;;  %v20867_v41 = vld [vmem:[#allocation92_spill] sm:$0xff] }
 0x39c   :  { %v3717_v50 = vsel %vm3433_vm12, %v20865_v36, %v3716_v17  ;;  %v4162_v35 = vsel %vm3429_vm7, %v15844_v12, %v15791_v49  ;;  %v3725_v30 = vsel %vm3435_vm13, %v15791_v49, %v3724_v42  ;;  %v3943_v6 = vsel %vm3431_vm6, %v15791_v49, %v3942_v55  ;;  %v20869_v55 = vld [vmem:[#allocation94_spill] sm:$0xff] }
 0x39d   :  { %v16992_v43 = vrot.slane %v4652_v7, %v14417_v27  ;;  %v16995_v0 = vrot.slane %v4653_v10, %v14417_v27  ;;  %v5081_v29 = vrot.slane %v11747_v45, %v14417_v27  ;;  %v3936_v21 = vsel %vm3431_vm6, %v20866_v16, %v3935_v57 }
 0x39e   :  { %v4155_v36 = vsel %vm3429_vm7, %v20867_v41, %v20866_v16  ;;  %v3718_v10 = vsel %vm3435_vm13, %v20866_v16, %v3717_v50  ;;  %v4163_v13 = vsel %vm3431_vm6, %v15849_v59, %v4162_v35  ;;  %v3726_v28 = vsel %vm3437_vm15, %v15844_v12, %v3725_v30  ;;  %v20870_v35 = vld [vmem:[#allocation45_spill] sm:$0xff] }
 0x39f   :  { %v4683_v23 = vcombine.high %v4660_v38, %v16992_v43  ;;  %v4684_v26 = vcombine.low %v16989_v51, %v16995_v0  ;;  %v3944_v49 = vsel %vm3433_vm12, %v15844_v12, %v3943_v6  ;;  %v4156_v18 = vsel %vm3431_vm6, %v20868_v37, %v4155_v36 }
 0x3a0   :  { %v3719_v45 = vsel %vm3437_vm15, %v20867_v41, %v3718_v10  ;;  %v4164_v17 = vsel %vm3433_vm12, %v15853_v25, %v4163_v13  ;;  %v3727_v42 = vsel %vm3439_vm2, %v15849_v59, %v3726_v28  ;;  %v3945_v12 = vsel %vm3435_vm13, %v15849_v59, %v3944_v49  ;;  %v20872_v10 = vld [vmem:[#allocation96_spill] sm:$0xff]  ;;  %v3647_v13 = vpop.permute.xlu0 %3646  ;;  %v20873_v49 = vld [vmem:[#allocation99_spill] sm:$0xff] }
 0x3a1   :  { %v11749_v24 = vcombine.low %v4683_v23, %v16989_v51  ;;  %v3937_v23 = vsel %vm3433_vm12, %v20867_v41, %v3936_v21  ;;  %v3720_v57 = vsel %vm3439_vm2, %v20868_v37, %v3719_v45  ;;  %v3946_v30 = vsel %vm3437_vm15, %v15853_v25, %v3945_v12  ;;  %v20871_v41 = vld [vmem:[#allocation95_spill] sm:$0xff]  ;;  %v20875_v12 = vld [vmem:[#allocation97_spill] sm:$0xff] }
 0x3a2   :  { %v3938_v50 = vsel %vm3435_vm13, %v20868_v37, %v3937_v23  ;;  %v3721_v6 = vsel %vm3441_vm4, %v20869_v55, %v3720_v57  ;;  %v3867_v16 = vpop.permute.xlu1 %3866  ;;  %v20874_v37 = vld [vmem:[#allocation58_spill] sm:$0xff] }
 0x3a3   :  { %v5095_v2 = vrot.slane %v11749_v24, %v14417_v27  ;;  %v4157_v24 = vsel %vm3433_vm12, %v20869_v55, %v4156_v18  ;;  %v3939_v21 = vsel %vm3437_vm15, %v20869_v55, %v3938_v50  ;;  %v3531_v18 = vpack.c.b16 %v20874_v37, %v20873_v49 }
 0x3a4   :  { %v4158_v59 = vsel %vm3435_vm13, %v15723_v32, %v4157_v24  ;;  %v3940_v23 = vsel %vm3439_vm2, %v15723_v32, %v3939_v21 }
 0x3a5   :  { %v5104_v38 = vcombine.high %v5081_v29, %v5095_v2  ;;  %v5103_v7 = vcombine.low %v5081_v29, %v5095_v2  ;;  %v4165_v29 = vsel %vm3435_vm13, %v20870_v35, %v4164_v17  ;;  %v3728_v2 = vsel %vm3441_vm4, %v15853_v25, %v3727_v42 }
 0x3a6   :  { %v4166_v36 = vsel %vm3437_vm15, %v20871_v41, %v4165_v29  ;;  %v4159_v28 = vsel %vm3437_vm15, %v15738_v1, %v4158_v59  ;;  %v4356_v24 = vsel %vm4338_vm11, %v3531_v18, %v3647_v13  ;;  %v3941_v50 = vsel %vm3441_vm4, %v15738_v1, %v3940_v23 }
 0x3a7   :  { %5577 = vmatprep.mubr.bf16.mxu1 %v5104_v38  ;;  %v3751_v38 = vpack.c.b16 %v3728_v2, %v3721_v6  ;;  %v4167_v25 = vsel %vm3439_vm2, %v20872_v10, %v4166_v36  ;;  %v4160_v17 = vsel %vm3439_vm2, %v15747_v4, %v4159_v28  ;;  %v3736_v4 = vsel %vm3429_vm7, %v16128_v52, %v16124_v3 }
 0x3a8   :  { %5578 = vmatmul.mubr.bf16.gmra.mrb[12].mxu1 %v5103_v7  ;;  %v3947_v7 = vsel %vm3439_vm2, %v20870_v35, %v3946_v30  ;;  %v4168_v55 = vsel %vm3441_vm4, %v20875_v12, %v4167_v25  ;;  %v4161_v2 = vsel %vm3441_vm4, %v15789_v39, %v4160_v17  ;;  %v3737_v6 = vsel %vm3431_vm6, %v16130_v53, %v3736_v4 }
 0x3a9   :  { %v4380_v45 = vsel %vm4338_vm11, %v3751_v38, %v3867_v16  ;;  %v3948_v42 = vsel %vm3441_vm4, %v20871_v41, %v3947_v7  ;;  %v4191_v30 = vpack.c.b16 %v4168_v55, %v4161_v2  ;;  %v3729_v39 = vsel %vm3429_vm7, %v20871_v41, %v20870_v35 }
 0x3aa   :  { %v4703_v57 = vcombine.low %v4356_v24, %v4380_v45  ;;  %v3971_v32 = vpack.c.b16 %v3948_v42, %v3941_v50  ;;  %v4704_v16 = vcombine.high %v4356_v24, %v4380_v45  ;;  %v3730_v7 = vsel %vm3431_vm6, %v20872_v10, %v3729_v39  ;;  %v20877_v50 = vld [vmem:[#allocation83_spill] sm:$0xff] }
 0x3ab   :  { %v3949_v25 = vsel %vm3429_vm7, %v20875_v12, %v20872_v10  ;;  %v3738_v13 = vsel %vm3433_vm12, %v16135_v8, %v3737_v6  ;;  %v4685_v28 = vcombine.high %v16989_v51, %v16995_v0  ;;  %v3956_v41 = vsel %vm3429_vm7, %v16135_v8, %v16130_v53  ;;  %v20876_v10 = vld [vmem:[#allocation98_spill] sm:$0xff] }
 0x3ac   :  { %v4087_v29 = vpop.permute.xlu0 %4086  ;;  %v17109_v36 = vrot.slane %v4703_v57, %v14417_v27  ;;  %v17129_v49 = vrot.slane %v4704_v16, %v14417_v27  ;;  %v3731_v37 = vsel %vm3433_vm12, %v20875_v12, %v3730_v7  ;;  %v3950_v18 = vsel %vm3431_vm6, %v20876_v10, %v3949_v25  ;;  %v20878_v6 = vld [vmem:[#allocation10_spill] sm:$0xff]  ;;  %v20879_v16 = vld [vmem:[#allocation12_spill] sm:$0xff] }
 0x3ad   :  { %v17100_v21 = vsel %vm4338_vm11, %v3971_v32, %v4087_v29  ;;  %v17137_v45 = vadd.f32 %v16942_v63, %v16936_v54  ;;  %v3739_v55 = vsel %vm3435_vm13, %v16139_v46, %v3738_v13  ;;  %v3957_v12 = vsel %vm3431_vm6, %v16139_v46, %v3956_v41 }
 0x3ae   :  { %v11751_v42 = vcombine.low %v4685_v28, %v17109_v36  ;;  %v3732_v54 = vsel %vm3435_vm13, %v20876_v10, %v3731_v37  ;;  %v4176_v63 = vsel %vm3429_vm7, %v16141_v9, %v16139_v46  ;;  %v3740_v57 = vsel %vm3437_vm15, %v16141_v9, %v3739_v55 }
 0x3af   :  { %v3951_v29 = vsel %vm3433_vm12, %v20877_v50, %v3950_v18  ;;  %v4169_v4 = vsel %vm3429_vm7, %v20877_v50, %v20876_v10  ;;  %v3733_v46 = vsel %vm3437_vm15, %v20877_v50, %v3732_v54  ;;  %v3876_v39 = vsel %vm3429_vm7, %v20879_v16, %v20878_v6  ;;  %v20880_v10 = vld [vmem:[#allocation11_spill] sm:$0xff] }
 0x3b0   :  { %v5134_v2 = vrot.slane %v11751_v42, %v14417_v27  ;;  %v3741_v25 = vsel %vm3439_vm2, %v16191_v44, %v3740_v57  ;;  %v4170_v28 = vsel %vm3431_vm6, %v16054_v40, %v4169_v4  ;;  %v17182_v41 = vadd.f32 %v16957_v31, %v16950_v14  ;;  %v20883_v31 = vld [vmem:[#allocation101_spill] sm:$0xff] }
 0x3b1   :  { %v3877_v18 = vsel %vm3431_vm6, %v20880_v10, %v3876_v39  ;;  %v3742_v14 = vsel %vm3441_vm4, %v16197_v15, %v3741_v25  ;;  %v4171_v57 = vsel %vm3433_vm12, %v20883_v31, %v4170_v28  ;;  %v20888_v39 = vld [vmem:[#allocation103_spill] sm:$0xff] }
 0x3b2   :  { %v4172_v16 = vsel %vm3435_vm13, %v16124_v3, %v4171_v57 }
 0x3b7   :  { %v4307_v59 = vpop.permute.xlu1 %4306 }
 0x3b8   :  { %v17103_v1 = vsel %vm4338_vm11, %v4191_v30, %v4307_v59  ;;  %v3958_v30 = vsel %vm3433_vm12, %v16141_v9, %v3957_v12  ;;  %v4177_v59 = vsel %vm3431_vm6, %v16191_v44, %v4176_v63  ;;  %v3952_v9 = vsel %vm3435_vm13, %v16054_v40, %v3951_v29 }
 0x3b9   :  { %v4705_v38 = vcombine.low %v17100_v21, %v17103_v1  ;;  %v3959_v13 = vsel %vm3435_vm13, %v16191_v44, %v3958_v30  ;;  %v4178_v37 = vsel %vm3433_vm12, %v16197_v15, %v4177_v59  ;;  %v20882_v44 = vld [vmem:[#allocation104_spill] sm:$0xff]  ;;  %v3734_v12 = vsel %vm3439_vm2, %v16054_v40, %v3733_v46  ;;  %v20887_v46 = vld [vmem:[#allocation21_spill] sm:$0xff] }
 0x3ba   :  { %v3532_v55 = vpack.c.b16 %v16685_v19, %v20882_v44  ;;  %v4706_v54 = vcombine.high %v17100_v21, %v17103_v1  ;;  %v3960_v63 = vsel %vm3437_vm15, %v16197_v15, %v3959_v13  ;;  %v20884_v19 = vld [vmem:[#allocation13_spill] sm:$0xff]  ;;  %v4179_v40 = vsel %vm3435_vm13, %v16199_v58, %v4178_v37  ;;  %v20886_v21 = vld [vmem:[#allocation14_spill] sm:$0xff]  ;;  %v20890_v37 = vld [vmem:[#allocation15_spill] sm:$0xff] }
 0x3bb   :  { %v17123_v35 = vrot.slane %v4705_v38, %v14417_v27  ;;  %v4096_v50 = vsel %vm3429_vm7, %v20884_v19, %v20880_v10  ;;  %v3878_v29 = vsel %vm3433_vm12, %v20884_v19, %v3877_v18  ;;  %v3743_v30 = vsel %vm3429_vm7, %v16292_v34, %v16199_v58 }
 0x3bc   :  { %v4097_v1 = vsel %vm3431_vm6, %v20886_v21, %v4096_v50  ;;  %v3879_v4 = vsel %vm3435_vm13, %v20886_v21, %v3878_v29  ;;  %v3961_v6 = vsel %vm3439_vm2, %v16199_v58, %v3960_v63  ;;  %v4180_v13 = vsel %vm3437_vm15, %v16292_v34, %v4179_v40  ;;  %v20891_v63 = vld [vmem:[#allocation24_spill] sm:$0xff]  ;;  %v20893_v21 = vld [vmem:[#allocation18_spill] sm:$0xff] }
 0x3bd   :  { %v4735_v23 = vcombine.low %v17109_v36, %v17123_v35  ;;  %v4736_v17 = vcombine.high %v17109_v36, %v17123_v35  ;;  %v4098_v58 = vsel %vm3433_vm12, %v20890_v37, %v4097_v1  ;;  %v4181_v10 = vsel %vm3439_vm2, %v20888_v39, %v4180_v13 }
 0x3be   :  { %v3880_v18 = vsel %vm3437_vm15, %v20890_v37, %v3879_v4  ;;  %v4182_v29 = vsel %vm3441_vm4, %v16300_v48, %v4181_v10  ;;  %v3533_v1 = vpack.c.b16 %v20893_v21, %v20893_v21  ;;  %v3897_v4 = vsel %vm3429_vm7, %v20814_v60, %v20822_v47 }
 0x3bf   :  { %v11753_v24 = vcombine.low %v4736_v17, %v17129_v49  ;;  %v20881_v17 = vld [vmem:[#allocation20_spill] sm:$0xff] }
 0x3c0   :  { %v3883_v42 = vsel %vm3429_vm7, %v20881_v17, %v20810_v11 }
 0x3c1   :  { %v5148_v32 = vrot.slane %v11753_v24, %v14417_v27  ;;  %v3953_v24 = vsel %vm3437_vm15, %v20883_v31, %v3952_v9  ;;  %v17235_v9 = vrot.slane %v4706_v54, %v14417_v27  ;;  %v4173_v54 = vsel %vm3437_vm15, %v16128_v52, %v4172_v16 }
 0x3c2   :  { %v3954_v15 = vsel %vm3439_vm2, %v16124_v3, %v3953_v24  ;;  %v3735_v3 = vsel %vm3441_vm4, %v20883_v31, %v3734_v12  ;;  %v3962_v24 = vsel %vm3441_vm4, %v16292_v34, %v3961_v6  ;;  %v4174_v31 = vsel %vm3439_vm2, %v16130_v53, %v4173_v54  ;;  %v20895_v6 = vld [vmem:[#allocation17_spill] sm:$0xff] }
 0x3c3   :  { %v5157_v38 = vcombine.high %v5134_v2, %v5148_v32  ;;  %v5156_v7 = vcombine.low %v5134_v2, %v5148_v32  ;;  %v20885_v2 = vld [vmem:[#allocation19_spill] sm:$0xff]  ;;  %v3752_v44 = vpack.c.b16 %v3742_v14, %v3735_v3  ;;  %v3955_v12 = vsel %vm3441_vm4, %v16128_v52, %v3954_v15  ;;  %v20892_v14 = vld [vmem:[#allocation16_spill] sm:$0xff]  ;;  %v20894_v15 = vld [vmem:[#allocation25_spill] sm:$0xff] }
 0x3c4   :  { %v3884_v32 = vsel %vm3431_vm6, %v20885_v2, %v3883_v42  ;;  %v4103_v59 = vsel %vm3429_vm7, %v20887_v46, %v20885_v2  ;;  %v4099_v50 = vsel %vm3435_vm13, %v20892_v14, %v4098_v58  ;;  %v4737_v34 = vcombine.low %v17129_v49, %v17235_v9  ;;  %v20898_v3 = vld [vmem:[#allocation26_spill] sm:$0xff] }
 0x3c5   :  { %5585 = vmatprep.mubr.bf16.mxu1 %v5157_v38  ;;  %v3744_v38 = vsel %vm3431_vm6, %v20888_v39, %v3743_v30  ;;  %v3885_v28 = vsel %vm3433_vm12, %v20887_v46, %v3884_v32  ;;  %v3881_v52 = vsel %vm3439_vm2, %v20892_v14, %v3880_v18  ;;  %v3972_v32 = vpack.c.b16 %v3962_v24, %v3955_v12 }
 0x3c6   :  { %5586 = vmatmul.mubr.bf16.gmra.mrb[16].mxu1 %v5156_v7  ;;  %v20889_v7 = vld [vmem:[#allocation22_spill] sm:$0xff]  ;;  %v17263_v19 = vsel %vm3433_vm12, %v16300_v48, %v3744_v38  ;;  %v4175_v46 = vsel %vm3441_vm4, %v16135_v8, %v4174_v31  ;;  %v4100_v16 = vsel %vm3437_vm15, %v20895_v6, %v4099_v50  ;;  %v20896_v38 = vld [vmem:[#allocation23_spill] sm:$0xff]  ;;  %v17294_v37 = vsel %vm3441_vm4, %v20895_v6, %v3881_v52  ;;  %v20902_v6 = vld [vmem:[#allocation40_spill] sm:$0xff] }
 0x3c7   :  { %v4104_v25 = vsel %vm3431_vm6, %v20889_v7, %v4103_v59  ;;  %v3886_v42 = vsel %vm3435_vm13, %v20889_v7, %v3885_v28  ;;  %v3753_v59 = vpack.c.b16 %v17263_v19, %v17263_v19  ;;  %v20897_v7 = vld [vmem:[#allocation27_spill] sm:$0xff]  ;;  %v4192_v28 = vpack.c.b16 %v4182_v29, %v4175_v46 }
 0x3c8   :  { %v4105_v57 = vsel %vm3433_vm12, %v20891_v63, %v4104_v25  ;;  %v3887_v53 = vsel %vm3437_vm15, %v20891_v63, %v3886_v42  ;;  %v3890_v25 = vsel %vm3429_vm7, %v20897_v7, %v20896_v38  ;;  %v3898_v18 = vsel %vm3431_vm6, %v20815_v20, %v3897_v4  ;;  %v20899_v63 = vld [vmem:[#allocation28_spill] sm:$0xff] }
 0x3c9   :  { %v3649_v40 = vpop.permute.xlu0 %3648  ;;  %v4106_v30 = vsel %vm3435_vm13, %v20894_v15, %v4105_v57  ;;  %v3888_v8 = vsel %vm3439_vm2, %v20894_v15, %v3887_v53  ;;  %v11752_v42 = vcombine.high %v16995_v0, %v4735_v23  ;;  %v4101_v54 = vsel %vm3439_vm2, %v20810_v11, %v4100_v16  ;;  %v20901_v53 = vld [vmem:[#allocation30_spill] sm:$0xff] }
 0x3ca   :  { %v4107_v10 = vsel %vm3437_vm15, %v20898_v3, %v4106_v30  ;;  %v4359_v24 = vsel %vm4338_vm11, %v3532_v55, %v3649_v40  ;;  %v3891_v57 = vsel %vm3431_vm6, %v20899_v63, %v3890_v25  ;;  %v4117_v12 = vsel %vm3429_vm7, %v20817_v61, %v20815_v20  ;;  %v20900_v20 = vld [vmem:[#allocation29_spill] sm:$0xff] }
 0x3cb   :  { %v4118_v36 = vsel %vm3431_vm6, %v20819_v33, %v4117_v12  ;;  %v4108_v11 = vsel %vm3439_vm2, %v20896_v38, %v4107_v10  ;;  %v3899_v14 = vsel %vm3433_vm12, %v20817_v61, %v3898_v18  ;;  %v4110_v50 = vsel %vm3429_vm7, %v20900_v20, %v20899_v63 }
 0x3cc   :  { %v3900_v52 = vsel %vm3435_vm13, %v20819_v33, %v3899_v14  ;;  %v4119_v16 = vsel %vm3433_vm12, %v20902_v6, %v4118_v36 }
 0x3d0   :  { %v3869_v2 = vpop.permute.xlu1 %3868 }
 0x3d1   :  { %v4383_v13 = vsel %vm4338_vm11, %v3752_v44, %v3869_v2  ;;  %v11754_v44 = vcombine.high %v17123_v35, %v4737_v34  ;;  %v17318_v35 = vrot.slane %v11752_v42, %v14417_v27  ;;  %v4111_v2 = vsel %vm3431_vm6, %v20901_v53, %v4110_v50 }
 0x3d2   :  { %v4756_v19 = vcombine.low %v4359_v24, %v4383_v13  ;;  %v4757_v15 = vcombine.high %v4359_v24, %v4383_v13  ;;  %v4738_v42 = vcombine.high %v17129_v49, %v17235_v9  ;;  %v4102_v13 = vsel %vm3441_vm4, %v20881_v17, %v4101_v54 }
 0x3d3   :  { %v4089_v58 = vpop.permute.xlu0 %4088  ;;  %v12208_v31 = vpop.f32.mrb[4].mxu1  ;;  %v17321_v55 = vrot.slane %v11754_v44, %v14417_v27  ;;  %v4109_v24 = vsel %vm3441_vm4, %v20897_v7, %v4108_v11  ;;  %v3901_v49 = vsel %vm3437_vm15, %v20902_v6, %v3900_v52 }
 0x3d4   :  { %v12209_v23 = vpop.f32.mrb[5].mxu1  ;;  %v4407_v30 = vsel %vm4338_vm11, %v3972_v32, %v4089_v58  ;;  %v17345_v33 = vrot.slane %v4756_v19, %v14417_v27  ;;  %v3889_v32 = vsel %vm3441_vm4, %v20898_v3, %v3888_v8  ;;  %v20903_v3 = vld [vmem:[#allocation32_spill] sm:$0xff]  ;;  %v4186_v14 = vpack.c.b16 %v4109_v24, %v4102_v13  ;;  %v20908_v13 = vld [vmem:[#allocation34_spill] sm:$0xff] }
 0x3d5   :  { %v17330_v34 = vadd.f32 %v12209_v23, %v12208_v31  ;;  %v12211_v40 = vpop.f32.mrb[6].mxu1  ;;  %v5159_v21 = vcombine.high %v17318_v35, %v17321_v55  ;;  %v5158_v61 = vcombine.low %v17318_v35, %v17321_v55  ;;  %v4112_v54 = vsel %vm3433_vm12, %v20903_v3, %v4111_v2  ;;  %v20906_v2 = vld [vmem:[#allocation42_spill] sm:$0xff] }
 0x3d6   :  { %v12212_v38 = vpop.f32.mrb[7].mxu1  ;;  %v17375_v31 = vrot.slane %v4757_v15, %v14417_v27  ;;  %v11755_v36 = vcombine.low %v4738_v42, %v17345_v33  ;;  %v3966_v11 = vpack.c.b16 %v3889_v32, %v17294_v37  ;;  %v20907_v42 = vld [vmem:[#allocation56_spill] sm:$0xff] }
 0x3d7   :  { %v4309_v29 = vpop.permute.xlu1 %4308  ;;  %v3651_v46 = vpop.permute.xlu0 %3650  ;;  %v17347_v18 = vadd.f32 %v12212_v38, %v12211_v40  ;;  %v20905_v40 = vld [vmem:[#allocation33_spill] sm:$0xff]  ;;  %v4131_v32 = vsel %vm3429_vm7, %v20907_v42, %v20788_v5 }
 0x3d8   :  { %v4431_v4 = vsel %vm4338_vm11, %v4192_v28, %v4309_v29  ;;  %v3892_v28 = vsel %vm3433_vm12, %v20900_v20, %v3891_v57  ;;  %v20904_v57 = vld [vmem:[#allocation41_spill] sm:$0xff]  ;;  %v4362_v19 = vsel %vm4338_vm11, %v3533_v1, %v3651_v46  ;;  %v4113_v29 = vsel %vm3435_vm13, %v20905_v40, %v4112_v54 }
 0x3d9   :  { %v4758_v25 = vcombine.low %v4407_v30, %v4431_v4  ;;  %v4759_v10 = vcombine.high %v4407_v30, %v4431_v4  ;;  %v3893_v63 = vsel %vm3435_vm13, %v20901_v53, %v3892_v28  ;;  %v4120_v12 = vsel %vm3435_vm13, %v20904_v57, %v4119_v16 }
 0x3da   :  { %v3894_v20 = vsel %vm3437_vm15, %v20903_v3, %v3893_v63  ;;  %v3902_v50 = vsel %vm3439_vm2, %v20904_v57, %v3901_v49  ;;  %v4121_v15 = vsel %vm3437_vm15, %v20906_v2, %v4120_v12  ;;  %v3911_v30 = vsel %vm3429_vm7, %v20781_v56, %v20833_v62  ;;  %v20909_v63 = vld [vmem:[#allocation57_spill] sm:$0xff]  ;;  %v20911_v3 = vld [vmem:[#allocation46_spill] sm:$0xff]  ;;  %v20912_v12 = vld [vmem:[#allocation47_spill] sm:$0xff] }
 0x3db   :  { %v17358_v58 = vrot.slane %v4758_v25, %v14417_v27  ;;  %v3871_v44 = vpop.permute.xlu1 %3870  ;;  %v17367_v8 = vrot.slane %v4759_v10, %v14417_v27  ;;  %v5187_v6 = vrot.slane %v11755_v36, %v14417_v27  ;;  %v4114_v28 = vsel %vm3437_vm15, %v20908_v13, %v4113_v29 }
 0x3dc   :  { %v4386_v17 = vsel %vm4338_vm11, %v3753_v59, %v3871_v44  ;;  %v4132_v49 = vsel %vm3431_vm6, %v20909_v63, %v4131_v32  ;;  %v3912_v57 = vsel %vm3431_vm6, %v20788_v5, %v3911_v30  ;;  %v3895_v30 = vsel %vm3439_vm2, %v20905_v40, %v3894_v20 }
 0x3dd   :  { %v4789_v7 = vcombine.high %v17345_v33, %v17358_v58  ;;  %v4809_v23 = vcombine.low %v4362_v19, %v4386_v17  ;;  %v4077_v59 = vpop.permute.xlu0 %4076  ;;  %v4791_v1 = vcombine.high %v17375_v31, %v17367_v8  ;;  %v20910_v17 = vld [vmem:[#allocation43_spill] sm:$0xff]  ;;  %v4133_v5 = vsel %vm3433_vm12, %v20792_v22, %v4132_v49  ;;  %v20917_v49 = vld [vmem:[#allocation52_spill] sm:$0xff] }
 0x3de   :  { %v4389_v4 = vsel %vm4338_vm11, %v3966_v11, %v4077_v59  ;;  %v3904_v54 = vsel %vm3429_vm7, %v20911_v3, %v20910_v17  ;;  %v4122_v59 = vsel %vm3439_vm2, %v20910_v17, %v4121_v15 }
 0x3df   :  { %v11757_v52 = vcombine.low %v4789_v7, %v17375_v31  ;;  %v17392_v53 = vrot.slane %v4809_v23, %v14417_v27  ;;  %v20913_v7 = vld [vmem:[#allocation48_spill] sm:$0xff]  ;;  %v3905_v15 = vsel %vm3431_vm6, %v20912_v12, %v3904_v54 }
 0x3e0   :  { %v4124_v19 = vsel %vm3429_vm7, %v20913_v7, %v20912_v12  ;;  %v20918_v12 = vld [vmem:[#allocation60_spill] sm:$0xff] }
 0x3e1   :  { %v4297_v37 = vpop.permute.xlu1 %4296  ;;  %v5201_v16 = vrot.slane %v11757_v52, %v14417_v27  ;;  %v11759_v38 = vcombine.low %v4791_v1, %v17392_v53 }
 0x3e2   :  { %v4413_v46 = vsel %vm4338_vm11, %v4186_v14, %v4297_v37  ;;  %v20914_v14 = vld [vmem:[#allocation49_spill] sm:$0xff] }
 0x3e3   :  { %v4469_v25 = vcombine.low %v4389_v4, %v4413_v46  ;;  %v4470_v10 = vcombine.high %v4389_v4, %v4413_v46  ;;  %v5210_v44 = vcombine.high %v5187_v6, %v5201_v16  ;;  %v5209_v24 = vcombine.low %v5187_v6, %v5201_v16 }
 0x3e4   :  { %v5238_v36 = vrot.slane %v11759_v38, %v14417_v27  ;;  %v4125_v29 = vsel %vm3431_vm6, %v20914_v14, %v4124_v19  ;;  %v17426_v52 = vpop.f32.mrb[72].mxu0  ;;  %v3903_v4 = vsel %vm3441_vm4, %v20906_v2, %v3902_v50  ;;  %v4115_v6 = vsel %vm3439_vm2, %v20822_v47, %v4114_v28  ;;  %v20916_v2 = vld [vmem:[#allocation59_spill] sm:$0xff] }
 0x3e5   :  { %v4491_v23 = vrot.slane %v4469_v25, %v14417_v27  ;;  %v4498_v11 = vrot.slane %v4470_v10, %v14417_v27  ;;  %5593 = vmatprep.mubr.bf16.mxu1 %v5210_v44  ;;  %v12602_v37 = vpop.f32.mrb[73].mxu0  ;;  %v4123_v16 = vsel %vm3441_vm4, %v20911_v3, %v4122_v59  ;;  %v3913_v38 = vsel %vm3433_vm12, %v20907_v42, %v3912_v57  ;;  %v20915_v25 = vld [vmem:[#allocation51_spill] sm:$0xff]  ;;  %v4079_v44 = vpop.permute.xlu0 %4078  ;;  %v20919_v59 = vld [vmem:[#allocation53_spill] sm:$0xff] }
 0x3e6   :  { %5594 = vmatmul.mubr.bf16.gmra.mrb[20].mxu1 %v5209_v24  ;;  %v5246_v1 = vcombine.high %v5238_v36, %v5238_v36  ;;  %v17436_v46 = vpop.f32.mrb[74].mxu0  ;;  %v4126_v20 = vsel %vm3433_vm12, %v20915_v25, %v4125_v29  ;;  %v3914_v50 = vsel %vm3435_vm13, %v20909_v63, %v3913_v38  ;;  %v4134_v10 = vsel %vm3435_vm13, %v20916_v2, %v4133_v5 }
 0x3e7   :  { %v12603_v40 = vpop.f32.mrb[75].mxu0  ;;  %v4929_v32 = vrot.slane %v4491_v23, %v14417_v27  ;;  %v4943_v47 = vrot.slane %v4498_v11, %v14417_v27  ;;  %v3906_v28 = vsel %vm3433_vm12, %v20913_v7, %v3905_v15  ;;  %v3896_v42 = vsel %vm3441_vm4, %v20908_v13, %v3895_v30  ;;  %v20921_v30 = vld [vmem:[#allocation62_spill] sm:$0xff] }
 0x3e8   :  { %5601 = vmatprep.mubr.bf16.mxu1 %v5246_v1  ;;  %v4116_v24 = vsel %vm3441_vm4, %v20814_v60, %v4115_v6  ;;  %v3907_v63 = vsel %vm3435_vm13, %v20914_v14, %v3906_v28  ;;  %v4127_v17 = vsel %vm3435_vm13, %v20917_v49, %v4126_v20  ;;  %v3967_v3 = vpack.c.b16 %v3903_v4, %v3896_v42  ;;  %v20920_v1 = vld [vmem:[#allocation35_spill] sm:$0xff]  ;;  %v20924_v28 = vld [vmem:[#allocation65_spill] sm:$0xff] }
 0x3e9   :  { %v4187_v54 = vpack.c.b16 %v4123_v16, %v4116_v24  ;;  %v3915_v57 = vsel %vm3437_vm15, %v20792_v22, %v3914_v50  ;;  %v4135_v7 = vsel %vm3437_vm15, %v20918_v12, %v4134_v10  ;;  %v4947_v13 = vcombine.high %v4929_v32, %v4943_v47  ;;  %v20922_v40 = vld [vmem:[#allocation63_spill] sm:$0xff]  ;;  %v20923_v50 = vld [vmem:[#allocation64_spill] sm:$0xff] }
 0x3ea   :  { %v4392_v23 = vsel %vm4338_vm11, %v3967_v3, %v4079_v44  ;;  %v3908_v11 = vsel %vm3437_vm15, %v20915_v25, %v3907_v63  ;;  %v4128_v14 = vsel %vm3437_vm15, %v20919_v59, %v4127_v17  ;;  %v3916_v22 = vsel %vm3439_vm2, %v20916_v2, %v3915_v57 }
 0x3eb   :  { %v4136_v37 = vsel %vm3439_vm2, %v20920_v1, %v4135_v7  ;;  %v3918_v4 = vsel %vm3429_vm7, %v20921_v30, %v20920_v1  ;;  %v4129_v16 = vsel %vm3439_vm2, %v20833_v62, %v4128_v14  ;;  %v3917_v38 = vsel %vm3441_vm4, %v20918_v12, %v3916_v22  ;;  %v20925_v7 = vld [vmem:[#allocation67_spill] sm:$0xff]  ;;  %v20926_v1 = vld [vmem:[#allocation54_spill] sm:$0xff] }
 0x3ec   :  { %v4137_v20 = vsel %vm3441_vm4, %v20921_v30, %v4136_v37  ;;  %v4138_v2 = vsel %vm3429_vm7, %v20923_v50, %v20922_v40  ;;  %v3919_v10 = vsel %vm3431_vm6, %v20922_v40, %v3918_v4  ;;  %v4130_v63 = vsel %vm3441_vm4, %v20781_v56, %v4129_v16  ;;  %v20927_v37 = vld [vmem:[#allocation61_spill] sm:$0xff] }
 0x3ed   :  { %v4299_v19 = vpop.permute.xlu1 %4298  ;;  %v4139_v42 = vsel %vm3431_vm6, %v20924_v28, %v4138_v2  ;;  %v4188_v3 = vpack.c.b16 %v4137_v20, %v4130_v63  ;;  %v3920_v12 = vsel %vm3433_vm12, %v20923_v50, %v3919_v10  ;;  %v4183_v30 = vsel %vm3429_vm7, %v20927_v37, %v20926_v1  ;;  %v20929_v28 = vld [vmem:[#allocation55_spill] sm:$0xff] }
 0x3ee   :  { %v4416_v60 = vsel %vm4338_vm11, %v4187_v54, %v4299_v19  ;;  %5602 = vmatmul.mubr.bf16.gmra.mrb[24].mxu1 %v5238_v36  ;;  %v3909_v36 = vsel %vm3439_vm2, %v20917_v49, %v3908_v11  ;;  %v4946_v49 = vcombine.low %v4929_v32, %v4943_v47  ;;  %v4140_v19 = vsel %vm3433_vm12, %v20925_v7, %v4139_v42 }
 0x3ef   :  { %v4522_v29 = vcombine.low %v4392_v23, %v4416_v60  ;;  %v4523_v5 = vcombine.high %v4392_v23, %v4416_v60  ;;  %5641 = vmatprep.mubr.bf16.mxu1 %v4947_v13  ;;  %v3910_v24 = vsel %vm3441_vm4, %v20919_v59, %v3909_v36  ;;  %v3969_v32 = vpack.c.b16 %v3920_v12, %v3920_v12 }
 0x3f0   :  { %v3968_v17 = vpack.c.b16 %v3917_v38, %v3910_v24  ;;  %v4189_v47 = vpack.c.b16 %v4140_v19, %v4140_v19  ;;  %v3963_v16 = vsel %vm3429_vm7, %v16300_v48, %v20888_v39  ;;  %v11750_v50 = vcombine.high %v16992_v43, %v4684_v26 }
 0x3f1   :  { %v4544_v15 = vrot.slane %v4522_v29, %v14417_v27  ;;  %v4551_v6 = vrot.slane %v4523_v5, %v14417_v27  ;;  %v3964_v10 = vsel %vm3431_vm6, %v20926_v1, %v3963_v16 }
 0x3f2   :  { %v3965_v42 = vsel %vm3433_vm12, %v20927_v37, %v3964_v10 }
 0x3f3   :  { %v4982_v44 = vrot.slane %v4544_v15, %v14417_v27  ;;  %v4996_v62 = vrot.slane %v4551_v6, %v14417_v27 }
 0x3f4   :  { %v4081_v25 = vpop.permute.xlu0 %4080 }
 0x3f5   :  { %v5000_v54 = vcombine.high %v4982_v44, %v4996_v62  ;;  %v4395_v13 = vsel %vm4338_vm11, %v3968_v17, %v4081_v25  ;;  %v4999_v15 = vcombine.low %v4982_v44, %v4996_v62  ;;  %v20928_v25 = vld [vmem:[#allocation78_spill] sm:$0xff]  ;;  %v5102_v62 = vrot.slane %v11750_v50, %v14417_v27 }
 0x3f6   :  { %5642 = vmatmul.mubr.bf16.vlgmr.msra.gmra.mrb[28].mxu1 %v4946_v49  ;;  %v4184_v20 = vsel %vm3431_vm6, %v20928_v25, %v4183_v30  ;;  %v4788_v17 = vcombine.low %v17345_v33, %v17358_v58 }
 0x3f7   :  { %v4301_v57 = vpop.permute.xlu1 %4300  ;;  %5649 = vmatprep.mubr.bf16.mxu1 %v5000_v54  ;;  %v4185_v48 = vsel %vm3433_vm12, %v20929_v28, %v4184_v20 }
 0x3f8   :  { %v4419_v23 = vsel %vm4338_vm11, %v4188_v3, %v4301_v57  ;;  %v4083_v56 = vpop.permute.xlu0 %4082  ;;  %v4193_v51 = vpack.c.b16 %v4185_v48, %v4185_v48  ;;  %v4790_v3 = vcombine.low %v17375_v31, %v17367_v8  ;;  %v11756_v7 = vcombine.high %v17235_v9, %v4788_v17  ;;  %v12775_v48 = vld [vmem:[%s20303_s5] ss:$8 sps:$4 sm:$0xff]  }
 0x3f9   :  { %v4575_v60 = vcombine.low %v4395_v13, %v4419_v23  ;;  %v4576_v11 = vcombine.high %v4395_v13, %v4419_v23  ;;  %v4398_v5 = vsel %vm4338_vm11, %v3969_v32, %v4083_v56 }
 0x3fa   :  { %v11758_v19 = vcombine.high %v17358_v58, %v4790_v3  ;;  %v5194_v33 = vrot.slane %v11756_v7, %v14417_v27  ;;  %v12778_v3 = vld [vmem:[%s20303_s5 + $0x10] ss:$8 sps:$4 sm:$0xff]  }
 0x3fb   :  { %v4597_v59 = vrot.slane %v4575_v60, %v14417_v27  ;;  %v4604_v14 = vrot.slane %v4576_v11, %v14417_v27  ;;  %v4303_v29 = vpop.permute.xlu1 %4302 }
 0x3fc   :  { %v4422_v22 = vsel %vm4338_vm11, %v4189_v47, %v4303_v29  ;;  %v4091_v26 = vpop.permute.xlu0 %4090  ;;  %v5208_v23 = vrot.slane %v11758_v19, %v14417_v27 }
 0x3fd   :  { %v4627_v4 = vcombine.low %v4398_v5, %v4422_v22  ;;  %v5035_v6 = vrot.slane %v4597_v59, %v14417_v27  ;;  %v5049_v36 = vrot.slane %v4604_v14, %v14417_v27 }
 0x3fe   :  { %5650 = vmatmul.mubr.bf16.gmra.mrb[32].mxu1 %v4999_v15  ;;  %v5212_v31 = vcombine.high %v5194_v33, %v5208_v23  ;;  %v5211_v58 = vcombine.low %v5194_v33, %v5208_v23 }
 0x3ff   :  { %v4641_v38 = vrot.slane %v4627_v4, %v14417_v27  ;;  %v5053_v40 = vcombine.high %v5035_v6, %v5049_v36  ;;  %v4311_v44 = vpop.permute.xlu1 %4310  ;;  %v5052_v0 = vcombine.low %v5035_v6, %v5049_v36 }
 0x400   :  { %v4434_v63 = vsel %vm4338_vm11, %v4193_v51, %v4311_v44 }
 0x401   :  { %v11748_v2 = vcombine.low %v4641_v38, %v16992_v43  ;;  %5657 = vmatprep.mubr.bf16.mxu1 %v5053_v40  ;;  %v3973_v43 = vpack.c.b16 %v3965_v42, %v3965_v42 }
 0x403   :  { %v5088_v39 = vrot.slane %v11748_v2, %v14417_v27  ;;  %v4410_v49 = vsel %vm4338_vm11, %v3973_v43, %v4091_v26 }
 0x404   :  { %v4810_v54 = vcombine.low %v4410_v49, %v4434_v63 }
 0x405   :  { %v5106_v24 = vcombine.high %v5088_v39, %v5102_v62  ;;  %v5105_v57 = vcombine.low %v5088_v39, %v5102_v62  ;;  %v12777_v39 = vld [vmem:[%s20303_s5 + $0x4] ss:$8 sps:$4 sm:$0xff]  }
 0x406   :  { %5658 = vmatmul.mubr.bf16.gmra.mrb[36].mxu1 %v5052_v0  ;;  %v4824_v12 = vrot.slane %v4810_v54, %v14417_v27  ;;  %8807 = vmatprep.subr.bf16.mxu1 %v12777_v39  ;;  %v12780_v54 = vld [vmem:[%s20303_s5 + $0x14] ss:$8 sps:$4 sm:$0xff]  }
 0x407   :  { %5665 = vmatprep.mubr.bf16.mxu1 %v5106_v24  ;;  %8808 = vmatpush1.bf16.msra.mxu1 %v12775_v48 }
 0x408   :  { %v4825_v13 = vcombine.low %v17392_v53, %v4824_v12  ;;  %8809 = vmatprep.subr.bf16.mxu1 %v12780_v54 }
 0x40a   :  { %v11760_v60 = vcombine.high %v17367_v8, %v4825_v13 }
 0x40b   :  { %8810 = vmatpush1.bf16.msra.mxu1 %v12778_v3  ;;  %v12786_v3 = vld [vmem:[%s20303_s5 + $0x34] ss:$8 sps:$4 sm:$0xff]  }
 0x40c   :  { %v5245_v9 = vrot.slane %v11760_v60, %v14417_v27 }
 0x40e   :  { %5666 = vmatmul.mubr.bf16.gmra.mrb[40].mxu1 %v5105_v57  ;;  %v5247_v11 = vcombine.high %v5245_v9, %v5245_v9  ;;  %v17599_v57 = vld [vmem:[%s20302_s4] ss:$0 sm:$0xff] }
 0x40f   :  { %5673 = vmatprep.mubr.bf16.mxu1 %v5159_v21  ;;  %v5556_v19 = vadd.f32 %v17137_v45, %v17599_v57 }
 0x416   :  { %5674 = vmatmul.mubr.bf16.gmra.mrb[44].mxu1 %v5158_v61 }
 0x417   :  { %5681 = vmatprep.mubr.bf16.mxu1 %v5212_v31  ;;  %v5559_v31 = vadd.f32 %v17182_v41, %v17599_v57  ;;  %v5567_v41 = vadd.f32 %v17347_v18, %v17599_v57 }
 0x41e   :  { %5682 = vmatmul.mubr.bf16.gmra.mrb[48].mxu1 %v5211_v58  ;;  %v20930_v58 = vld [vmem:[#allocation85_spill] sm:$0xff] }
 0x41f   :  { %5689 = vmatprep.mubr.bf16.mxu1 %v5247_v11 }
 0x426   :  { %5690 = vmatmul.mubr.bf16.gmra.mrb[52].mxu1 %v5245_v9 }
 0x428   :  { %v12214_v21 = vpop.f32.mrb[8].mxu1 }
 0x429   :  { %v12215_v53 = vpop.f32.mrb[9].mxu1 }
 0x42a   :  { %v17556_v56 = vadd.f32 %v12215_v53, %v12214_v21  ;;  %v12217_v32 = vpop.f32.mrb[10].mxu1 }
 0x42b   :  { %v12218_v47 = vpop.f32.mrb[11].mxu1 }
 0x42c   :  { %v17558_v59 = vadd.f32 %v12218_v47, %v12217_v32  ;;  %v20931_v32 = vld [vmem:[#allocation100_spill] sm:$0xff]  ;;  %v5572_v39 = vadd.f32 %v17556_v56, %v17599_v57 }
 0x42e   :  { %v17560_v8 = vpop.f32.mrb[76].mxu0 }
 0x42f   :  { %v12606_v35 = vpop.f32.mrb[77].mxu0 }
 0x430   :  { %v17562_v55 = vpop.f32.mrb[78].mxu0 }
 0x431   :  { %v12607_v61 = vpop.f32.mrb[79].mxu0 }
 0x454   :  { %v17564_v14 = vpop.f32.mrb[80].mxu0 }
 0x455   :  { %v12610_v29 = vpop.f32.mrb[81].mxu0 }
 0x456   :  { %v17566_v5 = vpop.f32.mrb[82].mxu0  ;;  %v5564_v29 = vadd.f32 %v17330_v34, %v17599_v57  ;;  %v20932_v34 = vld [vmem:[#allocation88_spill] sm:$0xff] }
 0x457   :  { %v12611_v22 = vpop.f32.mrb[83].mxu0 }
 0x461   :  { %v17568_v1 = vpop.f32.mrb[84].mxu0 }
 0x462   :  { %v12614_v37 = vpop.f32.mrb[85].mxu0 }
 0x463   :  { %v5782_v30 = vpop.f32.mrb[86].mxu0 }
 0x464   :  { %v12615_v4 = vpop.f32.mrb[87].mxu0 }
 0x47b   :  { %v12220_v15 = vpop.f32.mrb[12].mxu1 }
 0x47c   :  { %v12221_v6 = vpop.f32.mrb[13].mxu1 }
 0x47d   :  { %v17570_v36 = vadd.f32 %v12221_v6, %v12220_v15  ;;  %v12223_v16 = vpop.f32.mrb[14].mxu1  ;;  %v12781_v6 = vld [vmem:[%s20303_s5 + $0x20] ss:$8 sps:$4 sm:$0xff]  }
 0x47e   :  { %v12224_v38 = vpop.f32.mrb[15].mxu1 }
 0x47f   :  { %v17572_v25 = vadd.f32 %v12224_v38, %v12223_v16  ;;  %v12783_v16 = vld [vmem:[%s20303_s5 + $0x24] ss:$8 sps:$4 sm:$0xff]  }
 0x480   :  { %8811 = vmatprep.subr.bf16.mxu1 %v12783_v16 }
 0x481   :  { %8812 = vmatpush1.bf16.msra.mxu1 %v12781_v6 }
 0x482   :  { %8813 = vmatprep.subr.bf16.mxu1 %v12786_v3 }
 0x499   :  { %v12226_v20 = vpop.f32.mrb[16].mxu1 }
 0x49a   :  { %v12227_v40 = vpop.f32.mrb[17].mxu1 }
 0x49b   :  { %v17574_v50 = vadd.f32 %v12227_v40, %v12226_v20  ;;  %v12229_v2 = vpop.f32.mrb[18].mxu1 }
 0x49c   :  { %v12230_v10 = vpop.f32.mrb[19].mxu1 }
 0x49d   :  { %v17576_v28 = vadd.f32 %v12230_v10, %v12229_v2  ;;  %v20933_v2 = vld [vmem:[#allocation102_spill] sm:$0xff] }
 0x4b9   :  { %v12232_v42 = vpop.f32.mrb[20].mxu1 }
 0x4ba   :  { %v12233_v44 = vpop.f32.mrb[21].mxu1 }
 0x4bb   :  { %v17584_v62 = vadd.f32 %v12233_v44, %v12232_v42  ;;  %v12235_v51 = vpop.f32.mrb[22].mxu1 }
 0x4bc   :  { %v12236_v0 = vpop.f32.mrb[23].mxu1 }
 0x4bd   :  { %v17586_v26 = vadd.f32 %v12236_v0, %v12235_v51 }
 0x4c1   :  { %v12238_v24 = vpop.f32.mrb[24].mxu1 }
 0x4c2   :  { %v12239_v43 = vpop.f32.mrb[25].mxu1 }
 0x4c3   :  { %v17588_v63 = vadd.f32 %v12239_v43, %v12238_v24  ;;  %v12241_v49 = vpop.f32.mrb[26].mxu1  ;;  %v5575_v24 = vadd.f32 %v17558_v59, %v17599_v57 }
 0x4c4   :  { %v12242_v17 = vpop.f32.mrb[27].mxu1 }
 0x4c5   :  { %v12784_v17 = vld [vmem:[%s20303_s5 + $0x30] ss:$8 sps:$4 sm:$0xff]  }
 0x4c6   :  { %8814 = vmatpush1.bf16.msra.mxu1 %v12784_v17 }
 0x4c9   :  { %v12260_v12 = vpop.f32.mrb[28].mxu1 }
 0x4ca   :  { %v12261_v7 = vpop.f32.mrb[29].mxu1 }
 0x4cb   :  { %v12262_v13 = vadd.f32 %v12261_v7, %v12260_v12  ;;  %v12263_v33 = vpop.f32.mrb[30].mxu1  ;;  %v20934_v12 = vld [vmem:[#allocation36_spill] sm:$0xff] }
 0x4cc   :  { %v12264_v23 = vpop.f32.mrb[31].mxu1 }
 0x4cd   :  { %v5644_v60 = vadd.f32 %v12262_v13, %v5556_v19  ;;  %v12265_v9 = vadd.f32 %v12264_v23, %v12263_v33  ;;  %v20935_v23 = vld [vmem:[#allocation37_spill] sm:$0xff] }
 0x4cf   :  { %v5732_v11 = vadd.f32 %v20930_v58, %v5644_v60  ;;  %v5647_v21 = vadd.f32 %v12265_v9, %v5559_v31 }
 0x4d1   :  { %v5798_v53 = vmul.f32 1.442695, %v5732_v11  ;;  %v5735_v47 = vadd.f32 %v20931_v32, %v5647_v21  ;;  %v12266_v35 = vpop.f32.mrb[32].mxu1  ;;  %vm5785_vm5 = vcmp.gt.f32.partialorder %v5732_v11, 0.0 }
 0x4d2   :  { %v12267_v61 = vpop.f32.mrb[33].mxu1 }
 0x4d3   :  { %13199 = vpow2.f32 %v5798_v53  ;;  %v5800_v45 = vmul.f32 1.442695, %v5735_v47  ;;  %v12268_v22 = vadd.f32 %v12267_v61, %v12266_v35  ;;  %v12269_v37 = vpop.f32.mrb[34].mxu1  ;;  %vm5786_vm14 = vcmp.gt.f32.partialorder %v5735_v47, 0.0 }
 0x4d4   :  { %v12270_v30 = vpop.f32.mrb[35].mxu1  ;;  %v5580_v61 = vadd.f32 %v17570_v36, %v17599_v57 }
 0x4d5   :  { %13201 = vpow2.f32 %v5800_v45  ;;  %v5652_v4 = vadd.f32 %v12268_v22, %v5564_v29  ;;  %v12271_v15 = vadd.f32 %v12270_v30, %v12269_v37 }
 0x4d7   :  { %v17618_v38 = vadd.f32 %v20932_v34, %v5652_v4  ;;  %v5655_v20 = vadd.f32 %v12271_v15, %v5567_v41 }
 0x4d9   :  { %v5802_v40 = vmul.f32 1.442695, %v17618_v38  ;;  %v17622_v18 = vadd.f32 %v20933_v2, %v5655_v20  ;;  %v12272_v10 = vpop.f32.mrb[36].mxu1  ;;  %vm5787_vm0 = vcmp.gt.f32.partialorder %v17618_v38, 0.0 }
 0x4da   :  { %v12273_v48 = vpop.f32.mrb[37].mxu1 }
 0x4db   :  { %13203 = vpow2.f32 %v5802_v40  ;;  %v12274_v42 = vadd.f32 %v12273_v48, %v12272_v10  ;;  %v12275_v44 = vpop.f32.mrb[38].mxu1  ;;  %v5804_v59 = vmul.f32 1.442695, %v17622_v18  ;;  %vm5788_vm8 = vcmp.gt.f32.partialorder %v17622_v18, 0.0 }
 0x4dc   :  { %v12276_v51 = vpop.f32.mrb[39].mxu1 }
 0x4dd   :  { %v13200_v0 = vpop.eup %13199  ;;  %v5660_v43 = vadd.f32 %v12274_v42, %v5572_v39  ;;  %v12277_v49 = vadd.f32 %v12276_v51, %v12275_v44  ;;  %13205 = vpow2.f32 %v5804_v59 }
 0x4de   :  { %v11804_v54 = vadd.f32 -1.0, %v13200_v0 }
 0x4df   :  { %v13202_v56 = vpop.eup %13201  ;;  %v17635_v7 = vadd.f32 %v20934_v12, %v5660_v43  ;;  %v5663_v19 = vadd.f32 %v12277_v49, %v5575_v24 }
 0x4e0   :  { %v5837_v13 = vmul.f32 1.6732632, %v11804_v54  ;;  %v11805_v33 = vadd.f32 -1.0, %v13202_v56 }
 0x4e1   :  { %v17639_v31 = vadd.f32 %v20935_v23, %v5663_v19  ;;  %v12278_v60 = vpop.f32.mrb[40].mxu1  ;;  %v5806_v21 = vmul.f32 1.442695, %v17635_v7  ;;  %vm5789_vm9 = vcmp.gt.f32.partialorder %v17635_v7, 0.0 }
 0x4e2   :  { %v5850_v9 = vsel %vm5785_vm5, %v5732_v11, %v5837_v13  ;;  %v5838_v58 = vmul.f32 1.6732632, %v11805_v33  ;;  %v12279_v53 = vpop.f32.mrb[41].mxu1 }
 0x4e3   :  { %v5863_v32 = vmul.f32 1.050701, %v5850_v9  ;;  %v12281_v35 = vpop.f32.mrb[42].mxu1  ;;  %v12280_v45 = vadd.f32 %v12279_v53, %v12278_v60  ;;  %13207 = vpow2.f32 %v5806_v21  ;;  %v17653_v2 = vmul.f32 1.442695, %v17639_v31 }
 0x4e4   :  { %v5851_v29 = vsel %vm5786_vm14, %v5735_v47, %v5838_v58  ;;  %v12282_v22 = vpop.f32.mrb[43].mxu1  ;;  %vm5790_vm10 = vcmp.gt.f32.partialorder %v17639_v31, 0.0 }
 0x4e5   :  { %v13204_v37 = vpop.eup %13203  ;;  %v5889_v30 = vcombine.high %v5863_v32, %v5863_v32  ;;  %v5896_v41 = vrot.slane %v5863_v32, %v14417_v27  ;;  %v5864_v4 = vmul.f32 1.050701, %v5851_v29  ;;  %v17645_v11 = vadd.f32 %v12280_v45, %v5580_v61  ;;  %v12787_v29 = vld [vmem:[%s20303_s5 + $0x40] ss:$8 sps:$4 sm:$0xff]   ;;  %v12789_v45 = vld [vmem:[%s20303_s5 + $0x44] ss:$8 sps:$4 sm:$0xff]  }
 0x4e6   :  { %v17647_v15 = vadd.f32 %v12282_v22, %v12281_v35  ;;  %v11806_v40 = vadd.f32 -1.0, %v13204_v37  ;;  %8815 = vmatprep.subr.bf16.mxu1 %v12789_v45  ;;  %13209 = vpow2.f32 %v17653_v2  ;;  %v17708_v2 = vadd.f32 %v17576_v28, %v17599_v57 }
 0x4e7   :  { %v5903_v6 = vrot.slane %v5889_v30, %v14417_v27  ;;  %v5904_v16 = vcombine.high %v5896_v41, %v5896_v41  ;;  %v6163_v36 = vsel %vm6162_vm3, %v5896_v41, -inf  ;;  %v5906_v34 = vcombine.high %v5864_v4, %v5864_v4  ;;  %v13206_v22 = vpop.eup %13205  ;;  %8816 = vmatpush1.bf16.msra.mxu1 %v12787_v29 }
 0x4e8   :  { %v6164_v47 = vrot.slane %v6163_v36, 4  ;;  %v5913_v20 = vrot.slane %v5864_v4, %v14417_v27 }
 0x4e9   :  { %v5905_v10 = vcombine.high %v5903_v6, %v5903_v6  ;;  %v6170_v48 = vsel %vm6162_vm3, %v5904_v16, -inf  ;;  %v6177_v39 = vsel %vm6162_vm3, %v5903_v6, -inf  ;;  %v5920_v42 = vrot.slane %v5906_v34, %v14417_v27  ;;  %v17658_v44 = vpop.f32.mrb[44].mxu1 }
 0x4ea   :  { %v6165_v51 = vmax.f32 %v6163_v36, %v6164_v47  ;;  %v6171_v0 = vrot.slane %v6170_v48, 4  ;;  %v6178_v24 = vrot.slane %v6177_v39, 4  ;;  %v5921_v43 = vcombine.high %v5913_v20, %v5913_v20  ;;  %v17660_v49 = vpop.f32.mrb[45].mxu1 }
 0x4eb   :  { %v6184_v17 = vsel %vm6162_vm3, %v5905_v10, -inf  ;;  %v5922_v3 = vcombine.high %v5920_v42, %v5920_v42  ;;  %v6191_v54 = vsel %vm6162_vm3, %v5913_v20, -inf  ;;  %v6205_v56 = vsel %vm6162_vm3, %v5920_v42, -inf  ;;  %v17665_v12 = vpop.f32.mrb[46].mxu1 }
 0x4ec   :  { %v6166_v19 = vrot.slane %v6165_v51, 2  ;;  %v6172_v13 = vmax.f32 %v6170_v48, %v6171_v0  ;;  %v6179_v33 = vmax.f32 %v6177_v39, %v6178_v24  ;;  %v6185_v59 = vrot.slane %v6184_v17, 4  ;;  %v17667_v23 = vpop.f32.mrb[47].mxu1 }
 0x4ed   :  { %v6192_v60 = vrot.slane %v6191_v54, 4  ;;  %v6198_v9 = vsel %vm6162_vm3, %v5921_v43, -inf  ;;  %v6206_v58 = vrot.slane %v6205_v56, 4  ;;  %v6212_v21 = vsel %vm6162_vm3, %v5922_v3, -inf  ;;  %v17677_v6 = vpop.eup %13207 }
 0x4ee   :  { %v6167_v53 = vmax.f32 %v6165_v51, %v6166_v19  ;;  %v6173_v32 = vrot.slane %v6172_v13, 2  ;;  %v6180_v35 = vrot.slane %v6179_v33, 2  ;;  %v6186_v61 = vmax.f32 %v6184_v17, %v6185_v59 }
 0x4ef   :  { %v6193_v37 = vmax.f32 %v6191_v54, %v6192_v60  ;;  %v6199_v30 = vrot.slane %v6198_v9, 4  ;;  %v6207_v41 = vmax.f32 %v6205_v56, %v6206_v58  ;;  %v6213_v4 = vrot.slane %v6212_v21, 4 }
 0x4f0   :  { %v6168_v16 = vrot.slane %v6167_v53, 1  ;;  %v6174_v36 = vmax.f32 %v6172_v13, %v6173_v32  ;;  %v6181_v34 = vmax.f32 %v6179_v33, %v6180_v35  ;;  %v6187_v47 = vrot.slane %v6186_v61, 2 }
 0x4f1   :  { %v6194_v20 = vrot.slane %v6193_v37, 2  ;;  %v6200_v10 = vmax.f32 %v6198_v9, %v6199_v30  ;;  %v6208_v48 = vrot.slane %v6207_v41, 2  ;;  %v6214_v39 = vmax.f32 %v6212_v21, %v6213_v4  ;;  %v17679_v42 = vpop.f32.mrb[48].mxu1 }
 0x4f2   :  { %v6169_v51 = vmax.f32 %v6167_v53, %v6168_v16  ;;  %v6175_v0 = vrot.slane %v6174_v36, 1  ;;  %v6182_v24 = vrot.slane %v6181_v34, 1  ;;  %v6188_v43 = vmax.f32 %v6186_v61, %v6187_v47  ;;  %v17681_v17 = vpop.f32.mrb[49].mxu1 }
 0x4f3   :  { %v6195_v3 = vmax.f32 %v6193_v37, %v6194_v20  ;;  %v6201_v54 = vrot.slane %v6200_v10, 2  ;;  %v6209_v56 = vmax.f32 %v6207_v41, %v6208_v48  ;;  %v6215_v19 = vrot.slane %v6214_v39, 2  ;;  %v12790_v37 = vld [vmem:[%s20303_s5 + $0x50] ss:$8 sps:$4 sm:$0xff]   ;;  %v17694_v16 = vpop.f32.mrb[50].mxu1 }
 0x4f4   :  { %v6176_v13 = vmax.f32 %v6174_v36, %v6175_v0  ;;  %v6183_v33 = vmax.f32 %v6181_v34, %v6182_v24  ;;  %v6189_v59 = vrot.slane %v6188_v43, 1  ;;  %v5839_v60 = vmul.f32 1.6732632, %v11806_v40  ;;  %v12792_v40 = vld [vmem:[%s20303_s5 + $0x54] ss:$8 sps:$4 sm:$0xff]   ;;  %v17698_v20 = vpop.f32.mrb[51].mxu1 }
 0x4f5   :  { %v6196_v9 = vrot.slane %v6195_v3, 1  ;;  %v6202_v58 = vmax.f32 %v6200_v10, %v6201_v54  ;;  %v6210_v21 = vrot.slane %v6209_v56, 1  ;;  %v6216_v32 = vmax.f32 %v6214_v39, %v6215_v19  ;;  %8817 = vmatprep.subr.bf16.mxu1 %v12792_v40 }
 0x4f6   :  { %v6190_v35 = vmax.f32 %v6188_v43, %v6189_v59  ;;  %v6527_v29 = vpack.c.bf16 %v6169_v51, %v6169_v51  ;;  %v6528_v53 = vpack.c.bf16 %v6176_v13, %v6176_v13  ;;  %v6529_v45 = vpack.c.bf16 %v6183_v33, %v6183_v33  ;;  %8818 = vmatpush1.bf16.msra.mxu1 %v12790_v37 }
 0x4f7   :  { %v5583_v61 = vadd.f32 %v17572_v25, %v17599_v57  ;;  %v6203_v41 = vrot.slane %v6202_v58, 1  ;;  %v5852_v4 = vsel %vm5787_vm0, %v17618_v38, %v5839_v60  ;;  %v6197_v25 = vmax.f32 %v6195_v3, %v6196_v9 }
 0x4f8   :  { %v6616_v30 = vunpack.c.l.b16 %v6528_v53  ;;  %v6530_v36 = vpack.c.bf16 %v6190_v35, %v6190_v35  ;;  %v17696_v34 = vmax.f32 %v6209_v56, %v6210_v21  ;;  %v6217_v47 = vrot.slane %v6216_v32, 1 }
 0x4f9   :  { %v6615_v10 = vunpack.c.l.b16 %v6527_v29  ;;  %v17700_v48 = vunpack.c.l.b16 %v6529_v45  ;;  %v5865_v39 = vmul.f32 1.050701, %v5852_v4  ;;  %v11807_v51 = vadd.f32 -1.0, %v13206_v22  ;;  %v13210_v29 = vpop.eup %13209 }
 0x4fa   :  { %v17704_v38 = vadd.f32 %v17574_v50, %v17599_v57  ;;  %v17712_v0 = vadd.f32 %v17584_v62, %v17599_v57  ;;  %v17716_v24 = vadd.f32 %v17586_v26, %v17599_v57  ;;  %v17720_v22 = vadd.f32 %v17588_v63, %v17599_v57 }
 0x4fb   :  { %v6651_v43 = vsel %vm3429_vm7, %v6616_v30, %v6615_v10  ;;  %v17723_v50 = vmax.f32 %v6202_v58, %v6203_v41  ;;  %v17726_v28 = vunpack.c.l.b16 %v6530_v36  ;;  %v17728_v3 = vmax.f32 %v6216_v32, %v6217_v47 }
 0x4fc   :  { %v6531_v62 = vpack.c.bf16 %v6197_v25, %v6197_v25  ;;  %v17734_v26 = vsel %vm3429_vm7, %v17700_v48, %v6616_v30  ;;  %v5923_v63 = vcombine.high %v5865_v39, %v5865_v39  ;;  %v5930_v57 = vrot.slane %v5865_v39, %v14417_v27 }
 0x4fd   :  { %v5840_v56 = vmul.f32 1.6732632, %v11807_v51  ;;  %v6652_v19 = vsel %vm3431_vm6, %v17700_v48, %v6651_v43  ;;  %v11808_v13 = vadd.f32 -1.0, %v17677_v6  ;;  %v17742_v33 = vadd.f32 %v17426_v52, %v17645_v11  ;;  %v12793_v6 = vld [vmem:[%s20303_s5 + $0x60] ss:$8 sps:$4 sm:$0xff]   ;;  %v17759_v11 = vpop.f32.mrb[52].mxu1 }
 0x4fe   :  { %v17745_v59 = vadd.f32 %v17647_v15, %v5583_v61  ;;  %v5937_v60 = vrot.slane %v5923_v63, %v14417_v27  ;;  %v5938_v9 = vcombine.high %v5930_v57, %v5930_v57  ;;  %v6219_v58 = vsel %vm6162_vm3, %v5930_v57, -inf  ;;  %v12795_v52 = vld [vmem:[%s20303_s5 + $0x64] ss:$8 sps:$4 sm:$0xff]   ;;  %v17769_v40 = vpop.f32.mrb[53].mxu1 }
 0x4ff   :  { %v5853_v21 = vsel %vm5788_vm8, %v17622_v18, %v5840_v56  ;;  %v6532_v15 = vpack.c.bf16 %v17723_v50, %v17723_v50  ;;  %v6220_v35 = vrot.slane %v6219_v58, 4  ;;  %v17765_v53 = vunpack.c.l.b16 %v6531_v62  ;;  %8819 = vmatprep.subr.bf16.mxu1 %v12795_v52  ;;  %v12299_v25 = vpop.f32.mrb[54].mxu1  ;;  %v12796_v50 = vld [vmem:[%s20303_s5 + $0x70] ss:$8 sps:$4 sm:$0xff]  }
 0x500   :  { %v5866_v18 = vmul.f32 1.050701, %v5853_v21  ;;  %v5939_v45 = vcombine.high %v5937_v60, %v5937_v60  ;;  %v6226_v61 = vsel %vm6162_vm3, %v5938_v9, -inf  ;;  %v6233_v37 = vsel %vm6162_vm3, %v5937_v60, -inf  ;;  %8820 = vmatpush1.bf16.msra.mxu1 %v12793_v6  ;;  %v12300_v43 = vpop.f32.mrb[55].mxu1 }
 0x501   :  { %v6221_v30 = vmax.f32 %v6219_v58, %v6220_v35  ;;  %v6227_v41 = vrot.slane %v6226_v61, 4  ;;  %v6234_v4 = vrot.slane %v6233_v37, 4  ;;  %v17773_v47 = vsel %vm3433_vm12, %v17726_v28, %v6652_v19 }
 0x502   :  { %v5940_v36 = vcombine.high %v5866_v18, %v5866_v18  ;;  %v6240_v10 = vsel %vm6162_vm3, %v5939_v45, -inf  ;;  %v5947_v39 = vrot.slane %v5866_v18, %v14417_v27  ;;  %v5841_v51 = vmul.f32 1.6732632, %v11808_v13 }
 0x503   :  { %v6222_v62 = vrot.slane %v6221_v30, 2  ;;  %v6228_v63 = vmax.f32 %v6226_v61, %v6227_v41  ;;  %v6235_v57 = vmax.f32 %v6233_v37, %v6234_v4  ;;  %v6241_v56 = vrot.slane %v6240_v10, 4 }
 0x504   :  { %v5954_v60 = vrot.slane %v5940_v36, %v14417_v27  ;;  %v5955_v9 = vcombine.high %v5947_v39, %v5947_v39  ;;  %v6247_v58 = vsel %vm6162_vm3, %v5947_v39, -inf  ;;  %v11809_v21 = vadd.f32 -1.0, %v13210_v29 }
 0x505   :  { %v6223_v6 = vmax.f32 %v6221_v30, %v6222_v62  ;;  %v6229_v52 = vrot.slane %v6228_v63, 2  ;;  %v6236_v19 = vrot.slane %v6235_v57, 2  ;;  %v6242_v35 = vmax.f32 %v6240_v10, %v6241_v56 }
 0x506   :  { %v5956_v25 = vcombine.high %v5954_v60, %v5954_v60  ;;  %v6248_v45 = vrot.slane %v6247_v58, 4  ;;  %v6254_v18 = vsel %vm6162_vm3, %v5955_v9, -inf  ;;  %v6261_v13 = vsel %vm6162_vm3, %v5954_v60, -inf }
 0x507   :  { %v6230_v61 = vmax.f32 %v6228_v63, %v6229_v52  ;;  %v6237_v37 = vmax.f32 %v6235_v57, %v6236_v19  ;;  %v6243_v41 = vrot.slane %v6242_v35, 2  ;;  %v5854_v4 = vsel %vm5789_vm9, %v17635_v7, %v5841_v51 }
 0x508   :  { %v6249_v29 = vmax.f32 %v6247_v58, %v6248_v45  ;;  %v6255_v30 = vrot.slane %v6254_v18, 4  ;;  %v6262_v36 = vrot.slane %v6261_v13, 4  ;;  %v6268_v10 = vsel %vm6162_vm3, %v5956_v25, -inf }
 0x509   :  { %v6727_v39 = vsel %vm3429_vm7, %v17726_v28, %v17700_v48  ;;  %v6224_v43 = vrot.slane %v6223_v6, 1  ;;  %v6244_v62 = vmax.f32 %v6242_v35, %v6243_v41  ;;  %v5842_v56 = vmul.f32 1.6732632, %v11809_v21 }
 0x50a   :  { %v6250_v60 = vrot.slane %v6249_v29, 2  ;;  %v6256_v63 = vmax.f32 %v6254_v18, %v6255_v30  ;;  %v6263_v57 = vmax.f32 %v6261_v13, %v6262_v36  ;;  %v6269_v9 = vrot.slane %v6268_v10, 4  ;;  %v12801_v36 = vld [vmem:[%s20303_s5 + $0x84] ss:$8 sps:$4 sm:$0xff]  }
 0x50b   :  { %v6231_v52 = vrot.slane %v6230_v61, 1  ;;  %v6238_v19 = vrot.slane %v6237_v37, 1  ;;  %v6245_v32 = vrot.slane %v6244_v62, 1  ;;  %v5867_v7 = vmul.f32 1.050701, %v5854_v4 }
 0x50c   :  { %v6251_v51 = vmax.f32 %v6249_v29, %v6250_v60  ;;  %v6257_v58 = vrot.slane %v6256_v63, 2  ;;  %v6264_v45 = vrot.slane %v6263_v57, 2  ;;  %v6270_v54 = vmax.f32 %v6268_v10, %v6269_v9  ;;  %v12804_v9 = vld [vmem:[%s20303_s5 + $0x94] ss:$8 sps:$4 sm:$0xff]  }
 0x50d   :  { %v17792_v25 = vsel %vm3431_vm6, %v17726_v28, %v17734_v26  ;;  %v17797_v48 = vunpack.c.l.b16 %v6532_v15  ;;  %v20937_v21 = vpack.c.bf16 %v17696_v34, %v17696_v34  ;;  %v17804_v18 = vmax.f32 %v6223_v6, %v6224_v43  ;;  %v12798_v34 = vld [vmem:[%s20303_s5 + $0x74] ss:$8 sps:$4 sm:$0xff]  }
 0x50e   :  { %20936 = vst [vmem:[#allocation38_spill] sm:$0xff] %v17792_v25  ;;  %v20938_v13 = vpack.c.bf16 %v17728_v3, %v17728_v3  ;;  %v6258_v4 = vmax.f32 %v6256_v63, %v6257_v58  ;;  %v6265_v26 = vmax.f32 %v6263_v57, %v6264_v45  ;;  %v6271_v29 = vrot.slane %v6270_v54, 2  ;;  %8821 = vmatprep.subr.bf16.mxu1 %v12798_v34 }
 0x50f   :  { %v17802_v35 = vunpack.c.l.b16 %v20937_v21  ;;  %v17819_v15 = vsel %vm3431_vm6, %v17765_v53, %v6727_v39  ;;  %v17824_v3 = vsel %vm3429_vm7, %v17765_v53, %v17726_v28  ;;  %v5957_v6 = vcombine.high %v5867_v7, %v5867_v7  ;;  %8822 = vmatpush1.bf16.msra.mxu1 %v12796_v50 }
 0x510   :  { %v17809_v41 = vunpack.c.l.b16 %v20938_v13  ;;  %20940 = vst [vmem:[#allocation31_spill] sm:$0xff] %v17819_v15  ;;  %20941 = vst [vmem:[#allocation50_spill] sm:$0xff] %v17824_v3  ;;  %v5855_v30 = vsel %vm5790_vm10, %v17639_v31, %v5842_v56  ;;  %v17832_v10 = vmax.f32 %v6230_v61, %v6231_v52  ;;  %v17834_v43 = vmax.f32 %v6237_v37, %v6238_v19 }
 0x511   :  { %v17836_v39 = vmax.f32 %v6244_v62, %v6245_v32  ;;  %v6252_v60 = vrot.slane %v6251_v51, 1  ;;  %v17841_v28 = vsel %vm3429_vm7, %v17797_v48, %v17765_v53  ;;  %v5964_v56 = vrot.slane %v5867_v7, %v14417_v27  ;;  %v12799_v32 = vld [vmem:[%s20303_s5 + $0x80] ss:$8 sps:$4 sm:$0xff]   ;;  %8823 = vmatprep.subr.bf16.mxu1 %v12801_v36 }
 0x512   :  { %20939 = vst [vmem:[#allocation39_spill] sm:$0xff] %v17809_v41  ;;  %20942 = vst [vmem:[#allocation69_spill] sm:$0xff] %v17841_v28  ;;  %v5971_v63 = vrot.slane %v5957_v6, %v14417_v27  ;;  %v6259_v61 = vrot.slane %v6258_v4, 1  ;;  %v6266_v37 = vrot.slane %v6265_v26, 1  ;;  %v17850_v62 = vmax.f32 %v6270_v54, %v6271_v29 }
 0x513   :  { %v5868_v57 = vmul.f32 1.050701, %v5855_v30  ;;  %v5972_v52 = vcombine.high %v5964_v56, %v5964_v56  ;;  %v6275_v7 = vsel %vm6162_vm3, %v5964_v56, -inf  ;;  %v17863_v13 = vmax.f32 %v6251_v51, %v6252_v60  ;;  %8824 = vmatpush1.bf16.msra.mxu1 %v12799_v32  ;;  %v12802_v30 = vld [vmem:[%s20303_s5 + $0x90] ss:$8 sps:$4 sm:$0xff]  }
 0x514   :  { %v5973_v19 = vcombine.high %v5971_v63, %v5971_v63  ;;  %v6289_v58 = vsel %vm6162_vm3, %v5971_v63, -inf  ;;  %v6276_v29 = vrot.slane %v6275_v7, 4  ;;  %v17870_v36 = vmax.f32 %v6258_v4, %v6259_v61  ;;  %8825 = vmatprep.subr.bf16.mxu1 %v12804_v9  ;;  %v12807_v51 = vld [vmem:[%s20303_s5 + $0xa4] ss:$8 sps:$4 sm:$0xff]  }
 0x515   :  { %v6282_v50 = vsel %vm6162_vm3, %v5972_v52, -inf  ;;  %v6290_v34 = vrot.slane %v6289_v58, 4  ;;  %v17872_v56 = vmax.f32 %v6265_v26, %v6266_v37  ;;  %v6273_v63 = vrot.slane %v17850_v62, 1 }
 0x516   :  { %v6296_v6 = vsel %vm6162_vm3, %v5973_v19, -inf  ;;  %v6283_v54 = vrot.slane %v6282_v50, 4  ;;  %v6277_v60 = vmax.f32 %v6275_v7, %v6276_v29  ;;  %v5974_v32 = vcombine.high %v5868_v57, %v5868_v57  ;;  %v12805_v7 = vld [vmem:[%s20303_s5 + $0xa0] ss:$8 sps:$4 sm:$0xff]  }
 0x517   :  { %v6291_v52 = vmax.f32 %v6289_v58, %v6290_v34  ;;  %v6297_v19 = vrot.slane %v6296_v6, 4  ;;  %v6539_v21 = vpack.c.bf16 %v17863_v13, %v17863_v13  ;;  %v5981_v4 = vrot.slane %v5868_v57, %v14417_v27  ;;  %8826 = vmatpush1.bf16.msra.mxu1 %v12802_v30  ;;  %v12810_v57 = vld [vmem:[%s20303_s5 + $0xb4] ss:$8 sps:$4 sm:$0xff]  }
 0x518   :  { %v6284_v45 = vmax.f32 %v6282_v50, %v6283_v54  ;;  %v5810_v26 = vmul.f32 1.442695, %v17742_v33  ;;  %v6278_v61 = vrot.slane %v6277_v60, 2  ;;  %v5988_v9 = vrot.slane %v5974_v32, %v14417_v27  ;;  %8827 = vmatprep.subr.bf16.mxu1 %v12807_v51  ;;  %v12808_v51 = vld [vmem:[%s20303_s5 + $0xb0] ss:$8 sps:$4 sm:$0xff]  }
 0x519   :  { %v6292_v37 = vrot.slane %v6291_v52, 2  ;;  %v6298_v31 = vmax.f32 %v6296_v6, %v6297_v19  ;;  %v5989_v29 = vcombine.high %v5981_v4, %v5981_v4  ;;  %v6303_v34 = vsel %vm6162_vm3, %v5981_v4, -inf }
 0x51a   :  { %v6285_v58 = vrot.slane %v6284_v45, 2  ;;  %13211 = vpow2.f32 %v5810_v26  ;;  %v6279_v54 = vmax.f32 %v6277_v60, %v6278_v61  ;;  %v5990_v6 = vcombine.high %v5988_v9, %v5988_v9 }
 0x51b   :  { %v6293_v13 = vmax.f32 %v6291_v52, %v6292_v37  ;;  %v6299_v50 = vrot.slane %v6298_v31, 2  ;;  %v6304_v30 = vrot.slane %v6303_v34, 4  ;;  %v6310_v32 = vsel %vm6162_vm3, %v5989_v29, -inf  ;;  %8828 = vmatpush1.bf16.msra.mxu1 %v12805_v7 }
 0x51c   :  { %v6286_v19 = vmax.f32 %v6284_v45, %v6285_v58  ;;  %v6317_v28 = vsel %vm6162_vm3, %v5988_v9, -inf  ;;  %v6280_v3 = vrot.slane %v6279_v54, 1  ;;  %v6311_v4 = vrot.slane %v6310_v32, 4  ;;  %8829 = vmatprep.subr.bf16.mxu1 %v12810_v57  ;;  %v12813_v45 = vld [vmem:[%s20303_s5 + $0xc4] ss:$8 sps:$4 sm:$0xff]  }
 0x51d   :  { %v6294_v15 = vrot.slane %v6293_v13, 1  ;;  %v6300_v25 = vmax.f32 %v6298_v31, %v6299_v50  ;;  %v6305_v60 = vmax.f32 %v6303_v34, %v6304_v30  ;;  %v6318_v52 = vrot.slane %v6317_v28, 4 }
 0x51e   :  { %v6287_v26 = vrot.slane %v6286_v19, 1  ;;  %v6324_v61 = vsel %vm6162_vm3, %v5990_v6, -inf  ;;  %v6274_v37 = vmax.f32 %v17850_v62, %v6273_v63  ;;  %v6540_v31 = vpack.c.bf16 %v17870_v36, %v17870_v36 }
 0x51f   :  { %v6281_v9 = vmax.f32 %v6279_v54, %v6280_v3  ;;  %v6312_v7 = vmax.f32 %v6310_v32, %v6311_v4  ;;  %v6301_v58 = vrot.slane %v6300_v25, 1  ;;  %v6306_v29 = vrot.slane %v6305_v60, 2  ;;  %8830 = vmatpush1.bf16.msra.mxu1 %v12808_v51 }
 0x520   :  { %v6319_v50 = vmax.f32 %v6317_v28, %v6318_v52  ;;  %v6325_v41 = vrot.slane %v6324_v61, 4  ;;  %vm5791_vm5 = vcmp.gt.f32.partialorder %v17742_v33, 0.0  ;;  %v20943_v34 = vpack.c.bf16 %v17804_v18, %v17804_v18  ;;  %v12811_v28 = vld [vmem:[%s20303_s5 + $0xc0] ss:$8 sps:$4 sm:$0xff]   ;;  %8831 = vmatprep.subr.bf16.mxu1 %v12813_v45 }
 0x521   :  { %v20944_v6 = vpack.c.bf16 %v17832_v10, %v17832_v10  ;;  %v6541_v3 = vpack.c.bf16 %v17872_v56, %v17872_v56  ;;  %v6313_v36 = vrot.slane %v6312_v7, 2  ;;  %v20945_v63 = vpack.c.bf16 %v17834_v43, %v17834_v43  ;;  %v12816_v10 = vld [vmem:[%s20303_s5 + $0xd4] ss:$8 sps:$4 sm:$0xff]  }
 0x522   :  { %v17906_v57 = vunpack.c.l.b16 %v20943_v34  ;;  %v6288_v54 = vmax.f32 %v6286_v19, %v6287_v26  ;;  %v6295_v30 = vmax.f32 %v6293_v13, %v6294_v15  ;;  %v6320_v32 = vrot.slane %v6319_v50, 2 }
 0x523   :  { %v17911_v62 = vunpack.c.l.b16 %v20944_v6  ;;  %v17921_v18 = vunpack.c.l.b16 %v20945_v63  ;;  %v20947_v56 = vpack.c.bf16 %v17836_v39, %v17836_v39  ;;  %v6542_v51 = vpack.c.bf16 %v6274_v37, %v6274_v37  ;;  %8832 = vmatpush1.bf16.msra.mxu1 %v12811_v28  ;;  %v12814_v39 = vld [vmem:[%s20303_s5 + $0xd0] ss:$8 sps:$4 sm:$0xff]  }
 0x524   :  { %v17931_v52 = vunpack.c.l.b16 %v6539_v21  ;;  %v6326_v34 = vmax.f32 %v6324_v61, %v6325_v41  ;;  %v13212_v43 = vpop.eup %13211  ;;  %v17933_v6 = vunpack.c.l.b16 %v6540_v31  ;;  %v6302_v19 = vmax.f32 %v6300_v25, %v6301_v58  ;;  %8833 = vmatprep.subr.bf16.mxu1 %v12816_v10 }
 0x525   :  { %20946 = vst [vmem:[#allocation66_spill] sm:$0xff] %v17921_v18  ;;  %v17929_v4 = vunpack.c.l.b16 %v20947_v56  ;;  %v6543_v15 = vpack.c.bf16 %v6281_v9, %v6281_v9  ;;  %v6307_v13 = vmax.f32 %v6305_v60, %v6306_v29  ;;  %v17935_v26 = vunpack.c.l.b16 %v6541_v3  ;;  %v12819_v60 = vld [vmem:[%s20303_s5 + $0xe4] ss:$8 sps:$4 sm:$0xff]   ;;  %v12817_v3 = vld [vmem:[%s20303_s5 + $0xe0] ss:$8 sps:$4 sm:$0xff]  }
 0x526   :  { %v6314_v45 = vmax.f32 %v6312_v7, %v6313_v36  ;;  %v11810_v63 = vadd.f32 -1.0, %v13212_v43  ;;  %v17939_v18 = vadd.f32 %v17436_v46, %v17745_v59  ;;  %v6544_v41 = vpack.c.bf16 %v6288_v54, %v6288_v54 }
 0x527   :  { %20948 = vst [vmem:[#allocation68_spill] sm:$0xff] %v17929_v4  ;;  %v6545_v21 = vpack.c.bf16 %v6295_v30, %v6295_v30  ;;  %v6321_v61 = vmax.f32 %v6319_v50, %v6320_v32  ;;  %v12286_v25 = vadd.f32 %v17660_v49, %v17658_v44  ;;  %v17949_v37 = vunpack.c.l.b16 %v6542_v51  ;;  %8834 = vmatpush1.bf16.msra.mxu1 %v12814_v39 }
 0x528   :  { %v6327_v46 = vrot.slane %v6326_v34, 2  ;;  %v5843_v59 = vmul.f32 1.6732632, %v11810_v63  ;;  %v5812_v31 = vmul.f32 1.442695, %v17939_v18  ;;  %v6546_v9 = vpack.c.bf16 %v6302_v19, %v6302_v19  ;;  %8835 = vmatprep.subr.bf16.mxu1 %v12819_v60 }
 0x529   :  { %v17952_v7 = vunpack.c.l.b16 %v6543_v15  ;;  %v6308_v58 = vrot.slane %v6307_v13, 1  ;;  %v5676_v29 = vadd.f32 %v12286_v25, %v17704_v38  ;;  %v6315_v50 = vrot.slane %v6314_v45, 1 }
 0x52a   :  { %v5856_v44 = vsel %vm5791_vm5, %v17742_v33, %v5843_v59  ;;  %13213 = vpow2.f32 %v5812_v31  ;;  %v12289_v49 = vadd.f32 %v17667_v23, %v17665_v12  ;;  %v17963_v36 = vunpack.c.l.b16 %v6544_v41  ;;  %v12822_v33 = vld [vmem:[%s20303_s5 + $0xf4] ss:$8 sps:$4 sm:$0xff]  }
 0x52b   :  { %v17965_v28 = vunpack.c.l.b16 %v6545_v21  ;;  %v6322_v54 = vrot.slane %v6321_v61, 1  ;;  %v5869_v38 = vmul.f32 1.050701, %v5856_v44  ;;  %v6328_v30 = vmax.f32 %v6326_v34, %v6327_v46  ;;  %8836 = vmatpush1.bf16.msra.mxu1 %v12817_v3 }
 0x52c   :  { %v17971_v32 = vadd.f32 %v17560_v8, %v5676_v29  ;;  %v5679_v12 = vadd.f32 %v12289_v49, %v17708_v2  ;;  %v12292_v23 = vadd.f32 %v17681_v17, %v17679_v42  ;;  %v17976_v10 = vunpack.c.l.b16 %v6546_v9  ;;  %v12820_v2 = vld [vmem:[%s20303_s5 + $0xf0] ss:$8 sps:$4 sm:$0xff]   ;;  %8837 = vmatprep.subr.bf16.mxu1 %v12822_v33 }
 0x52d   :  { %v6309_v56 = vmax.f32 %v6307_v13, %v6308_v58  ;;  %v5991_v51 = vcombine.high %v5869_v38, %v5869_v38  ;;  %v5998_v43 = vrot.slane %v5869_v38, %v14417_v27  ;;  %v6316_v19 = vmax.f32 %v6314_v45, %v6315_v50 }
 0x52e   :  { %v5814_v15 = vmul.f32 1.442695, %v17971_v32  ;;  %v17981_v63 = vadd.f32 %v17562_v55, %v5679_v12  ;;  %v5684_v8 = vadd.f32 %v12292_v23, %v17712_v0  ;;  %v17987_v42 = vmax.f32 %v6321_v61, %v6322_v54  ;;  %v12825_v55 = vld [vmem:[%s20303_s5 + $0x104] ss:$8 sps:$4 sm:$0xff]  }
 0x52f   :  { %v6005_v17 = vrot.slane %v5991_v51, %v14417_v27  ;;  %v6006_v34 = vcombine.high %v5998_v43, %v5998_v43  ;;  %v6331_v13 = vsel %vm6162_vm3, %v5998_v43, -inf  ;;  %v6329_v45 = vrot.slane %v6328_v30, 1  ;;  %8838 = vmatpush1.bf16.msra.mxu1 %v12820_v2 }
 0x530   :  { %20949 = vst [vmem:[#allocation71_spill] sm:$0xff] %v17987_v42  ;;  %v6332_v39 = vrot.slane %v6331_v13, 4  ;;  %vm5792_vm14 = vcmp.gt.f32.partialorder %v17939_v18, 0.0  ;;  %13215 = vpow2.f32 %v5814_v15  ;;  %v5816_v0 = vmul.f32 1.442695, %v17981_v63  ;;  %8868 = vmatprep.subr.bf16.mxu1 %v12825_v55 }
 0x531   :  { %v6007_v41 = vcombine.high %v6005_v17, %v6005_v17  ;;  %v6338_v21 = vsel %vm6162_vm3, %v6006_v34, -inf  ;;  %v6345_v61 = vsel %vm6162_vm3, %v6005_v17, -inf  ;;  %v17999_v25 = vadd.f32 %v17564_v14, %v5684_v8 }
 0x532   :  { %v6333_v60 = vmax.f32 %v6331_v13, %v6332_v39  ;;  %v6339_v46 = vrot.slane %v6338_v21, 4  ;;  %v6346_v59 = vrot.slane %v6345_v61, 4  ;;  %13217 = vpow2.f32 %v5816_v0 }
 0x533   :  { %v6547_v31 = vpack.c.bf16 %v6309_v56, %v6309_v56  ;;  %v6548_v9 = vpack.c.bf16 %v6316_v19, %v6316_v19  ;;  %v6352_v58 = vsel %vm6162_vm3, %v6007_v41, -inf  ;;  %v12295_v29 = vadd.f32 %v17698_v20, %v17694_v16 }
 0x534   :  { %v13214_v50 = vpop.eup %13213  ;;  %v6334_v44 = vrot.slane %v6333_v60, 2  ;;  %v6340_v49 = vmax.f32 %v6338_v21, %v6339_v46  ;;  %v6347_v3 = vmax.f32 %v6345_v61, %v6346_v59  ;;  %v6353_v54 = vrot.slane %v6352_v58, 4 }
 0x535   :  { %v18004_v14 = vmax.f32 %v6328_v30, %v6329_v45  ;;  %v11811_v38 = vadd.f32 -1.0, %v13214_v50  ;;  %v5687_v33 = vadd.f32 %v12295_v29, %v17716_v24  ;;  %v12298_v12 = vadd.f32 %v17769_v40, %v17759_v11 }
 0x536   :  { %v6335_v23 = vmax.f32 %v6333_v60, %v6334_v44  ;;  %v6341_v56 = vrot.slane %v6340_v49, 2  ;;  %v6348_v51 = vrot.slane %v6347_v3, 2  ;;  %v6354_v43 = vmax.f32 %v6352_v58, %v6353_v54 }
 0x537   :  { %20950 = vst [vmem:[#allocation72_spill] sm:$0xff] %v18004_v14  ;;  %v5844_v19 = vmul.f32 1.6732632, %v11811_v38  ;;  %v5818_v16 = vmul.f32 1.442695, %v17999_v25  ;;  %v18011_v20 = vadd.f32 %v17566_v5, %v5687_v33  ;;  %v5692_v15 = vadd.f32 %v12298_v12, %v17720_v22 }
 0x538   :  { %v18016_v8 = vunpack.c.l.b16 %v6547_v31  ;;  %v6349_v24 = vmax.f32 %v6347_v3, %v6348_v51  ;;  %v6355_v2 = vrot.slane %v6354_v43, 2  ;;  %v18018_v11 = vunpack.c.l.b16 %v6548_v9 }
 0x539   :  { %v6336_v40 = vrot.slane %v6335_v23, 1  ;;  %v5857_v17 = vsel %vm5792_vm14, %v17939_v18, %v5844_v19  ;;  %v18024_v34 = vadd.f32 %v17568_v1, %v5692_v15  ;;  %v18028_v13 = vmax.f32 %v6340_v49, %v6341_v56 }
 0x53a   :  { %20951 = vst [vmem:[#allocation73_spill] sm:$0xff] %v18018_v11  ;;  %v13216_v5 = vpop.eup %13215  ;;  %v6350_v55 = vrot.slane %v6349_v24, 1  ;;  %v6356_v45 = vmax.f32 %v6354_v43, %v6355_v2  ;;  %v5870_v39 = vmul.f32 1.050701, %v5857_v17  ;;  %vm5793_vm0 = vcmp.gt.f32.partialorder %v17971_v32, 0.0 }
 0x53b   :  { %v11812_v0 = vadd.f32 -1.0, %v13216_v5  ;;  %13219 = vpow2.f32 %v5818_v16  ;;  %v5820_v18 = vmul.f32 1.442695, %v18011_v20  ;;  %v18035_v1 = vsel %vm3435_vm13, %v17765_v53, %v17773_v47 }
 0x53c   :  { %v13218_v41 = vpop.eup %13217  ;;  %v6351_v21 = vmax.f32 %v6349_v24, %v6350_v55  ;;  %v6357_v61 = vrot.slane %v6356_v45, 1  ;;  %v18037_v60 = vmax.f32 %v6335_v23, %v6336_v40  ;;  %v6008_v46 = vcombine.high %v5870_v39, %v5870_v39 }
 0x53d   :  { %v6015_v59 = vrot.slane %v5870_v39, %v14417_v27  ;;  %v5845_v31 = vmul.f32 1.6732632, %v11812_v0  ;;  %v6343_v9 = vrot.slane %v18028_v13, 1  ;;  %v11813_v50 = vadd.f32 -1.0, %v13218_v41 }
 0x53e   :  { %20952 = vst [vmem:[#allocation7_spill] sm:$0xff] %v18037_v60  ;;  %v6358_v58 = vmax.f32 %v6356_v45, %v6357_v61  ;;  %v6553_v29 = vpack.c.bf16 %v6351_v21, %v6351_v21  ;;  %v6022_v44 = vrot.slane %v6008_v46, %v14417_v27  ;;  %13221 = vpow2.f32 %v5820_v18 }
 0x53f   :  { %v6023_v49 = vcombine.high %v6015_v59, %v6015_v59  ;;  %v6359_v3 = vsel %vm6162_vm3, %v6015_v59, -inf  ;;  %v5858_v47 = vsel %vm5793_vm0, %v17971_v32, %v5845_v31  ;;  %v18052_v40 = vmul.f32 1.6732632, %v11813_v50 }
 0x540   :  { %v6554_v54 = vpack.c.bf16 %v6358_v58, %v6358_v58  ;;  %v6633_v38 = vunpack.c.l.b16 %v6553_v29  ;;  %v6360_v33 = vrot.slane %v6359_v3, 4  ;;  %v6024_v12 = vcombine.high %v6022_v44, %v6022_v44 }
 0x541   :  { %v6366_v23 = vsel %vm6162_vm3, %v6023_v49, -inf  ;;  %v6373_v56 = vsel %vm6162_vm3, %v6022_v44, -inf  ;;  %v5871_v51 = vmul.f32 1.050701, %v5858_v47  ;;  %vm5794_vm8 = vcmp.gt.f32.partialorder %v17981_v63, 0.0 }
 0x542   :  { %v18048_v43 = vunpack.c.l.b16 %v6554_v54  ;;  %v6361_v19 = vmax.f32 %v6359_v3, %v6360_v33  ;;  %v6367_v16 = vrot.slane %v6366_v23, 4  ;;  %v6374_v15 = vrot.slane %v6373_v56, 4 }
 0x543   :  { %v6380_v24 = vsel %vm6162_vm3, %v6024_v12, -inf  ;;  %v6025_v2 = vcombine.high %v5871_v51, %v5871_v51  ;;  %v6032_v32 = vrot.slane %v5871_v51, %v14417_v27  ;;  %vm5795_vm9 = vcmp.gt.f32.partialorder %v17999_v25, 0.0 }
 0x544   :  { %v6666_v17 = vsel %vm3429_vm7, %v18048_v43, %v6633_v38  ;;  %v6362_v5 = vrot.slane %v6361_v19, 2  ;;  %v6368_v55 = vmax.f32 %v6366_v23, %v6367_v16  ;;  %v6375_v45 = vmax.f32 %v6373_v56, %v6374_v15 }
 0x545   :  { %v18056_v39 = vpop.eup %13219  ;;  %v6381_v0 = vrot.slane %v6380_v24, 4  ;;  %v6039_v41 = vrot.slane %v6025_v2, %v14417_v27  ;;  %v6040_v21 = vcombine.high %v6032_v32, %v6032_v32  ;;  %v6387_v61 = vsel %vm6162_vm3, %v6032_v32, -inf }
 0x546   :  { %v6363_v18 = vmax.f32 %v6361_v19, %v6362_v5  ;;  %v6369_v46 = vrot.slane %v6368_v55, 2  ;;  %v6376_v59 = vrot.slane %v6375_v45, 2  ;;  %v6388_v31 = vrot.slane %v6387_v61, 4 }
 0x547   :  { %v6382_v58 = vmax.f32 %v6380_v24, %v6381_v0  ;;  %v6041_v29 = vcombine.high %v6039_v41, %v6039_v41  ;;  %v6394_v50 = vsel %vm6162_vm3, %v6040_v21, -inf  ;;  %v6401_v44 = vsel %vm6162_vm3, %v6039_v41, -inf }
 0x548   :  { %v6364_v49 = vrot.slane %v6363_v18, 1  ;;  %v6370_v3 = vmax.f32 %v6368_v55, %v6369_v46  ;;  %v6377_v47 = vmax.f32 %v6375_v45, %v6376_v59  ;;  %v6389_v54 = vmax.f32 %v6387_v61, %v6388_v31  ;;  %v13222_v56 = vpop.eup %13221 }
 0x549   :  { %v6383_v38 = vrot.slane %v6382_v58, 2  ;;  %v6395_v33 = vrot.slane %v6394_v50, 4  ;;  %v6402_v12 = vrot.slane %v6401_v44, 4  ;;  %v6408_v23 = vsel %vm6162_vm3, %v6041_v29, -inf }
 0x54a   :  { %v6365_v51 = vmax.f32 %v6363_v18, %v6364_v49  ;;  %v6371_v19 = vrot.slane %v6370_v3, 1  ;;  %v6378_v16 = vrot.slane %v6377_v47, 1  ;;  %v6390_v15 = vrot.slane %v6389_v54, 2 }
 0x54b   :  { %v6384_v24 = vmax.f32 %v6382_v58, %v6383_v38  ;;  %v6396_v2 = vmax.f32 %v6394_v50, %v6395_v33  ;;  %v6403_v32 = vmax.f32 %v6401_v44, %v6402_v12  ;;  %v6409_v5 = vrot.slane %v6408_v23, 4 }
 0x54c   :  { %v6372_v0 = vmax.f32 %v6370_v3, %v6371_v19  ;;  %v6379_v55 = vmax.f32 %v6377_v47, %v6378_v16  ;;  %v6555_v45 = vpack.c.bf16 %v6365_v51, %v6365_v51  ;;  %v6391_v41 = vmax.f32 %v6389_v54, %v6390_v15 }
 0x54d   :  { %v6385_v21 = vrot.slane %v6384_v24, 1  ;;  %v6397_v61 = vrot.slane %v6396_v2, 2  ;;  %v6404_v46 = vrot.slane %v6403_v32, 2  ;;  %v6410_v59 = vmax.f32 %v6408_v23, %v6409_v5 }
 0x54e   :  { %v6556_v31 = vpack.c.bf16 %v6372_v0, %v6372_v0  ;;  %v6557_v29 = vpack.c.bf16 %v6379_v55, %v6379_v55  ;;  %v6635_v18 = vunpack.c.l.b16 %v6555_v45  ;;  %v6392_v49 = vrot.slane %v6391_v41, 1 }
 0x54f   :  { %v6386_v22 = vmax.f32 %v6384_v24, %v6385_v21  ;;  %v6398_v30 = vmax.f32 %v6396_v2, %v6397_v61  ;;  %v6405_v58 = vmax.f32 %v6403_v32, %v6404_v46  ;;  %v6411_v50 = vrot.slane %v6410_v59, 2 }
 0x550   :  { %v6636_v44 = vunpack.c.l.b16 %v6556_v31  ;;  %v18064_v38 = vunpack.c.l.b16 %v6557_v29  ;;  %v6667_v3 = vsel %vm3431_vm6, %v6635_v18, %v6666_v17  ;;  %v6704_v47 = vsel %vm3429_vm7, %v6635_v18, %v18048_v43 }
 0x551   :  { %v6558_v54 = vpack.c.bf16 %v6386_v22, %v6386_v22  ;;  %v6393_v33 = vmax.f32 %v6391_v41, %v6392_v49  ;;  %v6399_v12 = vrot.slane %v6398_v30, 1  ;;  %v6406_v23 = vrot.slane %v6405_v58, 1 }
 0x552   :  { %v18072_v51 = vmax.f32 %v18028_v13, %v6343_v9  ;;  %v18075_v19 = vsel %vm3433_vm12, %v6636_v44, %v6667_v3  ;;  %v6705_v16 = vsel %vm3431_vm6, %v6636_v44, %v6704_v47  ;;  %v6742_v15 = vsel %vm3429_vm7, %v6636_v44, %v6635_v18 }
 0x553   :  { %v18080_v17 = vunpack.c.l.b16 %v6558_v54  ;;  %v18084_v22 = vsel %vm3433_vm12, %v18064_v38, %v6705_v16  ;;  %v6743_v43 = vsel %vm3431_vm6, %v18064_v38, %v6742_v15  ;;  %v6400_v13 = vmax.f32 %v6398_v30, %v6399_v12 }
 0x554   :  { %20953 = vst [vmem:[#allocation8_spill] sm:$0xff] %v18072_v51  ;;  %v6780_v9 = vsel %vm3429_vm7, %v18064_v38, %v6636_v44  ;;  %v6407_v24 = vmax.f32 %v6405_v58, %v6406_v23  ;;  %v6412_v2 = vmax.f32 %v6410_v59, %v6411_v50  ;;  %v5859_v32 = vsel %vm5794_vm8, %v17981_v63, %v18052_v40 }
 0x555   :  { %v6559_v0 = vpack.c.bf16 %v6393_v33, %v6393_v33  ;;  %v6560_v55 = vpack.c.bf16 %v6400_v13, %v6400_v13  ;;  %vm5796_vm10 = vcmp.gt.f32.partialorder %v18011_v20, 0.0  ;;  %v18101_v45 = vsel %vm3433_vm12, %v18080_v17, %v6743_v43 }
 0x556   :  { %v6413_v41 = vrot.slane %v6412_v2, 1  ;;  %v5872_v21 = vmul.f32 1.050701, %v5859_v32  ;;  %v18105_v61 = vsel %vm3431_vm6, %v18080_v17, %v6780_v9  ;;  %v18110_v63 = vsel %vm3429_vm7, %v18080_v17, %v18064_v38 }
 0x557   :  { %20954 = vst [vmem:[#allocation74_spill] sm:$0xff] %v18110_v63  ;;  %v11814_v40 = vadd.f32 -1.0, %v18056_v39  ;;  %v11815_v46 = vadd.f32 -1.0, %v13222_v56  ;;  %v6561_v31 = vpack.c.bf16 %v6407_v24, %v6407_v24  ;;  %v18114_v49 = vunpack.c.l.b16 %v6559_v0 }
 0x558   :  { %v6414_v59 = vmax.f32 %v6412_v2, %v6413_v41  ;;  %v6042_v29 = vcombine.high %v5872_v21, %v5872_v21  ;;  %v6049_v18 = vrot.slane %v5872_v21, %v14417_v27  ;;  %v18116_v58 = vunpack.c.l.b16 %v6560_v55 }
 0x559   :  { %v5847_v50 = vmul.f32 1.6732632, %v11814_v40  ;;  %v5848_v44 = vmul.f32 1.6732632, %v11815_v46  ;;  %v5822_v33 = vmul.f32 1.442695, %v18024_v34  ;;  %v6655_v23 = vsel %vm3437_vm15, %v17797_v48, %v18035_v1 }
 0x55a   :  { %v6056_v3 = vrot.slane %v6042_v29, %v14417_v27  ;;  %v6057_v47 = vcombine.high %v6049_v18, %v6049_v18  ;;  %v6415_v54 = vsel %vm6162_vm3, %v6049_v18, -inf  ;;  %v6562_v16 = vpack.c.bf16 %v6414_v59, %v6414_v59 }
 0x55b   :  { %v6416_v39 = vrot.slane %v6415_v54, 4  ;;  %v5860_v56 = vsel %vm5795_vm9, %v17999_v25, %v5847_v50  ;;  %v5861_v12 = vsel %vm5796_vm10, %v18011_v20, %v5848_v44  ;;  %v18132_v0 = vunpack.c.l.b16 %v6561_v31 }
 0x55c   :  { %v6058_v15 = vcombine.high %v6056_v3, %v6056_v3  ;;  %v6422_v43 = vsel %vm6162_vm3, %v6057_v47, -inf  ;;  %v6429_v13 = vsel %vm6162_vm3, %v6056_v3, -inf  ;;  %v5873_v32 = vmul.f32 1.050701, %v5860_v56 }
 0x55d   :  { %v6417_v9 = vmax.f32 %v6415_v54, %v6416_v39  ;;  %v6423_v24 = vrot.slane %v6422_v43, 4  ;;  %v6430_v2 = vrot.slane %v6429_v13, 4  ;;  %v5874_v55 = vmul.f32 1.050701, %v5861_v12 }
 0x55e   :  { %v6436_v25 = vsel %vm6162_vm3, %v6058_v15, -inf  ;;  %13223 = vpow2.f32 %v5822_v33  ;;  %v18135_v40 = vunpack.c.l.b16 %v6562_v16  ;;  %v6059_v46 = vcombine.high %v5873_v32, %v5873_v32 }
 0x55f   :  { %v6418_v20 = vrot.slane %v6417_v9, 2  ;;  %v6424_v41 = vmax.f32 %v6422_v43, %v6423_v24  ;;  %v6431_v21 = vmax.f32 %v6429_v13, %v6430_v2  ;;  %v6437_v1 = vrot.slane %v6436_v25, 4 }
 0x560   :  { %v6066_v59 = vrot.slane %v5873_v32, %v14417_v27  ;;  %v6656_v29 = vsel %vm3439_vm2, %v17802_v35, %v6655_v23  ;;  %v6073_v3 = vrot.slane %v6059_v46, %v14417_v27  ;;  %v6076_v33 = vcombine.high %v5874_v55, %v5874_v55 }
 0x561   :  { %v6419_v18 = vmax.f32 %v6417_v9, %v6418_v20  ;;  %v6425_v50 = vrot.slane %v6424_v41, 2  ;;  %v6432_v31 = vrot.slane %v6431_v21, 2  ;;  %v6438_v44 = vmax.f32 %v6436_v25, %v6437_v1 }
 0x562   :  { %v6074_v47 = vcombine.high %v6066_v59, %v6066_v59  ;;  %v6443_v54 = vsel %vm6162_vm3, %v6066_v59, -inf  ;;  %v6075_v15 = vcombine.high %v6073_v3, %v6073_v3  ;;  %v6457_v23 = vsel %vm6162_vm3, %v6073_v3, -inf }
 0x563   :  { %v6420_v39 = vrot.slane %v6419_v18, 1  ;;  %v6426_v56 = vmax.f32 %v6424_v41, %v6425_v50  ;;  %v6433_v12 = vmax.f32 %v6431_v21, %v6432_v31  ;;  %v6439_v16 = vrot.slane %v6438_v44, 2 }
 0x564   :  { %v6444_v43 = vrot.slane %v6443_v54, 4  ;;  %v6450_v13 = vsel %vm6162_vm3, %v6074_v47, -inf  ;;  %v6083_v32 = vrot.slane %v5874_v55, %v14417_v27  ;;  %v6458_v1 = vrot.slane %v6457_v23, 4 }
 0x565   :  { %v6427_v9 = vrot.slane %v6426_v56, 1  ;;  %v6434_v24 = vrot.slane %v6433_v12, 1  ;;  %v6440_v2 = vmax.f32 %v6438_v44, %v6439_v16  ;;  %v6451_v20 = vrot.slane %v6450_v13, 4  ;;  %v20955_v44 = vld [vmem:[#allocation39_spill] sm:$0xff] }
 0x566   :  { %v6445_v25 = vmax.f32 %v6443_v54, %v6444_v43  ;;  %v6464_v46 = vsel %vm6162_vm3, %v6075_v15, -inf  ;;  %v6421_v59 = vmax.f32 %v6419_v18, %v6420_v39  ;;  %v6459_v47 = vmax.f32 %v6457_v23, %v6458_v1 }
 0x567   :  { %v6428_v41 = vmax.f32 %v6426_v56, %v6427_v9  ;;  %v6435_v21 = vmax.f32 %v6433_v12, %v6434_v24  ;;  %v6441_v50 = vrot.slane %v6440_v2, 1  ;;  %v6452_v5 = vmax.f32 %v6450_v13, %v6451_v20 }
 0x568   :  { %v13224_v31 = vpop.eup %13223  ;;  %v6446_v30 = vrot.slane %v6445_v25, 2  ;;  %v6465_v51 = vrot.slane %v6464_v46, 4  ;;  %v6090_v60 = vrot.slane %v6076_v33, %v14417_v27  ;;  %v18149_v55 = vsel %vm3441_vm4, %v20955_v44, %v6656_v29 }
 0x569   :  { %v6442_v3 = vmax.f32 %v6440_v2, %v6441_v50  ;;  %v6658_v54 = vsel %vm3429_vm7, %v17911_v62, %v17906_v57  ;;  %v6453_v39 = vrot.slane %v6452_v5, 2  ;;  %v6460_v56 = vrot.slane %v6459_v47, 2 }
 0x56a   :  { %v6447_v18 = vmax.f32 %v6445_v25, %v6446_v30  ;;  %v6466_v12 = vmax.f32 %v6464_v46, %v6465_v51  ;;  %v6563_v16 = vpack.c.bf16 %v6421_v59, %v6421_v59  ;;  %v6564_v15 = vpack.c.bf16 %v6428_v41, %v6428_v41 }
 0x56b   :  { %v6565_v43 = vpack.c.bf16 %v6435_v21, %v6435_v21  ;;  %v6091_v13 = vcombine.high %v6083_v32, %v6083_v32  ;;  %v6454_v9 = vmax.f32 %v6452_v5, %v6453_v39  ;;  %v6461_v24 = vmax.f32 %v6459_v47, %v6460_v56 }
 0x56c   :  { %v6448_v23 = vrot.slane %v6447_v18, 1  ;;  %v6467_v33 = vrot.slane %v6466_v12, 2  ;;  %v6566_v2 = vpack.c.bf16 %v6442_v3, %v6442_v3  ;;  %v6092_v20 = vcombine.high %v6090_v60, %v6090_v60 }
 0x56d   :  { %v6471_v29 = vsel %vm6162_vm3, %v6083_v32, -inf  ;;  %v6478_v1 = vsel %vm6162_vm3, %v6091_v13, -inf  ;;  %v6455_v14 = vrot.slane %v6454_v9, 1  ;;  %v6462_v30 = vrot.slane %v6461_v24, 1 }
 0x56e   :  { %v6449_v50 = vmax.f32 %v6447_v18, %v6448_v23  ;;  %v6468_v25 = vmax.f32 %v6466_v12, %v6467_v33  ;;  %v6472_v42 = vrot.slane %v6471_v29, 4  ;;  %v6479_v51 = vrot.slane %v6478_v1, 4 }
 0x56f   :  { %v6485_v46 = vsel %vm6162_vm3, %v6090_v60, -inf  ;;  %v6492_v59 = vsel %vm6162_vm3, %v6092_v20, -inf  ;;  %vm5797_vm5 = vcmp.gt.f32.partialorder %v18024_v34, 0.0  ;;  %v18159_v5 = vunpack.c.l.b16 %v6563_v16 }
 0x570   :  { %v6456_v41 = vmax.f32 %v6454_v9, %v6455_v14  ;;  %v6463_v21 = vmax.f32 %v6461_v24, %v6462_v30  ;;  %v6469_v47 = vrot.slane %v6468_v25, 1  ;;  %v6473_v32 = vmax.f32 %v6471_v29, %v6472_v42 }
 0x571   :  { %v6480_v3 = vmax.f32 %v6478_v1, %v6479_v51  ;;  %v6486_v39 = vrot.slane %v6485_v46, 4  ;;  %v6493_v18 = vrot.slane %v6492_v59, 4  ;;  %v18161_v56 = vunpack.c.l.b16 %v6564_v15  ;;  %v20957_v51 = vld [vmem:[#allocation38_spill] sm:$0xff] }
 0x572   :  { %v18163_v12 = vunpack.c.l.b16 %v6565_v43  ;;  %v18165_v13 = vunpack.c.l.b16 %v6566_v2  ;;  %v6567_v60 = vpack.c.bf16 %v6449_v50, %v6449_v50  ;;  %v6474_v23 = vrot.slane %v6473_v32, 2  ;;  %v20956_v43 = vld [vmem:[#allocation66_spill] sm:$0xff] }
 0x573   :  { %v6481_v33 = vrot.slane %v6480_v3, 2  ;;  %v6487_v20 = vmax.f32 %v6485_v46, %v6486_v39  ;;  %v6494_v11 = vmax.f32 %v6492_v59, %v6493_v18  ;;  %v6470_v16 = vmax.f32 %v6468_v25, %v6469_v47 }
 0x574   :  { %v6568_v63 = vpack.c.bf16 %v6456_v41, %v6456_v41  ;;  %v6569_v14 = vpack.c.bf16 %v6463_v21, %v6463_v21  ;;  %v11816_v9 = vadd.f32 -1.0, %v13224_v31  ;;  %v6475_v24 = vmax.f32 %v6473_v32, %v6474_v23 }
 0x575   :  { %v6482_v42 = vmax.f32 %v6480_v3, %v6481_v33  ;;  %v6488_v29 = vrot.slane %v6487_v20, 2  ;;  %v6495_v1 = vrot.slane %v6494_v11, 2  ;;  %v18167_v30 = vunpack.c.l.b16 %v6567_v60 }
 0x576   :  { %v5849_v15 = vmul.f32 1.6732632, %v11816_v9  ;;  %v6659_v2 = vsel %vm3431_vm6, %v20956_v43, %v6658_v54  ;;  %v6691_v50 = vsel %vm3433_vm12, %v17765_v53, %v20957_v51  ;;  %v6476_v46 = vrot.slane %v6475_v24, 1 }
 0x577   :  { %v6483_v59 = vrot.slane %v6482_v42, 1  ;;  %v6489_v25 = vmax.f32 %v6487_v20, %v6488_v29  ;;  %v6496_v41 = vmax.f32 %v6494_v11, %v6495_v1  ;;  %v6570_v21 = vpack.c.bf16 %v6470_v16, %v6470_v16 }
 0x578   :  { %v5862_v31 = vsel %vm5797_vm5, %v18024_v34, %v5849_v15  ;;  %v6660_v47 = vsel %vm3433_vm12, %v17929_v4, %v6659_v2  ;;  %v6692_v32 = vsel %vm3435_vm13, %v17797_v48, %v6691_v50  ;;  %v6477_v54 = vmax.f32 %v6475_v24, %v6476_v46 }
 0x579   :  { %v6484_v3 = vmax.f32 %v6482_v42, %v6483_v59  ;;  %v6490_v39 = vrot.slane %v6489_v25, 1  ;;  %v6497_v18 = vrot.slane %v6496_v41, 1  ;;  %v5875_v53 = vmul.f32 1.050701, %v5862_v31 }
 0x57a   :  { %v6661_v60 = vsel %vm3435_vm13, %v17931_v52, %v6660_v47  ;;  %v6693_v11 = vsel %vm3437_vm15, %v17802_v35, %v6692_v32  ;;  %v6696_v34 = vsel %vm3429_vm7, %v20956_v43, %v17911_v62  ;;  %v6571_v20 = vpack.c.bf16 %v6477_v54, %v6477_v54 }
 0x57b   :  { %v6491_v23 = vmax.f32 %v6489_v25, %v6490_v39  ;;  %v6498_v33 = vmax.f32 %v6496_v41, %v6497_v18  ;;  %v6572_v16 = vpack.c.bf16 %v6484_v3, %v6484_v3  ;;  %v18188_v9 = vunpack.c.l.b16 %v6568_v63 }
 0x57c   :  { %v18190_v24 = vunpack.c.l.b16 %v6569_v14  ;;  %v6093_v42 = vcombine.high %v5875_v53, %v5875_v53  ;;  %v6100_v29 = vrot.slane %v5875_v53, %v14417_v27  ;;  %v18193_v1 = vunpack.c.l.b16 %v6570_v21 }
 0x57d   :  { %v6662_v15 = vsel %vm3437_vm15, %v17933_v6, %v6661_v60  ;;  %v6694_v2 = vsel %vm3439_vm2, %v20955_v44, %v6693_v11  ;;  %v6697_v51 = vsel %vm3431_vm6, %v17929_v4, %v6696_v34  ;;  %v6573_v50 = vpack.c.bf16 %v6491_v23, %v6491_v23  ;;  %v20958_v34 = vld [vmem:[#allocation31_spill] sm:$0xff] }
 0x57e   :  { %v6107_v63 = vrot.slane %v6093_v42, %v14417_v27  ;;  %v6108_v46 = vcombine.high %v6100_v29, %v6100_v29  ;;  %v6499_v14 = vsel %vm6162_vm3, %v6100_v29, -inf  ;;  %v6574_v59 = vpack.c.bf16 %v6498_v33, %v6498_v33 }
 0x57f   :  { %v18203_v25 = vunpack.c.l.b16 %v6571_v20  ;;  %v18205_v41 = vunpack.c.l.b16 %v6572_v16  ;;  %v6500_v21 = vrot.slane %v6499_v14, 4  ;;  %v6663_v54 = vsel %vm3439_vm2, %v17935_v26, %v6662_v15 }
 0x580   :  { %v6109_v31 = vcombine.high %v6107_v63, %v6107_v63  ;;  %v6506_v47 = vsel %vm6162_vm3, %v6108_v46, -inf  ;;  %v6513_v32 = vsel %vm6162_vm3, %v6107_v63, -inf  ;;  %v6698_v53 = vsel %vm3433_vm12, %v17931_v52, %v6697_v51  ;;  %v20959_v46 = vld [vmem:[#allocation50_spill] sm:$0xff] }
 0x581   :  { %v6501_v3 = vmax.f32 %v6499_v14, %v6500_v21  ;;  %v6507_v39 = vrot.slane %v6506_v47, 4  ;;  %v6514_v18 = vrot.slane %v6513_v32, 4  ;;  %v6699_v11 = vsel %vm3435_vm13, %v17933_v6, %v6698_v53 }
 0x582   :  { %v6520_v60 = vsel %vm6162_vm3, %v6109_v31, -inf  ;;  %v6729_v23 = vsel %vm3433_vm12, %v17797_v48, %v20958_v34  ;;  %v6734_v33 = vsel %vm3429_vm7, %v17929_v4, %v20956_v43  ;;  %v6700_v15 = vsel %vm3437_vm15, %v17935_v26, %v6699_v11 }
 0x583   :  { %v6502_v20 = vrot.slane %v6501_v3, 2  ;;  %v6508_v16 = vmax.f32 %v6506_v47, %v6507_v39  ;;  %v6515_v42 = vmax.f32 %v6513_v32, %v6514_v18  ;;  %v6521_v29 = vrot.slane %v6520_v60, 4 }
 0x584   :  { %v6730_v51 = vsel %vm3435_vm13, %v17802_v35, %v6729_v23  ;;  %v6735_v63 = vsel %vm3431_vm6, %v17931_v52, %v6734_v33  ;;  %v6766_v14 = vsel %vm3431_vm6, %v17797_v48, %v20959_v46  ;;  %v18231_v47 = vunpack.c.l.b16 %v6573_v50 }
 0x585   :  { %v6503_v21 = vmax.f32 %v6501_v3, %v6502_v20  ;;  %v6509_v31 = vrot.slane %v6508_v16, 2  ;;  %v6516_v53 = vrot.slane %v6515_v42, 2  ;;  %v6522_v34 = vmax.f32 %v6520_v60, %v6521_v29 }
 0x586   :  { %v6731_v32 = vsel %vm3437_vm15, %v20955_v44, %v6730_v51  ;;  %v6736_v39 = vsel %vm3433_vm12, %v17933_v6, %v6735_v63  ;;  %v6767_v18 = vsel %vm3433_vm12, %v17802_v35, %v6766_v14  ;;  %v18239_v11 = vunpack.c.l.b16 %v6574_v59 }
 0x587   :  { %v6504_v23 = vrot.slane %v6503_v21, 1  ;;  %v6510_v33 = vmax.f32 %v6508_v16, %v6509_v31  ;;  %v6517_v46 = vmax.f32 %v6515_v42, %v6516_v53  ;;  %v6523_v3 = vrot.slane %v6522_v34, 2 }
 0x588   :  { %v6701_v60 = vsel %vm3439_vm2, %v17949_v37, %v6700_v15  ;;  %v6737_v50 = vsel %vm3435_vm13, %v17935_v26, %v6736_v39  ;;  %v6768_v20 = vsel %vm3435_vm13, %v20955_v44, %v6767_v18  ;;  %v6732_v59 = vsel %vm3439_vm2, %v17906_v57, %v6731_v32 }
 0x589   :  { %v6505_v29 = vmax.f32 %v6503_v21, %v6504_v23  ;;  %v6511_v51 = vrot.slane %v6510_v33, 1  ;;  %v6518_v63 = vrot.slane %v6517_v46, 1  ;;  %v18251_v16 = vsel %vm3441_vm4, %v17949_v37, %v6663_v54 }
 0x58a   :  { %20960 = vst [vmem:[#allocation9_spill] sm:$0xff] %v18251_v16  ;;  %v6738_v42 = vsel %vm3437_vm15, %v17949_v37, %v6737_v50  ;;  %v6769_v15 = vsel %vm3437_vm15, %v17906_v57, %v6768_v20  ;;  %v6772_v14 = vsel %vm3429_vm7, %v17931_v52, %v17929_v4  ;;  %v6695_v31 = vsel %vm3441_vm4, %v17906_v57, %v6694_v2 }
 0x58b   :  { %v6575_v21 = vpack.c.bf16 %v6505_v29, %v6505_v29  ;;  %v6702_v53 = vsel %vm3441_vm4, %v17952_v7, %v6701_v60  ;;  %v6739_v54 = vsel %vm3439_vm2, %v17952_v7, %v6738_v42  ;;  %v18266_v32 = vmax.f32 %v6522_v34, %v6523_v3 }
 0x58c   :  { %v6733_v39 = vsel %vm3441_vm4, %v17911_v62, %v6732_v59  ;;  %v6770_v18 = vsel %vm3439_vm2, %v17911_v62, %v6769_v15  ;;  %v6773_v23 = vsel %vm3431_vm6, %v17933_v6, %v6772_v14  ;;  %v18274_v50 = vmax.f32 %v6510_v33, %v6511_v51 }
 0x58d   :  { %20961 = vst [vmem:[#allocation80_spill] sm:$0xff] %v18266_v32  ;;  %v18276_v2 = vmax.f32 %v6517_v46, %v6518_v63  ;;  %v6740_v60 = vsel %vm3441_vm4, %v17963_v36, %v6739_v54  ;;  %v6771_v34 = vsel %vm3441_vm4, %v20956_v43, %v6770_v18  ;;  %v18282_v3 = vunpack.c.l.b16 %v6575_v21 }
 0x58e   :  { %v6774_v20 = vsel %vm3433_vm12, %v17935_v26, %v6773_v23  ;;  %v11817_v29 = vpack.c.b16 %v6695_v31, %v18149_v55  ;;  %v11818_v33 = vpack.c.b16 %v6702_v53, %v18251_v16  ;;  %v11819_v46 = vpack.c.b16 %v6771_v34, %v6733_v39  ;;  %v20962_v34 = vld [vmem:[#allocation5_spill] sm:$0xff] }
 0x58f   :  { %v6775_v59 = vsel %vm3435_vm13, %v17949_v37, %v6774_v20  ;;  %v13292_v51 = vmov 1966171168   ;;  %v18295_v15 = vsel %vm3429_vm7, %v17963_v36, %v17952_v7  ;;  %v6669_v55 = vsel %vm3435_vm13, %v18064_v38, %v18075_v19 }
 0x590   :  { %v6982_v63 = vunpack.c.l.s4 %v13292_v51  ;;  %v6776_v42 = vsel %vm3437_vm15, %v17952_v7, %v6775_v59  ;;  %v6673_v14 = vsel %vm3429_vm7, %v18135_v40, %v18132_v0  ;;  %v6670_v53 = vsel %vm3437_vm15, %v18080_v17, %v6669_v55 }
 0x591   :  { %v6777_v21 = vsel %vm3439_vm2, %v17963_v36, %v6776_v42  ;;  %v6674_v54 = vsel %vm3431_vm6, %v18159_v5, %v6673_v14  ;;  %v6671_v38 = vsel %vm3439_vm2, %v18114_v49, %v6670_v53  ;;  %v18318_v18 = vsel %vm3429_vm7, %v17965_v28, %v17963_v36 }
 0x592   :  { %v6983_v31 = vunpack.c.0.s8 %v6982_v63  ;;  %v6778_v39 = vsel %vm3441_vm4, %v17965_v28, %v6777_v21  ;;  %v6675_v19 = vsel %vm3433_vm12, %v18161_v56, %v6674_v54  ;;  %v18325_v59 = vsel %vm3441_vm4, %v18116_v58, %v6671_v38 }
 0x593   :  { %v11820_v23 = vpack.c.b16 %v6778_v39, %v6740_v60  ;;  %v6676_v51 = vsel %vm3435_vm13, %v18163_v12, %v6675_v19  ;;  %v6707_v42 = vsel %vm3435_vm13, %v18080_v17, %v18084_v22  ;;  %v6711_v60 = vsel %vm3429_vm7, %v18159_v5, %v18135_v40 }
 0x594   :  { %v18321_v20 = vsub.s32 %v6983_v31, %v20962_v34  ;;  %v6677_v63 = vsel %vm3437_vm15, %v18165_v13, %v6676_v51  ;;  %v18340_v55 = vsel %vm3429_vm7, %v17976_v10, %v17965_v28  ;;  %v6708_v54 = vsel %vm3437_vm15, %v18114_v49, %v6707_v42 }
 0x595   :  { %v6678_v22 = vsel %vm3439_vm2, %v18167_v30, %v6677_v63  ;;  %v6712_v39 = vsel %vm3431_vm6, %v18161_v56, %v6711_v60  ;;  %v6745_v38 = vsel %vm3435_vm13, %v18114_v49, %v18101_v45 }
 0x596   :  { %v6987_v14 = vrot.slane %v11817_v29, %v18321_v20  ;;  %v6994_v21 = vrot.slane %v11818_v33, %v18321_v20  ;;  %v7001_v31 = vrot.slane %v11819_v46, %v18321_v20  ;;  %v7008_v53 = vrot.slane %v11820_v23, %v18321_v20 }
 0x597   :  { %v18357_v46 = vsel %vm3441_vm4, %v18188_v9, %v6678_v22  ;;  %v6709_v23 = vsel %vm3439_vm2, %v18116_v58, %v6708_v54  ;;  %v6713_v63 = vsel %vm3433_vm12, %v18163_v12, %v6712_v39  ;;  %v6746_v42 = vsel %vm3437_vm15, %v18116_v58, %v6745_v38 }
 0x598   :  { %v7037_v29 = vcombine.low %v6987_v14, %v7001_v31  ;;  %v7038_v19 = vcombine.high %v6987_v14, %v7001_v31  ;;  %v7039_v33 = vcombine.low %v6994_v21, %v7008_v53  ;;  %v7040_v51 = vcombine.high %v6994_v21, %v7008_v53 }
 0x599   :  { %v18371_v31 = vsel %vm3441_vm4, %v18132_v0, %v6709_v23  ;;  %v6714_v53 = vsel %vm3435_vm13, %v18165_v13, %v6713_v63  ;;  %v6747_v22 = vsel %vm3439_vm2, %v18132_v0, %v6746_v42  ;;  %v6749_v54 = vsel %vm3429_vm7, %v18161_v56, %v18159_v5 }
 0x59a   :  { %v7051_v60 = vrot.slane %v7037_v29, %v18321_v20  ;;  %v7058_v45 = vrot.slane %v7039_v33, %v18321_v20  ;;  %v7065_v14 = vrot.slane %v7038_v19, %v18321_v20  ;;  %v7072_v21 = vrot.slane %v7040_v51, %v18321_v20 }
 0x59b   :  { %v6715_v33 = vsel %vm3437_vm15, %v18167_v30, %v6714_v53  ;;  %v18384_v51 = vsel %vm3441_vm4, %v18135_v40, %v6747_v22  ;;  %v6750_v23 = vsel %vm3431_vm6, %v18163_v12, %v6749_v54  ;;  %v18391_v63 = vsel %vm3429_vm7, %v18016_v8, %v17976_v10 }
 0x59c   :  { %v11843_v39 = vcombine.low %v7051_v60, %v7065_v14  ;;  %v11845_v38 = vcombine.high %v7051_v60, %v7065_v14  ;;  %v11847_v29 = vcombine.low %v7058_v45, %v7072_v21  ;;  %v11849_v19 = vcombine.high %v7058_v45, %v7072_v21 }
 0x59d   :  { %v6716_v21 = vsel %vm3439_vm2, %v18188_v9, %v6715_v33  ;;  %v6751_v53 = vsel %vm3433_vm12, %v18165_v13, %v6750_v23  ;;  %v6782_v22 = vsel %vm3433_vm12, %v18114_v49, %v18105_v61  ;;  %v6787_v54 = vsel %vm3429_vm7, %v18163_v12, %v18161_v56 }
 0x59e   :  { %v7639_v42 = vrot.slane %v11843_v39, %v18321_v20  ;;  %v7653_v60 = vrot.slane %v11845_v38, %v18321_v20  ;;  %v7667_v45 = vrot.slane %v11847_v29, %v18321_v20  ;;  %v7681_v14 = vrot.slane %v11849_v19, %v18321_v20 }
 0x59f   :  { %v18409_v19 = vsel %vm3441_vm4, %v18190_v24, %v6716_v21  ;;  %v6752_v33 = vsel %vm3435_vm13, %v18167_v30, %v6751_v53  ;;  %v6783_v23 = vsel %vm3435_vm13, %v18116_v58, %v6782_v22  ;;  %v6788_v61 = vsel %vm3431_vm6, %v18165_v13, %v6787_v54  ;;  %v20964_v22 = vld [vmem:[#allocation74_spill] sm:$0xff] }
 0x5a0   :  { %v7689_v39 = vcombine.low %v7639_v42, %v7653_v60  ;;  %v7690_v38 = vcombine.high %v7639_v42, %v7653_v60  ;;  %v7693_v27 = vcombine.low %v7667_v45, %v7681_v14  ;;  %v7694_v29 = vcombine.high %v7667_v45, %v7681_v14 }
 0x5a1   :  { %v6753_v14 = vsel %vm3437_vm15, %v18188_v9, %v6752_v33  ;;  %v6784_v21 = vsel %vm3437_vm15, %v18132_v0, %v6783_v23  ;;  %v6789_v53 = vsel %vm3433_vm12, %v18167_v30, %v6788_v61  ;;  %v6819_v54 = vsel %vm3431_vm6, %v18114_v49, %v20964_v22  ;;  %v12828_v23 = vld [vmem:[%s20303_s5 + $0x114] ss:$8 sps:$4 sm:$0xff]  }
 0x5a2   :  { %v18418_v34 = vrot.slane %v7690_v38, %v18321_v20  ;;  %v18421_v42 = vrot.slane %v7694_v29, %v18321_v20  ;;  %v18424_v60 = vrot.slane %v7689_v39, %v18321_v20  ;;  %v18427_v45 = vrot.slane %v7693_v27, %v18321_v20  ;;  %v12823_v27 = vld [vmem:[%s20303_s5 + $0x100] ss:$8 sps:$4 sm:$0xff]  }
 0x5a3   :  { %v6754_v29 = vsel %vm3439_vm2, %v18190_v24, %v6753_v14  ;;  %v6785_v33 = vsel %vm3439_vm2, %v18135_v40, %v6784_v21  ;;  %v6790_v16 = vsel %vm3435_vm13, %v18188_v9, %v6789_v53  ;;  %v6820_v14 = vsel %vm3433_vm12, %v18116_v58, %v6819_v54 }
 0x5a4   :  { %20963 = vst [vmem:[#allocation81_spill] sm:$0xff] %v18418_v34  ;;  %v7757_v39 = vcombine.low %v18418_v34, %v18421_v42  ;;  %v7753_v38 = vcombine.low %v18424_v60, %v18427_v45  ;;  %v18454_v61 = vsel %vm3441_vm4, %v18193_v1, %v6754_v29  ;;  %v18458_v22 = vsel %vm3441_vm4, %v18159_v5, %v6785_v33 }
 0x5a5   :  { %v6791_v21 = vsel %vm3437_vm15, %v18190_v24, %v6790_v16  ;;  %v6821_v32 = vsel %vm3435_vm13, %v18132_v0, %v6820_v14  ;;  %v6825_v29 = vsel %vm3429_vm7, %v18165_v13, %v18163_v12  ;;  %v6856_v33 = vsel %vm3429_vm7, %v18114_v49, %v18080_v17  ;;  %v12826_v14 = vld [vmem:[%s20303_s5 + $0x110] ss:$8 sps:$4 sm:$0xff]  }
 0x5a6   :  { %8839 = vmatprep.mubr.bf16.mxu1 %v7757_v39  ;;  %v6792_v53 = vsel %vm3439_vm2, %v18193_v1, %v6791_v21  ;;  %v6822_v54 = vsel %vm3437_vm15, %v18135_v40, %v6821_v32  ;;  %v6826_v16 = vsel %vm3431_vm6, %v18167_v30, %v6825_v29  ;;  %v6857_v39 = vsel %vm3431_vm6, %v18116_v58, %v6856_v33 }
 0x5a7   :  { %8840 = vmatmul.mubr.bf16.vlgmr.msra.gmra.mrb[56].mxu1 %v7753_v38  ;;  %v18487_v17 = vsel %vm3441_vm4, %v18203_v25, %v6792_v53  ;;  %v6823_v38 = vsel %vm3439_vm2, %v18159_v5, %v6822_v54  ;;  %v6827_v32 = vsel %vm3433_vm12, %v18188_v9, %v6826_v16  ;;  %v6858_v21 = vsel %vm3433_vm12, %v18132_v0, %v6857_v39 }
 0x5a8   :  { %8869 = vmatpush1.bf16.msra.mxu1 %v12823_v27  ;;  %v12831_v27 = vld [vmem:[%s20303_s5 + $0x124] ss:$8 sps:$4 sm:$0xff]   ;;  %v18500_v29 = vsel %vm3441_vm4, %v18161_v56, %v6823_v38  ;;  %v6828_v33 = vsel %vm3435_vm13, %v18190_v24, %v6827_v32  ;;  %v6859_v53 = vsel %vm3435_vm13, %v18135_v40, %v6858_v21  ;;  %v6863_v54 = vsel %vm3429_vm7, %v18167_v30, %v18165_v13 }
 0x5a9   :  { %8870 = vmatprep.subr.bf16.mxu1 %v12828_v23  ;;  %v6829_v23 = vsel %vm3437_vm15, %v18193_v1, %v6828_v33  ;;  %v6860_v16 = vsel %vm3437_vm15, %v18159_v5, %v6859_v53  ;;  %v6864_v39 = vsel %vm3431_vm6, %v18188_v9, %v6863_v54  ;;  %v6894_v38 = vsel %vm3429_vm7, %v18116_v58, %v18114_v49  ;;  %v12829_v53 = vld [vmem:[%s20303_s5 + $0x120] ss:$8 sps:$4 sm:$0xff]  }
 0x5aa   :  { %v6830_v32 = vsel %vm3439_vm2, %v18203_v25, %v6829_v23  ;;  %v6861_v21 = vsel %vm3439_vm2, %v18161_v56, %v6860_v16  ;;  %v6865_v4 = vsel %vm3433_vm12, %v18190_v24, %v6864_v39  ;;  %v6895_v33 = vsel %vm3431_vm6, %v18132_v0, %v6894_v38 }
 0x5ab   :  { %v18531_v49 = vsel %vm3441_vm4, %v18205_v41, %v6830_v32  ;;  %v18535_v54 = vsel %vm3441_vm4, %v18163_v12, %v6861_v21  ;;  %v6866_v23 = vsel %vm3435_vm13, %v18193_v1, %v6865_v4  ;;  %v6896_v16 = vsel %vm3433_vm12, %v18135_v40, %v6895_v33 }
 0x5ac   :  { %8871 = vmatpush1.bf16.msra.mxu1 %v12826_v14  ;;  %v12834_v14 = vld [vmem:[%s20303_s5 + $0x134] ss:$8 sps:$4 sm:$0xff]   ;;  %v6867_v39 = vsel %vm3437_vm15, %v18203_v25, %v6866_v23  ;;  %v6897_v38 = vsel %vm3435_vm13, %v18159_v5, %v6896_v16  ;;  %v6901_v32 = vsel %vm3429_vm7, %v18188_v9, %v18167_v30  ;;  %v6932_v4 = vsel %vm3429_vm7, %v18132_v0, %v18116_v58 }
 0x5ad   :  { %8872 = vmatprep.subr.bf16.mxu1 %v12831_v27  ;;  %v6868_v27 = vsel %vm3439_vm2, %v18205_v41, %v6867_v39  ;;  %v6898_v21 = vsel %vm3437_vm15, %v18161_v56, %v6897_v38  ;;  %v6902_v33 = vsel %vm3431_vm6, %v18190_v24, %v6901_v32  ;;  %v6933_v23 = vsel %vm3431_vm6, %v18135_v40, %v6932_v4  ;;  %v12832_v39 = vld [vmem:[%s20303_s5 + $0x130] ss:$8 sps:$4 sm:$0xff]  }
 0x5ae   :  { %v6869_v16 = vsel %vm3441_vm4, %v18231_v47, %v6868_v27  ;;  %v6899_v34 = vsel %vm3439_vm2, %v18163_v12, %v6898_v21  ;;  %v6903_v58 = vsel %vm3433_vm12, %v18193_v1, %v6902_v33  ;;  %v6934_v0 = vsel %vm3433_vm12, %v18159_v5, %v6933_v23  ;;  %v12837_v5 = vld [vmem:[%s20303_s5 + $0x144] ss:$8 sps:$4 sm:$0xff]  }
 0x5af   :  { %v6900_v40 = vsel %vm3441_vm4, %v18165_v13, %v6899_v34  ;;  %v6904_v38 = vsel %vm3435_vm13, %v18203_v25, %v6903_v58  ;;  %v6935_v32 = vsel %vm3435_vm13, %v18161_v56, %v6934_v0  ;;  %v6939_v4 = vsel %vm3429_vm7, %v18190_v24, %v18188_v9 }
 0x5b0   :  { %8873 = vmatpush1.bf16.msra.mxu1 %v12829_v53  ;;  %v6905_v53 = vsel %vm3437_vm15, %v18205_v41, %v6904_v38  ;;  %v6936_v34 = vsel %vm3437_vm15, %v18163_v12, %v6935_v32  ;;  %v6940_v27 = vsel %vm3431_vm6, %v18193_v1, %v6939_v4  ;;  %v6955_v56 = vsel %vm3431_vm6, %v17965_v28, %v18295_v15  ;;  %v20965_v32 = vld [vmem:[#allocation73_spill] sm:$0xff] }
 0x5b1   :  { %8874 = vmatprep.subr.bf16.mxu1 %v12834_v14  ;;  %v6906_v9 = vsel %vm3439_vm2, %v18231_v47, %v6905_v53  ;;  %v6937_v14 = vsel %vm3439_vm2, %v18165_v13, %v6936_v34  ;;  %v6941_v21 = vsel %vm3433_vm12, %v18203_v25, %v6940_v27  ;;  %v6956_v33 = vsel %vm3433_vm12, %v17976_v10, %v6955_v56  ;;  %v12835_v13 = vld [vmem:[%s20303_s5 + $0x140] ss:$8 sps:$4 sm:$0xff]  }
 0x5b2   :  { %v6907_v12 = vsel %vm3441_vm4, %v18239_v11, %v6906_v9  ;;  %v6938_v23 = vsel %vm3441_vm4, %v18167_v30, %v6937_v14  ;;  %v6942_v58 = vsel %vm3435_vm13, %v18205_v41, %v6941_v21  ;;  %v6957_v0 = vsel %vm3435_vm13, %v18016_v8, %v6956_v33 }
 0x5b3   :  { %v6943_v38 = vsel %vm3437_vm15, %v18231_v47, %v6942_v58  ;;  %v18617_v4 = vsel %vm3437_vm15, %v20965_v32, %v6957_v0  ;;  %v11826_v30 = vpack.c.b16 %v18318_v18, %v18295_v15  ;;  %v11827_v53 = vpack.c.b16 %v18391_v63, %v18340_v55 }
 0x5b4   :  { %8875 = vmatpush1.bf16.msra.mxu1 %v12832_v39  ;;  %v12840_v39 = vld [vmem:[%s20303_s5 + $0x154] ss:$8 sps:$4 sm:$0xff]   ;;  %v6944_v34 = vsel %vm3439_vm2, %v18239_v11, %v6943_v38  ;;  %v11830_v27 = vpack.c.b16 %v18371_v31, %v18325_v59  ;;  %v11831_v56 = vpack.c.b16 %v18409_v19, %v18357_v46  ;;  %v11832_v15 = vpack.c.b16 %v18458_v22, %v18384_v51  ;;  %v12838_v22 = vld [vmem:[%s20303_s5 + $0x150] ss:$8 sps:$4 sm:$0xff]  }
 0x5b5   :  { %8876 = vmatprep.subr.bf16.mxu1 %v12837_v5  ;;  %v6945_v18 = vsel %vm3441_vm4, %v18282_v3, %v6944_v34  ;;  %v7168_v55 = vrot.slane %v11826_v30, %v18321_v20  ;;  %v7175_v63 = vrot.slane %v11827_v53, %v18321_v20  ;;  %v11833_v5 = vpack.c.b16 %v18487_v17, %v18454_v61  ;;  %v12843_v17 = vld [vmem:[%s20303_s5 + $0x164] ss:$8 sps:$4 sm:$0xff]   ;;  %v12841_v30 = vld [vmem:[%s20303_s5 + $0x160] ss:$8 sps:$4 sm:$0xff]  }
 0x5b6   :  { %v11834_v9 = vpack.c.b16 %v18535_v54, %v18500_v29  ;;  %v11835_v59 = vpack.c.b16 %v6869_v16, %v18531_v49  ;;  %v11836_v31 = vpack.c.b16 %v6938_v23, %v6900_v40  ;;  %v11837_v19 = vpack.c.b16 %v6945_v18, %v6907_v12 }
 0x5b7   :  { %v6576_v51 = vpack.c.bf16 %v18274_v50, %v18274_v50  ;;  %v7190_v14 = vcombine.low %v7168_v55, %v7175_v63  ;;  %v7235_v21 = vrot.slane %v11830_v27, %v18321_v20  ;;  %v7249_v61 = vrot.slane %v11832_v15, %v18321_v20 }
 0x5b8   :  { %8877 = vmatpush1.bf16.msra.mxu1 %v12835_v13  ;;  %v7242_v29 = vrot.slane %v11831_v56, %v18321_v20  ;;  %v7256_v49 = vrot.slane %v11833_v5, %v18321_v20  ;;  %v7263_v54 = vrot.slane %v11834_v9, %v18321_v20  ;;  %v7277_v16 = vrot.slane %v11836_v31, %v18321_v20  ;;  %v12846_v56 = vld [vmem:[%s20303_s5 + $0x174] ss:$8 sps:$4 sm:$0xff]  }
 0x5b9   :  { %8878 = vmatprep.subr.bf16.mxu1 %v12840_v39  ;;  %v7270_v40 = vrot.slane %v11835_v59, %v18321_v20  ;;  %v7284_v33 = vrot.slane %v11837_v19, %v18321_v20  ;;  %v7285_v12 = vcombine.low %v7235_v21, %v7249_v61  ;;  %v7286_v23 = vcombine.high %v7235_v21, %v7249_v61 }
 0x5ba   :  { %v7287_v58 = vcombine.low %v7242_v29, %v7256_v49  ;;  %v7288_v0 = vcombine.high %v7242_v29, %v7256_v49  ;;  %v7289_v13 = vcombine.low %v7263_v54, %v7277_v16  ;;  %v7290_v38 = vcombine.high %v7263_v54, %v7277_v16  ;;  %v12849_v54 = vld [vmem:[%s20303_s5 + $0x184] ss:$8 sps:$4 sm:$0xff]  }
 0x5bb   :  { %v7198_v53 = vrot.slane %v7190_v14, %v18321_v20  ;;  %v7291_v39 = vcombine.low %v7270_v40, %v7284_v33  ;;  %v7299_v34 = vrot.slane %v7285_v12, %v18321_v20  ;;  %v6680_v27 = vsel %vm3429_vm7, %v18193_v1, %v18190_v24 }
 0x5bc   :  { %8879 = vmatpush1.bf16.msra.mxu1 %v12838_v22  ;;  %v18671_v15 = vrot.slane %v7287_v58, %v18321_v20  ;;  %v18674_v18 = vrot.slane %v7286_v23, %v18321_v20  ;;  %v18677_v55 = vrot.slane %v7289_v13, %v18321_v20  ;;  %v18680_v63 = vrot.slane %v7290_v38, %v18321_v20 }
 0x5bd   :  { %8880 = vmatprep.subr.bf16.mxu1 %v12843_v17  ;;  %v18683_v5 = vrot.slane %v7291_v39, %v18321_v20  ;;  %v11853_v24 = vcombine.low %v7198_v53, %v7299_v34  ;;  %v6718_v9 = vsel %vm3429_vm7, %v18203_v25, %v18193_v1  ;;  %v6756_v59 = vsel %vm3429_vm7, %v18205_v41, %v18203_v25  ;;  %v12844_v1 = vld [vmem:[%s20303_s5 + $0x170] ss:$8 sps:$4 sm:$0xff]   ;;  %v12847_v53 = vld [vmem:[%s20303_s5 + $0x180] ss:$8 sps:$4 sm:$0xff]  }
 0x5be   :  { %v7350_v31 = vcombine.high %v7299_v34, %v18677_v55  ;;  %v7354_v19 = vcombine.high %v18674_v18, %v18680_v63  ;;  %v6794_v22 = vsel %vm3429_vm7, %v18231_v47, %v18205_v41  ;;  %v6962_v14 = vsel %vm3431_vm6, %v18203_v25, %v6680_v27  ;;  %v20966_v34 = vld [vmem:[#allocation69_spill] sm:$0xff] }
 0x5bf   :  { %v18703_v21 = vrot.slane %v7288_v0, %v18321_v20  ;;  %v7352_v61 = vcombine.high %v18671_v15, %v18683_v5  ;;  %v18709_v17 = vsel %vm3433_vm12, %v18205_v41, %v6962_v14  ;;  %v7292_v29 = vcombine.high %v7270_v40, %v7284_v33 }
 0x5c0   :  { %8881 = vmatpush1.bf16.msra.mxu1 %v12841_v30  ;;  %v11855_v49 = vcombine.low %v18674_v18, %v7350_v31  ;;  %v11857_v25 = vcombine.low %v7354_v19, %v18671_v15  ;;  %v11839_v16 = vpack.c.b16 %v6718_v9, %v6680_v27  ;;  %v11840_v12 = vpack.c.b16 %v6794_v22, %v6756_v59  ;;  %v12852_v31 = vld [vmem:[%s20303_s5 + $0x194] ss:$8 sps:$4 sm:$0xff]  }
 0x5c1   :  { %8882 = vmatprep.subr.bf16.mxu1 %v12846_v56  ;;  %v11859_v23 = vcombine.low %v18703_v21, %v7352_v61  ;;  %v7824_v58 = vrot.slane %v11853_v24, %v18321_v20  ;;  %v18719_v0 = vrot.slane %v7292_v29, %v18321_v20  ;;  %v7754_v41 = vcombine.high %v18424_v60, %v18427_v45 }
 0x5c2   :  { %v7838_v40 = vrot.slane %v11855_v49, %v18321_v20  ;;  %v7852_v33 = vrot.slane %v11857_v25, %v18321_v20  ;;  %v7416_v13 = vrot.slane %v11839_v16, %v18321_v20  ;;  %v7423_v38 = vrot.slane %v11840_v12, %v18321_v20 }
 0x5c3   :  { %v7866_v30 = vrot.slane %v11859_v23, %v18321_v20  ;;  %v7356_v39 = vcombine.high %v18703_v21, %v18719_v0  ;;  %v6804_v27 = vsel %vm3431_vm6, %v17802_v35, %v20966_v34  ;;  %v6810_v56 = vsel %vm3429_vm7, %v17933_v6, %v17931_v52 }
 0x5c4   :  { %8883 = vmatpush1.bf16.msra.mxu1 %v12844_v1  ;;  %v7875_v24 = vcombine.high %v7824_v58, %v7838_v40  ;;  %v7874_v9 = vcombine.low %v7824_v58, %v7838_v40  ;;  %v7438_v59 = vcombine.low %v7416_v13, %v7423_v38  ;;  %v6805_v19 = vsel %vm3433_vm12, %v20955_v44, %v6804_v27  ;;  %v12850_v58 = vld [vmem:[%s20303_s5 + $0x190] ss:$8 sps:$4 sm:$0xff]   ;;  %v12855_v13 = vld [vmem:[%s20303_s5 + $0x1a4] ss:$8 sps:$4 sm:$0xff]  }
 0x5c5   :  { %8884 = vmatprep.subr.bf16.mxu1 %v12849_v54  ;;  %v7879_v22 = vcombine.high %v7852_v33, %v7866_v30  ;;  %v7878_v14 = vcombine.low %v7852_v33, %v7866_v30  ;;  %v6806_v1 = vsel %vm3435_vm13, %v17906_v57, %v6805_v19  ;;  %v6811_v61 = vsel %vm3431_vm6, %v17935_v26, %v6810_v56 }
 0x5c6   :  { %v6577_v29 = vpack.c.bf16 %v18276_v2, %v18276_v2  ;;  %v18751_v49 = vrot.slane %v7875_v24, %v18321_v20  ;;  %v18754_v25 = vrot.slane %v7438_v59, %v18321_v20  ;;  %v6807_v54 = vsel %vm3437_vm15, %v17911_v62, %v6806_v1  ;;  %v20969_v1 = vld [vmem:[#allocation81_spill] sm:$0xff] }
 0x5c7   :  { %v18759_v16 = vrot.slane %v7879_v22, %v18321_v20  ;;  %v18762_v12 = vrot.slane %v7874_v9, %v18321_v20  ;;  %v18765_v23 = vrot.slane %v7878_v14, %v18321_v20  ;;  %v6812_v40 = vsel %vm3433_vm12, %v17949_v37, %v6811_v61  ;;  %v12853_v14 = vld [vmem:[%s20303_s5 + $0x1a0] ss:$8 sps:$4 sm:$0xff]  }
 0x5c8   :  { %8885 = vmatpush1.bf16.msra.mxu1 %v12847_v53  ;;  %v11861_v33 = vcombine.low %v7356_v39, %v18754_v25  ;;  %v6808_v38 = vsel %vm3439_vm2, %v20956_v43, %v6807_v54  ;;  %v6813_v30 = vsel %vm3435_vm13, %v17952_v7, %v6812_v40  ;;  %v6841_v53 = vsel %vm3429_vm7, %v17802_v35, %v17797_v48 }
 0x5c9   :  { %8886 = vmatprep.subr.bf16.mxu1 %v12852_v31  ;;  %v7942_v34 = vcombine.low %v18751_v49, %v18759_v16  ;;  %v7938_v39 = vcombine.low %v18762_v12, %v18765_v23  ;;  %v7943_v27 = vcombine.high %v18751_v49, %v18759_v16  ;;  %v7939_v56 = vcombine.high %v18762_v12, %v18765_v23  ;;  %v20967_v31 = vld [vmem:[#allocation71_spill] sm:$0xff] }
 0x5ca   :  { %v8003_v24 = vrot.slane %v11861_v33, %v18321_v20  ;;  %v6814_v9 = vsel %vm3437_vm15, %v17963_v36, %v6813_v30  ;;  %v6842_v48 = vsel %vm3431_vm6, %v20955_v44, %v6841_v53  ;;  %v6848_v59 = vsel %vm3429_vm7, %v17935_v26, %v17933_v6  ;;  %v20970_v33 = vld [vmem:[#allocation72_spill] sm:$0xff] }
 0x5cb   :  { %v20968_v19 = vpack.c.bf16 %v20967_v31, %v20967_v31  ;;  %8849 = vmatprep.mubr.bf16.mxu1 %v7942_v34  ;;  %v7758_v61 = vcombine.high %v20969_v1, %v18421_v42  ;;  %v6843_v54 = vsel %vm3433_vm12, %v17906_v57, %v6842_v48  ;;  %v6849_v40 = vsel %vm3431_vm6, %v17949_v37, %v6848_v59  ;;  %v12858_v34 = vld [vmem:[%s20303_s5 + $0x1b4] ss:$8 sps:$4 sm:$0xff]  }
 0x5cc   :  { %8887 = vmatpush1.bf16.msra.mxu1 %v12850_v58  ;;  %v20971_v30 = vpack.c.bf16 %v20970_v33, %v20970_v33  ;;  %v8011_v58 = vcombine.high %v8003_v24, %v8003_v24  ;;  %v20972_v31 = vld [vmem:[#allocation68_spill] sm:$0xff]  ;;  %v6815_v48 = vsel %vm3439_vm2, %v17965_v28, %v6814_v9  ;;  %v6844_v59 = vsel %vm3435_vm13, %v17911_v62, %v6843_v54 }
 0x5cd   :  { %v18802_v22 = vunpack.c.l.b16 %v20968_v19  ;;  %8850 = vmatmul.mubr.bf16.gmra.mrb[60].mxu1 %v7938_v39  ;;  %8888 = vmatprep.subr.bf16.mxu1 %v12855_v13  ;;  %v18823_v42 = vsel %vm3441_vm4, %v20972_v31, %v6808_v38  ;;  %v6850_v19 = vsel %vm3433_vm12, %v17952_v7, %v6849_v40  ;;  %v6879_v13 = vsel %vm3429_vm7, %v20955_v44, %v17802_v35  ;;  %v12856_v35 = vld [vmem:[%s20303_s5 + $0x1b0] ss:$8 sps:$4 sm:$0xff]  }
 0x5ce   :  { %v18816_v53 = vunpack.c.l.b16 %v20971_v30  ;;  %v6886_v39 = vsel %vm3429_vm7, %v17949_v37, %v17935_v26  ;;  %v18838_v38 = vrot.slane %v8011_v58, %v18321_v20  ;;  %v18841_v1 = vrot.slane %v8003_v24, %v18321_v20  ;;  %v20973_v58 = vld [vmem:[#allocation7_spill] sm:$0xff] }
 0x5cf   :  { %v6845_v9 = vsel %vm3437_vm15, %v20956_v43, %v6844_v59  ;;  %v6851_v54 = vsel %vm3435_vm13, %v17963_v36, %v6850_v19  ;;  %v6880_v24 = vsel %vm3431_vm6, %v17906_v57, %v6879_v13  ;;  %v6887_v30 = vsel %vm3431_vm6, %v17952_v7, %v6886_v39  ;;  %v12861_v19 = vld [vmem:[%s20303_s5 + $0x1c4] ss:$8 sps:$4 sm:$0xff]  }
 0x5d0   :  { %8889 = vmatpush1.bf16.msra.mxu1 %v12853_v14  ;;  %v6846_v40 = vsel %vm3439_vm2, %v20972_v31, %v6845_v9  ;;  %v6852_v33 = vsel %vm3437_vm15, %v17965_v28, %v6851_v54  ;;  %v20974_v59 = vpack.c.bf16 %v20973_v58, %v20973_v58  ;;  %8859 = vmatprep.mubr.bf16.mxu1 %v18838_v38 }
 0x5d1   :  { %8890 = vmatprep.subr.bf16.mxu1 %v12858_v34  ;;  %v6816_v9 = vsel %vm3441_vm4, %v17976_v10, %v6815_v48  ;;  %v6847_v13 = vsel %vm3441_vm4, %v17931_v52, %v6846_v40  ;;  %v6853_v39 = vsel %vm3439_vm2, %v17976_v10, %v6852_v33  ;;  %v6881_v58 = vsel %vm3433_vm12, %v17911_v62, %v6880_v24 }
 0x5d2   :  { %v18861_v14 = vunpack.c.l.b16 %v20974_v59  ;;  %v6854_v54 = vsel %vm3441_vm4, %v18016_v8, %v6853_v39  ;;  %v6888_v34 = vsel %vm3433_vm12, %v17963_v36, %v6887_v30  ;;  %v6917_v59 = vsel %vm3429_vm7, %v17906_v57, %v20955_v44  ;;  %v12859_v30 = vld [vmem:[%s20303_s5 + $0x1c0] ss:$8 sps:$4 sm:$0xff]  }
 0x5d3   :  { %v6882_v48 = vsel %vm3435_vm13, %v20956_v43, %v6881_v58  ;;  %v6889_v40 = vsel %vm3435_vm13, %v17965_v28, %v6888_v34  ;;  %v6918_v33 = vsel %vm3431_vm6, %v17911_v62, %v6917_v59  ;;  %v6924_v24 = vsel %vm3429_vm7, %v17952_v7, %v17949_v37  ;;  %v12864_v7 = vld [vmem:[%s20303_s5 + $0x1d4] ss:$8 sps:$4 sm:$0xff]  }
 0x5d4   :  { %8891 = vmatpush1.bf16.msra.mxu1 %v12856_v35  ;;  %v6883_v57 = vsel %vm3437_vm15, %v20972_v31, %v6882_v48  ;;  %v6890_v44 = vsel %vm3437_vm15, %v17976_v10, %v6889_v40  ;;  %v6919_v39 = vsel %vm3433_vm12, %v20956_v43, %v6918_v33  ;;  %v6925_v62 = vsel %vm3431_vm6, %v17963_v36, %v6924_v24  ;;  %v12862_v48 = vld [vmem:[%s20303_s5 + $0x1d0] ss:$8 sps:$4 sm:$0xff]  }
 0x5d5   :  { %v18905_v37 = vunpack.c.l.b16 %v6576_v51  ;;  %8860 = vmatmul.mubr.bf16.gmra.mrb[64].mxu1 %v18841_v1  ;;  %8892 = vmatprep.subr.bf16.mxu1 %v12861_v19  ;;  %v6884_v35 = vsel %vm3439_vm2, %v17931_v52, %v6883_v57  ;;  %v6891_v43 = vsel %vm3439_vm2, %v18016_v8, %v6890_v44  ;;  %v6920_v36 = vsel %vm3435_vm13, %v20972_v31, %v6919_v39  ;;  %v12865_v39 = vld [vmem:[%s20303_s5 + $0x1e0] ss:$8 sps:$4 sm:$0xff]  }
 0x5d6   :  { %8900 = vmatprep.mubr.bf16.mxu1 %v7758_v61  ;;  %v6885_v50 = vsel %vm3441_vm4, %v17933_v6, %v6884_v35  ;;  %v6892_v51 = vsel %vm3441_vm4, %v20965_v32, %v6891_v43  ;;  %v6921_v19 = vsel %vm3437_vm15, %v17931_v52, %v6920_v36  ;;  %v6926_v58 = vsel %vm3433_vm12, %v17965_v28, %v6925_v62 }
 0x5d7   :  { %v6922_v34 = vsel %vm3439_vm2, %v17933_v6, %v6921_v19  ;;  %v6927_v59 = vsel %vm3435_vm13, %v17976_v10, %v6926_v58  ;;  %v11821_v61 = vpack.c.b16 %v6847_v13, %v18823_v42  ;;  %v11822_v31 = vpack.c.b16 %v6854_v54, %v6816_v9  ;;  %v12867_v42 = vld [vmem:[%s20303_s5 + $0x1e4] ss:$8 sps:$4 sm:$0xff]  }
 0x5d8   :  { %8893 = vmatpush1.bf16.msra.mxu1 %v12859_v30  ;;  %v6923_v52 = vsel %vm3441_vm4, %v17935_v26, %v6922_v34  ;;  %v6928_v28 = vsel %vm3437_vm15, %v18016_v8, %v6927_v59  ;;  %v6817_v6 = vsel %vm3429_vm7, %v20965_v32, %v18016_v8  ;;  %v6855_v10 = vsel %vm3429_vm7, %v18802_v22, %v20965_v32 }
 0x5d9   :  { %8894 = vmatprep.subr.bf16.mxu1 %v12864_v7  ;;  %v6929_v9 = vsel %vm3439_vm2, %v20965_v32, %v6928_v28  ;;  %v11823_v26 = vpack.c.b16 %v6923_v52, %v6885_v50  ;;  %v7015_v13 = vrot.slane %v11821_v61, %v18321_v20  ;;  %v7022_v54 = vrot.slane %v11822_v31, %v18321_v20 }
 0x5da   :  { %v6930_v8 = vsel %vm3441_vm4, %v18802_v22, %v6929_v9  ;;  %v6893_v40 = vsel %vm3429_vm7, %v18816_v53, %v18802_v22  ;;  %v6931_v33 = vsel %vm3429_vm7, %v18861_v14, %v18816_v53  ;;  %v11828_v24 = vpack.c.b16 %v6855_v10, %v6817_v6  ;;  %v12873_v10 = vld [vmem:[%s20303_s5 + $0x204] ss:$8 sps:$4 sm:$0xff]  }
 0x5db   :  { %v11824_v30 = vpack.c.b16 %v6930_v8, %v6892_v51  ;;  %v7029_v32 = vrot.slane %v11823_v26, %v18321_v20  ;;  %v11829_v57 = vpack.c.b16 %v6931_v33, %v6893_v40  ;;  %v7351_v44 = vcombine.low %v18671_v15, %v18683_v5  ;;  %v12870_v15 = vld [vmem:[%s20303_s5 + $0x1f4] ss:$8 sps:$4 sm:$0xff]  }
 0x5dc   :  { %8895 = vmatpush1.bf16.msra.mxu1 %v12862_v48  ;;  %v7182_v62 = vrot.slane %v11828_v24, %v18321_v20  ;;  %v7353_v7 = vcombine.low %v18674_v18, %v18680_v63  ;;  %v7355_v35 = vcombine.low %v18703_v21, %v18719_v0  ;;  %v6832_v43 = vsel %vm3429_vm7, %v18239_v11, %v18231_v47 }
 0x5dd   :  { %8896 = vmatprep.subr.bf16.mxu1 %v12867_v42  ;;  %v7036_v36 = vrot.slane %v11824_v30, %v18321_v20  ;;  %v7041_v50 = vcombine.low %v7015_v13, %v7029_v32  ;;  %v7042_v51 = vcombine.high %v7015_v13, %v7029_v32  ;;  %v7189_v19 = vrot.slane %v11829_v57, %v18321_v20  ;;  %v12871_v32 = vld [vmem:[%s20303_s5 + $0x200] ss:$8 sps:$4 sm:$0xff]  }
 0x5de   :  { %v11856_v18 = vcombine.high %v7353_v7, %v18677_v55  ;;  %v11858_v58 = vcombine.high %v18680_v63, %v7351_v44  ;;  %v11860_v21 = vcombine.high %v7355_v35, %v18683_v5  ;;  %v6870_v34 = vsel %vm3429_vm7, %v18282_v3, %v18239_v11  ;;  %v12868_v63 = vld [vmem:[%s20303_s5 + $0x1f0] ss:$8 sps:$4 sm:$0xff]   ;;  %v12876_v7 = vld [vmem:[%s20303_s5 + $0x214] ss:$8 sps:$4 sm:$0xff]  }
 0x5df   :  { %v7043_v59 = vcombine.low %v7022_v54, %v7036_v36  ;;  %v7044_v61 = vcombine.high %v7022_v54, %v7036_v36  ;;  %v7079_v31 = vrot.slane %v7041_v50, %v18321_v20  ;;  %v7093_v48 = vrot.slane %v7042_v51, %v18321_v20 }
 0x5e0   :  { %v18988_v52 = vunpack.c.l.b16 %v6577_v29  ;;  %8897 = vmatpush1.bf16.msra.mxu1 %v12865_v39  ;;  %v7191_v5 = vcombine.low %v7182_v62, %v7189_v19  ;;  %v7859_v28 = vrot.slane %v11858_v58, %v18321_v20  ;;  %v7873_v6 = vrot.slane %v11860_v21, %v18321_v20 }
 0x5e1   :  { %8898 = vmatprep.subr.bf16.mxu1 %v12870_v15  ;;  %v7086_v42 = vrot.slane %v7043_v59, %v18321_v20  ;;  %v7100_v2 = vrot.slane %v7044_v61, %v18321_v20  ;;  %v11844_v29 = vcombine.low %v7079_v31, %v7093_v48  ;;  %v11846_v9 = vcombine.high %v7079_v31, %v7093_v48 }
 0x5e2   :  { %v7205_v26 = vrot.slane %v7191_v5, %v18321_v20  ;;  %v7881_v13 = vcombine.high %v7859_v28, %v7873_v6  ;;  %v7880_v54 = vcombine.low %v7859_v28, %v7873_v6  ;;  %v6908_v8 = vsel %vm3429_vm7, %v18905_v37, %v18282_v3 }
 0x5e3   :  { %v11848_v40 = vcombine.low %v7086_v42, %v7100_v2  ;;  %v11850_v33 = vcombine.high %v7086_v42, %v7100_v2  ;;  %v7646_v24 = vrot.slane %v11844_v29, %v18321_v20  ;;  %v7660_v30 = vrot.slane %v11846_v9, %v18321_v20  ;;  %v20977_v42 = vld [vmem:[#allocation80_spill] sm:$0xff] }
 0x5e4   :  { %8899 = vmatpush1.bf16.msra.mxu1 %v12868_v63  ;;  %v11854_v57 = vcombine.low %v7205_v26, %v18677_v55  ;;  %v7845_v44 = vrot.slane %v11856_v18, %v18321_v20  ;;  %v19012_v39 = vrot.slane %v7881_v13, %v18321_v20  ;;  %v6946_v62 = vsel %vm3429_vm7, %v18988_v52, %v18905_v37  ;;  %v12877_v2 = vld [vmem:[%s20303_s5 + $0x220] ss:$8 sps:$4 sm:$0xff]  }
 0x5e5   :  { %8929 = vmatprep.subr.bf16.mxu1 %v12873_v10  ;;  %v7674_v35 = vrot.slane %v11848_v40, %v18321_v20  ;;  %v7688_v15 = vrot.slane %v11850_v33, %v18321_v20  ;;  %v7691_v36 = vcombine.low %v7646_v24, %v7660_v30  ;;  %v7692_v55 = vcombine.high %v7646_v24, %v7660_v30 }
 0x5e6   :  { %v7831_v50 = vrot.slane %v11854_v57, %v18321_v20  ;;  %v11841_v51 = vpack.c.b16 %v6870_v34, %v6832_v43  ;;  %v11842_v19 = vpack.c.b16 %v6946_v62, %v6908_v8  ;;  %v6959_v18 = vsel %vm3439_vm2, %v18802_v22, %v18617_v4  ;;  %v12874_v4 = vld [vmem:[%s20303_s5 + $0x210] ss:$8 sps:$4 sm:$0xff]  }
 0x5e7   :  { %8901 = vmatmul.mubr.bf16.vlgmr.msra.gmra.mrb[56].mxu1 %v7754_v41  ;;  %v7695_v58 = vcombine.low %v7674_v35, %v7688_v15  ;;  %v7696_v21 = vcombine.high %v7674_v35, %v7688_v15  ;;  %v19030_v59 = vrot.slane %v7692_v55, %v18321_v20  ;;  %v19033_v61 = vrot.slane %v7880_v54, %v18321_v20  ;;  %v12879_v41 = vld [vmem:[%s20303_s5 + $0x224] ss:$8 sps:$4 sm:$0xff]   ;;  %v20975_v34 = vld [vmem:[#allocation8_spill] sm:$0xff] }
 0x5e8   :  { %8910 = vmatprep.mubr.bf16.mxu1 %v7943_v27  ;;  %8930 = vmatpush1.bf16.msra.mxu1 %v12871_v32  ;;  %v7877_v22 = vcombine.high %v7831_v50, %v7845_v44  ;;  %v7876_v60 = vcombine.low %v7831_v50, %v7845_v44  ;;  %v7430_v45 = vrot.slane %v11841_v51, %v18321_v20  ;;  %v12882_v54 = vld [vmem:[%s20303_s5 + $0x234] ss:$8 sps:$4 sm:$0xff]   ;;  %v12891_v50 = vld [vmem:[%s20303_s5 + $0x264] ss:$8 sps:$4 sm:$0xff]  }
 0x5e9   :  { %8931 = vmatprep.subr.bf16.mxu1 %v12876_v7  ;;  %v19046_v43 = vrot.slane %v7696_v21, %v18321_v20  ;;  %v19049_v49 = vrot.slane %v7695_v58, %v18321_v20  ;;  %v7437_v16 = vrot.slane %v11842_v19, %v18321_v20  ;;  %v19054_v27 = vsel %vm3441_vm4, %v18816_v53, %v6959_v18 }
 0x5ea   :  { %v20976_v31 = vpack.c.bf16 %v20975_v34, %v20975_v34  ;;  %v19060_v63 = vrot.slane %v7691_v36, %v18321_v20  ;;  %v19063_v5 = vrot.slane %v7877_v22, %v18321_v20  ;;  %v19066_v28 = vrot.slane %v7876_v60, %v18321_v20 }
 0x5eb   :  { %v7439_v6 = vcombine.low %v7430_v45, %v7437_v16  ;;  %v7760_v10 = vcombine.high %v19030_v59, %v19046_v43  ;;  %v6525_v53 = vrot.slane %v20977_v42, 1  ;;  %v8043_v33 = vcombine.high %v18838_v38, %v18838_v38  ;;  %v12880_v38 = vld [vmem:[%s20303_s5 + $0x230] ss:$8 sps:$4 sm:$0xff]   ;;  %v12889_v16 = vld [vmem:[%s20303_s5 + $0x260] ss:$8 sps:$4 sm:$0xff]  }
 0x5ec   :  { %v6953_v48 = vunpack.c.l.b16 %v20976_v31  ;;  %8932 = vmatpush1.bf16.msra.mxu1 %v12874_v4  ;;  %v7944_v29 = vcombine.low %v19063_v5, %v19012_v39  ;;  %v7940_v9 = vcombine.low %v19066_v28, %v19033_v61  ;;  %v7756_v26 = vcombine.high %v19060_v63, %v19049_v49  ;;  %v12894_v31 = vld [vmem:[%s20303_s5 + $0x274] ss:$8 sps:$4 sm:$0xff]  }
 0x5ed   :  { %v7945_v13 = vcombine.high %v19063_v5, %v19012_v39  ;;  %8933 = vmatprep.subr.bf16.mxu1 %v12879_v41  ;;  %v7453_v8 = vrot.slane %v7439_v6, %v18321_v20  ;;  %v7941_v40 = vcombine.high %v19066_v28, %v19033_v61  ;;  %v6964_v30 = vsel %vm3435_vm13, %v18231_v47, %v18709_v17  ;;  %v12885_v47 = vld [vmem:[%s20303_s5 + $0x244] ss:$8 sps:$4 sm:$0xff]   ;;  %v12973_v39 = vld [vmem:[%s20303_s5 + $0x420] ss:$8 sps:$4 sm:$0xff]  }
 0x5ee   :  { %v6961_v24 = vsel %vm3429_vm7, %v6953_v48, %v18861_v14  ;;  %v6526_v57 = vmax.f32 %v20977_v42, %v6525_v53  ;;  %v6965_v14 = vsel %vm3437_vm15, %v18239_v11, %v6964_v30  ;;  %v12883_v11 = vld [vmem:[%s20303_s5 + $0x240] ss:$8 sps:$4 sm:$0xff]  }
 0x5ef   :  { %8911 = vmatmul.mubr.bf16.gmra.mrb[60].mxu1 %v7939_v56  ;;  %v7454_v32 = vcombine.low %v18754_v25, %v7453_v8  ;;  %v6966_v25 = vsel %vm3439_vm2, %v18282_v3, %v6965_v14  ;;  %v6970_v12 = vpack.c.b16 %v6961_v24, %v6961_v24  ;;  %v12888_v3 = vld [vmem:[%s20303_s5 + $0x254] ss:$8 sps:$4 sm:$0xff]   ;;  %v12979_v28 = vld [vmem:[%s20303_s5 + $0x440] ss:$8 sps:$4 sm:$0xff]  }
 0x5f0   :  { %8920 = vmatprep.mubr.bf16.mxu1 %v8043_v33  ;;  %8934 = vmatpush1.bf16.msra.mxu1 %v12877_v2  ;;  %v6967_v23 = vsel %vm3441_vm4, %v18905_v37, %v6966_v25  ;;  %v6578_v56 = vpack.c.bf16 %v6526_v57, %v6526_v57  ;;  %v7759_v37 = vcombine.low %v19030_v59, %v19046_v43  ;;  %v12892_v33 = vld [vmem:[%s20303_s5 + $0x270] ss:$8 sps:$4 sm:$0xff]   ;;  %v12942_v59 = vld [vmem:[%s20303_s5 + $0x374] ss:$8 sps:$4 sm:$0xff]  }
 0x5f1   :  { %8935 = vmatprep.subr.bf16.mxu1 %v12882_v54  ;;  %v19109_v17 = vcombine.high %v18719_v0, %v7454_v32  ;;  %v6971_v44 = vpack.c.b16 %v6967_v23, %v18357_v46  ;;  %v11838_v62 = vpack.c.b16 %v6967_v23, %v6967_v23  ;;  %v8041_v0 = vcombine.high %v18841_v1, %v18841_v1  ;;  %v12886_v1 = vld [vmem:[%s20303_s5 + $0x250] ss:$8 sps:$4 sm:$0xff]   ;;  %v12897_v32 = vld [vmem:[%s20303_s5 + $0x284] ss:$8 sps:$4 sm:$0xff]   ;;  %v12900_v23 = vld [vmem:[%s20303_s5 + $0x294] ss:$8 sps:$4 sm:$0xff]  }
 0x5f2   :  { %v7213_v7 = vrot.slane %v6970_v12, %v18321_v20  ;;  %v6954_v46 = vunpack.c.l.b16 %v6578_v56  ;;  %v12940_v43 = vld [vmem:[%s20303_s5 + $0x370] ss:$8 sps:$4 sm:$0xff]  }
 0x5f3   :  { %v7364_v35 = vrot.slane %v6971_v44, %v18321_v20  ;;  %v7371_v15 = vrot.slane %v11838_v62, %v18321_v20  ;;  %v12903_v44 = vld [vmem:[%s20303_s5 + $0x2a4] ss:$8 sps:$4 sm:$0xff]   ;;  %v12901_v62 = vld [vmem:[%s20303_s5 + $0x2a0] ss:$8 sps:$4 sm:$0xff]  }
 0x5f4   :  { %8936 = vmatpush1.bf16.msra.mxu1 %v12880_v38  ;;  %v7220_v51 = vrot.slane %v7213_v7, %v18321_v20  ;;  %v6968_v4 = vsel %vm3429_vm7, %v6954_v46, %v18988_v52  ;;  %v12909_v7 = vld [vmem:[%s20303_s5 + $0x2c4] ss:$8 sps:$4 sm:$0xff]  }
 0x5f5   :  { %8937 = vmatprep.subr.bf16.mxu1 %v12885_v47  ;;  %v7372_v36 = vcombine.high %v7364_v35, %v7364_v35  ;;  %v7373_v55 = vcombine.high %v7371_v15, %v7371_v15  ;;  %v7380_v19 = vrot.slane %v7364_v35, %v18321_v20  ;;  %v7387_v18 = vrot.slane %v7371_v15, %v18321_v20  ;;  %v12895_v47 = vld [vmem:[%s20303_s5 + $0x280] ss:$8 sps:$4 sm:$0xff]   ;;  %v12912_v35 = vld [vmem:[%s20303_s5 + $0x2d4] ss:$8 sps:$4 sm:$0xff]   ;;  %v12910_v15 = vld [vmem:[%s20303_s5 + $0x2d0] ss:$8 sps:$4 sm:$0xff]  }
 0x5f6   :  { %v6972_v41 = vpack.c.b16 %v6968_v4, %v6968_v4  ;;  %v12915_v46 = vld [vmem:[%s20303_s5 + $0x2e4] ss:$8 sps:$4 sm:$0xff]  }
 0x5f7   :  { %8921 = vmatmul.mubr.bf16.gmra.mrb[64].mxu1 %v8041_v0  ;;  %v7394_v58 = vrot.slane %v7372_v36, %v18321_v20  ;;  %v7401_v21 = vrot.slane %v7373_v55, %v18321_v20  ;;  %v7402_v22 = vcombine.high %v7380_v19, %v7380_v19  ;;  %v7403_v60 = vcombine.high %v7387_v18, %v7387_v18  ;;  %v12906_v0 = vld [vmem:[%s20303_s5 + $0x2b4] ss:$8 sps:$4 sm:$0xff]   ;;  %v12916_v55 = vld [vmem:[%s20303_s5 + $0x2f0] ss:$8 sps:$4 sm:$0xff]   ;;  %v12927_v4 = vld [vmem:[%s20303_s5 + $0x324] ss:$8 sps:$4 sm:$0xff]  }
 0x5f8   :  { %8938 = vmatpush1.bf16.msra.mxu1 %v12883_v11  ;;  %8961 = vmatprep.mubr.bf16.mxu1 %v7759_v37  ;;  %v7946_v45 = vcombine.low %v7220_v51, %v7380_v19  ;;  %v7461_v52 = vrot.slane %v6972_v41, %v18321_v20  ;;  %v12898_v11 = vld [vmem:[%s20303_s5 + $0x290] ss:$8 sps:$4 sm:$0xff]   ;;  %v12907_v37 = vld [vmem:[%s20303_s5 + $0x2c0] ss:$8 sps:$4 sm:$0xff]   ;;  %v12918_v36 = vld [vmem:[%s20303_s5 + $0x2f4] ss:$8 sps:$4 sm:$0xff]   ;;  %v7755_v19 = vcombine.low %v19060_v63, %v19049_v49 }
 0x5f9   :  { %8939 = vmatprep.subr.bf16.mxu1 %v12888_v3  ;;  %v7404_v34 = vcombine.high %v7394_v58, %v7394_v58  ;;  %v7947_v48 = vcombine.low %v7394_v58, %v7402_v22  ;;  %v7949_v6 = vcombine.low %v7401_v21, %v7403_v60  ;;  %v7405_v42 = vcombine.high %v7401_v21, %v7401_v21  ;;  %v12904_v3 = vld [vmem:[%s20303_s5 + $0x2b0] ss:$8 sps:$4 sm:$0xff]   ;;  %v12919_v51 = vld [vmem:[%s20303_s5 + $0x300] ss:$8 sps:$4 sm:$0xff]   ;;  %v12933_v41 = vld [vmem:[%s20303_s5 + $0x344] ss:$8 sps:$4 sm:$0xff]  }
 0x5fa   :  { %v7956_v2 = vrot.slane %v7946_v45, %v18321_v20  ;;  %v7468_v8 = vrot.slane %v7461_v52, %v18321_v20  ;;  %v8010_v58 = vrot.slane %v19109_v17, %v18321_v20  ;;  %v12922_v21 = vld [vmem:[%s20303_s5 + $0x310] ss:$8 sps:$4 sm:$0xff]   ;;  %v12925_v17 = vld [vmem:[%s20303_s5 + $0x320] ss:$8 sps:$4 sm:$0xff]   ;;  %v12948_v52 = vld [vmem:[%s20303_s5 + $0x394] ss:$8 sps:$4 sm:$0xff]  }
 0x5fb   :  { %v7948_v53 = vcombine.low %v7404_v34, %v7387_v18  ;;  %v7963_v54 = vrot.slane %v7947_v48, %v18321_v20  ;;  %v7977_v30 = vrot.slane %v7949_v6, %v18321_v20  ;;  %v12924_v18 = vld [vmem:[%s20303_s5 + $0x314] ss:$8 sps:$4 sm:$0xff]   ;;  %v12928_v45 = vld [vmem:[%s20303_s5 + $0x330] ss:$8 sps:$4 sm:$0xff]   ;;  %v12939_v48 = vld [vmem:[%s20303_s5 + $0x364] ss:$8 sps:$4 sm:$0xff]  }
 0x5fc   :  { %8940 = vmatpush1.bf16.msra.mxu1 %v12886_v1  ;;  %v19160_v38 = vcombine.low %v7405_v42, %v7468_v8  ;;  %v12913_v1 = vld [vmem:[%s20303_s5 + $0x2e0] ss:$8 sps:$4 sm:$0xff]   ;;  %v8012_v22 = vcombine.high %v8010_v58, %v8010_v58  ;;  %v19256_v34 = vrot.slane %v8010_v58, %v18321_v20  ;;  %v12954_v8 = vld [vmem:[%s20303_s5 + $0x3b4] ss:$8 sps:$4 sm:$0xff]   ;;  %v12982_v58 = vld [vmem:[%s20303_s5 + $0x450] ss:$8 sps:$4 sm:$0xff]  }
 0x5fd   :  { %8941 = vmatprep.subr.bf16.mxu1 %v12891_v50  ;;  %v7970_v24 = vrot.slane %v7948_v53, %v18321_v20  ;;  %v7978_v57 = vcombine.low %v7956_v2, %v7963_v54  ;;  %v12921_v50 = vld [vmem:[%s20303_s5 + $0x304] ss:$8 sps:$4 sm:$0xff]   ;;  %v12937_v6 = vld [vmem:[%s20303_s5 + $0x360] ss:$8 sps:$4 sm:$0xff]   ;;  %v12946_v53 = vld [vmem:[%s20303_s5 + $0x390] ss:$8 sps:$4 sm:$0xff]  }
 0x5fe   :  { %v19240_v60 = vrot.slane %v8012_v22, %v18321_v20  ;;  %v12943_v42 = vld [vmem:[%s20303_s5 + $0x380] ss:$8 sps:$4 sm:$0xff]   ;;  %v12951_v2 = vld [vmem:[%s20303_s5 + $0x3a4] ss:$8 sps:$4 sm:$0xff]   ;;  %v12978_v63 = vld [vmem:[%s20303_s5 + $0x434] ss:$8 sps:$4 sm:$0xff]  }
 0x5ff   :  { %v7979_v14 = vcombine.low %v7970_v24, %v7977_v30  ;;  %v7986_v25 = vrot.slane %v7978_v57, %v18321_v20  ;;  %v12949_v54 = vld [vmem:[%s20303_s5 + $0x3a0] ss:$8 sps:$4 sm:$0xff]   ;;  %v12957_v24 = vld [vmem:[%s20303_s5 + $0x3c4] ss:$8 sps:$4 sm:$0xff]   ;;  %v12958_v57 = vld [vmem:[%s20303_s5 + $0x3d0] ss:$8 sps:$4 sm:$0xff]  }
 0x600   :  { %8942 = vmatpush1.bf16.msra.mxu1 %v12889_v16  ;;  %v12931_v16 = vld [vmem:[%s20303_s5 + $0x340] ss:$8 sps:$4 sm:$0xff]  }
 0x601   :  { %8943 = vmatprep.subr.bf16.mxu1 %v12894_v31  ;;  %v7993_v12 = vrot.slane %v7979_v14, %v18321_v20  ;;  %v12934_v31 = vld [vmem:[%s20303_s5 + $0x350] ss:$8 sps:$4 sm:$0xff]   ;;  %v12955_v30 = vld [vmem:[%s20303_s5 + $0x3c0] ss:$8 sps:$4 sm:$0xff]   ;;  %v12963_v14 = vld [vmem:[%s20303_s5 + $0x3e4] ss:$8 sps:$4 sm:$0xff]  }
 0x603   :  { %v19170_v56 = vcombine.low %v7986_v25, %v7993_v12  ;;  %v12966_v25 = vld [vmem:[%s20303_s5 + $0x3f4] ss:$8 sps:$4 sm:$0xff]   ;;  %v12964_v12 = vld [vmem:[%s20303_s5 + $0x3f0] ss:$8 sps:$4 sm:$0xff]  }
 0x604   :  { %8944 = vmatpush1.bf16.msra.mxu1 %v12892_v33  ;;  %v12952_v33 = vld [vmem:[%s20303_s5 + $0x3b0] ss:$8 sps:$4 sm:$0xff]  }
 0x605   :  { %8945 = vmatprep.subr.bf16.mxu1 %v12897_v32  ;;  %v12960_v32 = vld [vmem:[%s20303_s5 + $0x3d4] ss:$8 sps:$4 sm:$0xff]  }
 0x608   :  { %8946 = vmatpush1.bf16.msra.mxu1 %v12895_v47  ;;  %v12961_v47 = vld [vmem:[%s20303_s5 + $0x3e0] ss:$8 sps:$4 sm:$0xff]  }
 0x609   :  { %8947 = vmatprep.subr.bf16.mxu1 %v12900_v23  ;;  %v12969_v23 = vld [vmem:[%s20303_s5 + $0x404] ss:$8 sps:$4 sm:$0xff]  }
 0x60c   :  { %8948 = vmatpush1.bf16.msra.mxu1 %v12898_v11  ;;  %v12967_v11 = vld [vmem:[%s20303_s5 + $0x400] ss:$8 sps:$4 sm:$0xff]  }
 0x60d   :  { %8949 = vmatprep.subr.bf16.mxu1 %v12903_v44  ;;  %v20978_v44 = vld [vmem:[#allocation9_spill] sm:$0xff] }
 0x610   :  { %8950 = vmatpush1.bf16.msra.mxu1 %v12901_v62  ;;  %v6969_v62 = vpack.c.b16 %v19054_v27, %v20978_v44  ;;  %v12999_v44 = vld [vmem:[%s20305_s7 + $0x440] sm:$0xff]  }
 0x611   :  { %8951 = vmatprep.subr.bf16.mxu1 %v12906_v0  ;;  %v12972_v0 = vld [vmem:[%s20303_s5 + $0x414] ss:$8 sps:$4 sm:$0xff]  }
 0x614   :  { %8952 = vmatpush1.bf16.msra.mxu1 %v12904_v3  ;;  %v11825_v3 = vpack.c.b16 %v19054_v27, %v19054_v27  ;;  %v12975_v27 = vld [vmem:[%s20303_s5 + $0x424] ss:$8 sps:$4 sm:$0xff]  }
 0x615   :  { %8953 = vmatprep.subr.bf16.mxu1 %v12909_v7  ;;  %v12970_v7 = vld [vmem:[%s20303_s5 + $0x410] ss:$8 sps:$4 sm:$0xff]  }
 0x618   :  { %8954 = vmatpush1.bf16.msra.mxu1 %v12907_v37  ;;  %v7116_v37 = vrot.slane %v6969_v62, %v18321_v20 }
 0x619   :  { %8955 = vmatprep.subr.bf16.mxu1 %v12912_v35  ;;  %v7123_v35 = vrot.slane %v11825_v3, %v18321_v20  ;;  %v13000_v3 = vld [vmem:[%s20305_s7 + $0x400] sm:$0xff]  }
 0x61a   :  { %v7124_v49 = vcombine.high %v7116_v37, %v7116_v37 }
 0x61b   :  { %v7125_v5 = vcombine.high %v7123_v35, %v7123_v35  ;;  %v7139_v61 = vrot.slane %v7123_v35, %v18321_v20  ;;  %v12995_v35 = vld [vmem:[%s20305_s7 + $0x50] sm:$0xff]  }
 0x61c   :  { %8956 = vmatpush1.bf16.msra.mxu1 %v12910_v15  ;;  %v7146_v15 = vrot.slane %v7124_v49, %v18321_v20 }
 0x61d   :  { %8957 = vmatprep.subr.bf16.mxu1 %v12915_v46  ;;  %v12981_v46 = vld [vmem:[%s20303_s5 + $0x444] ss:$8 sps:$4 sm:$0xff]  }
 0x620   :  { %8958 = vmatpush1.bf16.msra.mxu1 %v12913_v1  ;;  %v7153_v1 = vrot.slane %v7125_v5, %v18321_v20 }
 0x621   :  { %8959 = vmatprep.subr.bf16.mxu1 %v12918_v36  ;;  %v7132_v36 = vrot.slane %v7116_v37, %v18321_v20 }
 0x624   :  { %8960 = vmatpush1.bf16.msra.mxu1 %v12916_v55  ;;  %v11851_v55 = vcombine.high %v7132_v36, %v7146_v15 }
 0x625   :  { %8990 = vmatprep.subr.bf16.mxu1 %v12921_v50  ;;  %v8042_v50 = vcombine.high %v19256_v34, %v19256_v34 }
 0x627   :  { %8962 = vmatmul.mubr.bf16.vlgmr.msra.gmra.mrb[56].mxu1 %v7755_v19  ;;  %v7763_v19 = vcombine.low %v7139_v61, %v7153_v1 }
 0x628   :  { %8971 = vmatprep.mubr.bf16.mxu1 %v7944_v29  ;;  %8991 = vmatpush1.bf16.msra.mxu1 %v12919_v51  ;;  %v12930_v29 = vld [vmem:[%s20303_s5 + $0x334] ss:$8 sps:$4 sm:$0xff]  }
 0x629   :  { %8992 = vmatprep.subr.bf16.mxu1 %v12924_v18  ;;  %v12984_v51 = vld [vmem:[%s20303_s5 + $0x454] ss:$8 sps:$4 sm:$0xff]   ;;  %v11852_v18 = vcombine.high %v7139_v61, %v7153_v1 }
 0x62c   :  { %8993 = vmatpush1.bf16.msra.mxu1 %v12922_v21  ;;  %v13293_v21 = vmov 0  }
 0x62d   :  { %8994 = vmatprep.subr.bf16.mxu1 %v12927_v4  ;;  %v12987_v4 = vld [vmem:[%s20303_s5 + $0x464] ss:$8 sps:$4 sm:$0xff]  }
 0x62f   :  { %8972 = vmatmul.mubr.bf16.gmra.mrb[60].mxu1 %v7940_v9  ;;  %v12936_v9 = vld [vmem:[%s20303_s5 + $0x354] ss:$8 sps:$4 sm:$0xff]  }
 0x630   :  { %8981 = vmatprep.mubr.bf16.mxu1 %v19240_v60  ;;  %8995 = vmatpush1.bf16.msra.mxu1 %v12925_v17  ;;  %v7778_v17 = vrot.slane %v11851_v55, %v18321_v20  ;;  %v13006_v55 = vld [vmem:[%s20305_s7 + $0x410] sm:$0xff]  }
 0x631   :  { %8996 = vmatprep.subr.bf16.mxu1 %v12930_v29  ;;  %v7785_v29 = vrot.slane %v7763_v19, %v18321_v20 }
 0x634   :  { %8997 = vmatpush1.bf16.msra.mxu1 %v12928_v45  ;;  %v12985_v45 = vld [vmem:[%s20303_s5 + $0x460] ss:$8 sps:$4 sm:$0xff]  }
 0x635   :  { %8998 = vmatprep.subr.bf16.mxu1 %v12933_v41  ;;  %v12990_v41 = vld [vmem:[%s20303_s5 + $0x474] ss:$8 sps:$4 sm:$0xff]  }
 0x637   :  { %8982 = vmatmul.mubr.bf16.gmra.mrb[64].mxu1 %v19256_v34 }
 0x638   :  { %8999 = vmatpush1.bf16.msra.mxu1 %v12931_v16  ;;  %9022 = vmatprep.mubr.bf16.mxu1 %v7760_v10  ;;  %v12945_v10 = vld [vmem:[%s20303_s5 + $0x384] ss:$8 sps:$4 sm:$0xff]  }
 0x639   :  { %9000 = vmatprep.subr.bf16.mxu1 %v12936_v9  ;;  %v12988_v9 = vld [vmem:[%s20303_s5 + $0x470] ss:$8 sps:$4 sm:$0xff]  }
 0x63c   :  { %9001 = vmatpush1.bf16.msra.mxu1 %v12934_v31 }
 0x63d   :  { %9002 = vmatprep.subr.bf16.mxu1 %v12939_v48 }
 0x640   :  { %9003 = vmatpush1.bf16.msra.mxu1 %v12937_v6 }
 0x641   :  { %9004 = vmatprep.subr.bf16.mxu1 %v12942_v59  ;;  %v8052_v59 = vrot.slane %v19160_v38, %v18321_v20 }
 0x644   :  { %9005 = vmatpush1.bf16.msra.mxu1 %v12940_v43  ;;  %v8059_v43 = vrot.slane %v8052_v59, %v18321_v20 }
 0x645   :  { %9006 = vmatprep.subr.bf16.mxu1 %v12945_v10  ;;  %v20979_v10 = vld [vmem:[#allocation5_spill] sm:$0xff] }
 0x648   :  { %9007 = vmatpush1.bf16.msra.mxu1 %v12943_v42  ;;  %v7617_v42 = vsub.s32 0, %v20979_v10 }
 0x649   :  { %9008 = vmatprep.subr.bf16.mxu1 %v12948_v52  ;;  %v7613_v52 = vld [vmem:[%s20304_s6] sm:$0x3] }
 0x64c   :  { %9009 = vmatpush1.bf16.msra.mxu1 %v12946_v53  ;;  %v7621_v53 = vsub.s32 1, %v20979_v10 }
 0x64d   :  { %9010 = vmatprep.subr.bf16.mxu1 %v12951_v2  ;;  %v19417_v2 = vrot.slane %v7613_v52, %v7617_v42  ;;  %v13011_v42 = vld [vmem:[%s20305_s7 + $0x460] sm:$0xff]  }
 0x650   :  { %9011 = vmatpush1.bf16.msra.mxu1 %v12949_v54  ;;  %v19419_v54 = vrot.slane %v7613_v52, %v7621_v53 }
 0x651   :  { %9012 = vmatprep.subr.bf16.mxu1 %v12954_v8 }
 0x654   :  { %9013 = vmatpush1.bf16.msra.mxu1 %v12952_v33 }
 0x655   :  { %9014 = vmatprep.subr.bf16.mxu1 %v12957_v24 }
 0x658   :  { %9015 = vmatpush1.bf16.msra.mxu1 %v12955_v30 }
 0x659   :  { %9016 = vmatprep.subr.bf16.mxu1 %v12960_v32 }
 0x65c   :  { %9017 = vmatpush1.bf16.msra.mxu1 %v12958_v57 }
 0x65d   :  { %9018 = vmatprep.subr.bf16.mxu1 %v12963_v14 }
 0x660   :  { %9019 = vmatpush1.bf16.msra.mxu1 %v12961_v47 }
 0x661   :  { %9020 = vmatprep.subr.bf16.mxu1 %v12966_v25  ;;  %v12991_v25 = vld [vmem:[%s20305_s7 + $0x40] sm:$0xff]  }
 0x662   :  { %12313 = vmatprep.subr.bf16.mxu0 %v12991_v25  ;;  %v13294_v25 = vmov 1934713408  }
 0x664   :  { %9021 = vmatpush1.bf16.msra.mxu1 %v12964_v12  ;;  %v12992_v12 = vld [vmem:[%s20305_s7] sm:$0xff]  }
 0x665   :  { %9051 = vmatprep.subr.bf16.mxu1 %v12969_v23  ;;  %v12993_v23 = vld [vmem:[%s20305_s7 + $0x48] sm:$0xff]   ;;  %12314 = vmatpush3.bf16.msra.mxu0 %v12992_v12  ;;  %v19535_v12 = vunpack.c.l.s4 %v13294_v25  ;;  %v13023_v25 = vld [vmem:[%s20305_s7 + $0xc0] sm:$0xff]  }
 0x666   :  { %12315 = vmatprep.subr.bf16.mxu0 %v12993_v23 }
 0x667   :  { %9023 = vmatmul.mubr.bf16.vlgmr.msra.gmra.mrb[56].mxu1 %v7756_v26  ;;  %v8044_v26 = vcombine.high %v19240_v60, %v19240_v60  ;;  %v7792_v60 = vrot.slane %v11852_v18, %v18321_v20 }
 0x668   :  { %9032 = vmatprep.mubr.bf16.mxu1 %v7945_v13  ;;  %9052 = vmatpush1.bf16.msra.mxu1 %v12967_v11  ;;  %v12976_v13 = vld [vmem:[%s20303_s5 + $0x430] ss:$8 sps:$4 sm:$0xff]  }
 0x669   :  { %9053 = vmatprep.subr.bf16.mxu1 %v12972_v0  ;;  %v7794_v34 = vcombine.low %v7785_v29, %v7792_v60  ;;  %v12994_v0 = vld [vmem:[%s20305_s7 + $0x8] sm:$0xff]  }
 0x66a   :  { %12316 = vmatpush3.bf16.msra.mxu0 %v12994_v0 }
 0x66b   :  { %v7808_v48 = vrot.slane %v7794_v34, %v18321_v20  ;;  %12317 = vmatprep.subr.bf16.mxu0 %v12995_v35 }
 0x66c   :  { %9054 = vmatpush1.bf16.msra.mxu1 %v12970_v7  ;;  %v13001_v7 = vld [vmem:[%s20305_s7 + $0x448] sm:$0xff]  }
 0x66d   :  { %9055 = vmatprep.subr.bf16.mxu1 %v12975_v27 }
 0x66f   :  { %9033 = vmatmul.mubr.bf16.gmra.mrb[60].mxu1 %v7941_v40  ;;  %v7761_v40 = vcombine.low %v7132_v36, %v7146_v15  ;;  %v13005_v15 = vld [vmem:[%s20305_s7 + $0x450] sm:$0xff]  }
 0x670   :  { %9042 = vmatprep.mubr.bf16.mxu1 %v8044_v26  ;;  %9056 = vmatpush1.bf16.msra.mxu1 %v12973_v39  ;;  %v12996_v36 = vld [vmem:[%s20305_s7 + $0x10] sm:$0xff]  }
 0x671   :  { %9057 = vmatprep.subr.bf16.mxu1 %v12978_v63  ;;  %v7771_v22 = vrot.slane %v7761_v40, %v18321_v20  ;;  %v13003_v63 = vld [vmem:[%s20305_s7 + $0x408] sm:$0xff]   ;;  %12318 = vmatpush3.bf16.msra.mxu0 %v12996_v36 }
 0x673   :  { %v7793_v16 = vcombine.low %v7771_v22, %v7778_v17 }
 0x674   :  { %9058 = vmatpush1.bf16.msra.mxu1 %v12976_v13 }
 0x675   :  { %9059 = vmatprep.subr.bf16.mxu1 %v12981_v46  ;;  %v7801_v31 = vrot.slane %v7793_v16, %v18321_v20 }
 0x677   :  { %9043 = vmatmul.mubr.bf16.gmra.mrb[64].mxu1 %v8042_v50  ;;  %v7809_v6 = vcombine.low %v7801_v31, %v7808_v48 }
 0x678   :  { %9060 = vmatpush1.bf16.msra.mxu1 %v12979_v28  ;;  %9083 = vmatprep.mubr.bf16.mxu1 %v13293_v21  ;;  %v12997_v28 = vld [vmem:[%s20305_s7 + $0x58] sm:$0xff]  }
 0x679   :  { %9061 = vmatprep.subr.bf16.mxu1 %v12984_v51  ;;  %v13008_v51 = vld [vmem:[%s20305_s7 + $0x458] sm:$0xff]   ;;  %12319 = vmatprep.subr.bf16.mxu0 %v12997_v28  ;;  %v13016_v28 = vld [vmem:[%s20305_s7 + $0x428] sm:$0xff]  }
 0x67c   :  { %9062 = vmatpush1.bf16.msra.mxu1 %v12982_v58 }
 0x67d   :  { %9063 = vmatprep.subr.bf16.mxu1 %v12987_v4  ;;  %v12998_v4 = vld [vmem:[%s20305_s7 + $0x18] sm:$0xff]  }
 0x67e   :  { %12320 = vmatpush3.bf16.msra.mxu0 %v12998_v4 }
 0x680   :  { %9064 = vmatpush1.bf16.msra.mxu1 %v12985_v45  ;;  %v13002_v45 = vld [vmem:[%s20305_s7 + $0x60] sm:$0xff]  }
 0x681   :  { %9065 = vmatprep.subr.bf16.mxu1 %v12990_v41  ;;  %v13010_v41 = vld [vmem:[%s20305_s7 + $0x418] sm:$0xff]   ;;  %12321 = vmatprep.subr.bf16.mxu0 %v13002_v45 }
 0x684   :  { %9066 = vmatpush1.bf16.msra.mxu1 %v12988_v9 }
 0x685   :  { %12489 = vmatprep.subr.bf16.mxu1 %v12999_v44 }
 0x687   :  { %9084 = vmatmul.mubr.bf16.vlgmr.msra.gmra.mrb[56].mxu1 %v7809_v6 }
 0x688   :  { %9093 = vmatprep.mubr.bf16.mxu1 %v13293_v21  ;;  %12490 = vmatpush3.bf16.msra.mxu1 %v13000_v3 }
 0x689   :  { %12491 = vmatprep.subr.bf16.mxu1 %v13001_v7 }
 0x68c   :  { %12492 = vmatpush3.bf16.msra.mxu1 %v13003_v63  ;;  %v9859_v63 = vunpack.c.0.s8 %v19535_v12 }
 0x68d   :  { %12493 = vmatprep.subr.bf16.mxu1 %v13005_v15 }
 0x68f   :  { %9094 = vmatmul.mubr.bf16.gmra.mrb[60].mxu1 %v19170_v56 }
 0x690   :  { %9103 = vmatprep.mubr.bf16.mxu1 %v13293_v21  ;;  %12494 = vmatpush3.bf16.msra.mxu1 %v13006_v55 }
 0x691   :  { %12495 = vmatprep.subr.bf16.mxu1 %v13008_v51 }
 0x694   :  { %12496 = vmatpush3.bf16.msra.mxu1 %v13010_v41 }
 0x695   :  { %12497 = vmatprep.subr.bf16.mxu1 %v13011_v42 }
 0x697   :  { %9104 = vmatmul.mubr.bf16.gmra.mrb[64].mxu1 %v8059_v43 }
 0x75a   :  { %v9085_v56 = vpop.f32.mrb[56].mxu1 }
 0x75b   :  { %v19422_v8 = vadd.f32 %v9085_v56, %v19417_v2  ;;  %v9087_v38 = vpop.f32.mrb[57].mxu1  ;;  %v13007_v56 = vld [vmem:[%s20305_s7 + $0x68] sm:$0xff]  }
 0x75c   :  { %v19425_v20 = vadd.f32 %v9087_v38, %v19419_v54  ;;  %v9089_v33 = vpop.f32.mrb[58].mxu1 }
 0x75d   :  { %v9122_v24 = vmul.f32 1.442695, %v19422_v8  ;;  %v19429_v30 = vadd.f32 %v9089_v33, %v19417_v2  ;;  %v9091_v32 = vpop.f32.mrb[59].mxu1  ;;  %vm9112_vm14 = vcmp.gt.f32.partialorder %v19422_v8, 0.0 }
 0x75e   :  { %v9124_v57 = vmul.f32 1.442695, %v19425_v20  ;;  %v19433_v14 = vadd.f32 %v9091_v32, %v19419_v54  ;;  %vm9113_vm0 = vcmp.gt.f32.partialorder %v19425_v20, 0.0 }
 0x75f   :  { %13225 = vpow2.f32 %v9122_v24  ;;  %v9126_v47 = vmul.f32 1.442695, %v19429_v30  ;;  %vm9114_vm8 = vcmp.gt.f32.partialorder %v19429_v30, 0.0 }
 0x760   :  { %13227 = vpow2.f32 %v9124_v57  ;;  %v9128_v11 = vmul.f32 1.442695, %v19433_v14  ;;  %vm9115_vm9 = vcmp.gt.f32.partialorder %v19433_v14, 0.0 }
 0x761   :  { %13229 = vpow2.f32 %v9126_v47  ;;  %v13012_v47 = vld [vmem:[%s20305_s7 + $0x420] sm:$0xff]  }
 0x762   :  { %13231 = vpow2.f32 %v9128_v11  ;;  %v9095_v62 = vpop.f32.mrb[60].mxu1  ;;  %12498 = vmatpush3.bf16.msra.mxu1 %v13012_v47 }
 0x763   :  { %v19459_v37 = vadd.f32 %v9095_v62, %v19417_v2  ;;  %v9097_v27 = vpop.f32.mrb[61].mxu1 }
 0x764   :  { %v19465_v39 = vadd.f32 %v9097_v27, %v19419_v54  ;;  %v9099_v49 = vpop.f32.mrb[62].mxu1  ;;  %v13009_v27 = vld [vmem:[%s20305_s7 + $0x28] sm:$0xff]  }
 0x765   :  { %v9130_v5 = vmul.f32 1.442695, %v19459_v37  ;;  %v19472_v26 = vadd.f32 %v9099_v49, %v19417_v2  ;;  %v9101_v13 = vpop.f32.mrb[63].mxu1  ;;  %vm9116_vm10 = vcmp.gt.f32.partialorder %v19459_v37, 0.0  ;;  %v13013_v49 = vld [vmem:[%s20305_s7 + $0x70] sm:$0xff]  }
 0x766   :  { %v9132_v46 = vmul.f32 1.442695, %v19465_v39  ;;  %v19479_v1 = vadd.f32 %v9101_v13, %v19419_v54  ;;  %vm9117_vm5 = vcmp.gt.f32.partialorder %v19465_v39, 0.0  ;;  %v20980_v13 = vld [vmem:[#allocation6_spill] sm:$0xff] }
 0x767   :  { %13233 = vpow2.f32 %v9130_v5  ;;  %v9134_v61 = vmul.f32 1.442695, %v19472_v26 }
 0x768   :  { %13235 = vpow2.f32 %v9132_v46  ;;  %v9136_v40 = vmul.f32 1.442695, %v19479_v1 }
 0x769   :  { %v13226_v50 = vpop.eup %13225  ;;  %13237 = vpow2.f32 %v9134_v61 }
 0x76a   :  { %v13228_v19 = vpop.eup %13227  ;;  %v12007_v18 = vadd.f32 -1.0, %v13226_v50  ;;  %13239 = vpow2.f32 %v9136_v40  ;;  %v9105_v58 = vpop.f32.mrb[64].mxu1  ;;  %v13017_v40 = vld [vmem:[%s20305_s7 + $0x470] sm:$0xff]  }
 0x76b   :  { %v13230_v22 = vpop.eup %13229  ;;  %v12008_v17 = vadd.f32 -1.0, %v13228_v19  ;;  %v19501_v29 = vadd.f32 %v9105_v58, %v19417_v2  ;;  %v9107_v60 = vpop.f32.mrb[65].mxu1 }
 0x76c   :  { %v13232_v16 = vpop.eup %13231  ;;  %v9152_v34 = vmul.f32 1.6732632, %v12007_v18  ;;  %v12009_v9 = vadd.f32 -1.0, %v13230_v22  ;;  %v19510_v31 = vadd.f32 %v9107_v60, %v19419_v54  ;;  %v9109_v48 = vpop.f32.mrb[66].mxu1  ;;  %v13004_v54 = vld [vmem:[%s20305_s7 + $0x20] sm:$0xff]  }
 0x76d   :  { %v9153_v6 = vmul.f32 1.6732632, %v12008_v17  ;;  %v12010_v59 = vadd.f32 -1.0, %v13232_v16  ;;  %v9138_v43 = vmul.f32 1.442695, %v19501_v29  ;;  %v9110_v2 = vpop.f32.mrb[67].mxu1  ;;  %12322 = vmatpush3.bf16.msra.mxu0 %v13004_v54 }
 0x76e   :  { %v9162_v52 = vsel %vm9112_vm14, %v19422_v8, %v9152_v34  ;;  %v9154_v53 = vmul.f32 1.6732632, %v12009_v9  ;;  %v9140_v8 = vmul.f32 1.442695, %v19510_v31  ;;  %12323 = vmatprep.subr.bf16.mxu0 %v13007_v56  ;;  %v13014_v17 = vld [vmem:[%s20305_s7 + $0x30] sm:$0xff]   ;;  %v13019_v34 = vld [vmem:[%s20305_s7 + $0x78] sm:$0xff]  }
 0x76f   :  { %v9172_v38 = vmul.f32 1.050701, %v9162_v52  ;;  %v9163_v33 = vsel %vm9113_vm0, %v19425_v20, %v9153_v6  ;;  %v9155_v24 = vmul.f32 1.6732632, %v12010_v59  ;;  %13241 = vpow2.f32 %v9138_v43 }
 0x770   :  { %v9173_v32 = vmul.f32 1.050701, %v9163_v33  ;;  %v9164_v57 = vsel %vm9114_vm8, %v19429_v30, %v9154_v53  ;;  %v13015_v30 = vld [vmem:[%s20305_s7 + $0x468] sm:$0xff]   ;;  %13243 = vpow2.f32 %v9140_v8  ;;  %v13021_v53 = vld [vmem:[%s20305_s7 + $0x478] sm:$0xff]   ;;  %vm9118_vm14 = vcmp.gt.f32.partialorder %v19472_v26, 0.0 }
 0x771   :  { %v13234_v23 = vpop.eup %13233  ;;  %v9174_v11 = vmul.f32 1.050701, %v9164_v57  ;;  %v9165_v20 = vsel %vm9115_vm9, %v19433_v14, %v9155_v24  ;;  %12499 = vmatprep.subr.bf16.mxu1 %v13015_v30  ;;  %12324 = vmatpush3.bf16.msra.mxu0 %v13009_v27  ;;  %v13020_v33 = vld [vmem:[%s20305_s7 + $0x38] sm:$0xff]   ;;  %vm9119_vm0 = vcmp.gt.f32.partialorder %v19479_v1, 0.0  ;;  %vm9120_vm8 = vcmp.gt.f32.partialorder %v19501_v29, 0.0 }
 0x772   :  { %v13236_v44 = vpop.eup %13235  ;;  %v9192_v62 = vcombine.low %v9172_v38, %v9173_v32  ;;  %v9193_v0 = vcombine.high %v9172_v38, %v9173_v32  ;;  %v9175_v3 = vmul.f32 1.050701, %v9165_v20  ;;  %v12011_v7 = vadd.f32 -1.0, %v13234_v23  ;;  %12325 = vmatprep.subr.bf16.mxu0 %v13013_v49  ;;  %12500 = vmatpush3.bf16.msra.mxu1 %v13016_v28 }
 0x773   :  { %v13238_v35 = vpop.eup %13237  ;;  %v12012_v14 = vadd.f32 -1.0, %v13236_v44  ;;  %12501 = vmatprep.subr.bf16.mxu1 %v13017_v40  ;;  %v13022_v44 = vld [vmem:[%s20305_s7 + $0x438] sm:$0xff]   ;;  %vm9121_vm9 = vcmp.gt.f32.partialorder %v19510_v31, 0.0 }
 0x774   :  { %v13240_v5 = vpop.eup %13239  ;;  %v9200_v15 = vrot.slane %v9192_v62, %v20980_v13  ;;  %v9207_v46 = vrot.slane %v9193_v0, %v20980_v13  ;;  %v9210_v36 = vcombine.low %v9174_v11, %v9175_v3  ;;  %v9211_v61 = vcombine.high %v9174_v11, %v9175_v3 }
 0x775   :  { %v9156_v55 = vmul.f32 1.6732632, %v12011_v7  ;;  %v9157_v50 = vmul.f32 1.6732632, %v12012_v14  ;;  %v19558_v51 = vadd.f32 -1.0, %v13238_v35  ;;  %v19560_v19 = vadd.f32 -1.0, %v13240_v5  ;;  %12326 = vmatpush3.bf16.msra.mxu0 %v13014_v17 }
 0x776   :  { %v9208_v18 = vcombine.high %v9200_v15, %v9200_v15  ;;  %v9209_v58 = vcombine.high %v9207_v46, %v9207_v46  ;;  %v9279_v4 = vrot.slane %v9200_v15, %v20980_v13  ;;  %v9295_v22 = vrot.slane %v9207_v46, %v20980_v13  ;;  %12327 = vmatprep.subr.bf16.mxu0 %v13019_v34 }
 0x777   :  { %v19568_v60 = vrot.slane %v9210_v36, %v20980_v13  ;;  %v19571_v45 = vrot.slane %v9211_v61, %v20980_v13  ;;  %v19576_v41 = vsel %vm9116_vm10, %v19459_v37, %v9156_v55  ;;  %v19581_v16 = vsel %vm9117_vm5, %v19465_v39, %v9157_v50  ;;  %v13018_v37 = vld [vmem:[%s20305_s7 + $0x430] sm:$0xff]  }
 0x778   :  { %v9280_v9 = vcombine.high %v9279_v4, %v9279_v4  ;;  %v9287_v48 = vrot.slane %v9208_v18, %v20980_v13  ;;  %v9296_v6 = vcombine.high %v9295_v22, %v9295_v22  ;;  %v9303_v59 = vrot.slane %v9209_v58, %v20980_v13  ;;  %12502 = vmatpush3.bf16.msra.mxu1 %v13018_v37 }
 0x779   :  { %v9453_v43 = vsel %vm6162_vm3, %v9279_v4, -inf  ;;  %v9481_v39 = vsel %vm6162_vm3, %v9295_v22, -inf  ;;  %v9226_v42 = vcombine.high %v19568_v60, %v19568_v60  ;;  %v9227_v52 = vcombine.high %v19571_v45, %v19571_v45  ;;  %v19604_v24 = vpop.eup %13241  ;;  %12503 = vmatprep.subr.bf16.mxu1 %v13021_v53  ;;  %12328 = vmatpush3.bf16.msra.mxu0 %v13020_v33 }
 0x77a   :  { %v9288_v2 = vcombine.high %v9287_v48, %v9287_v48  ;;  %v9304_v54 = vcombine.high %v9303_v59, %v9303_v59  ;;  %v9454_v56 = vrot.slane %v9453_v43, 4  ;;  %v9460_v38 = vsel %vm6162_vm3, %v9280_v9, -inf  ;;  %v19615_v62 = vpop.eup %13243  ;;  %12335 = vmatprep.subr.bf16.mxu0 %v13023_v25 }
 0x77b   :  { %v9461_v8 = vrot.slane %v9460_v38, 4  ;;  %v9467_v32 = vsel %vm6162_vm3, %v9287_v48, -inf  ;;  %v9482_v57 = vrot.slane %v9481_v39, 4  ;;  %v9488_v47 = vsel %vm6162_vm3, %v9296_v6, -inf }
 0x77c   :  { %v9455_v23 = vmax.f32 %v9453_v43, %v9454_v56  ;;  %v9468_v11 = vrot.slane %v9467_v32, 4  ;;  %v9474_v20 = vsel %vm6162_vm3, %v9288_v2, -inf  ;;  %v9489_v30 = vrot.slane %v9488_v47, 4  ;;  %12504 = vmatpush3.bf16.msra.mxu1 %v13022_v44 }
 0x77d   :  { %v9462_v0 = vmax.f32 %v9460_v38, %v9461_v8  ;;  %v9475_v3 = vrot.slane %v9474_v20, 4  ;;  %v9483_v7 = vmax.f32 %v9481_v39, %v9482_v57  ;;  %v9495_v27 = vsel %vm6162_vm3, %v9303_v59, -inf }
 0x77e   :  { %v9456_v35 = vrot.slane %v9455_v23, 2  ;;  %v9469_v14 = vmax.f32 %v9467_v32, %v9468_v11  ;;  %v9490_v49 = vmax.f32 %v9488_v47, %v9489_v30  ;;  %v9496_v5 = vrot.slane %v9495_v27, 4 }
 0x77f   :  { %v9463_v15 = vrot.slane %v9462_v0, 2  ;;  %v9476_v46 = vmax.f32 %v9474_v20, %v9475_v3  ;;  %v9484_v36 = vrot.slane %v9483_v7, 2  ;;  %v9502_v61 = vsel %vm6162_vm3, %v9304_v54, -inf }
 0x780   :  { %v9457_v28 = vmax.f32 %v9455_v23, %v9456_v35  ;;  %v9470_v40 = vrot.slane %v9469_v14, 2  ;;  %v9491_v55 = vrot.slane %v9490_v49, 2  ;;  %v9497_v50 = vmax.f32 %v9495_v27, %v9496_v5 }
 0x781   :  { %v9464_v18 = vmax.f32 %v9462_v0, %v9463_v15  ;;  %v9477_v58 = vrot.slane %v9476_v46, 2  ;;  %v9485_v4 = vmax.f32 %v9483_v7, %v9484_v36  ;;  %v9503_v22 = vrot.slane %v9502_v61, 4 }
 0x782   :  { %v9458_v17 = vrot.slane %v9457_v28, 1  ;;  %v9471_v34 = vmax.f32 %v9469_v14, %v9470_v40  ;;  %v9492_v9 = vmax.f32 %v9490_v49, %v9491_v55  ;;  %v9498_v48 = vrot.slane %v9497_v50, 2 }
 0x783   :  { %v9465_v6 = vrot.slane %v9464_v18, 1  ;;  %v9478_v59 = vmax.f32 %v9476_v46, %v9477_v58  ;;  %v9486_v37 = vrot.slane %v9485_v4, 1  ;;  %v9504_v43 = vmax.f32 %v9502_v61, %v9503_v22 }
 0x784   :  { %v9459_v39 = vmax.f32 %v9457_v28, %v9458_v17  ;;  %v9472_v53 = vrot.slane %v9471_v34, 1  ;;  %v9493_v2 = vrot.slane %v9492_v9, 1  ;;  %v9499_v54 = vmax.f32 %v9497_v50, %v9498_v48 }
 0x785   :  { %v9466_v56 = vmax.f32 %v9464_v18, %v9465_v6  ;;  %v9479_v38 = vrot.slane %v9478_v59, 1  ;;  %v9487_v33 = vmax.f32 %v9485_v4, %v9486_v37  ;;  %v9505_v8 = vrot.slane %v9504_v43, 2 }
 0x786   :  { %v9473_v32 = vmax.f32 %v9471_v34, %v9472_v53  ;;  %v9494_v57 = vmax.f32 %v9492_v9, %v9493_v2  ;;  %v9500_v47 = vrot.slane %v9499_v54, 1  ;;  %v9705_v25 = vpack.c.bf16 %v9459_v39, %v9459_v39 }
 0x787   :  { %v9480_v23 = vmax.f32 %v9478_v59, %v9479_v38  ;;  %v9506_v11 = vmax.f32 %v9504_v43, %v9505_v8  ;;  %v9706_v20 = vpack.c.bf16 %v9466_v56, %v9466_v56  ;;  %v9709_v30 = vpack.c.bf16 %v9487_v33, %v9487_v33 }
 0x788   :  { %v9501_v44 = vmax.f32 %v9499_v54, %v9500_v47  ;;  %v9707_v0 = vpack.c.bf16 %v9473_v32, %v9473_v32  ;;  %v9710_v3 = vpack.c.bf16 %v9494_v57, %v9494_v57  ;;  %v9777_v7 = vunpack.c.l.b16 %v9705_v25 }
 0x789   :  { %v9507_v27 = vrot.slane %v9506_v11, 1  ;;  %v9708_v35 = vpack.c.bf16 %v9480_v23, %v9480_v23  ;;  %v19619_v14 = vunpack.c.l.b16 %v9706_v20  ;;  %v9781_v49 = vunpack.c.l.b16 %v9709_v30 }
 0x78a   :  { %v9711_v5 = vpack.c.bf16 %v9501_v44, %v9501_v44  ;;  %v9779_v15 = vunpack.c.l.b16 %v9707_v0  ;;  %v19621_v46 = vunpack.c.l.b16 %v9710_v3  ;;  %v9311_v36 = vrot.slane %v19568_v60, %v20980_v13 }
 0x78b   :  { %v19625_v61 = vmax.f32 %v9506_v11, %v9507_v27  ;;  %v19627_v28 = vunpack.c.l.b16 %v9708_v35  ;;  %v9319_v40 = vrot.slane %v9226_v42, %v20980_v13  ;;  %v9327_v55 = vrot.slane %v19571_v45, %v20980_v13 }
 0x78c   :  { %v9783_v50 = vunpack.c.l.b16 %v9711_v5  ;;  %v9813_v18 = vsel %vm3429_vm7, %v9779_v15, %v9777_v7  ;;  %v9312_v58 = vcombine.high %v9311_v36, %v9311_v36  ;;  %v9335_v4 = vrot.slane %v9227_v52, %v20980_v13 }
 0x78d   :  { %v9712_v22 = vpack.c.bf16 %v19625_v61, %v19625_v61  ;;  %v9814_v17 = vsel %vm3431_vm6, %v9781_v49, %v9813_v18  ;;  %v9320_v34 = vcombine.high %v9319_v40, %v9319_v40  ;;  %v9328_v60 = vcombine.high %v9327_v55, %v9327_v55 }
 0x78e   :  { %v19644_v42 = vsel %vm3433_vm12, %v9783_v50, %v9814_v17  ;;  %v9336_v9 = vcombine.high %v9335_v4, %v9335_v4  ;;  %v9509_v48 = vsel %vm6162_vm3, %v9311_v36, -inf  ;;  %v9516_v6 = vsel %vm6162_vm3, %v9312_v58, -inf }
 0x78f   :  { %v9510_v59 = vrot.slane %v9509_v48, 4  ;;  %v9517_v37 = vrot.slane %v9516_v6, 4  ;;  %v9523_v45 = vsel %vm6162_vm3, %v9319_v40, -inf  ;;  %v9530_v52 = vsel %vm6162_vm3, %v9320_v34, -inf }
 0x790   :  { %v9524_v43 = vrot.slane %v9523_v45, 4  ;;  %v9531_v39 = vrot.slane %v9530_v52, 4  ;;  %v9537_v53 = vsel %vm6162_vm3, %v9327_v55, -inf  ;;  %v9544_v2 = vsel %vm6162_vm3, %v9328_v60, -inf }
 0x791   :  { %v9511_v54 = vmax.f32 %v9509_v48, %v9510_v59  ;;  %v9518_v56 = vmax.f32 %v9516_v6, %v9517_v37  ;;  %v9538_v38 = vrot.slane %v9537_v53, 4  ;;  %v9545_v33 = vrot.slane %v9544_v2, 4 }
 0x792   :  { %v9525_v8 = vmax.f32 %v9523_v45, %v9524_v43  ;;  %v9532_v32 = vmax.f32 %v9530_v52, %v9531_v39  ;;  %v9551_v57 = vsel %vm6162_vm3, %v9335_v4, -inf  ;;  %v9558_v47 = vsel %vm6162_vm3, %v9336_v9, -inf }
 0x793   :  { %v9512_v25 = vrot.slane %v9511_v54, 2  ;;  %v9519_v23 = vrot.slane %v9518_v56, 2  ;;  %v9539_v11 = vmax.f32 %v9537_v53, %v9538_v38  ;;  %v9546_v20 = vmax.f32 %v9544_v2, %v9545_v33 }
 0x794   :  { %v9526_v30 = vrot.slane %v9525_v8, 2  ;;  %v9533_v44 = vrot.slane %v9532_v32, 2  ;;  %v9552_v0 = vrot.slane %v9551_v57, 4  ;;  %v9559_v3 = vrot.slane %v9558_v47, 4 }
 0x795   :  { %v9513_v7 = vmax.f32 %v9511_v54, %v9512_v25  ;;  %v9520_v27 = vmax.f32 %v9518_v56, %v9519_v23  ;;  %v9540_v35 = vrot.slane %v9539_v11, 2  ;;  %v9547_v49 = vrot.slane %v9546_v20, 2 }
 0x796   :  { %v9527_v5 = vmax.f32 %v9525_v8, %v9526_v30  ;;  %v19656_v15 = vmax.f32 %v9532_v32, %v9533_v44  ;;  %v9553_v36 = vmax.f32 %v9551_v57, %v9552_v0  ;;  %v19658_v40 = vmax.f32 %v9558_v47, %v9559_v3 }
 0x797   :  { %v9514_v55 = vrot.slane %v9513_v7, 1  ;;  %v9521_v50 = vrot.slane %v9520_v27, 1  ;;  %v9541_v18 = vmax.f32 %v9539_v11, %v9540_v35  ;;  %v19660_v58 = vmax.f32 %v9546_v20, %v9547_v49 }
 0x798   :  { %v9528_v4 = vrot.slane %v9527_v5, 1  ;;  %v9554_v17 = vrot.slane %v9553_v36, 2  ;;  %v9176_v34 = vmul.f32 1.050701, %v19576_v41  ;;  %v9177_v60 = vmul.f32 1.050701, %v19581_v16 }
 0x799   :  { %v9515_v9 = vmax.f32 %v9513_v7, %v9514_v55  ;;  %v19664_v48 = vmax.f32 %v9520_v27, %v9521_v50  ;;  %v9542_v6 = vrot.slane %v9541_v18, 1  ;;  %v9158_v59 = vmul.f32 1.6732632, %v19558_v51 }
 0x79a   :  { %v9529_v37 = vmax.f32 %v9527_v5, %v9528_v4  ;;  %v9555_v45 = vmax.f32 %v9553_v36, %v9554_v17  ;;  %v9228_v52 = vcombine.low %v9176_v34, %v9177_v60  ;;  %v9229_v43 = vcombine.high %v9176_v34, %v9177_v60 }
 0x79b   :  { %v9543_v39 = vmax.f32 %v9541_v18, %v9542_v6  ;;  %v9713_v53 = vpack.c.bf16 %v9515_v9, %v9515_v9  ;;  %v9168_v2 = vsel %vm9118_vm14, %v19472_v26, %v9158_v59  ;;  %v9159_v41 = vmul.f32 1.6732632, %v19560_v19 }
 0x79c   :  { %v9556_v54 = vrot.slane %v9555_v45, 1  ;;  %v9715_v16 = vpack.c.bf16 %v9529_v37, %v9529_v37  ;;  %v9236_v56 = vrot.slane %v9228_v52, %v20980_v13  ;;  %v9243_v38 = vrot.slane %v9229_v43, %v20980_v13 }
 0x79d   :  { %v9717_v33 = vpack.c.bf16 %v9543_v39, %v9543_v39  ;;  %v19673_v51 = vunpack.c.l.b16 %v9713_v53  ;;  %v19675_v8 = vmul.f32 1.050701, %v9168_v2  ;;  %v9169_v32 = vsel %vm9119_vm0, %v19479_v1, %v9159_v41 }
 0x79e   :  { %v9557_v57 = vmax.f32 %v9555_v45, %v9556_v54  ;;  %v19680_v47 = vunpack.c.l.b16 %v9715_v16  ;;  %v9244_v26 = vcombine.high %v9236_v56, %v9236_v56  ;;  %v9245_v19 = vcombine.high %v9243_v38, %v9243_v38 }
 0x79f   :  { %v19682_v25 = vunpack.c.l.b16 %v9717_v33  ;;  %v9343_v23 = vrot.slane %v9236_v56, %v20980_v13  ;;  %v9359_v11 = vrot.slane %v9243_v38, %v20980_v13  ;;  %v9179_v20 = vmul.f32 1.050701, %v9169_v32 }
 0x7a0   :  { %v9719_v30 = vpack.c.bf16 %v9557_v57, %v9557_v57  ;;  %v9351_v44 = vrot.slane %v9244_v26, %v20980_v13  ;;  %v9367_v0 = vrot.slane %v9245_v19, %v20980_v13  ;;  %v19689_v3 = vadd.f32 -1.0, %v19604_v24 }
 0x7a1   :  { %v9344_v1 = vcombine.high %v9343_v23, %v9343_v23  ;;  %v9360_v7 = vcombine.high %v9359_v11, %v9359_v11  ;;  %v9565_v27 = vsel %vm6162_vm3, %v9343_v23, -inf  ;;  %v9593_v35 = vsel %vm6162_vm3, %v9359_v11, -inf }
 0x7a2   :  { %v19693_v49 = vunpack.c.l.b16 %v9719_v30  ;;  %v9352_v5 = vcombine.high %v9351_v44, %v9351_v44  ;;  %v9368_v36 = vcombine.high %v9367_v0, %v9367_v0  ;;  %v9566_v55 = vrot.slane %v9565_v27, 4 }
 0x7a3   :  { %v19696_v50 = vsel %vm6162_vm3, %v9344_v1, -inf  ;;  %v9579_v18 = vsel %vm6162_vm3, %v9351_v44, -inf  ;;  %v9594_v4 = vrot.slane %v9593_v35, 4  ;;  %v9600_v24 = vsel %vm6162_vm3, %v9360_v7, -inf }
 0x7a4   :  { %v9567_v17 = vmax.f32 %v9565_v27, %v9566_v55  ;;  %v9573_v34 = vrot.slane %v19696_v50, 4  ;;  %v9580_v60 = vrot.slane %v9579_v18, 4  ;;  %v9586_v9 = vsel %vm6162_vm3, %v9352_v5, -inf }
 0x7a5   :  { %v9587_v6 = vrot.slane %v9586_v9, 4  ;;  %v9595_v59 = vmax.f32 %v9593_v35, %v9594_v4  ;;  %v9601_v37 = vrot.slane %v9600_v24, 4  ;;  %v9607_v45 = vsel %vm6162_vm3, %v9367_v0, -inf }
 0x7a6   :  { %v9568_v52 = vrot.slane %v9567_v17, 2  ;;  %v9581_v43 = vmax.f32 %v9579_v18, %v9580_v60  ;;  %v9608_v39 = vrot.slane %v9607_v45, 4  ;;  %v9614_v53 = vsel %vm6162_vm3, %v9368_v36, -inf }
 0x7a7   :  { %v9588_v2 = vmax.f32 %v9586_v9, %v9587_v6  ;;  %v9596_v41 = vrot.slane %v9595_v59, 2  ;;  %v9602_v54 = vmax.f32 %v9600_v24, %v9601_v37  ;;  %v9615_v16 = vrot.slane %v9614_v53, 4 }
 0x7a8   :  { %v9569_v56 = vmax.f32 %v9567_v17, %v9568_v52  ;;  %v9582_v38 = vrot.slane %v9581_v43, 2  ;;  %v9609_v33 = vmax.f32 %v9607_v45, %v9608_v39  ;;  %v9246_v32 = vcombine.low %v19675_v8, %v9179_v20 }
 0x7a9   :  { %v9589_v57 = vrot.slane %v9588_v2, 2  ;;  %v9597_v26 = vmax.f32 %v9595_v59, %v9596_v41  ;;  %v9603_v19 = vrot.slane %v9602_v54, 2  ;;  %v9616_v23 = vmax.f32 %v9614_v53, %v9615_v16 }
 0x7aa   :  { %v9570_v11 = vrot.slane %v9569_v56, 1  ;;  %v9583_v30 = vmax.f32 %v9581_v43, %v9582_v38  ;;  %v9610_v44 = vrot.slane %v9609_v33, 2  ;;  %v9247_v0 = vcombine.high %v19675_v8, %v9179_v20 }
 0x7ab   :  { %v9590_v1 = vmax.f32 %v9588_v2, %v9589_v57  ;;  %v9598_v7 = vrot.slane %v9597_v26, 1  ;;  %v9604_v27 = vmax.f32 %v9602_v54, %v9603_v19  ;;  %v9617_v35 = vrot.slane %v9616_v23, 2 }
 0x7ac   :  { %v19706_v5 = vmax.f32 %v9569_v56, %v9570_v11  ;;  %v9584_v36 = vrot.slane %v9583_v30, 1  ;;  %v9611_v55 = vmax.f32 %v9609_v33, %v9610_v44  ;;  %v9254_v18 = vrot.slane %v9246_v32, %v20980_v13 }
 0x7ad   :  { %v9591_v4 = vrot.slane %v9590_v1, 1  ;;  %v9599_v24 = vmax.f32 %v9597_v26, %v9598_v7  ;;  %v9605_v17 = vrot.slane %v9604_v27, 1  ;;  %v9618_v60 = vmax.f32 %v9616_v23, %v9617_v35 }
 0x7ae   :  { %v9585_v9 = vmax.f32 %v9583_v30, %v9584_v36  ;;  %v9612_v6 = vrot.slane %v9611_v55, 1  ;;  %v9261_v59 = vrot.slane %v9247_v0, %v20980_v13  ;;  %v9262_v37 = vcombine.high %v9254_v18, %v9254_v18 }
 0x7af   :  { %v9592_v8 = vmax.f32 %v9590_v1, %v9591_v4  ;;  %v9606_v20 = vmax.f32 %v9604_v27, %v9605_v17  ;;  %v9619_v45 = vrot.slane %v9618_v60, 1  ;;  %v9725_v52 = vpack.c.bf16 %v9599_v24, %v9599_v24 }
 0x7b0   :  { %v9613_v43 = vmax.f32 %v9611_v55, %v9612_v6  ;;  %v9723_v39 = vpack.c.bf16 %v9585_v9, %v9585_v9  ;;  %v9263_v53 = vcombine.high %v9261_v59, %v9261_v59  ;;  %v9375_v2 = vrot.slane %v9254_v18, %v20980_v13 }
 0x7b1   :  { %v9620_v41 = vmax.f32 %v9618_v60, %v9619_v45  ;;  %v9724_v54 = vpack.c.bf16 %v9592_v8, %v9592_v8  ;;  %v9726_v16 = vpack.c.bf16 %v9606_v20, %v9606_v20  ;;  %v9797_v56 = vunpack.c.l.b16 %v9725_v52 }
 0x7b2   :  { %v9727_v38 = vpack.c.bf16 %v9613_v43, %v9613_v43  ;;  %v9795_v33 = vunpack.c.l.b16 %v9723_v39  ;;  %v9376_v32 = vcombine.high %v9375_v2, %v9375_v2  ;;  %v9383_v57 = vrot.slane %v9262_v37, %v20980_v13 }
 0x7b3   :  { %v9728_v26 = vpack.c.bf16 %v9620_v41, %v9620_v41  ;;  %v19712_v19 = vunpack.c.l.b16 %v9724_v54  ;;  %v19714_v23 = vunpack.c.l.b16 %v9726_v16  ;;  %v9391_v11 = vrot.slane %v9261_v59, %v20980_v13 }
 0x7b4   :  { %v9799_v30 = vunpack.c.l.b16 %v9727_v38  ;;  %v9827_v44 = vsel %vm3429_vm7, %v9797_v56, %v9795_v33  ;;  %v9384_v0 = vcombine.high %v9383_v57, %v9383_v57  ;;  %v9399_v1 = vrot.slane %v9263_v53, %v20980_v13 }
 0x7b5   :  { %v19719_v7 = vunpack.c.l.b16 %v9728_v26  ;;  %v9392_v27 = vcombine.high %v9391_v11, %v9391_v11  ;;  %v9621_v35 = vsel %vm6162_vm3, %v9375_v2, -inf  ;;  %v9628_v36 = vsel %vm6162_vm3, %v9376_v32, -inf }
 0x7b6   :  { %v19724_v55 = vsel %vm3431_vm6, %v9799_v30, %v9827_v44  ;;  %v9400_v18 = vcombine.high %v9399_v1, %v9399_v1  ;;  %v9622_v4 = vrot.slane %v9621_v35, 4  ;;  %v9629_v24 = vrot.slane %v9628_v36, 4 }
 0x7b7   :  { %v9635_v17 = vsel %vm6162_vm3, %v9383_v57, -inf  ;;  %v9642_v60 = vsel %vm6162_vm3, %v9384_v0, -inf  ;;  %v9649_v9 = vsel %vm6162_vm3, %v9391_v11, -inf  ;;  %v9656_v6 = vsel %vm6162_vm3, %v9392_v27, -inf }
 0x7b8   :  { %v9623_v59 = vmax.f32 %v9621_v35, %v9622_v4  ;;  %v9630_v37 = vmax.f32 %v9628_v36, %v9629_v24  ;;  %v9636_v8 = vrot.slane %v9635_v17, 4  ;;  %v9643_v20 = vrot.slane %v9642_v60, 4 }
 0x7b9   :  { %v9650_v45 = vrot.slane %v9649_v9, 4  ;;  %v9657_v52 = vrot.slane %v9656_v6, 4  ;;  %v9663_v43 = vsel %vm6162_vm3, %v9399_v1, -inf  ;;  %v9670_v39 = vsel %vm6162_vm3, %v9400_v18, -inf }
 0x7ba   :  { %v9624_v53 = vrot.slane %v9623_v59, 2  ;;  %v9631_v2 = vrot.slane %v9630_v37, 2  ;;  %v9637_v41 = vmax.f32 %v9635_v17, %v9636_v8  ;;  %v9644_v54 = vmax.f32 %v9642_v60, %v9643_v20 }
 0x7bb   :  { %v9651_v16 = vmax.f32 %v9649_v9, %v9650_v45  ;;  %v9658_v56 = vmax.f32 %v9656_v6, %v9657_v52  ;;  %v9664_v38 = vrot.slane %v9663_v43, 4  ;;  %v9671_v33 = vrot.slane %v9670_v39, 4 }
 0x7bc   :  { %v9625_v32 = vmax.f32 %v9623_v59, %v9624_v53  ;;  %v9632_v57 = vmax.f32 %v9630_v37, %v9631_v2  ;;  %v9638_v26 = vrot.slane %v9637_v41, 2  ;;  %v9645_v11 = vrot.slane %v9644_v54, 2 }
 0x7bd   :  { %v9652_v30 = vrot.slane %v9651_v16, 2  ;;  %v9659_v44 = vrot.slane %v9658_v56, 2  ;;  %v9665_v0 = vmax.f32 %v9663_v43, %v9664_v38  ;;  %v9672_v1 = vmax.f32 %v9670_v39, %v9671_v33 }
 0x7be   :  { %v9626_v27 = vrot.slane %v9625_v32, 1  ;;  %v9633_v35 = vrot.slane %v9632_v57, 1  ;;  %v9639_v36 = vmax.f32 %v9637_v41, %v9638_v26  ;;  %v9646_v18 = vmax.f32 %v9644_v54, %v9645_v11 }
 0x7bf   :  { %v9653_v4 = vmax.f32 %v9651_v16, %v9652_v30  ;;  %v9660_v24 = vmax.f32 %v9658_v56, %v9659_v44  ;;  %v9666_v17 = vrot.slane %v9665_v0, 2  ;;  %v9673_v60 = vrot.slane %v9672_v1, 2 }
 0x7c0   :  { %v9627_v9 = vmax.f32 %v9625_v32, %v9626_v27  ;;  %v9634_v6 = vmax.f32 %v9632_v57, %v9633_v35  ;;  %v9640_v59 = vrot.slane %v9639_v36, 1  ;;  %v9647_v37 = vrot.slane %v9646_v18, 1 }
 0x7c1   :  { %v9654_v8 = vrot.slane %v9653_v4, 1  ;;  %v9661_v20 = vrot.slane %v9660_v24, 1  ;;  %v9667_v45 = vmax.f32 %v9665_v0, %v9666_v17  ;;  %v9160_v52 = vmul.f32 1.6732632, %v19689_v3 }
 0x7c2   :  { %v9641_v43 = vmax.f32 %v9639_v36, %v9640_v59  ;;  %v9729_v39 = vpack.c.bf16 %v9627_v9, %v9627_v9  ;;  %v9730_v53 = vpack.c.bf16 %v9634_v6, %v9634_v6  ;;  %v12016_v2 = vadd.f32 -1.0, %v19615_v62 }
 0x7c3   :  { %v9655_v41 = vmax.f32 %v9653_v4, %v9654_v8  ;;  %v9668_v54 = vrot.slane %v9667_v45, 1  ;;  %v9170_v16 = vsel %vm9120_vm8, %v19501_v29, %v9160_v52  ;;  %v9535_v56 = vrot.slane %v19656_v15, 1 }
 0x7c4   :  { %v9731_v38 = vpack.c.bf16 %v9641_v43, %v9641_v43  ;;  %v9801_v33 = vunpack.c.l.b16 %v9729_v39  ;;  %v19740_v32 = vunpack.c.l.b16 %v9730_v53  ;;  %v9180_v57 = vmul.f32 1.050701, %v9170_v16 }
 0x7c5   :  { %v9669_v26 = vmax.f32 %v9667_v45, %v9668_v54  ;;  %v9733_v3 = vpack.c.bf16 %v9655_v41, %v9655_v41  ;;  %v9161_v11 = vmul.f32 1.6732632, %v12016_v2  ;;  %v9536_v30 = vmax.f32 %v19656_v15, %v9535_v56 }
 0x7c6   :  { %v19743_v44 = vunpack.c.l.b16 %v9731_v38  ;;  %v19747_v62 = vsel %vm3433_vm12, %v9801_v33, %v19724_v55  ;;  %v9549_v29 = vrot.slane %v19660_v58, 1  ;;  %v9561_v0 = vrot.slane %v19658_v40, 2 }
 0x7c7   :  { %v9735_v27 = vpack.c.bf16 %v9669_v26, %v9669_v26  ;;  %v19751_v35 = vunpack.c.l.b16 %v9733_v3  ;;  %v9171_v36 = vsel %vm9121_vm9, %v19510_v31, %v9161_v11  ;;  %v9574_v15 = vmax.f32 %v19696_v50, %v9573_v34 }
 0x7c8   :  { %v9181_v4 = vmul.f32 1.050701, %v9171_v36  ;;  %v9550_v17 = vmax.f32 %v19660_v58, %v9549_v29  ;;  %v9562_v55 = vmax.f32 %v19658_v40, %v9561_v0  ;;  %v9648_v9 = vmax.f32 %v9646_v18, %v9647_v37 }
 0x7c9   :  { %v19761_v6 = vunpack.c.l.b16 %v9735_v27  ;;  %v9575_v59 = vrot.slane %v9574_v15, 2  ;;  %v9662_v8 = vmax.f32 %v9660_v24, %v9661_v20  ;;  %v9674_v45 = vmax.f32 %v9672_v1, %v9673_v60 }
 0x7ca   :  { %v9264_v52 = vcombine.low %v9180_v57, %v9181_v4  ;;  %v9563_v43 = vrot.slane %v9562_v55, 1  ;;  %v9714_v31 = vpack.c.bf16 %v19664_v48, %v19664_v48  ;;  %v9716_v39 = vpack.c.bf16 %v9536_v30, %v9536_v30 }
 0x7cb   :  { %v9576_v53 = vmax.f32 %v9574_v15, %v9575_v59  ;;  %v9675_v2 = vrot.slane %v9674_v45, 1  ;;  %v9718_v50 = vpack.c.bf16 %v9550_v17, %v9550_v17  ;;  %v9732_v34 = vpack.c.bf16 %v9648_v9, %v9648_v9 }
 0x7cc   :  { %v9271_v58 = vrot.slane %v9264_v52, %v20980_v13  ;;  %v9564_v41 = vmax.f32 %v9562_v55, %v9563_v43  ;;  %v9734_v40 = vpack.c.bf16 %v9662_v8, %v9662_v8  ;;  %v9784_v18 = vunpack.c.l.b16 %v9712_v22 }
 0x7cd   :  { %v9577_v24 = vrot.slane %v9576_v53, 1  ;;  %v9676_v1 = vmax.f32 %v9674_v45, %v9675_v2  ;;  %v9786_v60 = vunpack.c.l.b16 %v9714_v31  ;;  %v9788_v37 = vunpack.c.l.b16 %v9716_v39 }
 0x7ce   :  { %v9272_v20 = vcombine.high %v9271_v58, %v9271_v58  ;;  %v9407_v48 = vrot.slane %v9271_v58, %v20980_v13  ;;  %v9720_v54 = vpack.c.bf16 %v9564_v41, %v9564_v41  ;;  %v9790_v16 = vunpack.c.l.b16 %v9718_v50 }
 0x7cf   :  { %v9578_v56 = vmax.f32 %v9576_v53, %v9577_v24  ;;  %v9736_v38 = vpack.c.bf16 %v9676_v1, %v9676_v1  ;;  %v9804_v33 = vunpack.c.l.b16 %v9732_v34  ;;  %v9806_v57 = vunpack.c.l.b16 %v9734_v40 }
 0x7d0   :  { %v9408_v26 = vcombine.high %v9407_v48, %v9407_v48  ;;  %v9415_v3 = vrot.slane %v9272_v20, %v20980_v13  ;;  %v9677_v11 = vsel %vm6162_vm3, %v9407_v48, -inf  ;;  %v9792_v61 = vunpack.c.l.b16 %v9720_v54 }
 0x7d1   :  { %v9678_v22 = vrot.slane %v9677_v11, 4  ;;  %v9722_v30 = vpack.c.bf16 %v9578_v56, %v9578_v56  ;;  %v9808_v29 = vunpack.c.l.b16 %v9736_v38  ;;  %v9820_v0 = vsel %vm3429_vm7, %v19627_v28, %v19619_v14 }
 0x7d2   :  { %v9416_v27 = vcombine.high %v9415_v3, %v9415_v3  ;;  %v9684_v36 = vsel %vm6162_vm3, %v9408_v26, -inf  ;;  %v9691_v15 = vsel %vm6162_vm3, %v9415_v3, -inf  ;;  %v9821_v4 = vsel %vm3431_vm6, %v19621_v46, %v9820_v0 }
 0x7d3   :  { %v9679_v17 = vmax.f32 %v9677_v11, %v9678_v22  ;;  %v9685_v55 = vrot.slane %v9684_v36, 4  ;;  %v9692_v9 = vrot.slane %v9691_v15, 4  ;;  %v9794_v59 = vunpack.c.l.b16 %v9722_v30 }
 0x7d4   :  { %v9698_v8 = vsel %vm6162_vm3, %v9416_v27, -inf  ;;  %v9822_v45 = vsel %vm3433_vm12, %v9784_v18, %v9821_v4  ;;  %v9834_v14 = vsel %vm3429_vm7, %v19714_v23, %v19712_v19  ;;  %v9721_v28 = vpack.c.bf16 %v19706_v5, %v19706_v5 }
 0x7d5   :  { %v9680_v52 = vrot.slane %v9679_v17, 2  ;;  %v9686_v43 = vmax.f32 %v9684_v36, %v9685_v55  ;;  %v9693_v31 = vmax.f32 %v9691_v15, %v9692_v9  ;;  %v9699_v39 = vrot.slane %v9698_v8, 4 }
 0x7d6   :  { %v9823_v46 = vsel %vm3435_vm13, %v9786_v60, %v9822_v45  ;;  %v9835_v53 = vsel %vm3431_vm6, %v19719_v7, %v9834_v14  ;;  %v9793_v2 = vunpack.c.l.b16 %v9721_v28  ;;  %v9816_v50 = vsel %vm3435_vm13, %v19673_v51, %v19644_v42 }
 0x7d7   :  { %v9681_v34 = vmax.f32 %v9679_v17, %v9680_v52  ;;  %v9687_v58 = vrot.slane %v9686_v43, 2  ;;  %v9694_v19 = vrot.slane %v9693_v31, 2  ;;  %v9700_v23 = vmax.f32 %v9698_v8, %v9699_v39 }
 0x7d8   :  { %v9824_v5 = vsel %vm3437_vm15, %v9788_v37, %v9823_v46  ;;  %v9836_v41 = vsel %vm3433_vm12, %v19740_v32, %v9835_v53  ;;  %v9817_v40 = vsel %vm3437_vm15, %v19680_v47, %v9816_v50  ;;  %v9830_v7 = vsel %vm3435_vm13, %v19743_v44, %v19747_v62 }
 0x7d9   :  { %v9682_v18 = vrot.slane %v9681_v34, 1  ;;  %v9695_v24 = vmax.f32 %v9693_v31, %v9694_v19  ;;  %v9688_v1 = vmax.f32 %v9686_v43, %v9687_v58  ;;  %v9701_v42 = vrot.slane %v9700_v23, 2 }
 0x7da   :  { %v9825_v51 = vsel %vm3439_vm2, %v9790_v16, %v9824_v5  ;;  %v9837_v60 = vsel %vm3435_vm13, %v9804_v33, %v9836_v41  ;;  %v9818_v37 = vsel %vm3439_vm2, %v19682_v25, %v9817_v40  ;;  %v9831_v32 = vsel %vm3437_vm15, %v19751_v35, %v9830_v7 }
 0x7db   :  { %v9683_v20 = vmax.f32 %v9681_v34, %v9682_v18  ;;  %v9696_v47 = vrot.slane %v9695_v24, 1  ;;  %v9689_v48 = vrot.slane %v9688_v1, 1  ;;  %v9702_v54 = vmax.f32 %v9700_v23, %v9701_v42 }
 0x7dc   :  { %v9826_v44 = vsel %vm3441_vm4, %v9792_v61, %v9825_v51  ;;  %v9838_v62 = vsel %vm3437_vm15, %v9806_v57, %v9837_v60  ;;  %v9819_v56 = vsel %vm3441_vm4, %v19693_v49, %v9818_v37  ;;  %v9832_v16 = vsel %vm3439_vm2, %v19761_v6, %v9831_v32  ;;  %v13024_v32 = vld [vmem:[%s20305_s7 + $0x80] sm:$0xff]  }
 0x7dd   :  { %v9737_v38 = vpack.c.bf16 %v9683_v20, %v9683_v20  ;;  %v9690_v33 = vmax.f32 %v9688_v1, %v9689_v48  ;;  %v9703_v25 = vrot.slane %v9702_v54, 1  ;;  %v9839_v26 = vsel %vm3439_vm2, %v9808_v29, %v9838_v62 }
 0x7de   :  { %v9842_v35 = vpack.c.b16 %v9794_v59, %v9826_v44  ;;  %v9697_v3 = vmax.f32 %v9695_v24, %v9696_v47  ;;  %v9841_v11 = vpack.c.b16 %v9793_v2, %v9819_v56  ;;  %v9862_v61 = vsub.s32 %v9859_v63, %v20979_v10 }
 0x7df   :  { %v9809_v22 = vunpack.c.l.b16 %v9737_v38  ;;  %v9704_v57 = vmax.f32 %v9702_v54, %v9703_v25  ;;  %v9738_v30 = vpack.c.bf16 %v9690_v33, %v9690_v33  ;;  %v13025_v54 = vld [vmem:[%s20305_s7 + $0xc8] sm:$0xff]  }
 0x7e0   :  { %v9905_v49 = vrot.slane %v9842_v35, %v20980_v13  ;;  %v9739_v0 = vpack.c.bf16 %v9697_v3, %v9697_v3  ;;  %v9855_v6 = vrot.slane %v9841_v11, %v20980_v13  ;;  %v9923_v12 = vcombine.high %v9842_v35, %v13293_v21 }
 0x7e1   :  { %v9740_v27 = vpack.c.bf16 %v9704_v57, %v9704_v57  ;;  %v9810_v36 = vunpack.c.l.b16 %v9738_v30  ;;  %v9833_v15 = vsel %vm3441_vm4, %v9809_v22, %v9832_v16  ;;  %v9873_v8 = vcombine.high %v9841_v11, %v13293_v21  ;;  %v13026_v22 = vld [vmem:[%s20305_s7 + $0x88] sm:$0xff]  }
 0x7e2   :  { %v9811_v29 = vunpack.c.l.b16 %v9739_v0  ;;  %v9913_v4 = vrot.slane %v9905_v49, %v9862_v61  ;;  %v9863_v17 = vrot.slane %v9855_v6, %v9862_v61  ;;  %v9906_v55 = vcombine.high %v9905_v49, %v13293_v21 }
 0x7e3   :  { %v9812_v9 = vunpack.c.l.b16 %v9740_v27  ;;  %v9840_v10 = vsel %vm3441_vm4, %v9810_v36, %v9839_v26  ;;  %v9856_v63 = vcombine.high %v9855_v6, %v13293_v21  ;;  %v13027_v6 = vld [vmem:[%s20305_s7 + $0xd0] sm:$0xff]  }
 0x7e4   :  { %v9843_v59 = vpack.c.b16 %v9811_v29, %v9833_v15  ;;  %v9989_v45 = vshrl.u32 %v9913_v4, 16  ;;  %v19825_v14 = vcombine.high %v9913_v4, %v13293_v21  ;;  %v19828_v52 = vcombine.high %v9863_v17, %v13293_v21 }
 0x7e5   :  { %v9844_v28 = vpack.c.b16 %v9812_v9, %v9840_v10  ;;  %v19830_v43 = vrot.slane %v9906_v55, %v9862_v61  ;;  %v19832_v31 = vrot.slane %v9856_v63, %v9862_v61  ;;  %v9953_v53 = vshrl.u32 %v9863_v17, 16  ;;  %v13028_v9 = vld [vmem:[%s20305_s7 + $0x90] sm:$0xff]   ;;  %v13030_v63 = vld [vmem:[%s20305_s7 + $0x98] sm:$0xff]  }
 0x7e6   :  { %v9880_v39 = vrot.slane %v9843_v59, %v20980_v13  ;;  %v9898_v46 = vcombine.high %v9843_v59, %v13293_v21  ;;  %v9997_v2 = vshrl.u32 %v19825_v14, 16  ;;  %v9961_v58 = vshrl.u32 %v19828_v52, 16  ;;  %v13031_v59 = vld [vmem:[%s20305_s7 + $0xe0] sm:$0xff]  }
 0x7e7   :  { %v9930_v50 = vrot.slane %v9844_v28, %v20980_v13  ;;  %v9948_v34 = vcombine.high %v9844_v28, %v13293_v21  ;;  %v10005_v19 = vshrl.u32 %v19830_v43, 16  ;;  %v9969_v40 = vshrl.u32 %v19832_v31, 16  ;;  %v13035_v28 = vld [vmem:[%s20305_s7 + $0xf0] sm:$0xff]  }
 0x7e8   :  { %v9983_v23 = vpack.i.b16 %v9898_v46, %v9873_v8  ;;  %v9888_v5 = vrot.slane %v9880_v39, %v9862_v61  ;;  %v9881_v41 = vcombine.high %v9880_v39, %v13293_v21  ;;  %v19846_v1 = vcombine.high %v19830_v43, %v13293_v21  ;;  %v13032_v8 = vld [vmem:[%s20305_s7 + $0xa0] sm:$0xff]   ;;  %v13036_v39 = vld [vmem:[%s20305_s7 + $0xb0] sm:$0xff]   ;;  %v13037_v46 = vld [vmem:[%s20305_s7 + $0xf8] sm:$0xff]  }
 0x7e9   :  { %v10019_v7 = vpack.i.b16 %v9948_v34, %v9923_v12  ;;  %v9938_v18 = vrot.slane %v9930_v50, %v9862_v61  ;;  %v9931_v24 = vcombine.high %v9930_v50, %v13293_v21  ;;  %v19889_v30 = vcombine.high %v19832_v31, %v13293_v21  ;;  %v13029_v12 = vld [vmem:[%s20305_s7 + $0xd8] sm:$0xff]   ;;  %v13040_v50 = vld [vmem:[%s20305_s7 + $0x100] sm:$0xff]   ;;  %v13041_v34 = vld [vmem:[%s20305_s7 + $0x148] sm:$0xff]  }
 0x7ea   :  { %v9951_v13 = vpack.i.b16 %v9888_v5, %v9863_v17  ;;  %v9954_v42 = vshrl.u32 %v9888_v5, 16  ;;  %v19849_v51 = vcombine.high %v9888_v5, %v13293_v21  ;;  %v19851_v60 = vrot.slane %v9881_v41, %v9862_v61  ;;  %v13045_v5 = vld [vmem:[%s20305_s7 + $0x158] sm:$0xff]  }
 0x7eb   :  { %11532 = vmatprep.mubr.bf16.mxu1 %v10019_v7  ;;  %v9987_v37 = vpack.i.b16 %v9938_v18, %v9913_v4  ;;  %v9990_v20 = vshrl.u32 %v9938_v18, 16  ;;  %v19857_v47 = vcombine.high %v9938_v18, %v13293_v21  ;;  %v19859_v48 = vrot.slane %v9931_v24, %v9862_v61  ;;  %v13046_v41 = vld [vmem:[%s20305_s7 + $0x118] sm:$0xff]   ;;  %v13048_v7 = vld [vmem:[%s20305_s7 + $0x120] sm:$0xff]   ;;  %v13049_v18 = vld [vmem:[%s20305_s7 + $0x168] sm:$0xff]  }
 0x7ec   :  { %11533 = vmatmul.mubr.bf16.vlgmr.msra.gmra.mrb[68].mxu1 %v9983_v23  ;;  %v9955_v44 = vpack.i.b16 %v9954_v42, %v9953_v53  ;;  %v9959_v62 = vpack.i.b16 %v19849_v51, %v19828_v52  ;;  %v9962_v56 = vshrl.u32 %v19849_v51, 16  ;;  %v9967_v16 = vpack.i.b16 %v19851_v60, %v19832_v31  ;;  %v13038_v53 = vld [vmem:[%s20305_s7 + $0xb8] sm:$0xff]   ;;  %v13044_v23 = vld [vmem:[%s20305_s7 + $0x110] sm:$0xff]   ;;  %v13050_v24 = vld [vmem:[%s20305_s7 + $0x128] sm:$0xff]  }
 0x7ed   :  { %11212 = vmatprep.mubr.bf16.mxu0 %v9987_v37  ;;  %v9991_v38 = vpack.i.b16 %v9990_v20, %v9989_v45  ;;  %v9995_v33 = vpack.i.b16 %v19857_v47, %v19825_v14  ;;  %v9998_v25 = vshrl.u32 %v19857_v47, 16  ;;  %v10003_v26 = vpack.i.b16 %v19859_v48, %v19830_v43  ;;  %v13033_v45 = vld [vmem:[%s20305_s7 + $0xe8] sm:$0xff]   ;;  %v13052_v42 = vld [vmem:[%s20305_s7 + $0x130] sm:$0xff]   ;;  %v13053_v37 = vld [vmem:[%s20305_s7 + $0x178] sm:$0xff]  }
 0x7ee   :  { %11213 = vmatmul.mubr.bf16.vlgmr.msra.gmra.mrb[88].mxu0 %v9951_v13  ;;  %v19874_v35 = vpack.i.b16 %v9962_v56, %v9961_v58  ;;  %v10006_v3 = vshrl.u32 %v19859_v48, 16  ;;  %v9970_v11 = vshrl.u32 %v19851_v60, 16  ;;  %v19880_v61 = vcombine.high %v19859_v48, %v13293_v21  ;;  %v13034_v14 = vld [vmem:[%s20305_s7 + $0xa8] sm:$0xff]   ;;  %v13051_v13 = vld [vmem:[%s20305_s7 + $0x170] sm:$0xff]   ;;  %v13055_v20 = vld [vmem:[%s20305_s7 + $0x1c0] sm:$0xff]  }
 0x7ef   :  { %12336 = vmatpush3.bf16.msra.mxu0 %v13024_v32  ;;  %11252 = vmatprep.mubr.bf16.mxu0 %v9991_v38  ;;  %v19885_v57 = vpack.i.b16 %v9998_v25, %v9997_v2  ;;  %v19893_v49 = vcombine.high %v19851_v60, %v13293_v21  ;;  %v10013_v0 = vshrl.u32 %v19846_v1, 16  ;;  %v9977_v4 = vshrl.u32 %v19889_v30, 16  ;;  %v13039_v2 = vld [vmem:[%s20305_s7 + $0x140] sm:$0xff]   ;;  %v13042_v58 = vld [vmem:[%s20305_s7 + $0x108] sm:$0xff]   ;;  %v13054_v32 = vld [vmem:[%s20305_s7 + $0x138] sm:$0xff]  }
 0x7f0   :  { %12337 = vmatprep.subr.bf16.mxu0 %v13025_v54  ;;  %v19899_v27 = vpack.i.b16 %v10006_v3, %v10005_v19  ;;  %v19901_v36 = vpack.i.b16 %v9970_v11, %v9969_v40  ;;  %v10011_v15 = vpack.i.b16 %v19880_v61, %v19846_v1  ;;  %v10014_v29 = vshrl.u32 %v19880_v61, 16  ;;  %v13043_v19 = vld [vmem:[%s20305_s7 + $0x150] sm:$0xff]   ;;  %v13047_v40 = vld [vmem:[%s20305_s7 + $0x160] sm:$0xff]   ;;  %v13057_v54 = vld [vmem:[%s20305_s7 + $0x1c8] sm:$0xff]  }
 0x7f1   :  { %v9975_v21 = vpack.i.b16 %v19893_v49, %v19889_v30  ;;  %v9978_v17 = vshrl.u32 %v19893_v49, 16  ;;  %v13056_v47 = vld [vmem:[%s20305_s7 + $0x180] sm:$0xff]   ;;  %v13059_v56 = vld [vmem:[%s20305_s7 + $0x1d0] sm:$0xff]   ;;  %v13061_v52 = vld [vmem:[%s20305_s7 + $0x1d8] sm:$0xff]  }
 0x7f2   :  { %v19910_v55 = vpack.i.b16 %v10014_v29, %v10013_v0  ;;  %v13060_v38 = vld [vmem:[%s20305_s7 + $0x190] sm:$0xff]   ;;  %v13062_v51 = vld [vmem:[%s20305_s7 + $0x198] sm:$0xff]   ;;  %v13065_v25 = vld [vmem:[%s20305_s7 + $0x1e8] sm:$0xff]  }
 0x7f3   :  { %12338 = vmatpush3.bf16.msra.mxu0 %v13026_v22  ;;  %v19915_v10 = vpack.i.b16 %v9978_v17, %v9977_v4  ;;  %v13066_v3 = vld [vmem:[%s20305_s7 + $0x1a8] sm:$0xff]   ;;  %v13067_v11 = vld [vmem:[%s20305_s7 + $0x1f0] sm:$0xff]   ;;  %v13070_v0 = vld [vmem:[%s20305_s7 + $0x1b8] sm:$0xff]  }
 0x7f4   :  { %12339 = vmatprep.subr.bf16.mxu0 %v13027_v6  ;;  %v13068_v22 = vld [vmem:[%s20305_s7 + $0x1b0] sm:$0xff]   ;;  %v13071_v6 = vld [vmem:[%s20305_s7 + $0x240] sm:$0xff]   ;;  %v13073_v4 = vld [vmem:[%s20305_s7 + $0x248] sm:$0xff]  }
 0x7f5   :  { %v13072_v29 = vld [vmem:[%s20305_s7 + $0x200] sm:$0xff]   ;;  %v13074_v17 = vld [vmem:[%s20305_s7 + $0x208] sm:$0xff]   ;;  %v13077_v43 = vld [vmem:[%s20305_s7 + $0x258] sm:$0xff]  }
 0x7f6   :  { %v13078_v48 = vld [vmem:[%s20305_s7 + $0x218] sm:$0xff]  }
 0x7f7   :  { %12340 = vmatpush3.bf16.msra.mxu0 %v13028_v9  ;;  %v13075_v9 = vld [vmem:[%s20305_s7 + $0x250] sm:$0xff]   ;;  %v13093_v31 = vld [vmem:[%s20305_s7 + $0x2d8] sm:$0xff]  }
 0x7f8   :  { %12341 = vmatprep.subr.bf16.mxu0 %v13029_v12  ;;  %v13076_v12 = vld [vmem:[%s20305_s7 + $0x210] sm:$0xff]   ;;  %v13094_v60 = vld [vmem:[%s20305_s7 + $0x298] sm:$0xff]  }
 0x7f9   :  { %v13109_v1 = vld [vmem:[%s20305_s7 + $0x358] sm:$0xff]  }
 0x7fa   :  { %v13110_v61 = vld [vmem:[%s20305_s7 + $0x318] sm:$0xff]  }
 0x7fb   :  { %12342 = vmatpush3.bf16.msra.mxu0 %v13030_v63  ;;  %v13081_v63 = vld [vmem:[%s20305_s7 + $0x268] sm:$0xff]   ;;  %v13125_v30 = vld [vmem:[%s20305_s7 + $0x3d8] sm:$0xff]  }
 0x7fc   :  { %12343 = vmatprep.subr.bf16.mxu0 %v13031_v59  ;;  %v13082_v59 = vld [vmem:[%s20305_s7 + $0x228] sm:$0xff]   ;;  %v13126_v49 = vld [vmem:[%s20305_s7 + $0x398] sm:$0xff]  }
 0x7ff   :  { %12344 = vmatpush3.bf16.msra.mxu0 %v13032_v8  ;;  %v13083_v8 = vld [vmem:[%s20305_s7 + $0x270] sm:$0xff]  }
 0x800   :  { %12345 = vmatprep.subr.bf16.mxu0 %v13033_v45  ;;  %v13084_v45 = vld [vmem:[%s20305_s7 + $0x230] sm:$0xff]  }
 0x803   :  { %12346 = vmatpush3.bf16.msra.mxu0 %v13034_v14  ;;  %v13085_v14 = vld [vmem:[%s20305_s7 + $0x278] sm:$0xff]  }
 0x804   :  { %12347 = vmatprep.subr.bf16.mxu0 %v13035_v28  ;;  %v13086_v28 = vld [vmem:[%s20305_s7 + $0x238] sm:$0xff]  }
 0x807   :  { %12348 = vmatpush3.bf16.msra.mxu0 %v13036_v39  ;;  %v13087_v39 = vld [vmem:[%s20305_s7 + $0x2c0] sm:$0xff]  }
 0x808   :  { %12349 = vmatprep.subr.bf16.mxu0 %v13037_v46  ;;  %v13088_v46 = vld [vmem:[%s20305_s7 + $0x280] sm:$0xff]  }
 0x80b   :  { %12350 = vmatpush3.bf16.msra.mxu0 %v13038_v53  ;;  %v13089_v53 = vld [vmem:[%s20305_s7 + $0x2c8] sm:$0xff]  }
 0x80c   :  { %12357 = vmatprep.subr.bf16.mxu0 %v13039_v2  ;;  %v13090_v2 = vld [vmem:[%s20305_s7 + $0x288] sm:$0xff]  }
 0x80e   :  { %11253 = vmatmul.mubr.bf16.vlgmr.msra.gmra.mrb[92].mxu0 %v9955_v44  ;;  %v13058_v44 = vld [vmem:[%s20305_s7 + $0x188] sm:$0xff]  }
 0x80f   :  { %12358 = vmatpush3.bf16.msra.mxu0 %v13040_v50  ;;  %11292 = vmatprep.mubr.bf16.mxu0 %v9995_v33  ;;  %v13064_v33 = vld [vmem:[%s20305_s7 + $0x1a0] sm:$0xff]   ;;  %v13091_v50 = vld [vmem:[%s20305_s7 + $0x2d0] sm:$0xff]  }
 0x810   :  { %12359 = vmatprep.subr.bf16.mxu0 %v13041_v34  ;;  %v13092_v34 = vld [vmem:[%s20305_s7 + $0x290] sm:$0xff]  }
 0x813   :  { %12360 = vmatpush3.bf16.msra.mxu0 %v13042_v58  ;;  %v13097_v58 = vld [vmem:[%s20305_s7 + $0x2e8] sm:$0xff]  }
 0x814   :  { %12361 = vmatprep.subr.bf16.mxu0 %v13043_v19  ;;  %v13098_v19 = vld [vmem:[%s20305_s7 + $0x2a8] sm:$0xff]  }
 0x817   :  { %12362 = vmatpush3.bf16.msra.mxu0 %v13044_v23  ;;  %v13099_v23 = vld [vmem:[%s20305_s7 + $0x2f0] sm:$0xff]  }
 0x818   :  { %12363 = vmatprep.subr.bf16.mxu0 %v13045_v5  ;;  %v13100_v5 = vld [vmem:[%s20305_s7 + $0x2b0] sm:$0xff]  }
 0x81b   :  { %12364 = vmatpush3.bf16.msra.mxu0 %v13046_v41  ;;  %v13101_v41 = vld [vmem:[%s20305_s7 + $0x2f8] sm:$0xff]  }
 0x81c   :  { %12365 = vmatprep.subr.bf16.mxu0 %v13047_v40  ;;  %v13102_v40 = vld [vmem:[%s20305_s7 + $0x2b8] sm:$0xff]  }
 0x81f   :  { %12366 = vmatpush3.bf16.msra.mxu0 %v13048_v7  ;;  %v13103_v7 = vld [vmem:[%s20305_s7 + $0x340] sm:$0xff]  }
 0x820   :  { %12367 = vmatprep.subr.bf16.mxu0 %v13049_v18  ;;  %v13104_v18 = vld [vmem:[%s20305_s7 + $0x300] sm:$0xff]  }
 0x823   :  { %12368 = vmatpush3.bf16.msra.mxu0 %v13050_v24  ;;  %v13105_v24 = vld [vmem:[%s20305_s7 + $0x348] sm:$0xff]  }
 0x824   :  { %12369 = vmatprep.subr.bf16.mxu0 %v13051_v13  ;;  %v13106_v13 = vld [vmem:[%s20305_s7 + $0x308] sm:$0xff]  }
 0x827   :  { %12370 = vmatpush3.bf16.msra.mxu0 %v13052_v42  ;;  %v13107_v42 = vld [vmem:[%s20305_s7 + $0x350] sm:$0xff]  }
 0x828   :  { %12371 = vmatprep.subr.bf16.mxu0 %v13053_v37  ;;  %v13108_v37 = vld [vmem:[%s20305_s7 + $0x310] sm:$0xff]  }
 0x82b   :  { %12372 = vmatpush3.bf16.msra.mxu0 %v13054_v32  ;;  %v13113_v32 = vld [vmem:[%s20305_s7 + $0x368] sm:$0xff]  }
 0x82c   :  { %12379 = vmatprep.subr.bf16.mxu0 %v13055_v20  ;;  %v13114_v20 = vld [vmem:[%s20305_s7 + $0x328] sm:$0xff]  }
 0x82e   :  { %11293 = vmatmul.mubr.bf16.vlgmr.msra.gmra.mrb[96].mxu0 %v9959_v62  ;;  %v13063_v62 = vld [vmem:[%s20305_s7 + $0x1e0] sm:$0xff]  }
 0x82f   :  { %12380 = vmatpush3.bf16.msra.mxu0 %v13056_v47  ;;  %11332 = vmatprep.mubr.bf16.mxu0 %v19885_v57  ;;  %v13069_v57 = vld [vmem:[%s20305_s7 + $0x1f8] sm:$0xff]   ;;  %v13115_v47 = vld [vmem:[%s20305_s7 + $0x370] sm:$0xff]  }
 0x830   :  { %12381 = vmatprep.subr.bf16.mxu0 %v13057_v54  ;;  %v13116_v54 = vld [vmem:[%s20305_s7 + $0x330] sm:$0xff]  }
 0x833   :  { %12382 = vmatpush3.bf16.msra.mxu0 %v13058_v44  ;;  %v13117_v44 = vld [vmem:[%s20305_s7 + $0x378] sm:$0xff]  }
 0x834   :  { %12383 = vmatprep.subr.bf16.mxu0 %v13059_v56  ;;  %v13118_v56 = vld [vmem:[%s20305_s7 + $0x338] sm:$0xff]  }
 0x837   :  { %12384 = vmatpush3.bf16.msra.mxu0 %v13060_v38  ;;  %v13119_v38 = vld [vmem:[%s20305_s7 + $0x3c0] sm:$0xff]  }
 0x838   :  { %12385 = vmatprep.subr.bf16.mxu0 %v13061_v52  ;;  %v13120_v52 = vld [vmem:[%s20305_s7 + $0x380] sm:$0xff]  }
 0x83b   :  { %12386 = vmatpush3.bf16.msra.mxu0 %v13062_v51  ;;  %v13121_v51 = vld [vmem:[%s20305_s7 + $0x3c8] sm:$0xff]  }
 0x83c   :  { %12387 = vmatprep.subr.bf16.mxu0 %v13063_v62  ;;  %v13122_v62 = vld [vmem:[%s20305_s7 + $0x388] sm:$0xff]  }
 0x83f   :  { %12388 = vmatpush3.bf16.msra.mxu0 %v13064_v33  ;;  %v13123_v33 = vld [vmem:[%s20305_s7 + $0x3d0] sm:$0xff]  }
 0x840   :  { %12389 = vmatprep.subr.bf16.mxu0 %v13065_v25  ;;  %v13124_v25 = vld [vmem:[%s20305_s7 + $0x390] sm:$0xff]  }
 0x843   :  { %12390 = vmatpush3.bf16.msra.mxu0 %v13066_v3  ;;  %v13129_v3 = vld [vmem:[%s20305_s7 + $0x3e8] sm:$0xff]  }
 0x844   :  { %12391 = vmatprep.subr.bf16.mxu0 %v13067_v11 }
 0x847   :  { %12392 = vmatpush3.bf16.msra.mxu0 %v13068_v22  ;;  %v13130_v22 = vld [vmem:[%s20305_s7 + $0x3a8] sm:$0xff]  }
 0x848   :  { %12393 = vmatprep.subr.bf16.mxu0 %v13069_v57 }
 0x84b   :  { %12394 = vmatpush3.bf16.msra.mxu0 %v13070_v0  ;;  %v13131_v0 = vld [vmem:[%s20305_s7 + $0x3f0] sm:$0xff]  }
 0x84c   :  { %12401 = vmatprep.subr.bf16.mxu0 %v13071_v6 }
 0x84e   :  { %11333 = vmatmul.mubr.bf16.vlgmr.msra.gmra.mrb[100].mxu0 %v19874_v35  ;;  %v13080_v35 = vld [vmem:[%s20305_s7 + $0x220] sm:$0xff]  }
 0x84f   :  { %12402 = vmatpush3.bf16.msra.mxu0 %v13072_v29  ;;  %11372 = vmatprep.mubr.bf16.mxu0 %v10003_v26  ;;  %v13079_v26 = vld [vmem:[%s20305_s7 + $0x260] sm:$0xff]  }
 0x850   :  { %12403 = vmatprep.subr.bf16.mxu0 %v13073_v4 }
 0x853   :  { %12404 = vmatpush3.bf16.msra.mxu0 %v13074_v17 }
 0x854   :  { %12405 = vmatprep.subr.bf16.mxu0 %v13075_v9 }
 0x857   :  { %12406 = vmatpush3.bf16.msra.mxu0 %v13076_v12 }
 0x858   :  { %12407 = vmatprep.subr.bf16.mxu0 %v13077_v43 }
 0x85b   :  { %12408 = vmatpush3.bf16.msra.mxu0 %v13078_v48  ;;  %v13132_v48 = vld [vmem:[%s20305_s7 + $0x3b0] sm:$0xff]  }
 0x85c   :  { %12409 = vmatprep.subr.bf16.mxu0 %v13079_v26 }
 0x85f   :  { %12410 = vmatpush3.bf16.msra.mxu0 %v13080_v35  ;;  %v13133_v35 = vld [vmem:[%s20305_s7 + $0x3f8] sm:$0xff]  }
 0x860   :  { %12411 = vmatprep.subr.bf16.mxu0 %v13081_v63  ;;  %v13134_v63 = vld [vmem:[%s20305_s7 + $0x3b8] sm:$0xff]  }
 0x863   :  { %12412 = vmatpush3.bf16.msra.mxu0 %v13082_v59  ;;  %v20981_v59 = vmov 0.0  }
 0x864   :  { %12413 = vmatprep.subr.bf16.mxu0 %v13083_v8  ;;  %v12017_v8 = vld [vmem:[%s20306_s8] ss:$0 sm:$0xff] }
 0x867   :  { %12414 = vmatpush3.bf16.msra.mxu0 %v13084_v45 }
 0x868   :  { %12415 = vmatprep.subr.bf16.mxu0 %v13085_v14 }
 0x86b   :  { %12416 = vmatpush3.bf16.msra.mxu0 %v13086_v28 }
 0x86c   :  { %12423 = vmatprep.subr.bf16.mxu0 %v13087_v39 }
 0x86e   :  { %11373 = vmatmul.mubr.bf16.vlgmr.msra.gmra.mrb[104].mxu0 %v9967_v16  ;;  %v13095_v16 = vld [vmem:[%s20305_s7 + $0x2e0] sm:$0xff]  }
 0x86f   :  { %12424 = vmatpush3.bf16.msra.mxu0 %v13088_v46  ;;  %11412 = vmatprep.mubr.bf16.mxu0 %v19899_v27  ;;  %v13096_v27 = vld [vmem:[%s20305_s7 + $0x2a0] sm:$0xff]  }
 0x870   :  { %12425 = vmatprep.subr.bf16.mxu0 %v13089_v53 }
 0x873   :  { %12426 = vmatpush3.bf16.msra.mxu0 %v13090_v2 }
 0x874   :  { %12427 = vmatprep.subr.bf16.mxu0 %v13091_v50 }
 0x877   :  { %12428 = vmatpush3.bf16.msra.mxu0 %v13092_v34 }
 0x878   :  { %12429 = vmatprep.subr.bf16.mxu0 %v13093_v31 }
 0x87b   :  { %12430 = vmatpush3.bf16.msra.mxu0 %v13094_v60 }
 0x87c   :  { %12431 = vmatprep.subr.bf16.mxu0 %v13095_v16 }
 0x87f   :  { %12432 = vmatpush3.bf16.msra.mxu0 %v13096_v27 }
 0x880   :  { %12433 = vmatprep.subr.bf16.mxu0 %v13097_v58 }
 0x883   :  { %12434 = vmatpush3.bf16.msra.mxu0 %v13098_v19 }
 0x884   :  { %12435 = vmatprep.subr.bf16.mxu0 %v13099_v23 }
 0x887   :  { %12436 = vmatpush3.bf16.msra.mxu0 %v13100_v5 }
 0x888   :  { %12437 = vmatprep.subr.bf16.mxu0 %v13101_v41 }
 0x88b   :  { %12438 = vmatpush3.bf16.msra.mxu0 %v13102_v40  ;;  %v13135_v40 = vld [vmem:[%s20307_s9] sm:$0xff]  }
 0x88c   :  { %12445 = vmatprep.subr.bf16.mxu0 %v13103_v7  ;;  %v13136_v7 = vld [vmem:[%s20307_s9 + $0x8] sm:$0xff]  }
 0x88e   :  { %11413 = vmatmul.mubr.bf16.vlgmr.msra.gmra.mrb[108].mxu0 %v19901_v36  ;;  %v13111_v36 = vld [vmem:[%s20305_s7 + $0x360] sm:$0xff]  }
 0x88f   :  { %12446 = vmatpush3.bf16.msra.mxu0 %v13104_v18  ;;  %11452 = vmatprep.mubr.bf16.mxu0 %v10011_v15  ;;  %v13112_v15 = vld [vmem:[%s20305_s7 + $0x320] sm:$0xff]  }
 0x890   :  { %12447 = vmatprep.subr.bf16.mxu0 %v13105_v24 }
 0x893   :  { %12448 = vmatpush3.bf16.msra.mxu0 %v13106_v13 }
 0x894   :  { %12449 = vmatprep.subr.bf16.mxu0 %v13107_v42 }
 0x897   :  { %12450 = vmatpush3.bf16.msra.mxu0 %v13108_v37  ;;  %v13137_v37 = vld [vmem:[%s20307_s9 + $0x10] sm:$0xff]  }
 0x898   :  { %12451 = vmatprep.subr.bf16.mxu0 %v13109_v1 }
 0x89b   :  { %12452 = vmatpush3.bf16.msra.mxu0 %v13110_v61 }
 0x89c   :  { %12453 = vmatprep.subr.bf16.mxu0 %v13111_v36  ;;  %v13138_v36 = vld [vmem:[%s20307_s9 + $0x18] sm:$0xff]  }
 0x89f   :  { %12454 = vmatpush3.bf16.msra.mxu0 %v13112_v15 }
 0x8a0   :  { %12455 = vmatprep.subr.bf16.mxu0 %v13113_v32 }
 0x8a3   :  { %12456 = vmatpush3.bf16.msra.mxu0 %v13114_v20 }
 0x8a4   :  { %12457 = vmatprep.subr.bf16.mxu0 %v13115_v47 }
 0x8a7   :  { %12458 = vmatpush3.bf16.msra.mxu0 %v13116_v54 }
 0x8a8   :  { %12459 = vmatprep.subr.bf16.mxu0 %v13117_v44 }
 0x8ab   :  { %12460 = vmatpush3.bf16.msra.mxu0 %v13118_v56 }
 0x8ac   :  { %12467 = vmatprep.subr.bf16.mxu0 %v13119_v38 }
 0x8ae   :  { %11453 = vmatmul.mubr.bf16.vlgmr.msra.gmra.mrb[112].mxu0 %v9975_v21  ;;  %v13127_v21 = vld [vmem:[%s20305_s7 + $0x3e0] sm:$0xff]  }
 0x8af   :  { %12468 = vmatpush3.bf16.msra.mxu0 %v13120_v52  ;;  %11492 = vmatprep.mubr.bf16.mxu0 %v19910_v55  ;;  %v13128_v55 = vld [vmem:[%s20305_s7 + $0x3a0] sm:$0xff]  }
 0x8b0   :  { %12469 = vmatprep.subr.bf16.mxu0 %v13121_v51 }
 0x8b3   :  { %12470 = vmatpush3.bf16.msra.mxu0 %v13122_v62 }
 0x8b4   :  { %12471 = vmatprep.subr.bf16.mxu0 %v13123_v33 }
 0x8b7   :  { %12472 = vmatpush3.bf16.msra.mxu0 %v13124_v25 }
 0x8b8   :  { %12473 = vmatprep.subr.bf16.mxu0 %v13125_v30 }
 0x8bb   :  { %12474 = vmatpush3.bf16.msra.mxu0 %v13126_v49 }
 0x8bc   :  { %12475 = vmatprep.subr.bf16.mxu0 %v13127_v21 }
 0x8bf   :  { %12476 = vmatpush3.bf16.msra.mxu0 %v13128_v55  ;;  %v12505_v11 = vpop.f32.mrb[68].mxu1 }
 0x8c0   :  { %v12506_v57 = vpop.f32.mrb[69].mxu1  ;;  %12477 = vmatprep.subr.bf16.mxu0 %v13129_v3 }
 0x8c1   :  { %v20246_v6 = vadd.f32 %v12506_v57, %v12505_v11  ;;  %v12329_v29 = vpop.f32.mrb[88].mxu0  ;;  %v12508_v4 = vpop.f32.mrb[70].mxu1 }
 0x8c2   :  { %v12330_v17 = vpop.f32.mrb[89].mxu0  ;;  %v12509_v9 = vpop.f32.mrb[71].mxu1 }
 0x8c3   :  { %v12331_v12 = vadd.f32 %v12330_v17, %v12329_v29  ;;  %12478 = vmatpush3.bf16.msra.mxu0 %v13130_v22  ;;  %v12332_v43 = vpop.f32.mrb[90].mxu0 }
 0x8c4   :  { %v12333_v26 = vpop.f32.mrb[91].mxu0  ;;  %12479 = vmatprep.subr.bf16.mxu0 %v13131_v0 }
 0x8c5   :  { %v11215_v28 = vadd.f32 %v12331_v12, %v12017_v8  ;;  %v12163_v12 = vld [vmem:[%s20308_s10] ss:$0 sm:$0xff]  ;;  %s13295_s10 = smov [#allocation2]  }
 0x8c6   :  { %s11649_s2 = sshll.u32 %s13295_s10, 4  ;;  %s11650_s2 = int_to_ptr.vmem [resolvable:$true] %s11649_s2 }
 0x8c7   :  { %12480 = vmatpush3.bf16.msra.mxu0 %v13132_v48  ;;  %s13255_s17 = scalar_lea.vmem %s11650_s2, 32  ;;  %p13260_p1 = scmp.lt.s32.totalorder %s11650_s2, %s11650_s2 }
 0x8c8   :  { %12481 = vmatprep.subr.bf16.mxu0 %v13133_v35  ;;  %p13256_p0 = scmp.ne.s32.totalorder %s11650_s2, %s13255_s17  ;;  %p13261_p2 = scmp.lt.s32.totalorder %s13255_s17, %s13255_s17 }
 0x8ca   :  { %p13262_p3 = por %p13261_p2, %p13260_p1 }
 0x8cb   :  { %12482 = vmatpush3.bf16.msra.mxu0 %v13134_v63 }
 0x8cc   :  { %12616 = vmatprep.subr.bf16.mxu0 %v20981_v59  ;;  %p13263_p4 = pnand %p13262_p3, %p13256_p0 }
 0x8ce   :  { %11493 = vmatmul.mubr.bf16.vlgmr.msra.gmra.mrb[116].mxu0 %v19915_v10 }
 0x8cf   :  { %12624 = vmatprep.mubr.msk.bf16.mxu0 %vm20596_vm1, %v20981_v59  ;;  %12617 = vmatpush3.bf16.msra.mxu0 %v13135_v40 }
 0x8d0   :  { %12618 = vmatprep.subr.bf16.mxu0 %v20981_v59 }
 0x8d3   :  { %12619 = vmatpush3.bf16.msra.mxu0 %v13136_v7 }
 0x8d4   :  { %12620 = vmatprep.subr.bf16.mxu0 %v20981_v59 }
 0x8d7   :  { %12621 = vmatpush3.bf16.msra.mxu0 %v13137_v37 }
 0x8d8   :  { %12622 = vmatprep.subr.bf16.mxu0 %v20981_v59 }
 0x8db   :  { %12623 = vmatpush3.bf16.msra.mxu0 %v13138_v36 }
 0x8e1   :  { %v12351_v45 = vpop.f32.mrb[92].mxu0 }
 0x8e2   :  { %v12352_v14 = vpop.f32.mrb[93].mxu0 }
 0x8e3   :  { %v12353_v39 = vadd.f32 %v12352_v14, %v12351_v45  ;;  %v12354_v46 = vpop.f32.mrb[94].mxu0 }
 0x8e4   :  { %v12355_v53 = vpop.f32.mrb[95].mxu0 }
 0x8e5   :  { %v11255_v2 = vadd.f32 %v12353_v39, %v11215_v28 }
 0x901   :  { %v12373_v50 = vpop.f32.mrb[96].mxu0 }
 0x902   :  { %v12374_v34 = vpop.f32.mrb[97].mxu0 }
 0x903   :  { %v12375_v31 = vadd.f32 %v12374_v34, %v12373_v50  ;;  %v12376_v60 = vpop.f32.mrb[98].mxu0 }
 0x904   :  { %v12377_v16 = vpop.f32.mrb[99].mxu0 }
 0x905   :  { %v11295_v10 = vadd.f32 %v12375_v31, %v11255_v2 }
 0x921   :  { %v12395_v27 = vpop.f32.mrb[100].mxu0 }
 0x922   :  { %v12396_v58 = vpop.f32.mrb[101].mxu0 }
 0x923   :  { %v12397_v19 = vadd.f32 %v12396_v58, %v12395_v27  ;;  %v12398_v23 = vpop.f32.mrb[102].mxu0 }
 0x924   :  { %v12399_v5 = vpop.f32.mrb[103].mxu0 }
 0x925   :  { %v11335_v41 = vadd.f32 %v12397_v19, %v11295_v10 }
 0x941   :  { %v12417_v18 = vpop.f32.mrb[104].mxu0 }
 0x942   :  { %v12418_v24 = vpop.f32.mrb[105].mxu0 }
 0x943   :  { %v12419_v13 = vadd.f32 %v12418_v24, %v12417_v18  ;;  %v12420_v42 = vpop.f32.mrb[106].mxu0 }
 0x944   :  { %v12421_v1 = vpop.f32.mrb[107].mxu0 }
 0x945   :  { %v11375_v61 = vadd.f32 %v12419_v13, %v11335_v41 }
 0x961   :  { %v12439_v15 = vpop.f32.mrb[108].mxu0 }
 0x962   :  { %v12440_v32 = vpop.f32.mrb[109].mxu0 }
 0x963   :  { %v12441_v20 = vadd.f32 %v12440_v32, %v12439_v15  ;;  %v12442_v47 = vpop.f32.mrb[110].mxu0 }
 0x964   :  { %v12443_v54 = vpop.f32.mrb[111].mxu0 }
 0x965   :  { %v11415_v44 = vadd.f32 %v12441_v20, %v11375_v61 }
 0x981   :  { %v12461_v56 = vpop.f32.mrb[112].mxu0 }
 0x982   :  { %v12462_v38 = vpop.f32.mrb[113].mxu0 }
 0x983   :  { %v12463_v52 = vadd.f32 %v12462_v38, %v12461_v56  ;;  %v12464_v51 = vpop.f32.mrb[114].mxu0 }
 0x984   :  { %v12465_v62 = vpop.f32.mrb[115].mxu0 }
 0x985   :  { %v11455_v33 = vadd.f32 %v12463_v52, %v11415_v44 }
 0x9a1   :  { %v12483_v25 = vpop.f32.mrb[116].mxu0 }
 0x9a2   :  { %v12484_v30 = vpop.f32.mrb[117].mxu0 }
 0x9a3   :  { %v12485_v49 = vadd.f32 %v12484_v30, %v12483_v25  ;;  %v12486_v21 = vpop.f32.mrb[118].mxu0 }
 0x9a4   :  { %v12487_v55 = vpop.f32.mrb[119].mxu0 }
 0x9a5   :  { %v11495_v3 = vadd.f32 %v12485_v49, %v11455_v33 }
 0x9a7   :  { %v11535_v11 = vadd.f32 %v20246_v6, %v11495_v3 }
 0x9a9   :  { %v11541_v22 = vmul.f32 1.442695, %v11535_v11  ;;  %vm11540_vm1 = vcmp.gt.f32.partialorder %v11535_v11, 0.0 }
 0x9ab   :  { %13245 = vpow2.f32 %v11541_v22 }
 0x9b5   :  { %v13246_v57 = vpop.eup %13245 }
 0x9b6   :  { %v12162_v0 = vadd.f32 -1.0, %v13246_v57 }
 0x9b8   :  { %v11544_v29 = vmul.f32 1.6732632, %v12162_v0 }
 0x9ba   :  { %v11545_v4 = vsel %vm11540_vm1, %v11535_v11, %v11544_v29 }
 0x9bb   :  { %v11546_v17 = vmul.f32 1.050701, %v11545_v4 }
 0x9bd   :  { %v11547_v9 = vpack.c.bf16 %v11546_v17, %v11546_v17 }
 0x9bf   :  { %12625 = vmatmul.mubr.msk.bf16.vlgmr.msra.gmra.mrb[120].mxu0 %vm4338_vm11, %v11547_v9 }
 0xa92   :  { %v11624_v43 = vpop.f32.mrb[120].mxu0 }
 0xa93   :  { %v11625_v48 = vadd.f32 %v12163_v12, %v11624_v43  ;;  %v12626_v26 = vpop.f32.mrb[121].mxu0 }
 0xa94   :  { %v11627_v35 = vpop.f32.mrb[122].mxu0 }
 0xa95   :  { %v12627_v6 = vpop.f32.mrb[123].mxu0  ;;  %v11630_v63 = vsel %vm6162_vm3, %v11625_v48, -inf }
 0xa96   :  { %11631 = vmax.xlane.f32.xlu0 %v11630_v63 }
 0xb23   :  { %v11632_v59 = vpop.xlane.xlu0 %11631 }
 0xb24   :  { %v11633_v8 = vsub.f32 %v11625_v48, %v11632_v59 }
 0xb26   :  { %v11634_v45 = vmul.f32 1.442695, %v11633_v8 }
 0xb28   :  { %13247 = vpow2.f32 %v11634_v45 }
 0xb32   :  { %v13248_v14 = vpop.eup %13247 }
 0xb33   :  { %v11636_v28 = vsel %vm6162_vm3, %v13248_v14, 0.0 }
 0xb34   :  { %11637 = vadd.xlane.f32.xlu1 %v11636_v28 }
 0xbc1   :  { %v11638_v39 = vpop.xlane.xlu1 %11637 }
 0xbc2   :  { %13249 = vlog2.f32 %v11638_v39 }
 0xbcc   :  { %v13250_v46 = vpop.eup %13249 }
 0xbcd   :  { %v11640_v53 = vmul.f32 0.6931472, %v13250_v46 }
 0xbcf   :  { %v11641_v2 = vsub.f32 %v11633_v8, %v11640_v53 }
 0xbd1   :  { %11642 = vst [vmem:[#allocation2] sm:$0x3] %v11641_v2 }
 0xbd2   :  { %13266 = shalt.err (!%p13263_p4)
}
 0xbd3   :  { %s13267_s20 = scalar_lea.hbm %s20309_s11, 32 }
 0xbd4   :  { %p13268_p5 = scmp.ne.s32.totalorder %s20309_s11, %s13267_s20  ;;  %p13271_p6 = scmp.lt.u32.totalorder %s13267_s20, %s20309_s11 }
 0xbd6   :  { %p13273_p7 = pnand %p13271_p6, %p13268_p5 }
 0xbd8   :  { %13276 = shalt.err (!%p13273_p7)
}
 0xbd9   :  { %11652 = dma.vmem_to_hbm [thread:$0]  %s11650_s2, 32, %s20309_s11, [#allocation3]  }
 0xbda   :  { %13277 = dma.done.wait [#allocation3], 32  }
 0xbdb   :  { %13278 = vsyncadd [#allocation3], 4294967264 }
 0xbdc   :  { %11656 = vsyncpa [#allocation3], 1 }

</bundles_post_ra>
